<compile_context>
chip_gen: v5e
topology: v5e:2x2
jax: 0.10.0
libtpu: 0.0.40
codegen_flags: <defaults>
</compile_context>

<pallas_src>
import jax
import jax.numpy as jnp
import numpy as np
from jax.experimental import pallas as pl
from jax.experimental.pallas import tpu as pltpu

# ----------------------------- config -----------------------------
D_MODEL = 32
INPUT_RES = 16
PATCH = 8
NUM_TOKENS = 100
LOGITS_PAD = 128          # lane-dense logits store; sliced back to NUM_TOKENS outside
TXT_SEQ_LEN = 8
PREFIX_TXT_LEN = 5
TARGET_TXT_LEN = 8
MAX_TRUNC = 3
HEADS = 4
D_HEAD = D_MODEL // HEADS
ENC_DEPTH = 2
DEC_DEPTH = 2
D_FF = 64
FMAP = INPUT_RES // PATCH          # 2
IMG_TOKENS = FMAP * FMAP           # 4
L_ENC = IMG_TOKENS + PREFIX_TXT_LEN   # 9
L_DEC = TARGET_TXT_LEN                # 8
EPS = 1e-5
NEG_INF = -1e30

assert INPUT_RES % PATCH == 0 and MAX_TRUNC <= PREFIX_TXT_LEN and MAX_TRUNC < TXT_SEQ_LEN
assert D_MODEL % HEADS == 0


# ----------------------------- helpers -----------------------------
def _full_spec(shape):
    """Whole-array VMEM block for a grid=(1,) pallas_call."""
    n = len(shape)
    return pl.BlockSpec(shape, lambda i, n=n: (0,) * n)


def _layernorm(x, g, b):
    """x: (R, D); g, b: (1, D)."""
    mu = jnp.mean(x, axis=-1, keepdims=True)
    var = jnp.mean(jnp.square(x - mu), axis=-1, keepdims=True)
    return (x - mu) * jax.lax.rsqrt(var + EPS) * g + b


def _mha(q, k, v, wo, bo, mask_bias, head_masks):
    """Multi-head attention on 2-D (rows, D) activations.

    Heads are isolated with per-head lane masks (no reshape/transpose/slice
    needed in-kernel); batch blocking + causality live in the additive
    mask_bias (block-diagonal, 0 / -1e30) so all batches run in one matmul."""
    scale = 1.0 / float(D_HEAD) ** 0.5
    attn = None
    for h in range(HEADS):
        m = head_masks[h]                                   # (1, D)
        s = jax.lax.dot_general(q * m, k, (((1,), (1,)), ((), ())),
                                preferred_element_type=jnp.float32)
        s = s * scale + mask_bias
        s = s - jnp.max(s, axis=-1, keepdims=True)
        p = jnp.exp(s)
        p = p / jnp.sum(p, axis=-1, keepdims=True)
        o = jnp.dot(p, v * m, preferred_element_type=jnp.float32)  # nonzero only in head-h lanes
        attn = o if attn is None else attn + o
    return jnp.dot(attn, wo, preferred_element_type=jnp.float32) + bo


# ----------------------- fused ResNet-stem kernel -----------------------
def _stem_kernel(patches_ref, shift_ref, pos_ref, pw_ref, pb_ref,
                 a_w1_ref, a_b1_ref, a_w2_ref, a_b2_ref, a_w3_ref, a_b3_ref, a_ws_ref, a_bs_ref,
                 b_w1_ref, b_b1_ref, b_w2_ref, b_b2_ref, b_w3_ref, b_b3_ref, b_ws_ref, b_bs_ref,
                 out_ref):
    x = jnp.dot(patches_ref[...], pw_ref[...],
                preferred_element_type=jnp.float32) + pb_ref[...]

    def bottleneck(x, w1, b1, w2_ref, b2, w3, b3, ws, bs):
        # TODO(synk): BottleneckBlock source not provided; standard
        # 1x1 -> ReLU -> 3x3(pad=1) -> ReLU -> 1x1 with projection shortcut + ReLU
        # (BatchNorm omitted).
        h = jnp.maximum(jnp.dot(x, w1, preferred_element_type=jnp.float32) + b1, 0.0)
        acc = b2
        for t in range(9):   # 3x3 conv as 9 shifted 1x1 convs (shift = block-diag select matmul)
            shifted = jnp.dot(shift_ref[t], h, preferred_element_type=jnp.float32)
            acc = acc + jnp.dot(shifted, w2_ref[t], preferred_element_type=jnp.float32)
        h = jnp.maximum(acc, 0.0)
        h = jnp.dot(h, w3, preferred_element_type=jnp.float32) + b3
        if x.shape[-1] != h.shape[-1]:
            sc = jnp.dot(x, ws, preferred_element_type=jnp.float32) + bs
        else:
            sc = x
        return jnp.maximum(h + sc, 0.0)

    x = bottleneck(x, a_w1_ref[...], a_b1_ref[...], a_w2_ref, a_b2_ref[...],
                   a_w3_ref[...], a_b3_ref[...], a_ws_ref[...], a_bs_ref[...])
    x = bottleneck(x, b_w1_ref[...], b_b1_ref[...], b_w2_ref, b_b2_ref[...],
                   b_w3_ref[...], b_b3_ref[...], b_ws_ref[...], b_bs_ref[...])
    out_ref[...] = x + pos_ref[...]


def _shift_matrices(B):
    """Block-diagonal (over batch) spatial selection matrices implementing a 3x3
    conv with zero padding on a FMAP x FMAP grid; rows/cols ordered (b, h, w)."""
    R = B * IMG_TOKENS
    s = np.zeros((9, R, R), np.float32)
    for dh in range(3):
        for dw in range(3):
            t = dh * 3 + dw
            for b in range(B):
                for h in range(FMAP):
                    for w in range(FMAP):
                        hs, ws = h + dh - 1, w + dw - 1
                        if 0 <= hs < FMAP and 0 <= ws < FMAP:
                            s[t, b * IMG_TOKENS + h * FMAP + w,
                                 b * IMG_TOKENS + hs * FMAP + ws] = 1.0
    return jnp.asarray(s)


def stem_forward(params, img):
    B = img.shape[0]
    # NCHW -> (B*fmap*fmap, patch*patch*3) patch matrix (cheap one-off XLA glue).
    x = jnp.transpose(img, (0, 2, 3, 1))
    x = x.reshape(B, FMAP, PATCH, FMAP, PATCH, 3)
    patches = jnp.transpose(x, (0, 1, 3, 2, 4, 5)).reshape(B * IMG_TOKENS, PATCH * PATCH * 3)

    shift = _shift_matrices(B)
    # axial positional embedding (summed per-axis embeddings), tiled over batch
    pos = (params["img_pos_h"][:, None, :] + params["img_pos_w"][None, :, :]
           ).reshape(IMG_TOKENS, D_MODEL)
    pos = jnp.tile(pos, (B, 1))

    bn1, bn2 = params["bn1"], params["bn2"]
    inputs = [patches, shift, pos, params["patch_w"], params["patch_b"],
              bn1["w1"], bn1["b1"], bn1["w2"], bn1["b2"],
              bn1["w3"], bn1["b3"], bn1["ws"], bn1["bs"],
              bn2["w1"], bn2["b1"], bn2["w2"], bn2["b2"],
              bn2["w3"], bn2["b3"], bn2["ws"], bn2["bs"]]
    out = pl.pallas_call(
        _stem_kernel,
        grid=(1,),
        in_specs=[_full_spec(a.shape) for a in inputs],
        out_specs=_full_spec((B * IMG_TOKENS, D_MODEL)),
        out_shape=jax.ShapeDtypeStruct((B * IMG_TOKENS, D_MODEL), jnp.float32),
        compiler_params=pltpu.CompilerParams(dimension_semantics=("arbitrary",)),
    )(*inputs)
    return out.reshape(B, IMG_TOKENS, D_MODEL)


# --------------------- fused transformer + logits kernel ---------------------
def _transformer_kernel(
        prefix_ref, tgt_ref, enc_m_ref, dec_m_ref, cross_m_ref, hmask_ref,
        e_ln1_ref, e_wqkv_ref, e_bqkv_ref, e_wo_ref, e_bo_ref,
        e_ln2_ref, e_w1_ref, e_b1_ref, e_w2_ref, e_b2_ref, e_norm_ref,
        d_ln1_ref, d_wqkv_ref, d_bqkv_ref, d_wo_ref, d_bo_ref,
        d_ln2_ref, d_cwq_ref, d_cbq_ref, d_cwkv_ref, d_cbkv_ref, d_cwo_ref, d_cbo_ref,
        d_ln3_ref, d_w1_ref, d_b1_ref, d_w2_ref, d_b2_ref, d_norm_ref,
        lg_ln_ref, lg_w_ref, lg_b_ref,
        out_ref):
    enc_mask = enc_m_ref[...]
    dec_mask = dec_m_ref[...]
    cross_mask = cross_m_ref[...]
    head_masks = [hmask_ref[h] for h in range(HEADS)]        # (1, D) each

    def proj_stack(h, w_ref, b_ref, layer, n):
        return [jnp.dot(h, w_ref[n * layer + j], preferred_element_type=jnp.float32)
                + b_ref[n * layer + j] for j in range(n)]

    # ------------------------------ encoder (pre-LN) ------------------------------
    x = prefix_ref[...]
    for l in range(ENC_DEPTH):
        h = _layernorm(x, e_ln1_ref[2 * l], e_ln1_ref[2 * l + 1])
        q, k, v = proj_stack(h, e_wqkv_ref, e_bqkv_ref, l, 3)
        x = x + _mha(q, k, v, e_wo_ref[l], e_bo_ref[l], enc_mask, head_masks)
        h = _layernorm(x, e_ln2_ref[2 * l], e_ln2_ref[2 * l + 1])
        ff = jnp.maximum(jnp.dot(h, e_w1_ref[l], preferred_element_type=jnp.float32)
                         + e_b1_ref[l], 0.0)
        x = x + jnp.dot(ff, e_w2_ref[l], preferred_element_type=jnp.float32) + e_b2_ref[l]
    memory = _layernorm(x, e_norm_ref[0], e_norm_ref[1])

    # ------------------------------ decoder (pre-LN) ------------------------------
    y = tgt_ref[...]
    for l in range(DEC_DEPTH):
        h = _layernorm(y, d_ln1_ref[2 * l], d_ln1_ref[2 * l + 1])
        q, k, v = proj_stack(h, d_wqkv_ref, d_bqkv_ref, l, 3)
        y = y + _mha(q, k, v, d_wo_ref[l], d_bo_ref[l], dec_mask, head_masks)

        h = _layernorm(y, d_ln2_ref[2 * l], d_ln2_ref[2 * l + 1])
        q = jnp.dot(h, d_cwq_ref[l], preferred_element_type=jnp.float32) + d_cbq_ref[l]
        k, v = proj_stack(memory, d_cwkv_ref, d_cbkv_ref, l, 2)
        y = y + _mha(q, k, v, d_cwo_ref[l], d_cbo_ref[l], cross_mask, head_masks)

        h = _layernorm(y, d_ln3_ref[2 * l], d_ln3_ref[2 * l + 1])
        ff = jnp.maximum(jnp.dot(h, d_w1_ref[l], preferred_element_type=jnp.float32)
                         + d_b1_ref[l], 0.0)
        y = y + jnp.dot(ff, d_w2_ref[l], preferred_element_type=jnp.float32) + d_b2_ref[l]
    y = _layernorm(y, d_norm_ref[0], d_norm_ref[1])

    # ------------------- to_logits (lane-padded to 128, dense store) -------------------
    h = _layernorm(y, lg_ln_ref[0], lg_ln_ref[1])
    out_ref[...] = jnp.dot(h, lg_w_ref[...], preferred_element_type=jnp.float32) + lg_b_ref[...]


def _block_mask(B, Lq, Lk, causal=False):
    """Additive attention bias: 0 within the same batch (and causal if requested),
    -1e30 elsewhere.  Lets one (B*Lq, B*Lk) matmul serve all batches."""
    bq = np.arange(B * Lq) // Lq
    bk = np.arange(B * Lk) // Lk
    ok = bq[:, None] == bk[None, :]
    if causal:
        iq = np.arange(B * Lq) % Lq
        ik = np.arange(B * Lk) % Lk
        ok &= ik[None, :] <= iq[:, None]
    return jnp.asarray(np.where(ok, 0.0, NEG_INF).astype(np.float32))


def _head_lane_masks():
    m = np.zeros((HEADS, 1, D_MODEL), np.float32)
    for h in range(HEADS):
        m[h, 0, h * D_HEAD:(h + 1) * D_HEAD] = 1.0
    return jnp.asarray(m)


def transformer_forward(params, prefix_2d, tgt_2d, B):
    enc_mask = _block_mask(B, L_ENC, L_ENC)
    dec_mask = _block_mask(B, L_DEC, L_DEC, causal=True)   # subsequent_mask per batch
    cross_mask = _block_mask(B, L_DEC, L_ENC)
    hmask = _head_lane_masks()
    e, d = params["enc"], params["dec"]
    inputs = [prefix_2d, tgt_2d, enc_mask, dec_mask, cross_mask, hmask,
              e["ln1"], e["wqkv"], e["bqkv"], e["wo"], e["bo"],
              e["ln2"], e["w1"], e["b1"], e["w2"], e["b2"], params["enc_norm"],
              d["ln1"], d["wqkv"], d["bqkv"], d["wo"], d["bo"],
              d["ln2"], d["cwq"], d["cbq"], d["cwkv"], d["cbkv"], d["cwo"], d["cbo"],
              d["ln3"], d["w1"], d["b1"], d["w2"], d["b2"], params["dec_norm"],
              params["logits_ln"], params["logits_w"], params["logits_b"]]
    return pl.pallas_call(
        _transformer_kernel,
        grid=(1,),
        in_specs=[_full_spec(a.shape) for a in inputs],
        out_specs=_full_spec((B * L_DEC, LOGITS_PAD)),
        out_shape=jax.ShapeDtypeStruct((B * L_DEC, LOGITS_PAD), jnp.float32),
        compiler_params=pltpu.CompilerParams(dimension_semantics=("arbitrary",)),
    )(*inputs)


# --------------------------------- model forward ---------------------------------
def prefix_lm_forward(params, img, txt):
    B = txt.shape[0]
    img_embed = stem_forward(params, img)                     # (B, IMG_TOKENS, D), pos included

    # --- text truncation / padding ---
    # TODO(synk): reference uses random.randint(0, max_trunc_txt_len); fixed to 2 for determinism.
    l = 2
    pre_txt = jnp.zeros((B, PREFIX_TXT_LEN), jnp.int32).at[:, :l].set(txt[:, :l])
    tgt_txt = jnp.zeros((B, TARGET_TXT_LEN), jnp.int32).at[:, :TXT_SEQ_LEN - l].set(txt[:, l:])
    tgt_txt = jnp.pad(tgt_txt, ((0, 0), (1, 0)), constant_values=4)
    labels = tgt_txt[:, 1:]   # TODO(synk): return_loss=True (cross_entropy, ignore_index=0) not implemented.
    del labels
    tgt_txt = tgt_txt[:, :-1]

    pre_txt_embed = jnp.take(params["txt_embed"], pre_txt, axis=0)
    pre_txt_embed = pre_txt_embed + params["txt_pos_embed"][None, :PREFIX_TXT_LEN, :]
    tgt_txt_embed = jnp.take(params["txt_embed"], tgt_txt, axis=0)
    tgt_txt_embed = tgt_txt_embed + params["txt_pos_embed"][
        None, PREFIX_TXT_LEN:PREFIX_TXT_LEN + TARGET_TXT_LEN, :]

    prefix = jnp.concatenate([img_embed, pre_txt_embed], axis=1)   # (B, L_ENC, D)

    logits_padded = transformer_forward(
        params, prefix.reshape(B * L_ENC, D_MODEL),
        tgt_txt_embed.reshape(B * L_DEC, D_MODEL), B)              # (B*L_DEC, 128)
    return logits_padded[:, :NUM_TOKENS].reshape(B, TARGET_TXT_LEN, NUM_TOKENS)


# --------------------------------- parameters ---------------------------------
def init_params(key):
    keys = iter(jax.random.split(key, 64))

    def dense(shape, scale=0.02):
        return scale * jax.random.normal(next(keys), shape, dtype=jnp.float32)

    def zeros(shape):
        return jnp.zeros(shape, jnp.float32)

    def ln_stack(depth):
        one = jnp.concatenate([jnp.ones((1, 1, D_MODEL), jnp.float32),
                               jnp.zeros((1, 1, D_MODEL), jnp.float32)], axis=0)
        return jnp.tile(one, (depth, 1, 1))          # (2*depth, 1, D): [gamma, beta] per layer

    def bottleneck(cin, cmid, cout):
        return {"w1": dense((cin, cmid)), "b1": zeros((1, cmid)),
                "w2": dense((9, cmid, cmid)), "b2": zeros((1, cmid)),
                "w3": dense((cmid, cout)), "b3": zeros((1, cout)),
                "ws": dense((cin, cout)), "bs": zeros((1, cout))}

    enc = {"ln1": ln_stack(ENC_DEPTH),
           "wqkv": dense((ENC_DEPTH * 3, D_MODEL, D_MODEL)),
           "bqkv": zeros((ENC_DEPTH * 3, 1, D_MODEL)),
           "wo": dense((ENC_DEPTH, D_MODEL, D_MODEL)),
           "bo": zeros((ENC_DEPTH, 1, D_MODEL)),
           "ln2": ln_stack(ENC_DEPTH),
           "w1": dense((ENC_DEPTH, D_MODEL, D_FF)),
           "b1": zeros((ENC_DEPTH, 1, D_FF)),
           "w2": dense((ENC_DEPTH, D_FF, D_MODEL)),
           "b2": zeros((ENC_DEPTH, 1, D_MODEL))}

    dec = {"ln1": ln_stack(DEC_DEPTH),
           "wqkv": dense((DEC_DEPTH * 3, D_MODEL, D_MODEL)),
           "bqkv": zeros((DEC_DEPTH * 3, 1, D_MODEL)),
           "wo": dense((DEC_DEPTH, D_MODEL, D_MODEL)),
           "bo": zeros((DEC_DEPTH, 1, D_MODEL)),
           "ln2": ln_stack(DEC_DEPTH),
           "cwq": dense((DEC_DEPTH, D_MODEL, D_MODEL)),
           "cbq": zeros((DEC_DEPTH, 1, D_MODEL)),
           "cwkv": dense((DEC_DEPTH * 2, D_MODEL, D_MODEL)),
           "cbkv": zeros((DEC_DEPTH * 2, 1, D_MODEL)),
           "cwo": dense((DEC_DEPTH, D_MODEL, D_MODEL)),
           "cbo": zeros((DEC_DEPTH, 1, D_MODEL)),
           "ln3": ln_stack(DEC_DEPTH),
           "w1": dense((DEC_DEPTH, D_MODEL, D_FF)),
           "b1": zeros((DEC_DEPTH, 1, D_FF)),
           "w2": dense((DEC_DEPTH, D_FF, D_MODEL)),
           "b2": zeros((DEC_DEPTH, 1, D_MODEL))}

    logits_w = jnp.pad(dense((D_MODEL, NUM_TOKENS)),
                       ((0, 0), (0, LOGITS_PAD - NUM_TOKENS)))

    return {"patch_w": dense((PATCH * PATCH * 3, 64)), "patch_b": zeros((1, 64)),
            "bn1": bottleneck(64, 64, 256),
            "bn2": bottleneck(256, 128, D_MODEL),
            "img_pos_h": dense((FMAP, D_MODEL)),
            "img_pos_w": dense((FMAP, D_MODEL)),
            "txt_embed": dense((NUM_TOKENS, D_MODEL)),
            "txt_pos_embed": dense((PREFIX_TXT_LEN + TARGET_TXT_LEN, D_MODEL)),
            "enc": enc, "enc_norm": ln_stack(1),
            "dec": dec, "dec_norm": ln_stack(1),
            "logits_ln": ln_stack(1),
            "logits_w": logits_w,
            "logits_b": zeros((1, LOGITS_PAD))}


# ------------------------------------ main ------------------------------------
if __name__ == "__main__":
    key = jax.random.PRNGKey(0)
    kp, ki, kt = jax.random.split(key, 3)
    params = init_params(kp)

    img = jax.random.normal(ki, (2, 3, INPUT_RES, INPUT_RES), dtype=jnp.float32)   # NCHW
    txt = jax.random.randint(kt, (2, TXT_SEQ_LEN), 1, NUM_TOKENS, dtype=jnp.int32)

    logits = jax.jit(prefix_lm_forward)(params, img, txt)
    jax.block_until_ready(logits)
    assert logits.shape == (2, TARGET_TXT_LEN, NUM_TOKENS), logits.shape
    assert logits.dtype == jnp.float32
    assert bool(jnp.isfinite(logits).all())
    print("KERNEL_OK")
</pallas_src>

<mosaic_0001>
module attributes {stable_mosaic.version = 11 : i64} {
  func.func @_stem_kernel(%arg0: i32, %arg1: memref<8x192xf32, #tpu.memory_space<vmem>>, %arg2: memref<9x8x8xf32, #tpu.memory_space<vmem>>, %arg3: memref<8x32xf32, #tpu.memory_space<vmem>>, %arg4: memref<192x64xf32, #tpu.memory_space<vmem>>, %arg5: memref<1x64xf32, #tpu.memory_space<vmem>>, %arg6: memref<64x64xf32, #tpu.memory_space<vmem>>, %arg7: memref<1x64xf32, #tpu.memory_space<vmem>>, %arg8: memref<9x64x64xf32, #tpu.memory_space<vmem>>, %arg9: memref<1x64xf32, #tpu.memory_space<vmem>>, %arg10: memref<64x256xf32, #tpu.memory_space<vmem>>, %arg11: memref<1x256xf32, #tpu.memory_space<vmem>>, %arg12: memref<64x256xf32, #tpu.memory_space<vmem>>, %arg13: memref<1x256xf32, #tpu.memory_space<vmem>>, %arg14: memref<256x128xf32, #tpu.memory_space<vmem>>, %arg15: memref<1x128xf32, #tpu.memory_space<vmem>>, %arg16: memref<9x128x128xf32, #tpu.memory_space<vmem>>, %arg17: memref<1x128xf32, #tpu.memory_space<vmem>>, %arg18: memref<128x32xf32, #tpu.memory_space<vmem>>, %arg19: memref<1x32xf32, #tpu.memory_space<vmem>>, %arg20: memref<256x32xf32, #tpu.memory_space<vmem>>, %arg21: memref<1x32xf32, #tpu.memory_space<vmem>>, %arg22: memref<8x32xf32, #tpu.memory_space<vmem>>) attributes {dimension_semantics = [#tpu.dimension_semantics<arbitrary>], iteration_bounds = array<i64: 1>, scalar_prefetch = 0 : i64, scratch_operands = 0 : i64, tpu.core_type = #tpu.core_type<tc>, window_params = [{pipeline_mode = #tpu.pipeline_mode<synchronous>, transform_indices = @transform_0, window_bounds = array<i64: 8, 192>}, {pipeline_mode = #tpu.pipeline_mode<synchronous>, transform_indices = @transform_1, window_bounds = array<i64: 9, 8, 8>}, {pipeline_mode = #tpu.pipeline_mode<synchronous>, transform_indices = @transform_2, window_bounds = array<i64: 8, 32>}, {pipeline_mode = #tpu.pipeline_mode<synchronous>, transform_indices = @transform_3, window_bounds = array<i64: 192, 64>}, {pipeline_mode = #tpu.pipeline_mode<synchronous>, transform_indices = @transform_4, window_bounds = array<i64: 1, 64>}, {pipeline_mode = #tpu.pipeline_mode<synchronous>, transform_indices = @transform_5, window_bounds = array<i64: 64, 64>}, {pipeline_mode = #tpu.pipeline_mode<synchronous>, transform_indices = @transform_6, window_bounds = array<i64: 1, 64>}, {pipeline_mode = #tpu.pipeline_mode<synchronous>, transform_indices = @transform_7, window_bounds = array<i64: 9, 64, 64>}, {pipeline_mode = #tpu.pipeline_mode<synchronous>, transform_indices = @transform_8, window_bounds = array<i64: 1, 64>}, {pipeline_mode = #tpu.pipeline_mode<synchronous>, transform_indices = @transform_9, window_bounds = array<i64: 64, 256>}, {pipeline_mode = #tpu.pipeline_mode<synchronous>, transform_indices = @transform_10, window_bounds = array<i64: 1, 256>}, {pipeline_mode = #tpu.pipeline_mode<synchronous>, transform_indices = @transform_11, window_bounds = array<i64: 64, 256>}, {pipeline_mode = #tpu.pipeline_mode<synchronous>, transform_indices = @transform_12, window_bounds = array<i64: 1, 256>}, {pipeline_mode = #tpu.pipeline_mode<synchronous>, transform_indices = @transform_13, window_bounds = array<i64: 256, 128>}, {pipeline_mode = #tpu.pipeline_mode<synchronous>, transform_indices = @transform_14, window_bounds = array<i64: 1, 128>}, {pipeline_mode = #tpu.pipeline_mode<synchronous>, transform_indices = @transform_15, window_bounds = array<i64: 9, 128, 128>}, {pipeline_mode = #tpu.pipeline_mode<synchronous>, transform_indices = @transform_16, window_bounds = array<i64: 1, 128>}, {pipeline_mode = #tpu.pipeline_mode<synchronous>, transform_indices = @transform_17, window_bounds = array<i64: 128, 32>}, {pipeline_mode = #tpu.pipeline_mode<synchronous>, transform_indices = @transform_18, window_bounds = array<i64: 1, 32>}, {pipeline_mode = #tpu.pipeline_mode<synchronous>, transform_indices = @transform_19, window_bounds = array<i64: 256, 32>}, {pipeline_mode = #tpu.pipeline_mode<synchronous>, transform_indices = @transform_20, window_bounds = array<i64: 1, 32>}, {pipeline_mode = #tpu.pipeline_mode<synchronous>, transform_indices = @transform_21, window_bounds = array<i64: 8, 32>}]} {
    %c0 = arith.constant 0 : index
    %c0_0 = arith.constant 0 : index
    %0 = vector.load %arg1[%c0, %c0_0] : memref<8x192xf32, #tpu.memory_space<vmem>>, vector<8x192xf32>
    %c0_1 = arith.constant 0 : index
    %c0_2 = arith.constant 0 : index
    %1 = vector.load %arg4[%c0_1, %c0_2] : memref<192x64xf32, #tpu.memory_space<vmem>>, vector<192x64xf32>
    %cst = arith.constant dense<0.000000e+00> : vector<8x64xf32>
    %2 = tpu.matmul %0, %1, %cst {dimension_numbers = #tpu.dot_dimension_numbers<[1], [0], [0], [1], [0, 0, 1, 1], [], []>} : vector<8x192xf32>, vector<192x64xf32>, vector<8x64xf32> -> vector<8x64xf32>
    %c0_3 = arith.constant 0 : index
    %c0_4 = arith.constant 0 : index
    %3 = vector.load %arg5[%c0_3, %c0_4] : memref<1x64xf32, #tpu.memory_space<vmem>>, vector<1x64xf32>
    %4 = vector.broadcast %3 : vector<1x64xf32> to vector<8x64xf32>
    %5 = arith.addf %2, %4 : vector<8x64xf32>
    %c0_5 = arith.constant 0 : index
    %c0_6 = arith.constant 0 : index
    %6 = vector.load %arg6[%c0_5, %c0_6] : memref<64x64xf32, #tpu.memory_space<vmem>>, vector<64x64xf32>
    %c0_7 = arith.constant 0 : index
    %c0_8 = arith.constant 0 : index
    %7 = vector.load %arg7[%c0_7, %c0_8] : memref<1x64xf32, #tpu.memory_space<vmem>>, vector<1x64xf32>
    %c0_9 = arith.constant 0 : index
    %c0_10 = arith.constant 0 : index
    %8 = vector.load %arg9[%c0_9, %c0_10] : memref<1x64xf32, #tpu.memory_space<vmem>>, vector<1x64xf32>
    %c0_11 = arith.constant 0 : index
    %c0_12 = arith.constant 0 : index
    %9 = vector.load %arg10[%c0_11, %c0_12] : memref<64x256xf32, #tpu.memory_space<vmem>>, vector<64x256xf32>
    %c0_13 = arith.constant 0 : index
    %c0_14 = arith.constant 0 : index
    %10 = vector.load %arg11[%c0_13, %c0_14] : memref<1x256xf32, #tpu.memory_space<vmem>>, vector<1x256xf32>
    %c0_15 = arith.constant 0 : index
    %c0_16 = arith.constant 0 : index
    %11 = vector.load %arg12[%c0_15, %c0_16] : memref<64x256xf32, #tpu.memory_space<vmem>>, vector<64x256xf32>
    %c0_17 = arith.constant 0 : index
    %c0_18 = arith.constant 0 : index
    %12 = vector.load %arg13[%c0_17, %c0_18] : memref<1x256xf32, #tpu.memory_space<vmem>>, vector<1x256xf32>
    %cst_19 = arith.constant dense<0.000000e+00> : vector<8x64xf32>
    %13 = tpu.matmul %5, %6, %cst_19 {dimension_numbers = #tpu.dot_dimension_numbers<[1], [0], [0], [1], [0, 0, 1, 1], [], []>} : vector<8x64xf32>, vector<64x64xf32>, vector<8x64xf32> -> vector<8x64xf32>
    %14 = vector.broadcast %7 : vector<1x64xf32> to vector<8x64xf32>
    %15 = arith.addf %13, %14 : vector<8x64xf32>
    %cst_20 = arith.constant 0.000000e+00 : f32
    %16 = vector.broadcast %cst_20 : f32 to vector<8x64xf32>
    %17 = arith.maximumf %15, %16 : vector<8x64xf32>
    %c0_21 = arith.constant 0 : index
    %c0_22 = arith.constant 0 : index
    %c0_23 = arith.constant 0 : index
    %18 = vector.load %arg2[%c0_21, %c0_22, %c0_23] : memref<9x8x8xf32, #tpu.memory_space<vmem>>, vector<1x8x8xf32>
    %19 = vector.shape_cast %18 : vector<1x8x8xf32> to vector<8x8xf32>
    %cst_24 = arith.constant dense<0.000000e+00> : vector<8x64xf32>
    %20 = tpu.matmul %19, %17, %cst_24 {dimension_numbers = #tpu.dot_dimension_numbers<[1], [0], [0], [1], [0, 0, 1, 1], [], []>} : vector<8x8xf32>, vector<8x64xf32>, vector<8x64xf32> -> vector<8x64xf32>
    %c0_25 = arith.constant 0 : index
    %c0_26 = arith.constant 0 : index
    %c0_27 = arith.constant 0 : index
    %21 = vector.load %arg8[%c0_25, %c0_26, %c0_27] : memref<9x64x64xf32, #tpu.memory_space<vmem>>, vector<1x64x64xf32>
    %22 = vector.shape_cast %21 : vector<1x64x64xf32> to vector<64x64xf32>
    %cst_28 = arith.constant dense<0.000000e+00> : vector<8x64xf32>
    %23 = tpu.matmul %20, %22, %cst_28 {dimension_numbers = #tpu.dot_dimension_numbers<[1], [0], [0], [1], [0, 0, 1, 1], [], []>} : vector<8x64xf32>, vector<64x64xf32>, vector<8x64xf32> -> vector<8x64xf32>
    %24 = vector.broadcast %8 : vector<1x64xf32> to vector<8x64xf32>
    %25 = arith.addf %24, %23 : vector<8x64xf32>
    %c1 = arith.constant 1 : index
    %c0_29 = arith.constant 0 : index
    %c0_30 = arith.constant 0 : index
    %26 = vector.load %arg2[%c1, %c0_29, %c0_30] : memref<9x8x8xf32, #tpu.memory_space<vmem>>, vector<1x8x8xf32>
    %27 = vector.shape_cast %26 : vector<1x8x8xf32> to vector<8x8xf32>
    %cst_31 = arith.constant dense<0.000000e+00> : vector<8x64xf32>
    %28 = tpu.matmul %27, %17, %cst_31 {dimension_numbers = #tpu.dot_dimension_numbers<[1], [0], [0], [1], [0, 0, 1, 1], [], []>} : vector<8x8xf32>, vector<8x64xf32>, vector<8x64xf32> -> vector<8x64xf32>
    %c1_32 = arith.constant 1 : index
    %c0_33 = arith.constant 0 : index
    %c0_34 = arith.constant 0 : index
    %29 = vector.load %arg8[%c1_32, %c0_33, %c0_34] : memref<9x64x64xf32, #tpu.memory_space<vmem>>, vector<1x64x64xf32>
    %30 = vector.shape_cast %29 : vector<1x64x64xf32> to vector<64x64xf32>
    %cst_35 = arith.constant dense<0.000000e+00> : vector<8x64xf32>
    %31 = tpu.matmul %28, %30, %cst_35 {dimension_numbers = #tpu.dot_dimension_numbers<[1], [0], [0], [1], [0, 0, 1, 1], [], []>} : vector<8x64xf32>, vector<64x64xf32>, vector<8x64xf32> -> vector<8x64xf32>
    %32 = arith.addf %25, %31 : vector<8x64xf32>
    %c2 = arith.constant 2 : index
    %c0_36 = arith.constant 0 : index
    %c0_37 = arith.constant 0 : index
    %33 = vector.load %arg2[%c2, %c0_36, %c0_37] : memref<9x8x8xf32, #tpu.memory_space<vmem>>, vector<1x8x8xf32>
    %34 = vector.shape_cast %33 : vector<1x8x8xf32> to vector<8x8xf32>
    %cst_38 = arith.constant dense<0.000000e+00> : vector<8x64xf32>
    %35 = tpu.matmul %34, %17, %cst_38 {dimension_numbers = #tpu.dot_dimension_numbers<[1], [0], [0], [1], [0, 0, 1, 1], [], []>} : vector<8x8xf32>, vector<8x64xf32>, vector<8x64xf32> -> vector<8x64xf32>
    %c2_39 = arith.constant 2 : index
    %c0_40 = arith.constant 0 : index
    %c0_41 = arith.constant 0 : index
    %36 = vector.load %arg8[%c2_39, %c0_40, %c0_41] : memref<9x64x64xf32, #tpu.memory_space<vmem>>, vector<1x64x64xf32>
    %37 = vector.shape_cast %36 : vector<1x64x64xf32> to vector<64x64xf32>
    %cst_42 = arith.constant dense<0.000000e+00> : vector<8x64xf32>
    %38 = tpu.matmul %35, %37, %cst_42 {dimension_numbers = #tpu.dot_dimension_numbers<[1], [0], [0], [1], [0, 0, 1, 1], [], []>} : vector<8x64xf32>, vector<64x64xf32>, vector<8x64xf32> -> vector<8x64xf32>
    %39 = arith.addf %32, %38 : vector<8x64xf32>
    %c3 = arith.constant 3 : index
    %c0_43 = arith.constant 0 : index
    %c0_44 = arith.constant 0 : index
    %40 = vector.load %arg2[%c3, %c0_43, %c0_44] : memref<9x8x8xf32, #tpu.memory_space<vmem>>, vector<1x8x8xf32>
    %41 = vector.shape_cast %40 : vector<1x8x8xf32> to vector<8x8xf32>
    %cst_45 = arith.constant dense<0.000000e+00> : vector<8x64xf32>
    %42 = tpu.matmul %41, %17, %cst_45 {dimension_numbers = #tpu.dot_dimension_numbers<[1], [0], [0], [1], [0, 0, 1, 1], [], []>} : vector<8x8xf32>, vector<8x64xf32>, vector<8x64xf32> -> vector<8x64xf32>
    %c3_46 = arith.constant 3 : index
    %c0_47 = arith.constant 0 : index
    %c0_48 = arith.constant 0 : index
    %43 = vector.load %arg8[%c3_46, %c0_47, %c0_48] : memref<9x64x64xf32, #tpu.memory_space<vmem>>, vector<1x64x64xf32>
    %44 = vector.shape_cast %43 : vector<1x64x64xf32> to vector<64x64xf32>
    %cst_49 = arith.constant dense<0.000000e+00> : vector<8x64xf32>
    %45 = tpu.matmul %42, %44, %cst_49 {dimension_numbers = #tpu.dot_dimension_numbers<[1], [0], [0], [1], [0, 0, 1, 1], [], []>} : vector<8x64xf32>, vector<64x64xf32>, vector<8x64xf32> -> vector<8x64xf32>
    %46 = arith.addf %39, %45 : vector<8x64xf32>
    %c4 = arith.constant 4 : index
    %c0_50 = arith.constant 0 : index
    %c0_51 = arith.constant 0 : index
    %47 = vector.load %arg2[%c4, %c0_50, %c0_51] : memref<9x8x8xf32, #tpu.memory_space<vmem>>, vector<1x8x8xf32>
    %48 = vector.shape_cast %47 : vector<1x8x8xf32> to vector<8x8xf32>
    %cst_52 = arith.constant dense<0.000000e+00> : vector<8x64xf32>
    %49 = tpu.matmul %48, %17, %cst_52 {dimension_numbers = #tpu.dot_dimension_numbers<[1], [0], [0], [1], [0, 0, 1, 1], [], []>} : vector<8x8xf32>, vector<8x64xf32>, vector<8x64xf32> -> vector<8x64xf32>
    %c4_53 = arith.constant 4 : index
    %c0_54 = arith.constant 0 : index
    %c0_55 = arith.constant 0 : index
    %50 = vector.load %arg8[%c4_53, %c0_54, %c0_55] : memref<9x64x64xf32, #tpu.memory_space<vmem>>, vector<1x64x64xf32>
    %51 = vector.shape_cast %50 : vector<1x64x64xf32> to vector<64x64xf32>
    %cst_56 = arith.constant dense<0.000000e+00> : vector<8x64xf32>
    %52 = tpu.matmul %49, %51, %cst_56 {dimension_numbers = #tpu.dot_dimension_numbers<[1], [0], [0], [1], [0, 0, 1, 1], [], []>} : vector<8x64xf32>, vector<64x64xf32>, vector<8x64xf32> -> vector<8x64xf32>
    %53 = arith.addf %46, %52 : vector<8x64xf32>
    %c5 = arith.constant 5 : index
    %c0_57 = arith.constant 0 : index
    %c0_58 = arith.constant 0 : index
    %54 = vector.load %arg2[%c5, %c0_57, %c0_58] : memref<9x8x8xf32, #tpu.memory_space<vmem>>, vector<1x8x8xf32>
    %55 = vector.shape_cast %54 : vector<1x8x8xf32> to vector<8x8xf32>
    %cst_59 = arith.constant dense<0.000000e+00> : vector<8x64xf32>
    %56 = tpu.matmul %55, %17, %cst_59 {dimension_numbers = #tpu.dot_dimension_numbers<[1], [0], [0], [1], [0, 0, 1, 1], [], []>} : vector<8x8xf32>, vector<8x64xf32>, vector<8x64xf32> -> vector<8x64xf32>
    %c5_60 = arith.constant 5 : index
    %c0_61 = arith.constant 0 : index
    %c0_62 = arith.constant 0 : index
    %57 = vector.load %arg8[%c5_60, %c0_61, %c0_62] : memref<9x64x64xf32, #tpu.memory_space<vmem>>, vector<1x64x64xf32>
    %58 = vector.shape_cast %57 : vector<1x64x64xf32> to vector<64x64xf32>
    %cst_63 = arith.constant dense<0.000000e+00> : vector<8x64xf32>
    %59 = tpu.matmul %56, %58, %cst_63 {dimension_numbers = #tpu.dot_dimension_numbers<[1], [0], [0], [1], [0, 0, 1, 1], [], []>} : vector<8x64xf32>, vector<64x64xf32>, vector<8x64xf32> -> vector<8x64xf32>
    %60 = arith.addf %53, %59 : vector<8x64xf32>
    %c6 = arith.constant 6 : index
    %c0_64 = arith.constant 0 : index
    %c0_65 = arith.constant 0 : index
    %61 = vector.load %arg2[%c6, %c0_64, %c0_65] : memref<9x8x8xf32, #tpu.memory_space<vmem>>, vector<1x8x8xf32>
    %62 = vector.shape_cast %61 : vector<1x8x8xf32> to vector<8x8xf32>
    %cst_66 = arith.constant dense<0.000000e+00> : vector<8x64xf32>
    %63 = tpu.matmul %62, %17, %cst_66 {dimension_numbers = #tpu.dot_dimension_numbers<[1], [0], [0], [1], [0, 0, 1, 1], [], []>} : vector<8x8xf32>, vector<8x64xf32>, vector<8x64xf32> -> vector<8x64xf32>
    %c6_67 = arith.constant 6 : index
    %c0_68 = arith.constant 0 : index
    %c0_69 = arith.constant 0 : index
    %64 = vector.load %arg8[%c6_67, %c0_68, %c0_69] : memref<9x64x64xf32, #tpu.memory_space<vmem>>, vector<1x64x64xf32>
    %65 = vector.shape_cast %64 : vector<1x64x64xf32> to vector<64x64xf32>
    %cst_70 = arith.constant dense<0.000000e+00> : vector<8x64xf32>
    %66 = tpu.matmul %63, %65, %cst_70 {dimension_numbers = #tpu.dot_dimension_numbers<[1], [0], [0], [1], [0, 0, 1, 1], [], []>} : vector<8x64xf32>, vector<64x64xf32>, vector<8x64xf32> -> vector<8x64xf32>
    %67 = arith.addf %60, %66 : vector<8x64xf32>
    %c7 = arith.constant 7 : index
    %c0_71 = arith.constant 0 : index
    %c0_72 = arith.constant 0 : index
    %68 = vector.load %arg2[%c7, %c0_71, %c0_72] : memref<9x8x8xf32, #tpu.memory_space<vmem>>, vector<1x8x8xf32>
    %69 = vector.shape_cast %68 : vector<1x8x8xf32> to vector<8x8xf32>
    %cst_73 = arith.constant dense<0.000000e+00> : vector<8x64xf32>
    %70 = tpu.matmul %69, %17, %cst_73 {dimension_numbers = #tpu.dot_dimension_numbers<[1], [0], [0], [1], [0, 0, 1, 1], [], []>} : vector<8x8xf32>, vector<8x64xf32>, vector<8x64xf32> -> vector<8x64xf32>
    %c7_74 = arith.constant 7 : index
    %c0_75 = arith.constant 0 : index
    %c0_76 = arith.constant 0 : index
    %71 = vector.load %arg8[%c7_74, %c0_75, %c0_76] : memref<9x64x64xf32, #tpu.memory_space<vmem>>, vector<1x64x64xf32>
    %72 = vector.shape_cast %71 : vector<1x64x64xf32> to vector<64x64xf32>
    %cst_77 = arith.constant dense<0.000000e+00> : vector<8x64xf32>
    %73 = tpu.matmul %70, %72, %cst_77 {dimension_numbers = #tpu.dot_dimension_numbers<[1], [0], [0], [1], [0, 0, 1, 1], [], []>} : vector<8x64xf32>, vector<64x64xf32>, vector<8x64xf32> -> vector<8x64xf32>
    %74 = arith.addf %67, %73 : vector<8x64xf32>
    %c8 = arith.constant 8 : index
    %c0_78 = arith.constant 0 : index
    %c0_79 = arith.constant 0 : index
    %75 = vector.load %arg2[%c8, %c0_78, %c0_79] : memref<9x8x8xf32, #tpu.memory_space<vmem>>, vector<1x8x8xf32>
    %76 = vector.shape_cast %75 : vector<1x8x8xf32> to vector<8x8xf32>
    %cst_80 = arith.constant dense<0.000000e+00> : vector<8x64xf32>
    %77 = tpu.matmul %76, %17, %cst_80 {dimension_numbers = #tpu.dot_dimension_numbers<[1], [0], [0], [1], [0, 0, 1, 1], [], []>} : vector<8x8xf32>, vector<8x64xf32>, vector<8x64xf32> -> vector<8x64xf32>
    %c8_81 = arith.constant 8 : index
    %c0_82 = arith.constant 0 : index
    %c0_83 = arith.constant 0 : index
    %78 = vector.load %arg8[%c8_81, %c0_82, %c0_83] : memref<9x64x64xf32, #tpu.memory_space<vmem>>, vector<1x64x64xf32>
    %79 = vector.shape_cast %78 : vector<1x64x64xf32> to vector<64x64xf32>
    %cst_84 = arith.constant dense<0.000000e+00> : vector<8x64xf32>
    %80 = tpu.matmul %77, %79, %cst_84 {dimension_numbers = #tpu.dot_dimension_numbers<[1], [0], [0], [1], [0, 0, 1, 1], [], []>} : vector<8x64xf32>, vector<64x64xf32>, vector<8x64xf32> -> vector<8x64xf32>
    %81 = arith.addf %74, %80 : vector<8x64xf32>
    %cst_85 = arith.constant 0.000000e+00 : f32
    %82 = vector.broadcast %cst_85 : f32 to vector<8x64xf32>
    %83 = arith.maximumf %81, %82 : vector<8x64xf32>
    %cst_86 = arith.constant dense<0.000000e+00> : vector<8x256xf32>
    %84 = tpu.matmul %83, %9, %cst_86 {dimension_numbers = #tpu.dot_dimension_numbers<[1], [0], [0], [1], [0, 0, 1, 1], [], []>} : vector<8x64xf32>, vector<64x256xf32>, vector<8x256xf32> -> vector<8x256xf32>
    %85 = vector.broadcast %10 : vector<1x256xf32> to vector<8x256xf32>
    %86 = arith.addf %84, %85 : vector<8x256xf32>
    %cst_87 = arith.constant dense<0.000000e+00> : vector<8x256xf32>
    %87 = tpu.matmul %5, %11, %cst_87 {dimension_numbers = #tpu.dot_dimension_numbers<[1], [0], [0], [1], [0, 0, 1, 1], [], []>} : vector<8x64xf32>, vector<64x256xf32>, vector<8x256xf32> -> vector<8x256xf32>
    %88 = vector.broadcast %12 : vector<1x256xf32> to vector<8x256xf32>
    %89 = arith.addf %87, %88 : vector<8x256xf32>
    %90 = arith.addf %86, %89 : vector<8x256xf32>
    %cst_88 = arith.constant 0.000000e+00 : f32
    %91 = vector.broadcast %cst_88 : f32 to vector<8x256xf32>
    %92 = arith.maximumf %90, %91 : vector<8x256xf32>
    %c0_89 = arith.constant 0 : index
    %c0_90 = arith.constant 0 : index
    %93 = vector.load %arg14[%c0_89, %c0_90] : memref<256x128xf32, #tpu.memory_space<vmem>>, vector<256x128xf32>
    %c0_91 = arith.constant 0 : index
    %c0_92 = arith.constant 0 : index
    %94 = vector.load %arg15[%c0_91, %c0_92] : memref<1x128xf32, #tpu.memory_space<vmem>>, vector<1x128xf32>
    %c0_93 = arith.constant 0 : index
    %c0_94 = arith.constant 0 : index
    %95 = vector.load %arg17[%c0_93, %c0_94] : memref<1x128xf32, #tpu.memory_space<vmem>>, vector<1x128xf32>
    %c0_95 = arith.constant 0 : index
    %c0_96 = arith.constant 0 : index
    %96 = vector.load %arg18[%c0_95, %c0_96] : memref<128x32xf32, #tpu.memory_space<vmem>>, vector<128x32xf32>
    %c0_97 = arith.constant 0 : index
    %c0_98 = arith.constant 0 : index
    %97 = vector.load %arg19[%c0_97, %c0_98] : memref<1x32xf32, #tpu.memory_space<vmem>>, vector<1x32xf32>
    %c0_99 = arith.constant 0 : index
    %c0_100 = arith.constant 0 : index
    %98 = vector.load %arg20[%c0_99, %c0_100] : memref<256x32xf32, #tpu.memory_space<vmem>>, vector<256x32xf32>
    %c0_101 = arith.constant 0 : index
    %c0_102 = arith.constant 0 : index
    %99 = vector.load %arg21[%c0_101, %c0_102] : memref<1x32xf32, #tpu.memory_space<vmem>>, vector<1x32xf32>
    %cst_103 = arith.constant dense<0.000000e+00> : vector<8x128xf32>
    %100 = tpu.matmul %92, %93, %cst_103 {dimension_numbers = #tpu.dot_dimension_numbers<[1], [0], [0], [1], [0, 0, 1, 1], [], []>} : vector<8x256xf32>, vector<256x128xf32>, vector<8x128xf32> -> vector<8x128xf32>
    %101 = vector.broadcast %94 : vector<1x128xf32> to vector<8x128xf32>
    %102 = arith.addf %100, %101 : vector<8x128xf32>
    %cst_104 = arith.constant 0.000000e+00 : f32
    %103 = vector.broadcast %cst_104 : f32 to vector<8x128xf32>
    %104 = arith.maximumf %102, %103 : vector<8x128xf32>
    %c0_105 = arith.constant 0 : index
    %c0_106 = arith.constant 0 : index
    %c0_107 = arith.constant 0 : index
    %105 = vector.load %arg2[%c0_105, %c0_106, %c0_107] : memref<9x8x8xf32, #tpu.memory_space<vmem>>, vector<1x8x8xf32>
    %106 = vector.shape_cast %105 : vector<1x8x8xf32> to vector<8x8xf32>
    %cst_108 = arith.constant dense<0.000000e+00> : vector<8x128xf32>
    %107 = tpu.matmul %106, %104, %cst_108 {dimension_numbers = #tpu.dot_dimension_numbers<[1], [0], [0], [1], [0, 0, 1, 1], [], []>} : vector<8x8xf32>, vector<8x128xf32>, vector<8x128xf32> -> vector<8x128xf32>
    %c0_109 = arith.constant 0 : index
    %c0_110 = arith.constant 0 : index
    %c0_111 = arith.constant 0 : index
    %108 = vector.load %arg16[%c0_109, %c0_110, %c0_111] : memref<9x128x128xf32, #tpu.memory_space<vmem>>, vector<1x128x128xf32>
    %109 = vector.shape_cast %108 : vector<1x128x128xf32> to vector<128x128xf32>
    %cst_112 = arith.constant dense<0.000000e+00> : vector<8x128xf32>
    %110 = tpu.matmul %107, %109, %cst_112 {dimension_numbers = #tpu.dot_dimension_numbers<[1], [0], [0], [1], [0, 0, 1, 1], [], []>} : vector<8x128xf32>, vector<128x128xf32>, vector<8x128xf32> -> vector<8x128xf32>
    %111 = vector.broadcast %95 : vector<1x128xf32> to vector<8x128xf32>
    %112 = arith.addf %111, %110 : vector<8x128xf32>
    %c1_113 = arith.constant 1 : index
    %c0_114 = arith.constant 0 : index
    %c0_115 = arith.constant 0 : index
    %113 = vector.load %arg2[%c1_113, %c0_114, %c0_115] : memref<9x8x8xf32, #tpu.memory_space<vmem>>, vector<1x8x8xf32>
    %114 = vector.shape_cast %113 : vector<1x8x8xf32> to vector<8x8xf32>
    %cst_116 = arith.constant dense<0.000000e+00> : vector<8x128xf32>
    %115 = tpu.matmul %114, %104, %cst_116 {dimension_numbers = #tpu.dot_dimension_numbers<[1], [0], [0], [1], [0, 0, 1, 1], [], []>} : vector<8x8xf32>, vector<8x128xf32>, vector<8x128xf32> -> vector<8x128xf32>
    %c1_117 = arith.constant 1 : index
    %c0_118 = arith.constant 0 : index
    %c0_119 = arith.constant 0 : index
    %116 = vector.load %arg16[%c1_117, %c0_118, %c0_119] : memref<9x128x128xf32, #tpu.memory_space<vmem>>, vector<1x128x128xf32>
    %117 = vector.shape_cast %116 : vector<1x128x128xf32> to vector<128x128xf32>
    %cst_120 = arith.constant dense<0.000000e+00> : vector<8x128xf32>
    %118 = tpu.matmul %115, %117, %cst_120 {dimension_numbers = #tpu.dot_dimension_numbers<[1], [0], [0], [1], [0, 0, 1, 1], [], []>} : vector<8x128xf32>, vector<128x128xf32>, vector<8x128xf32> -> vector<8x128xf32>
    %119 = arith.addf %112, %118 : vector<8x128xf32>
    %c2_121 = arith.constant 2 : index
    %c0_122 = arith.constant 0 : index
    %c0_123 = arith.constant 0 : index
    %120 = vector.load %arg2[%c2_121, %c0_122, %c0_123] : memref<9x8x8xf32, #tpu.memory_space<vmem>>, vector<1x8x8xf32>
    %121 = vector.shape_cast %120 : vector<1x8x8xf32> to vector<8x8xf32>
    %cst_124 = arith.constant dense<0.000000e+00> : vector<8x128xf32>
    %122 = tpu.matmul %121, %104, %cst_124 {dimension_numbers = #tpu.dot_dimension_numbers<[1], [0], [0], [1], [0, 0, 1, 1], [], []>} : vector<8x8xf32>, vector<8x128xf32>, vector<8x128xf32> -> vector<8x128xf32>
    %c2_125 = arith.constant 2 : index
    %c0_126 = arith.constant 0 : index
    %c0_127 = arith.constant 0 : index
    %123 = vector.load %arg16[%c2_125, %c0_126, %c0_127] : memref<9x128x128xf32, #tpu.memory_space<vmem>>, vector<1x128x128xf32>
    %124 = vector.shape_cast %123 : vector<1x128x128xf32> to vector<128x128xf32>
    %cst_128 = arith.constant dense<0.000000e+00> : vector<8x128xf32>
    %125 = tpu.matmul %122, %124, %cst_128 {dimension_numbers = #tpu.dot_dimension_numbers<[1], [0], [0], [1], [0, 0, 1, 1], [], []>} : vector<8x128xf32>, vector<128x128xf32>, vector<8x128xf32> -> vector<8x128xf32>
    %126 = arith.addf %119, %125 : vector<8x128xf32>
    %c3_129 = arith.constant 3 : index
    %c0_130 = arith.constant 0 : index
    %c0_131 = arith.constant 0 : index
    %127 = vector.load %arg2[%c3_129, %c0_130, %c0_131] : memref<9x8x8xf32, #tpu.memory_space<vmem>>, vector<1x8x8xf32>
    %128 = vector.shape_cast %127 : vector<1x8x8xf32> to vector<8x8xf32>
    %cst_132 = arith.constant dense<0.000000e+00> : vector<8x128xf32>
    %129 = tpu.matmul %128, %104, %cst_132 {dimension_numbers = #tpu.dot_dimension_numbers<[1], [0], [0], [1], [0, 0, 1, 1], [], []>} : vector<8x8xf32>, vector<8x128xf32>, vector<8x128xf32> -> vector<8x128xf32>
    %c3_133 = arith.constant 3 : index
    %c0_134 = arith.constant 0 : index
    %c0_135 = arith.constant 0 : index
    %130 = vector.load %arg16[%c3_133, %c0_134, %c0_135] : memref<9x128x128xf32, #tpu.memory_space<vmem>>, vector<1x128x128xf32>
    %131 = vector.shape_cast %130 : vector<1x128x128xf32> to vector<128x128xf32>
    %cst_136 = arith.constant dense<0.000000e+00> : vector<8x128xf32>
    %132 = tpu.matmul %129, %131, %cst_136 {dimension_numbers = #tpu.dot_dimension_numbers<[1], [0], [0], [1], [0, 0, 1, 1], [], []>} : vector<8x128xf32>, vector<128x128xf32>, vector<8x128xf32> -> vector<8x128xf32>
    %133 = arith.addf %126, %132 : vector<8x128xf32>
    %c4_137 = arith.constant 4 : index
    %c0_138 = arith.constant 0 : index
    %c0_139 = arith.constant 0 : index
    %134 = vector.load %arg2[%c4_137, %c0_138, %c0_139] : memref<9x8x8xf32, #tpu.memory_space<vmem>>, vector<1x8x8xf32>
    %135 = vector.shape_cast %134 : vector<1x8x8xf32> to vector<8x8xf32>
    %cst_140 = arith.constant dense<0.000000e+00> : vector<8x128xf32>
    %136 = tpu.matmul %135, %104, %cst_140 {dimension_numbers = #tpu.dot_dimension_numbers<[1], [0], [0], [1], [0, 0, 1, 1], [], []>} : vector<8x8xf32>, vector<8x128xf32>, vector<8x128xf32> -> vector<8x128xf32>
    %c4_141 = arith.constant 4 : index
    %c0_142 = arith.constant 0 : index
    %c0_143 = arith.constant 0 : index
    %137 = vector.load %arg16[%c4_141, %c0_142, %c0_143] : memref<9x128x128xf32, #tpu.memory_space<vmem>>, vector<1x128x128xf32>
    %138 = vector.shape_cast %137 : vector<1x128x128xf32> to vector<128x128xf32>
    %cst_144 = arith.constant dense<0.000000e+00> : vector<8x128xf32>
    %139 = tpu.matmul %136, %138, %cst_144 {dimension_numbers = #tpu.dot_dimension_numbers<[1], [0], [0], [1], [0, 0, 1, 1], [], []>} : vector<8x128xf32>, vector<128x128xf32>, vector<8x128xf32> -> vector<8x128xf32>
    %140 = arith.addf %133, %139 : vector<8x128xf32>
    %c5_145 = arith.constant 5 : index
    %c0_146 = arith.constant 0 : index
    %c0_147 = arith.constant 0 : index
    %141 = vector.load %arg2[%c5_145, %c0_146, %c0_147] : memref<9x8x8xf32, #tpu.memory_space<vmem>>, vector<1x8x8xf32>
    %142 = vector.shape_cast %141 : vector<1x8x8xf32> to vector<8x8xf32>
    %cst_148 = arith.constant dense<0.000000e+00> : vector<8x128xf32>
    %143 = tpu.matmul %142, %104, %cst_148 {dimension_numbers = #tpu.dot_dimension_numbers<[1], [0], [0], [1], [0, 0, 1, 1], [], []>} : vector<8x8xf32>, vector<8x128xf32>, vector<8x128xf32> -> vector<8x128xf32>
    %c5_149 = arith.constant 5 : index
    %c0_150 = arith.constant 0 : index
    %c0_151 = arith.constant 0 : index
    %144 = vector.load %arg16[%c5_149, %c0_150, %c0_151] : memref<9x128x128xf32, #tpu.memory_space<vmem>>, vector<1x128x128xf32>
    %145 = vector.shape_cast %144 : vector<1x128x128xf32> to vector<128x128xf32>
    %cst_152 = arith.constant dense<0.000000e+00> : vector<8x128xf32>
    %146 = tpu.matmul %143, %145, %cst_152 {dimension_numbers = #tpu.dot_dimension_numbers<[1], [0], [0], [1], [0, 0, 1, 1], [], []>} : vector<8x128xf32>, vector<128x128xf32>, vector<8x128xf32> -> vector<8x128xf32>
    %147 = arith.addf %140, %146 : vector<8x128xf32>
    %c6_153 = arith.constant 6 : index
    %c0_154 = arith.constant 0 : index
    %c0_155 = arith.constant 0 : index
    %148 = vector.load %arg2[%c6_153, %c0_154, %c0_155] : memref<9x8x8xf32, #tpu.memory_space<vmem>>, vector<1x8x8xf32>
    %149 = vector.shape_cast %148 : vector<1x8x8xf32> to vector<8x8xf32>
    %cst_156 = arith.constant dense<0.000000e+00> : vector<8x128xf32>
    %150 = tpu.matmul %149, %104, %cst_156 {dimension_numbers = #tpu.dot_dimension_numbers<[1], [0], [0], [1], [0, 0, 1, 1], [], []>} : vector<8x8xf32>, vector<8x128xf32>, vector<8x128xf32> -> vector<8x128xf32>
    %c6_157 = arith.constant 6 : index
    %c0_158 = arith.constant 0 : index
    %c0_159 = arith.constant 0 : index
    %151 = vector.load %arg16[%c6_157, %c0_158, %c0_159] : memref<9x128x128xf32, #tpu.memory_space<vmem>>, vector<1x128x128xf32>
    %152 = vector.shape_cast %151 : vector<1x128x128xf32> to vector<128x128xf32>
    %cst_160 = arith.constant dense<0.000000e+00> : vector<8x128xf32>
    %153 = tpu.matmul %150, %152, %cst_160 {dimension_numbers = #tpu.dot_dimension_numbers<[1], [0], [0], [1], [0, 0, 1, 1], [], []>} : vector<8x128xf32>, vector<128x128xf32>, vector<8x128xf32> -> vector<8x128xf32>
    %154 = arith.addf %147, %153 : vector<8x128xf32>
    %c7_161 = arith.constant 7 : index
    %c0_162 = arith.constant 0 : index
    %c0_163 = arith.constant 0 : index
    %155 = vector.load %arg2[%c7_161, %c0_162, %c0_163] : memref<9x8x8xf32, #tpu.memory_space<vmem>>, vector<1x8x8xf32>
    %156 = vector.shape_cast %155 : vector<1x8x8xf32> to vector<8x8xf32>
    %cst_164 = arith.constant dense<0.000000e+00> : vector<8x128xf32>
    %157 = tpu.matmul %156, %104, %cst_164 {dimension_numbers = #tpu.dot_dimension_numbers<[1], [0], [0], [1], [0, 0, 1, 1], [], []>} : vector<8x8xf32>, vector<8x128xf32>, vector<8x128xf32> -> vector<8x128xf32>
    %c7_165 = arith.constant 7 : index
    %c0_166 = arith.constant 0 : index
    %c0_167 = arith.constant 0 : index
    %158 = vector.load %arg16[%c7_165, %c0_166, %c0_167] : memref<9x128x128xf32, #tpu.memory_space<vmem>>, vector<1x128x128xf32>
    %159 = vector.shape_cast %158 : vector<1x128x128xf32> to vector<128x128xf32>
    %cst_168 = arith.constant dense<0.000000e+00> : vector<8x128xf32>
    %160 = tpu.matmul %157, %159, %cst_168 {dimension_numbers = #tpu.dot_dimension_numbers<[1], [0], [0], [1], [0, 0, 1, 1], [], []>} : vector<8x128xf32>, vector<128x128xf32>, vector<8x128xf32> -> vector<8x128xf32>
    %161 = arith.addf %154, %160 : vector<8x128xf32>
    %c8_169 = arith.constant 8 : index
    %c0_170 = arith.constant 0 : index
    %c0_171 = arith.constant 0 : index
    %162 = vector.load %arg2[%c8_169, %c0_170, %c0_171] : memref<9x8x8xf32, #tpu.memory_space<vmem>>, vector<1x8x8xf32>
    %163 = vector.shape_cast %162 : vector<1x8x8xf32> to vector<8x8xf32>
    %cst_172 = arith.constant dense<0.000000e+00> : vector<8x128xf32>
    %164 = tpu.matmul %163, %104, %cst_172 {dimension_numbers = #tpu.dot_dimension_numbers<[1], [0], [0], [1], [0, 0, 1, 1], [], []>} : vector<8x8xf32>, vector<8x128xf32>, vector<8x128xf32> -> vector<8x128xf32>
    %c8_173 = arith.constant 8 : index
    %c0_174 = arith.constant 0 : index
    %c0_175 = arith.constant 0 : index
    %165 = vector.load %arg16[%c8_173, %c0_174, %c0_175] : memref<9x128x128xf32, #tpu.memory_space<vmem>>, vector<1x128x128xf32>
    %166 = vector.shape_cast %165 : vector<1x128x128xf32> to vector<128x128xf32>
    %cst_176 = arith.constant dense<0.000000e+00> : vector<8x128xf32>
    %167 = tpu.matmul %164, %166, %cst_176 {dimension_numbers = #tpu.dot_dimension_numbers<[1], [0], [0], [1], [0, 0, 1, 1], [], []>} : vector<8x128xf32>, vector<128x128xf32>, vector<8x128xf32> -> vector<8x128xf32>
    %168 = arith.addf %161, %167 : vector<8x128xf32>
    %cst_177 = arith.constant 0.000000e+00 : f32
    %169 = vector.broadcast %cst_177 : f32 to vector<8x128xf32>
    %170 = arith.maximumf %168, %169 : vector<8x128xf32>
    %cst_178 = arith.constant dense<0.000000e+00> : vector<8x32xf32>
    %171 = tpu.matmul %170, %96, %cst_178 {dimension_numbers = #tpu.dot_dimension_numbers<[1], [0], [0], [1], [0, 0, 1, 1], [], []>} : vector<8x128xf32>, vector<128x32xf32>, vector<8x32xf32> -> vector<8x32xf32>
    %172 = vector.broadcast %97 : vector<1x32xf32> to vector<8x32xf32>
    %173 = arith.addf %171, %172 : vector<8x32xf32>
    %cst_179 = arith.constant dense<0.000000e+00> : vector<8x32xf32>
    %174 = tpu.matmul %92, %98, %cst_179 {dimension_numbers = #tpu.dot_dimension_numbers<[1], [0], [0], [1], [0, 0, 1, 1], [], []>} : vector<8x256xf32>, vector<256x32xf32>, vector<8x32xf32> -> vector<8x32xf32>
    %175 = vector.broadcast %99 : vector<1x32xf32> to vector<8x32xf32>
    %176 = arith.addf %174, %175 : vector<8x32xf32>
    %177 = arith.addf %173, %176 : vector<8x32xf32>
    %cst_180 = arith.constant 0.000000e+00 : f32
    %178 = vector.broadcast %cst_180 : f32 to vector<8x32xf32>
    %179 = arith.maximumf %177, %178 : vector<8x32xf32>
    %c0_181 = arith.constant 0 : index
    %c0_182 = arith.constant 0 : index
    %180 = vector.load %arg3[%c0_181, %c0_182] : memref<8x32xf32, #tpu.memory_space<vmem>>, vector<8x32xf32>
    %181 = arith.addf %179, %180 : vector<8x32xf32>
    %c0_183 = arith.constant 0 : index
    %c0_184 = arith.constant 0 : index
    %182 = vector.load %arg22[%c0_183, %c0_184] : memref<8x32xf32, #tpu.memory_space<vmem>>, vector<8x32xf32>
    tpu.vector_store %arg22[%c0_183, %c0_184], %181 {strides = array<i32>} : memref<8x32xf32, #tpu.memory_space<vmem>>, vector<8x32xf32>,
    return
  }
  func.func @transform_0(%arg0: i32) -> (i32, i32) {
    %c0_i32 = arith.constant 0 : i32
    %c0_i32_0 = arith.constant 0 : i32
    %c0_i32_1 = arith.constant 0 : i32
    return %c0_i32, %c0_i32_0 : i32, i32
  }
  func.func @transform_1(%arg0: i32) -> (i32, i32, i32) {
    %c0_i32 = arith.constant 0 : i32
    %c0_i32_0 = arith.constant 0 : i32
    %c0_i32_1 = arith.constant 0 : i32
    %c0_i32_2 = arith.constant 0 : i32
    return %c0_i32, %c0_i32_0, %c0_i32_1 : i32, i32, i32
  }
  func.func @transform_2(%arg0: i32) -> (i32, i32) {
    %c0_i32 = arith.constant 0 : i32
    %c0_i32_0 = arith.constant 0 : i32
    %c0_i32_1 = arith.constant 0 : i32
    return %c0_i32, %c0_i32_0 : i32, i32
  }
  func.func @transform_3(%arg0: i32) -> (i32, i32) {
    %c0_i32 = arith.constant 0 : i32
    %c0_i32_0 = arith.constant 0 : i32
    %c0_i32_1 = arith.constant 0 : i32
    return %c0_i32, %c0_i32_0 : i32, i32
  }
  func.func @transform_4(%arg0: i32) -> (i32, i32) {
    %c0_i32 = arith.constant 0 : i32
    %c0_i32_0 = arith.constant 0 : i32
    %c0_i32_1 = arith.constant 0 : i32
    return %c0_i32, %c0_i32_0 : i32, i32
  }
  func.func @transform_5(%arg0: i32) -> (i32, i32) {
    %c0_i32 = arith.constant 0 : i32
    %c0_i32_0 = arith.constant 0 : i32
    %c0_i32_1 = arith.constant 0 : i32
    return %c0_i32, %c0_i32_0 : i32, i32
  }
  func.func @transform_6(%arg0: i32) -> (i32, i32) {
    %c0_i32 = arith.constant 0 : i32
    %c0_i32_0 = arith.constant 0 : i32
    %c0_i32_1 = arith.constant 0 : i32
    return %c0_i32, %c0_i32_0 : i32, i32
  }
  func.func @transform_7(%arg0: i32) -> (i32, i32, i32) {
    %c0_i32 = arith.constant 0 : i32
    %c0_i32_0 = arith.constant 0 : i32
    %c0_i32_1 = arith.constant 0 : i32
    %c0_i32_2 = arith.constant 0 : i32
    return %c0_i32, %c0_i32_0, %c0_i32_1 : i32, i32, i32
  }
  func.func @transform_8(%arg0: i32) -> (i32, i32) {
    %c0_i32 = arith.constant 0 : i32
    %c0_i32_0 = arith.constant 0 : i32
    %c0_i32_1 = arith.constant 0 : i32
    return %c0_i32, %c0_i32_0 : i32, i32
  }
  func.func @transform_9(%arg0: i32) -> (i32, i32) {
    %c0_i32 = arith.constant 0 : i32
    %c0_i32_0 = arith.constant 0 : i32
    %c0_i32_1 = arith.constant 0 : i32
    return %c0_i32, %c0_i32_0 : i32, i32
  }
  func.func @transform_10(%arg0: i32) -> (i32, i32) {
    %c0_i32 = arith.constant 0 : i32
    %c0_i32_0 = arith.constant 0 : i32
    %c0_i32_1 = arith.constant 0 : i32
    return %c0_i32, %c0_i32_0 : i32, i32
  }
  func.func @transform_11(%arg0: i32) -> (i32, i32) {
    %c0_i32 = arith.constant 0 : i32
    %c0_i32_0 = arith.constant 0 : i32
    %c0_i32_1 = arith.constant 0 : i32
    return %c0_i32, %c0_i32_0 : i32, i32
  }
  func.func @transform_12(%arg0: i32) -> (i32, i32) {
    %c0_i32 = arith.constant 0 : i32
    %c0_i32_0 = arith.constant 0 : i32
    %c0_i32_1 = arith.constant 0 : i32
    return %c0_i32, %c0_i32_0 : i32, i32
  }
  func.func @transform_13(%arg0: i32) -> (i32, i32) {
    %c0_i32 = arith.constant 0 : i32
    %c0_i32_0 = arith.constant 0 : i32
    %c0_i32_1 = arith.constant 0 : i32
    return %c0_i32, %c0_i32_0 : i32, i32
  }
  func.func @transform_14(%arg0: i32) -> (i32, i32) {
    %c0_i32 = arith.constant 0 : i32
    %c0_i32_0 = arith.constant 0 : i32
    %c0_i32_1 = arith.constant 0 : i32
    return %c0_i32, %c0_i32_0 : i32, i32
  }
  func.func @transform_15(%arg0: i32) -> (i32, i32, i32) {
    %c0_i32 = arith.constant 0 : i32
    %c0_i32_0 = arith.constant 0 : i32
    %c0_i32_1 = arith.constant 0 : i32
    %c0_i32_2 = arith.constant 0 : i32
    return %c0_i32, %c0_i32_0, %c0_i32_1 : i32, i32, i32
  }
  func.func @transform_16(%arg0: i32) -> (i32, i32) {
    %c0_i32 = arith.constant 0 : i32
    %c0_i32_0 = arith.constant 0 : i32
    %c0_i32_1 = arith.constant 0 : i32
    return %c0_i32, %c0_i32_0 : i32, i32
  }
  func.func @transform_17(%arg0: i32) -> (i32, i32) {
    %c0_i32 = arith.constant 0 : i32
    %c0_i32_0 = arith.constant 0 : i32
    %c0_i32_1 = arith.constant 0 : i32
    return %c0_i32, %c0_i32_0 : i32, i32
  }
  func.func @transform_18(%arg0: i32) -> (i32, i32) {
    %c0_i32 = arith.constant 0 : i32
    %c0_i32_0 = arith.constant 0 : i32
    %c0_i32_1 = arith.constant 0 : i32
    return %c0_i32, %c0_i32_0 : i32, i32
  }
  func.func @transform_19(%arg0: i32) -> (i32, i32) {
    %c0_i32 = arith.constant 0 : i32
    %c0_i32_0 = arith.constant 0 : i32
    %c0_i32_1 = arith.constant 0 : i32
    return %c0_i32, %c0_i32_0 : i32, i32
  }
  func.func @transform_20(%arg0: i32) -> (i32, i32) {
    %c0_i32 = arith.constant 0 : i32
    %c0_i32_0 = arith.constant 0 : i32
    %c0_i32_1 = arith.constant 0 : i32
    return %c0_i32, %c0_i32_0 : i32, i32
  }
  func.func @transform_21(%arg0: i32) -> (i32, i32) {
    %c0_i32 = arith.constant 0 : i32
    %c0_i32_0 = arith.constant 0 : i32
    %c0_i32_1 = arith.constant 0 : i32
    return %c0_i32, %c0_i32_0 : i32, i32
  }
}

module attributes {stable_mosaic.version = 11 : i64} {
  func.func @_transformer_kernel(%arg0: i32, %arg1: memref<18x32xf32, #tpu.memory_space<vmem>>, %arg2: memref<16x32xf32, #tpu.memory_space<vmem>>, %arg3: memref<18x18xf32, #tpu.memory_space<vmem>>, %arg4: memref<16x16xf32, #tpu.memory_space<vmem>>, %arg5: memref<16x18xf32, #tpu.memory_space<vmem>>, %arg6: memref<4x1x32xf32, #tpu.memory_space<vmem>>, %arg7: memref<4x1x32xf32, #tpu.memory_space<vmem>>, %arg8: memref<6x32x32xf32, #tpu.memory_space<vmem>>, %arg9: memref<6x1x32xf32, #tpu.memory_space<vmem>>, %arg10: memref<2x32x32xf32, #tpu.memory_space<vmem>>, %arg11: memref<2x1x32xf32, #tpu.memory_space<vmem>>, %arg12: memref<4x1x32xf32, #tpu.memory_space<vmem>>, %arg13: memref<2x32x64xf32, #tpu.memory_space<vmem>>, %arg14: memref<2x1x64xf32, #tpu.memory_space<vmem>>, %arg15: memref<2x64x32xf32, #tpu.memory_space<vmem>>, %arg16: memref<2x1x32xf32, #tpu.memory_space<vmem>>, %arg17: memref<2x1x32xf32, #tpu.memory_space<vmem>>, %arg18: memref<4x1x32xf32, #tpu.memory_space<vmem>>, %arg19: memref<6x32x32xf32, #tpu.memory_space<vmem>>, %arg20: memref<6x1x32xf32, #tpu.memory_space<vmem>>, %arg21: memref<2x32x32xf32, #tpu.memory_space<vmem>>, %arg22: memref<2x1x32xf32, #tpu.memory_space<vmem>>, %arg23: memref<4x1x32xf32, #tpu.memory_space<vmem>>, %arg24: memref<2x32x32xf32, #tpu.memory_space<vmem>>, %arg25: memref<2x1x32xf32, #tpu.memory_space<vmem>>, %arg26: memref<4x32x32xf32, #tpu.memory_space<vmem>>, %arg27: memref<4x1x32xf32, #tpu.memory_space<vmem>>, %arg28: memref<2x32x32xf32, #tpu.memory_space<vmem>>, %arg29: memref<2x1x32xf32, #tpu.memory_space<vmem>>, %arg30: memref<4x1x32xf32, #tpu.memory_space<vmem>>, %arg31: memref<2x32x64xf32, #tpu.memory_space<vmem>>, %arg32: memref<2x1x64xf32, #tpu.memory_space<vmem>>, %arg33: memref<2x64x32xf32, #tpu.memory_space<vmem>>, %arg34: memref<2x1x32xf32, #tpu.memory_space<vmem>>, %arg35: memref<2x1x32xf32, #tpu.memory_space<vmem>>, %arg36: memref<2x1x32xf32, #tpu.memory_space<vmem>>, %arg37: memref<32x128xf32, #tpu.memory_space<vmem>>, %arg38: memref<1x128xf32, #tpu.memory_space<vmem>>, %arg39: memref<16x128xf32, #tpu.memory_space<vmem>>) attributes {dimension_semantics = [#tpu.dimension_semantics<arbitrary>], iteration_bounds = array<i64: 1>, scalar_prefetch = 0 : i64, scratch_operands = 0 : i64, tpu.core_type = #tpu.core_type<tc>, window_params = [{pipeline_mode = #tpu.pipeline_mode<synchronous>, transform_indices = @transform_0, window_bounds = array<i64: 18, 32>}, {pipeline_mode = #tpu.pipeline_mode<synchronous>, transform_indices = @transform_1, window_bounds = array<i64: 16, 32>}, {pipeline_mode = #tpu.pipeline_mode<synchronous>, transform_indices = @transform_2, window_bounds = array<i64: 18, 18>}, {pipeline_mode = #tpu.pipeline_mode<synchronous>, transform_indices = @transform_3, window_bounds = array<i64: 16, 16>}, {pipeline_mode = #tpu.pipeline_mode<synchronous>, transform_indices = @transform_4, window_bounds = array<i64: 16, 18>}, {pipeline_mode = #tpu.pipeline_mode<synchronous>, transform_indices = @transform_5, window_bounds = array<i64: 4, 1, 32>}, {pipeline_mode = #tpu.pipeline_mode<synchronous>, transform_indices = @transform_6, window_bounds = array<i64: 4, 1, 32>}, {pipeline_mode = #tpu.pipeline_mode<synchronous>, transform_indices = @transform_7, window_bounds = array<i64: 6, 32, 32>}, {pipeline_mode = #tpu.pipeline_mode<synchronous>, transform_indices = @transform_8, window_bounds = array<i64: 6, 1, 32>}, {pipeline_mode = #tpu.pipeline_mode<synchronous>, transform_indices = @transform_9, window_bounds = array<i64: 2, 32, 32>}, {pipeline_mode = #tpu.pipeline_mode<synchronous>, transform_indices = @transform_10, window_bounds = array<i64: 2, 1, 32>}, {pipeline_mode = #tpu.pipeline_mode<synchronous>, transform_indices = @transform_11, window_bounds = array<i64: 4, 1, 32>}, {pipeline_mode = #tpu.pipeline_mode<synchronous>, transform_indices = @transform_12, window_bounds = array<i64: 2, 32, 64>}, {pipeline_mode = #tpu.pipeline_mode<synchronous>, transform_indices = @transform_13, window_bounds = array<i64: 2, 1, 64>}, {pipeline_mode = #tpu.pipeline_mode<synchronous>, transform_indices = @transform_14, window_bounds = array<i64: 2, 64, 32>}, {pipeline_mode = #tpu.pipeline_mode<synchronous>, transform_indices = @transform_15, window_bounds = array<i64: 2, 1, 32>}, {pipeline_mode = #tpu.pipeline_mode<synchronous>, transform_indices = @transform_16, window_bounds = array<i64: 2, 1, 32>}, {pipeline_mode = #tpu.pipeline_mode<synchronous>, transform_indices = @transform_17, window_bounds = array<i64: 4, 1, 32>}, {pipeline_mode = #tpu.pipeline_mode<synchronous>, transform_indices = @transform_18, window_bounds = array<i64: 6, 32, 32>}, {pipeline_mode = #tpu.pipeline_mode<synchronous>, transform_indices = @transform_19, window_bounds = array<i64: 6, 1, 32>}, {pipeline_mode = #tpu.pipeline_mode<synchronous>, transform_indices = @transform_20, window_bounds = array<i64: 2, 32, 32>}, {pipeline_mode = #tpu.pipeline_mode<synchronous>, transform_indices = @transform_21, window_bounds = array<i64: 2, 1, 32>}, {pipeline_mode = #tpu.pipeline_mode<synchronous>, transform_indices = @transform_22, window_bounds = array<i64: 4, 1, 32>}, {pipeline_mode = #tpu.pipeline_mode<synchronous>, transform_indices = @transform_23, window_bounds = array<i64: 2, 32, 32>}, {pipeline_mode = #tpu.pipeline_mode<synchronous>, transform_indices = @transform_24, window_bounds = array<i64: 2, 1, 32>}, {pipeline_mode = #tpu.pipeline_mode<synchronous>, transform_indices = @transform_25, window_bounds = array<i64: 4, 32, 32>}, {pipeline_mode = #tpu.pipeline_mode<synchronous>, transform_indices = @transform_26, window_bounds = array<i64: 4, 1, 32>}, {pipeline_mode = #tpu.pipeline_mode<synchronous>, transform_indices = @transform_27, window_bounds = array<i64: 2, 32, 32>}, {pipeline_mode = #tpu.pipeline_mode<synchronous>, transform_indices = @transform_28, window_bounds = array<i64: 2, 1, 32>}, {pipeline_mode = #tpu.pipeline_mode<synchronous>, transform_indices = @transform_29, window_bounds = array<i64: 4, 1, 32>}, {pipeline_mode = #tpu.pipeline_mode<synchronous>, transform_indices = @transform_30, window_bounds = array<i64: 2, 32, 64>}, {pipeline_mode = #tpu.pipeline_mode<synchronous>, transform_indices = @transform_31, window_bounds = array<i64: 2, 1, 64>}, {pipeline_mode = #tpu.pipeline_mode<synchronous>, transform_indices = @transform_32, window_bounds = array<i64: 2, 64, 32>}, {pipeline_mode = #tpu.pipeline_mode<synchronous>, transform_indices = @transform_33, window_bounds = array<i64: 2, 1, 32>}, {pipeline_mode = #tpu.pipeline_mode<synchronous>, transform_indices = @transform_34, window_bounds = array<i64: 2, 1, 32>}, {pipeline_mode = #tpu.pipeline_mode<synchronous>, transform_indices = @transform_35, window_bounds = array<i64: 2, 1, 32>}, {pipeline_mode = #tpu.pipeline_mode<synchronous>, transform_indices = @transform_36, window_bounds = array<i64: 32, 128>}, {pipeline_mode = #tpu.pipeline_mode<synchronous>, transform_indices = @transform_37, window_bounds = array<i64: 1, 128>}, {pipeline_mode = #tpu.pipeline_mode<synchronous>, transform_indices = @transform_38, window_bounds = array<i64: 16, 128>}]} {
    %c0 = arith.constant 0 : index
    %c0_0 = arith.constant 0 : index
    %0 = vector.load %arg3[%c0, %c0_0] : memref<18x18xf32, #tpu.memory_space<vmem>>, vector<18x18xf32>
    %c0_1 = arith.constant 0 : index
    %c0_2 = arith.constant 0 : index
    %1 = vector.load %arg4[%c0_1, %c0_2] : memref<16x16xf32, #tpu.memory_space<vmem>>, vector<16x16xf32>
    %c0_3 = arith.constant 0 : index
    %c0_4 = arith.constant 0 : index
    %2 = vector.load %arg5[%c0_3, %c0_4] : memref<16x18xf32, #tpu.memory_space<vmem>>, vector<16x18xf32>
    %c0_5 = arith.constant 0 : index
    %c0_6 = arith.constant 0 : index
    %c0_7 = arith.constant 0 : index
    %3 = vector.load %arg6[%c0_5, %c0_6, %c0_7] : memref<4x1x32xf32, #tpu.memory_space<vmem>>, vector<1x1x32xf32>
    %4 = vector.shape_cast %3 : vector<1x1x32xf32> to vector<1x32xf32>
    %c1 = arith.constant 1 : index
    %c0_8 = arith.constant 0 : index
    %c0_9 = arith.constant 0 : index
    %5 = vector.load %arg6[%c1, %c0_8, %c0_9] : memref<4x1x32xf32, #tpu.memory_space<vmem>>, vector<1x1x32xf32>
    %6 = vector.shape_cast %5 : vector<1x1x32xf32> to vector<1x32xf32>
    %c2 = arith.constant 2 : index
    %c0_10 = arith.constant 0 : index
    %c0_11 = arith.constant 0 : index
    %7 = vector.load %arg6[%c2, %c0_10, %c0_11] : memref<4x1x32xf32, #tpu.memory_space<vmem>>, vector<1x1x32xf32>
    %8 = vector.shape_cast %7 : vector<1x1x32xf32> to vector<1x32xf32>
    %c3 = arith.constant 3 : index
    %c0_12 = arith.constant 0 : index
    %c0_13 = arith.constant 0 : index
    %9 = vector.load %arg6[%c3, %c0_12, %c0_13] : memref<4x1x32xf32, #tpu.memory_space<vmem>>, vector<1x1x32xf32>
    %10 = vector.shape_cast %9 : vector<1x1x32xf32> to vector<1x32xf32>
    %c0_14 = arith.constant 0 : index
    %c0_15 = arith.constant 0 : index
    %11 = vector.load %arg1[%c0_14, %c0_15] : memref<18x32xf32, #tpu.memory_space<vmem>>, vector<18x32xf32>
    %c0_16 = arith.constant 0 : index
    %c0_17 = arith.constant 0 : index
    %c0_18 = arith.constant 0 : index
    %12 = vector.load %arg7[%c0_16, %c0_17, %c0_18] : memref<4x1x32xf32, #tpu.memory_space<vmem>>, vector<1x1x32xf32>
    %13 = vector.shape_cast %12 : vector<1x1x32xf32> to vector<1x32xf32>
    %c1_19 = arith.constant 1 : index
    %c0_20 = arith.constant 0 : index
    %c0_21 = arith.constant 0 : index
    %14 = vector.load %arg7[%c1_19, %c0_20, %c0_21] : memref<4x1x32xf32, #tpu.memory_space<vmem>>, vector<1x1x32xf32>
    %15 = vector.shape_cast %14 : vector<1x1x32xf32> to vector<1x32xf32>
    %cst = arith.constant dense<0.000000e+00> : vector<18xf32>
    %16 = vector.multi_reduction <add>, %11, %cst [1] : vector<18x32xf32> to vector<18xf32>
    %17 = vector.shape_cast %16 : vector<18xf32> to vector<18x1xf32>
    %cst_22 = arith.constant 3.200000e+01 : f32
    %18 = vector.broadcast %cst_22 : f32 to vector<18x1xf32>
    %19 = arith.divf %17, %18 : vector<18x1xf32>
    %20 = vector.broadcast %19 : vector<18x1xf32> to vector<18x32xf32>
    %21 = arith.subf %11, %20 : vector<18x32xf32>
    %22 = arith.mulf %21, %21 : vector<18x32xf32>
    %cst_23 = arith.constant dense<0.000000e+00> : vector<18xf32>
    %23 = vector.multi_reduction <add>, %22, %cst_23 [1] : vector<18x32xf32> to vector<18xf32>
    %24 = vector.shape_cast %23 : vector<18xf32> to vector<18x1xf32>
    %cst_24 = arith.constant 3.200000e+01 : f32
    %25 = vector.broadcast %cst_24 : f32 to vector<18x1xf32>
    %26 = arith.divf %24, %25 : vector<18x1xf32>
    %27 = vector.broadcast %19 : vector<18x1xf32> to vector<18x32xf32>
    %28 = arith.subf %11, %27 : vector<18x32xf32>
    %cst_25 = arith.constant 9.99999974E-6 : f32
    %29 = vector.broadcast %cst_25 : f32 to vector<18x1xf32>
    %30 = arith.addf %26, %29 : vector<18x1xf32>
    %31 = math.rsqrt %30 : vector<18x1xf32>
    %32 = vector.broadcast %31 : vector<18x1xf32> to vector<18x32xf32>
    %33 = arith.mulf %28, %32 : vector<18x32xf32>
    %34 = vector.broadcast %13 : vector<1x32xf32> to vector<18x32xf32>
    %35 = arith.mulf %33, %34 : vector<18x32xf32>
    %36 = vector.broadcast %15 : vector<1x32xf32> to vector<18x32xf32>
    %37 = arith.addf %35, %36 : vector<18x32xf32>
    %c0_26 = arith.constant 0 : index
    %c0_27 = arith.constant 0 : index
    %c0_28 = arith.constant 0 : index
    %38 = vector.load %arg8[%c0_26, %c0_27, %c0_28] : memref<6x32x32xf32, #tpu.memory_space<vmem>>, vector<1x32x32xf32>
    %39 = vector.shape_cast %38 : vector<1x32x32xf32> to vector<32x32xf32>
    %cst_29 = arith.constant dense<0.000000e+00> : vector<18x32xf32>
    %40 = tpu.matmul %37, %39, %cst_29 {dimension_numbers = #tpu.dot_dimension_numbers<[1], [0], [0], [1], [0, 0, 1, 1], [], []>} : vector<18x32xf32>, vector<32x32xf32>, vector<18x32xf32> -> vector<18x32xf32>
    %c0_30 = arith.constant 0 : index
    %c0_31 = arith.constant 0 : index
    %c0_32 = arith.constant 0 : index
    %41 = vector.load %arg9[%c0_30, %c0_31, %c0_32] : memref<6x1x32xf32, #tpu.memory_space<vmem>>, vector<1x1x32xf32>
    %42 = vector.shape_cast %41 : vector<1x1x32xf32> to vector<1x32xf32>
    %43 = vector.broadcast %42 : vector<1x32xf32> to vector<18x32xf32>
    %44 = arith.addf %40, %43 : vector<18x32xf32>
    %c1_33 = arith.constant 1 : index
    %c0_34 = arith.constant 0 : index
    %c0_35 = arith.constant 0 : index
    %45 = vector.load %arg8[%c1_33, %c0_34, %c0_35] : memref<6x32x32xf32, #tpu.memory_space<vmem>>, vector<1x32x32xf32>
    %46 = vector.shape_cast %45 : vector<1x32x32xf32> to vector<32x32xf32>
    %cst_36 = arith.constant dense<0.000000e+00> : vector<18x32xf32>
    %47 = tpu.matmul %37, %46, %cst_36 {dimension_numbers = #tpu.dot_dimension_numbers<[1], [0], [0], [1], [0, 0, 1, 1], [], []>} : vector<18x32xf32>, vector<32x32xf32>, vector<18x32xf32> -> vector<18x32xf32>
    %c1_37 = arith.constant 1 : index
    %c0_38 = arith.constant 0 : index
    %c0_39 = arith.constant 0 : index
    %48 = vector.load %arg9[%c1_37, %c0_38, %c0_39] : memref<6x1x32xf32, #tpu.memory_space<vmem>>, vector<1x1x32xf32>
    %49 = vector.shape_cast %48 : vector<1x1x32xf32> to vector<1x32xf32>
    %50 = vector.broadcast %49 : vector<1x32xf32> to vector<18x32xf32>
    %51 = arith.addf %47, %50 : vector<18x32xf32>
    %c2_40 = arith.constant 2 : index
    %c0_41 = arith.constant 0 : index
    %c0_42 = arith.constant 0 : index
    %52 = vector.load %arg8[%c2_40, %c0_41, %c0_42] : memref<6x32x32xf32, #tpu.memory_space<vmem>>, vector<1x32x32xf32>
    %53 = vector.shape_cast %52 : vector<1x32x32xf32> to vector<32x32xf32>
    %cst_43 = arith.constant dense<0.000000e+00> : vector<18x32xf32>
    %54 = tpu.matmul %37, %53, %cst_43 {dimension_numbers = #tpu.dot_dimension_numbers<[1], [0], [0], [1], [0, 0, 1, 1], [], []>} : vector<18x32xf32>, vector<32x32xf32>, vector<18x32xf32> -> vector<18x32xf32>
    %c2_44 = arith.constant 2 : index
    %c0_45 = arith.constant 0 : index
    %c0_46 = arith.constant 0 : index
    %55 = vector.load %arg9[%c2_44, %c0_45, %c0_46] : memref<6x1x32xf32, #tpu.memory_space<vmem>>, vector<1x1x32xf32>
    %56 = vector.shape_cast %55 : vector<1x1x32xf32> to vector<1x32xf32>
    %57 = vector.broadcast %56 : vector<1x32xf32> to vector<18x32xf32>
    %58 = arith.addf %54, %57 : vector<18x32xf32>
    %c0_47 = arith.constant 0 : index
    %c0_48 = arith.constant 0 : index
    %c0_49 = arith.constant 0 : index
    %59 = vector.load %arg10[%c0_47, %c0_48, %c0_49] : memref<2x32x32xf32, #tpu.memory_space<vmem>>, vector<1x32x32xf32>
    %60 = vector.shape_cast %59 : vector<1x32x32xf32> to vector<32x32xf32>
    %c0_50 = arith.constant 0 : index
    %c0_51 = arith.constant 0 : index
    %c0_52 = arith.constant 0 : index
    %61 = vector.load %arg11[%c0_50, %c0_51, %c0_52] : memref<2x1x32xf32, #tpu.memory_space<vmem>>, vector<1x1x32xf32>
    %62 = vector.shape_cast %61 : vector<1x1x32xf32> to vector<1x32xf32>
    %63 = vector.broadcast %4 : vector<1x32xf32> to vector<18x32xf32>
    %64 = arith.mulf %44, %63 : vector<18x32xf32>
    %cst_53 = arith.constant dense<0.000000e+00> : vector<18x18xf32>
    %65 = tpu.matmul %64, %51, %cst_53 {dimension_numbers = #tpu.dot_dimension_numbers<[1], [1], [0], [0], [0, 0, 1, 0], [], []>} : vector<18x32xf32>, vector<18x32xf32>, vector<18x18xf32> -> vector<18x18xf32>
    %cst_54 = arith.constant 0.353553385 : f32
    %66 = vector.broadcast %cst_54 : f32 to vector<18x18xf32>
    %67 = arith.mulf %65, %66 : vector<18x18xf32>
    %68 = arith.addf %67, %0 : vector<18x18xf32>
    %cst_55 = arith.constant dense<0xFF800000> : vector<18xf32>
    %69 = vector.multi_reduction <maximumf>, %68, %cst_55 [1] : vector<18x18xf32> to vector<18xf32>
    %70 = vector.shape_cast %69 : vector<18xf32> to vector<18x1xf32>
    %71 = vector.broadcast %70 : vector<18x1xf32> to vector<18x18xf32>
    %72 = arith.subf %68, %71 : vector<18x18xf32>
    %73 = math.exp %72 : vector<18x18xf32>
    %cst_56 = arith.constant dense<0.000000e+00> : vector<18xf32>
    %74 = vector.multi_reduction <add>, %73, %cst_56 [1] : vector<18x18xf32> to vector<18xf32>
    %75 = vector.shape_cast %74 : vector<18xf32> to vector<18x1xf32>
    %76 = vector.broadcast %75 : vector<18x1xf32> to vector<18x18xf32>
    %77 = arith.divf %73, %76 : vector<18x18xf32>
    %78 = vector.broadcast %4 : vector<1x32xf32> to vector<18x32xf32>
    %79 = arith.mulf %58, %78 : vector<18x32xf32>
    %cst_57 = arith.constant dense<0.000000e+00> : vector<18x32xf32>
    %80 = tpu.matmul %77, %79, %cst_57 {dimension_numbers = #tpu.dot_dimension_numbers<[1], [0], [0], [1], [0, 0, 1, 1], [], []>} : vector<18x18xf32>, vector<18x32xf32>, vector<18x32xf32> -> vector<18x32xf32>
    %81 = vector.broadcast %6 : vector<1x32xf32> to vector<18x32xf32>
    %82 = arith.mulf %44, %81 : vector<18x32xf32>
    %cst_58 = arith.constant dense<0.000000e+00> : vector<18x18xf32>
    %83 = tpu.matmul %82, %51, %cst_58 {dimension_numbers = #tpu.dot_dimension_numbers<[1], [1], [0], [0], [0, 0, 1, 0], [], []>} : vector<18x32xf32>, vector<18x32xf32>, vector<18x18xf32> -> vector<18x18xf32>
    %cst_59 = arith.constant 0.353553385 : f32
    %84 = vector.broadcast %cst_59 : f32 to vector<18x18xf32>
    %85 = arith.mulf %83, %84 : vector<18x18xf32>
    %86 = arith.addf %85, %0 : vector<18x18xf32>
    %cst_60 = arith.constant dense<0xFF800000> : vector<18xf32>
    %87 = vector.multi_reduction <maximumf>, %86, %cst_60 [1] : vector<18x18xf32> to vector<18xf32>
    %88 = vector.shape_cast %87 : vector<18xf32> to vector<18x1xf32>
    %89 = vector.broadcast %88 : vector<18x1xf32> to vector<18x18xf32>
    %90 = arith.subf %86, %89 : vector<18x18xf32>
    %91 = math.exp %90 : vector<18x18xf32>
    %cst_61 = arith.constant dense<0.000000e+00> : vector<18xf32>
    %92 = vector.multi_reduction <add>, %91, %cst_61 [1] : vector<18x18xf32> to vector<18xf32>
    %93 = vector.shape_cast %92 : vector<18xf32> to vector<18x1xf32>
    %94 = vector.broadcast %93 : vector<18x1xf32> to vector<18x18xf32>
    %95 = arith.divf %91, %94 : vector<18x18xf32>
    %96 = vector.broadcast %6 : vector<1x32xf32> to vector<18x32xf32>
    %97 = arith.mulf %58, %96 : vector<18x32xf32>
    %cst_62 = arith.constant dense<0.000000e+00> : vector<18x32xf32>
    %98 = tpu.matmul %95, %97, %cst_62 {dimension_numbers = #tpu.dot_dimension_numbers<[1], [0], [0], [1], [0, 0, 1, 1], [], []>} : vector<18x18xf32>, vector<18x32xf32>, vector<18x32xf32> -> vector<18x32xf32>
    %99 = arith.addf %80, %98 : vector<18x32xf32>
    %100 = vector.broadcast %8 : vector<1x32xf32> to vector<18x32xf32>
    %101 = arith.mulf %44, %100 : vector<18x32xf32>
    %cst_63 = arith.constant dense<0.000000e+00> : vector<18x18xf32>
    %102 = tpu.matmul %101, %51, %cst_63 {dimension_numbers = #tpu.dot_dimension_numbers<[1], [1], [0], [0], [0, 0, 1, 0], [], []>} : vector<18x32xf32>, vector<18x32xf32>, vector<18x18xf32> -> vector<18x18xf32>
    %cst_64 = arith.constant 0.353553385 : f32
    %103 = vector.broadcast %cst_64 : f32 to vector<18x18xf32>
    %104 = arith.mulf %102, %103 : vector<18x18xf32>
    %105 = arith.addf %104, %0 : vector<18x18xf32>
    %cst_65 = arith.constant dense<0xFF800000> : vector<18xf32>
    %106 = vector.multi_reduction <maximumf>, %105, %cst_65 [1] : vector<18x18xf32> to vector<18xf32>
    %107 = vector.shape_cast %106 : vector<18xf32> to vector<18x1xf32>
    %108 = vector.broadcast %107 : vector<18x1xf32> to vector<18x18xf32>
    %109 = arith.subf %105, %108 : vector<18x18xf32>
    %110 = math.exp %109 : vector<18x18xf32>
    %cst_66 = arith.constant dense<0.000000e+00> : vector<18xf32>
    %111 = vector.multi_reduction <add>, %110, %cst_66 [1] : vector<18x18xf32> to vector<18xf32>
    %112 = vector.shape_cast %111 : vector<18xf32> to vector<18x1xf32>
    %113 = vector.broadcast %112 : vector<18x1xf32> to vector<18x18xf32>
    %114 = arith.divf %110, %113 : vector<18x18xf32>
    %115 = vector.broadcast %8 : vector<1x32xf32> to vector<18x32xf32>
    %116 = arith.mulf %58, %115 : vector<18x32xf32>
    %cst_67 = arith.constant dense<0.000000e+00> : vector<18x32xf32>
    %117 = tpu.matmul %114, %116, %cst_67 {dimension_numbers = #tpu.dot_dimension_numbers<[1], [0], [0], [1], [0, 0, 1, 1], [], []>} : vector<18x18xf32>, vector<18x32xf32>, vector<18x32xf32> -> vector<18x32xf32>
    %118 = arith.addf %99, %117 : vector<18x32xf32>
    %119 = vector.broadcast %10 : vector<1x32xf32> to vector<18x32xf32>
    %120 = arith.mulf %44, %119 : vector<18x32xf32>
    %cst_68 = arith.constant dense<0.000000e+00> : vector<18x18xf32>
    %121 = tpu.matmul %120, %51, %cst_68 {dimension_numbers = #tpu.dot_dimension_numbers<[1], [1], [0], [0], [0, 0, 1, 0], [], []>} : vector<18x32xf32>, vector<18x32xf32>, vector<18x18xf32> -> vector<18x18xf32>
    %cst_69 = arith.constant 0.353553385 : f32
    %122 = vector.broadcast %cst_69 : f32 to vector<18x18xf32>
    %123 = arith.mulf %121, %122 : vector<18x18xf32>
    %124 = arith.addf %123, %0 : vector<18x18xf32>
    %cst_70 = arith.constant dense<0xFF800000> : vector<18xf32>
    %125 = vector.multi_reduction <maximumf>, %124, %cst_70 [1] : vector<18x18xf32> to vector<18xf32>
    %126 = vector.shape_cast %125 : vector<18xf32> to vector<18x1xf32>
    %127 = vector.broadcast %126 : vector<18x1xf32> to vector<18x18xf32>
    %128 = arith.subf %124, %127 : vector<18x18xf32>
    %129 = math.exp %128 : vector<18x18xf32>
    %cst_71 = arith.constant dense<0.000000e+00> : vector<18xf32>
    %130 = vector.multi_reduction <add>, %129, %cst_71 [1] : vector<18x18xf32> to vector<18xf32>
    %131 = vector.shape_cast %130 : vector<18xf32> to vector<18x1xf32>
    %132 = vector.broadcast %131 : vector<18x1xf32> to vector<18x18xf32>
    %133 = arith.divf %129, %132 : vector<18x18xf32>
    %134 = vector.broadcast %10 : vector<1x32xf32> to vector<18x32xf32>
    %135 = arith.mulf %58, %134 : vector<18x32xf32>
    %cst_72 = arith.constant dense<0.000000e+00> : vector<18x32xf32>
    %136 = tpu.matmul %133, %135, %cst_72 {dimension_numbers = #tpu.dot_dimension_numbers<[1], [0], [0], [1], [0, 0, 1, 1], [], []>} : vector<18x18xf32>, vector<18x32xf32>, vector<18x32xf32> -> vector<18x32xf32>
    %137 = arith.addf %118, %136 : vector<18x32xf32>
    %cst_73 = arith.constant dense<0.000000e+00> : vector<18x32xf32>
    %138 = tpu.matmul %137, %60, %cst_73 {dimension_numbers = #tpu.dot_dimension_numbers<[1], [0], [0], [1], [0, 0, 1, 1], [], []>} : vector<18x32xf32>, vector<32x32xf32>, vector<18x32xf32> -> vector<18x32xf32>
    %139 = vector.broadcast %62 : vector<1x32xf32> to vector<18x32xf32>
    %140 = arith.addf %138, %139 : vector<18x32xf32>
    %141 = arith.addf %11, %140 : vector<18x32xf32>
    %c0_74 = arith.constant 0 : index
    %c0_75 = arith.constant 0 : index
    %c0_76 = arith.constant 0 : index
    %142 = vector.load %arg12[%c0_74, %c0_75, %c0_76] : memref<4x1x32xf32, #tpu.memory_space<vmem>>, vector<1x1x32xf32>
    %143 = vector.shape_cast %142 : vector<1x1x32xf32> to vector<1x32xf32>
    %c1_77 = arith.constant 1 : index
    %c0_78 = arith.constant 0 : index
    %c0_79 = arith.constant 0 : index
    %144 = vector.load %arg12[%c1_77, %c0_78, %c0_79] : memref<4x1x32xf32, #tpu.memory_space<vmem>>, vector<1x1x32xf32>
    %145 = vector.shape_cast %144 : vector<1x1x32xf32> to vector<1x32xf32>
    %cst_80 = arith.constant dense<0.000000e+00> : vector<18xf32>
    %146 = vector.multi_reduction <add>, %141, %cst_80 [1] : vector<18x32xf32> to vector<18xf32>
    %147 = vector.shape_cast %146 : vector<18xf32> to vector<18x1xf32>
    %cst_81 = arith.constant 3.200000e+01 : f32
    %148 = vector.broadcast %cst_81 : f32 to vector<18x1xf32>
    %149 = arith.divf %147, %148 : vector<18x1xf32>
    %150 = vector.broadcast %149 : vector<18x1xf32> to vector<18x32xf32>
    %151 = arith.subf %141, %150 : vector<18x32xf32>
    %152 = arith.mulf %151, %151 : vector<18x32xf32>
    %cst_82 = arith.constant dense<0.000000e+00> : vector<18xf32>
    %153 = vector.multi_reduction <add>, %152, %cst_82 [1] : vector<18x32xf32> to vector<18xf32>
    %154 = vector.shape_cast %153 : vector<18xf32> to vector<18x1xf32>
    %cst_83 = arith.constant 3.200000e+01 : f32
    %155 = vector.broadcast %cst_83 : f32 to vector<18x1xf32>
    %156 = arith.divf %154, %155 : vector<18x1xf32>
    %157 = vector.broadcast %149 : vector<18x1xf32> to vector<18x32xf32>
    %158 = arith.subf %141, %157 : vector<18x32xf32>
    %cst_84 = arith.constant 9.99999974E-6 : f32
    %159 = vector.broadcast %cst_84 : f32 to vector<18x1xf32>
    %160 = arith.addf %156, %159 : vector<18x1xf32>
    %161 = math.rsqrt %160 : vector<18x1xf32>
    %162 = vector.broadcast %161 : vector<18x1xf32> to vector<18x32xf32>
    %163 = arith.mulf %158, %162 : vector<18x32xf32>
    %164 = vector.broadcast %143 : vector<1x32xf32> to vector<18x32xf32>
    %165 = arith.mulf %163, %164 : vector<18x32xf32>
    %166 = vector.broadcast %145 : vector<1x32xf32> to vector<18x32xf32>
    %167 = arith.addf %165, %166 : vector<18x32xf32>
    %c0_85 = arith.constant 0 : index
    %c0_86 = arith.constant 0 : index
    %c0_87 = arith.constant 0 : index
    %168 = vector.load %arg13[%c0_85, %c0_86, %c0_87] : memref<2x32x64xf32, #tpu.memory_space<vmem>>, vector<1x32x64xf32>
    %169 = vector.shape_cast %168 : vector<1x32x64xf32> to vector<32x64xf32>
    %cst_88 = arith.constant dense<0.000000e+00> : vector<18x64xf32>
    %170 = tpu.matmul %167, %169, %cst_88 {dimension_numbers = #tpu.dot_dimension_numbers<[1], [0], [0], [1], [0, 0, 1, 1], [], []>} : vector<18x32xf32>, vector<32x64xf32>, vector<18x64xf32> -> vector<18x64xf32>
    %c0_89 = arith.constant 0 : index
    %c0_90 = arith.constant 0 : index
    %c0_91 = arith.constant 0 : index
    %171 = vector.load %arg14[%c0_89, %c0_90, %c0_91] : memref<2x1x64xf32, #tpu.memory_space<vmem>>, vector<1x1x64xf32>
    %172 = vector.shape_cast %171 : vector<1x1x64xf32> to vector<1x64xf32>
    %173 = vector.broadcast %172 : vector<1x64xf32> to vector<18x64xf32>
    %174 = arith.addf %170, %173 : vector<18x64xf32>
    %cst_92 = arith.constant 0.000000e+00 : f32
    %175 = vector.broadcast %cst_92 : f32 to vector<18x64xf32>
    %176 = arith.maximumf %174, %175 : vector<18x64xf32>
    %c0_93 = arith.constant 0 : index
    %c0_94 = arith.constant 0 : index
    %c0_95 = arith.constant 0 : index
    %177 = vector.load %arg15[%c0_93, %c0_94, %c0_95] : memref<2x64x32xf32, #tpu.memory_space<vmem>>, vector<1x64x32xf32>
    %178 = vector.shape_cast %177 : vector<1x64x32xf32> to vector<64x32xf32>
    %cst_96 = arith.constant dense<0.000000e+00> : vector<18x32xf32>
    %179 = tpu.matmul %176, %178, %cst_96 {dimension_numbers = #tpu.dot_dimension_numbers<[1], [0], [0], [1], [0, 0, 1, 1], [], []>} : vector<18x64xf32>, vector<64x32xf32>, vector<18x32xf32> -> vector<18x32xf32>
    %180 = arith.addf %141, %179 : vector<18x32xf32>
    %c0_97 = arith.constant 0 : index
    %c0_98 = arith.constant 0 : index
    %c0_99 = arith.constant 0 : index
    %181 = vector.load %arg16[%c0_97, %c0_98, %c0_99] : memref<2x1x32xf32, #tpu.memory_space<vmem>>, vector<1x1x32xf32>
    %182 = vector.shape_cast %181 : vector<1x1x32xf32> to vector<1x32xf32>
    %183 = vector.broadcast %182 : vector<1x32xf32> to vector<18x32xf32>
    %184 = arith.addf %180, %183 : vector<18x32xf32>
    %c2_100 = arith.constant 2 : index
    %c0_101 = arith.constant 0 : index
    %c0_102 = arith.constant 0 : index
    %185 = vector.load %arg7[%c2_100, %c0_101, %c0_102] : memref<4x1x32xf32, #tpu.memory_space<vmem>>, vector<1x1x32xf32>
    %186 = vector.shape_cast %185 : vector<1x1x32xf32> to vector<1x32xf32>
    %c3_103 = arith.constant 3 : index
    %c0_104 = arith.constant 0 : index
    %c0_105 = arith.constant 0 : index
    %187 = vector.load %arg7[%c3_103, %c0_104, %c0_105] : memref<4x1x32xf32, #tpu.memory_space<vmem>>, vector<1x1x32xf32>
    %188 = vector.shape_cast %187 : vector<1x1x32xf32> to vector<1x32xf32>
    %cst_106 = arith.constant dense<0.000000e+00> : vector<18xf32>
    %189 = vector.multi_reduction <add>, %184, %cst_106 [1] : vector<18x32xf32> to vector<18xf32>
    %190 = vector.shape_cast %189 : vector<18xf32> to vector<18x1xf32>
    %cst_107 = arith.constant 3.200000e+01 : f32
    %191 = vector.broadcast %cst_107 : f32 to vector<18x1xf32>
    %192 = arith.divf %190, %191 : vector<18x1xf32>
    %193 = vector.broadcast %192 : vector<18x1xf32> to vector<18x32xf32>
    %194 = arith.subf %184, %193 : vector<18x32xf32>
    %195 = arith.mulf %194, %194 : vector<18x32xf32>
    %cst_108 = arith.constant dense<0.000000e+00> : vector<18xf32>
    %196 = vector.multi_reduction <add>, %195, %cst_108 [1] : vector<18x32xf32> to vector<18xf32>
    %197 = vector.shape_cast %196 : vector<18xf32> to vector<18x1xf32>
    %cst_109 = arith.constant 3.200000e+01 : f32
    %198 = vector.broadcast %cst_109 : f32 to vector<18x1xf32>
    %199 = arith.divf %197, %198 : vector<18x1xf32>
    %200 = vector.broadcast %192 : vector<18x1xf32> to vector<18x32xf32>
    %201 = arith.subf %184, %200 : vector<18x32xf32>
    %cst_110 = arith.constant 9.99999974E-6 : f32
    %202 = vector.broadcast %cst_110 : f32 to vector<18x1xf32>
    %203 = arith.addf %199, %202 : vector<18x1xf32>
    %204 = math.rsqrt %203 : vector<18x1xf32>
    %205 = vector.broadcast %204 : vector<18x1xf32> to vector<18x32xf32>
    %206 = arith.mulf %201, %205 : vector<18x32xf32>
    %207 = vector.broadcast %186 : vector<1x32xf32> to vector<18x32xf32>
    %208 = arith.mulf %206, %207 : vector<18x32xf32>
    %209 = vector.broadcast %188 : vector<1x32xf32> to vector<18x32xf32>
    %210 = arith.addf %208, %209 : vector<18x32xf32>
    %c3_111 = arith.constant 3 : index
    %c0_112 = arith.constant 0 : index
    %c0_113 = arith.constant 0 : index
    %211 = vector.load %arg8[%c3_111, %c0_112, %c0_113] : memref<6x32x32xf32, #tpu.memory_space<vmem>>, vector<1x32x32xf32>
    %212 = vector.shape_cast %211 : vector<1x32x32xf32> to vector<32x32xf32>
    %cst_114 = arith.constant dense<0.000000e+00> : vector<18x32xf32>
    %213 = tpu.matmul %210, %212, %cst_114 {dimension_numbers = #tpu.dot_dimension_numbers<[1], [0], [0], [1], [0, 0, 1, 1], [], []>} : vector<18x32xf32>, vector<32x32xf32>, vector<18x32xf32> -> vector<18x32xf32>
    %c3_115 = arith.constant 3 : index
    %c0_116 = arith.constant 0 : index
    %c0_117 = arith.constant 0 : index
    %214 = vector.load %arg9[%c3_115, %c0_116, %c0_117] : memref<6x1x32xf32, #tpu.memory_space<vmem>>, vector<1x1x32xf32>
    %215 = vector.shape_cast %214 : vector<1x1x32xf32> to vector<1x32xf32>
    %216 = vector.broadcast %215 : vector<1x32xf32> to vector<18x32xf32>
    %217 = arith.addf %213, %216 : vector<18x32xf32>
    %c4 = arith.constant 4 : index
    %c0_118 = arith.constant 0 : index
    %c0_119 = arith.constant 0 : index
    %218 = vector.load %arg8[%c4, %c0_118, %c0_119] : memref<6x32x32xf32, #tpu.memory_space<vmem>>, vector<1x32x32xf32>
    %219 = vector.shape_cast %218 : vector<1x32x32xf32> to vector<32x32xf32>
    %cst_120 = arith.constant dense<0.000000e+00> : vector<18x32xf32>
    %220 = tpu.matmul %210, %219, %cst_120 {dimension_numbers = #tpu.dot_dimension_numbers<[1], [0], [0], [1], [0, 0, 1, 1], [], []>} : vector<18x32xf32>, vector<32x32xf32>, vector<18x32xf32> -> vector<18x32xf32>
    %c4_121 = arith.constant 4 : index
    %c0_122 = arith.constant 0 : index
    %c0_123 = arith.constant 0 : index
    %221 = vector.load %arg9[%c4_121, %c0_122, %c0_123] : memref<6x1x32xf32, #tpu.memory_space<vmem>>, vector<1x1x32xf32>
    %222 = vector.shape_cast %221 : vector<1x1x32xf32> to vector<1x32xf32>
    %223 = vector.broadcast %222 : vector<1x32xf32> to vector<18x32xf32>
    %224 = arith.addf %220, %223 : vector<18x32xf32>
    %c5 = arith.constant 5 : index
    %c0_124 = arith.constant 0 : index
    %c0_125 = arith.constant 0 : index
    %225 = vector.load %arg8[%c5, %c0_124, %c0_125] : memref<6x32x32xf32, #tpu.memory_space<vmem>>, vector<1x32x32xf32>
    %226 = vector.shape_cast %225 : vector<1x32x32xf32> to vector<32x32xf32>
    %cst_126 = arith.constant dense<0.000000e+00> : vector<18x32xf32>
    %227 = tpu.matmul %210, %226, %cst_126 {dimension_numbers = #tpu.dot_dimension_numbers<[1], [0], [0], [1], [0, 0, 1, 1], [], []>} : vector<18x32xf32>, vector<32x32xf32>, vector<18x32xf32> -> vector<18x32xf32>
    %c5_127 = arith.constant 5 : index
    %c0_128 = arith.constant 0 : index
    %c0_129 = arith.constant 0 : index
    %228 = vector.load %arg9[%c5_127, %c0_128, %c0_129] : memref<6x1x32xf32, #tpu.memory_space<vmem>>, vector<1x1x32xf32>
    %229 = vector.shape_cast %228 : vector<1x1x32xf32> to vector<1x32xf32>
    %230 = vector.broadcast %229 : vector<1x32xf32> to vector<18x32xf32>
    %231 = arith.addf %227, %230 : vector<18x32xf32>
    %c1_130 = arith.constant 1 : index
    %c0_131 = arith.constant 0 : index
    %c0_132 = arith.constant 0 : index
    %232 = vector.load %arg10[%c1_130, %c0_131, %c0_132] : memref<2x32x32xf32, #tpu.memory_space<vmem>>, vector<1x32x32xf32>
    %233 = vector.shape_cast %232 : vector<1x32x32xf32> to vector<32x32xf32>
    %c1_133 = arith.constant 1 : index
    %c0_134 = arith.constant 0 : index
    %c0_135 = arith.constant 0 : index
    %234 = vector.load %arg11[%c1_133, %c0_134, %c0_135] : memref<2x1x32xf32, #tpu.memory_space<vmem>>, vector<1x1x32xf32>
    %235 = vector.shape_cast %234 : vector<1x1x32xf32> to vector<1x32xf32>
    %236 = vector.broadcast %4 : vector<1x32xf32> to vector<18x32xf32>
    %237 = arith.mulf %217, %236 : vector<18x32xf32>
    %cst_136 = arith.constant dense<0.000000e+00> : vector<18x18xf32>
    %238 = tpu.matmul %237, %224, %cst_136 {dimension_numbers = #tpu.dot_dimension_numbers<[1], [1], [0], [0], [0, 0, 1, 0], [], []>} : vector<18x32xf32>, vector<18x32xf32>, vector<18x18xf32> -> vector<18x18xf32>
    %cst_137 = arith.constant 0.353553385 : f32
    %239 = vector.broadcast %cst_137 : f32 to vector<18x18xf32>
    %240 = arith.mulf %238, %239 : vector<18x18xf32>
    %241 = arith.addf %240, %0 : vector<18x18xf32>
    %cst_138 = arith.constant dense<0xFF800000> : vector<18xf32>
    %242 = vector.multi_reduction <maximumf>, %241, %cst_138 [1] : vector<18x18xf32> to vector<18xf32>
    %243 = vector.shape_cast %242 : vector<18xf32> to vector<18x1xf32>
    %244 = vector.broadcast %243 : vector<18x1xf32> to vector<18x18xf32>
    %245 = arith.subf %241, %244 : vector<18x18xf32>
    %246 = math.exp %245 : vector<18x18xf32>
    %cst_139 = arith.constant dense<0.000000e+00> : vector<18xf32>
    %247 = vector.multi_reduction <add>, %246, %cst_139 [1] : vector<18x18xf32> to vector<18xf32>
    %248 = vector.shape_cast %247 : vector<18xf32> to vector<18x1xf32>
    %249 = vector.broadcast %248 : vector<18x1xf32> to vector<18x18xf32>
    %250 = arith.divf %246, %249 : vector<18x18xf32>
    %251 = vector.broadcast %4 : vector<1x32xf32> to vector<18x32xf32>
    %252 = arith.mulf %231, %251 : vector<18x32xf32>
    %cst_140 = arith.constant dense<0.000000e+00> : vector<18x32xf32>
    %253 = tpu.matmul %250, %252, %cst_140 {dimension_numbers = #tpu.dot_dimension_numbers<[1], [0], [0], [1], [0, 0, 1, 1], [], []>} : vector<18x18xf32>, vector<18x32xf32>, vector<18x32xf32> -> vector<18x32xf32>
    %254 = vector.broadcast %6 : vector<1x32xf32> to vector<18x32xf32>
    %255 = arith.mulf %217, %254 : vector<18x32xf32>
    %cst_141 = arith.constant dense<0.000000e+00> : vector<18x18xf32>
    %256 = tpu.matmul %255, %224, %cst_141 {dimension_numbers = #tpu.dot_dimension_numbers<[1], [1], [0], [0], [0, 0, 1, 0], [], []>} : vector<18x32xf32>, vector<18x32xf32>, vector<18x18xf32> -> vector<18x18xf32>
    %cst_142 = arith.constant 0.353553385 : f32
    %257 = vector.broadcast %cst_142 : f32 to vector<18x18xf32>
    %258 = arith.mulf %256, %257 : vector<18x18xf32>
    %259 = arith.addf %258, %0 : vector<18x18xf32>
    %cst_143 = arith.constant dense<0xFF800000> : vector<18xf32>
    %260 = vector.multi_reduction <maximumf>, %259, %cst_143 [1] : vector<18x18xf32> to vector<18xf32>
    %261 = vector.shape_cast %260 : vector<18xf32> to vector<18x1xf32>
    %262 = vector.broadcast %261 : vector<18x1xf32> to vector<18x18xf32>
    %263 = arith.subf %259, %262 : vector<18x18xf32>
    %264 = math.exp %263 : vector<18x18xf32>
    %cst_144 = arith.constant dense<0.000000e+00> : vector<18xf32>
    %265 = vector.multi_reduction <add>, %264, %cst_144 [1] : vector<18x18xf32> to vector<18xf32>
    %266 = vector.shape_cast %265 : vector<18xf32> to vector<18x1xf32>
    %267 = vector.broadcast %266 : vector<18x1xf32> to vector<18x18xf32>
    %268 = arith.divf %264, %267 : vector<18x18xf32>
    %269 = vector.broadcast %6 : vector<1x32xf32> to vector<18x32xf32>
    %270 = arith.mulf %231, %269 : vector<18x32xf32>
    %cst_145 = arith.constant dense<0.000000e+00> : vector<18x32xf32>
    %271 = tpu.matmul %268, %270, %cst_145 {dimension_numbers = #tpu.dot_dimension_numbers<[1], [0], [0], [1], [0, 0, 1, 1], [], []>} : vector<18x18xf32>, vector<18x32xf32>, vector<18x32xf32> -> vector<18x32xf32>
    %272 = arith.addf %253, %271 : vector<18x32xf32>
    %273 = vector.broadcast %8 : vector<1x32xf32> to vector<18x32xf32>
    %274 = arith.mulf %217, %273 : vector<18x32xf32>
    %cst_146 = arith.constant dense<0.000000e+00> : vector<18x18xf32>
    %275 = tpu.matmul %274, %224, %cst_146 {dimension_numbers = #tpu.dot_dimension_numbers<[1], [1], [0], [0], [0, 0, 1, 0], [], []>} : vector<18x32xf32>, vector<18x32xf32>, vector<18x18xf32> -> vector<18x18xf32>
    %cst_147 = arith.constant 0.353553385 : f32
    %276 = vector.broadcast %cst_147 : f32 to vector<18x18xf32>
    %277 = arith.mulf %275, %276 : vector<18x18xf32>
    %278 = arith.addf %277, %0 : vector<18x18xf32>
    %cst_148 = arith.constant dense<0xFF800000> : vector<18xf32>
    %279 = vector.multi_reduction <maximumf>, %278, %cst_148 [1] : vector<18x18xf32> to vector<18xf32>
    %280 = vector.shape_cast %279 : vector<18xf32> to vector<18x1xf32>
    %281 = vector.broadcast %280 : vector<18x1xf32> to vector<18x18xf32>
    %282 = arith.subf %278, %281 : vector<18x18xf32>
    %283 = math.exp %282 : vector<18x18xf32>
    %cst_149 = arith.constant dense<0.000000e+00> : vector<18xf32>
    %284 = vector.multi_reduction <add>, %283, %cst_149 [1] : vector<18x18xf32> to vector<18xf32>
    %285 = vector.shape_cast %284 : vector<18xf32> to vector<18x1xf32>
    %286 = vector.broadcast %285 : vector<18x1xf32> to vector<18x18xf32>
    %287 = arith.divf %283, %286 : vector<18x18xf32>
    %288 = vector.broadcast %8 : vector<1x32xf32> to vector<18x32xf32>
    %289 = arith.mulf %231, %288 : vector<18x32xf32>
    %cst_150 = arith.constant dense<0.000000e+00> : vector<18x32xf32>
    %290 = tpu.matmul %287, %289, %cst_150 {dimension_numbers = #tpu.dot_dimension_numbers<[1], [0], [0], [1], [0, 0, 1, 1], [], []>} : vector<18x18xf32>, vector<18x32xf32>, vector<18x32xf32> -> vector<18x32xf32>
    %291 = arith.addf %272, %290 : vector<18x32xf32>
    %292 = vector.broadcast %10 : vector<1x32xf32> to vector<18x32xf32>
    %293 = arith.mulf %217, %292 : vector<18x32xf32>
    %cst_151 = arith.constant dense<0.000000e+00> : vector<18x18xf32>
    %294 = tpu.matmul %293, %224, %cst_151 {dimension_numbers = #tpu.dot_dimension_numbers<[1], [1], [0], [0], [0, 0, 1, 0], [], []>} : vector<18x32xf32>, vector<18x32xf32>, vector<18x18xf32> -> vector<18x18xf32>
    %cst_152 = arith.constant 0.353553385 : f32
    %295 = vector.broadcast %cst_152 : f32 to vector<18x18xf32>
    %296 = arith.mulf %294, %295 : vector<18x18xf32>
    %297 = arith.addf %296, %0 : vector<18x18xf32>
    %cst_153 = arith.constant dense<0xFF800000> : vector<18xf32>
    %298 = vector.multi_reduction <maximumf>, %297, %cst_153 [1] : vector<18x18xf32> to vector<18xf32>
    %299 = vector.shape_cast %298 : vector<18xf32> to vector<18x1xf32>
    %300 = vector.broadcast %299 : vector<18x1xf32> to vector<18x18xf32>
    %301 = arith.subf %297, %300 : vector<18x18xf32>
    %302 = math.exp %301 : vector<18x18xf32>
    %cst_154 = arith.constant dense<0.000000e+00> : vector<18xf32>
    %303 = vector.multi_reduction <add>, %302, %cst_154 [1] : vector<18x18xf32> to vector<18xf32>
    %304 = vector.shape_cast %303 : vector<18xf32> to vector<18x1xf32>
    %305 = vector.broadcast %304 : vector<18x1xf32> to vector<18x18xf32>
    %306 = arith.divf %302, %305 : vector<18x18xf32>
    %307 = vector.broadcast %10 : vector<1x32xf32> to vector<18x32xf32>
    %308 = arith.mulf %231, %307 : vector<18x32xf32>
    %cst_155 = arith.constant dense<0.000000e+00> : vector<18x32xf32>
    %309 = tpu.matmul %306, %308, %cst_155 {dimension_numbers = #tpu.dot_dimension_numbers<[1], [0], [0], [1], [0, 0, 1, 1], [], []>} : vector<18x18xf32>, vector<18x32xf32>, vector<18x32xf32> -> vector<18x32xf32>
    %310 = arith.addf %291, %309 : vector<18x32xf32>
    %cst_156 = arith.constant dense<0.000000e+00> : vector<18x32xf32>
    %311 = tpu.matmul %310, %233, %cst_156 {dimension_numbers = #tpu.dot_dimension_numbers<[1], [0], [0], [1], [0, 0, 1, 1], [], []>} : vector<18x32xf32>, vector<32x32xf32>, vector<18x32xf32> -> vector<18x32xf32>
    %312 = vector.broadcast %235 : vector<1x32xf32> to vector<18x32xf32>
    %313 = arith.addf %311, %312 : vector<18x32xf32>
    %314 = arith.addf %184, %313 : vector<18x32xf32>
    %c2_157 = arith.constant 2 : index
    %c0_158 = arith.constant 0 : index
    %c0_159 = arith.constant 0 : index
    %315 = vector.load %arg12[%c2_157, %c0_158, %c0_159] : memref<4x1x32xf32, #tpu.memory_space<vmem>>, vector<1x1x32xf32>
    %316 = vector.shape_cast %315 : vector<1x1x32xf32> to vector<1x32xf32>
    %c3_160 = arith.constant 3 : index
    %c0_161 = arith.constant 0 : index
    %c0_162 = arith.constant 0 : index
    %317 = vector.load %arg12[%c3_160, %c0_161, %c0_162] : memref<4x1x32xf32, #tpu.memory_space<vmem>>, vector<1x1x32xf32>
    %318 = vector.shape_cast %317 : vector<1x1x32xf32> to vector<1x32xf32>
    %cst_163 = arith.constant dense<0.000000e+00> : vector<18xf32>
    %319 = vector.multi_reduction <add>, %314, %cst_163 [1] : vector<18x32xf32> to vector<18xf32>
    %320 = vector.shape_cast %319 : vector<18xf32> to vector<18x1xf32>
    %cst_164 = arith.constant 3.200000e+01 : f32
    %321 = vector.broadcast %cst_164 : f32 to vector<18x1xf32>
    %322 = arith.divf %320, %321 : vector<18x1xf32>
    %323 = vector.broadcast %322 : vector<18x1xf32> to vector<18x32xf32>
    %324 = arith.subf %314, %323 : vector<18x32xf32>
    %325 = arith.mulf %324, %324 : vector<18x32xf32>
    %cst_165 = arith.constant dense<0.000000e+00> : vector<18xf32>
    %326 = vector.multi_reduction <add>, %325, %cst_165 [1] : vector<18x32xf32> to vector<18xf32>
    %327 = vector.shape_cast %326 : vector<18xf32> to vector<18x1xf32>
    %cst_166 = arith.constant 3.200000e+01 : f32
    %328 = vector.broadcast %cst_166 : f32 to vector<18x1xf32>
    %329 = arith.divf %327, %328 : vector<18x1xf32>
    %330 = vector.broadcast %322 : vector<18x1xf32> to vector<18x32xf32>
    %331 = arith.subf %314, %330 : vector<18x32xf32>
    %cst_167 = arith.constant 9.99999974E-6 : f32
    %332 = vector.broadcast %cst_167 : f32 to vector<18x1xf32>
    %333 = arith.addf %329, %332 : vector<18x1xf32>
    %334 = math.rsqrt %333 : vector<18x1xf32>
    %335 = vector.broadcast %334 : vector<18x1xf32> to vector<18x32xf32>
    %336 = arith.mulf %331, %335 : vector<18x32xf32>
    %337 = vector.broadcast %316 : vector<1x32xf32> to vector<18x32xf32>
    %338 = arith.mulf %336, %337 : vector<18x32xf32>
    %339 = vector.broadcast %318 : vector<1x32xf32> to vector<18x32xf32>
    %340 = arith.addf %338, %339 : vector<18x32xf32>
    %c1_168 = arith.constant 1 : index
    %c0_169 = arith.constant 0 : index
    %c0_170 = arith.constant 0 : index
    %341 = vector.load %arg13[%c1_168, %c0_169, %c0_170] : memref<2x32x64xf32, #tpu.memory_space<vmem>>, vector<1x32x64xf32>
    %342 = vector.shape_cast %341 : vector<1x32x64xf32> to vector<32x64xf32>
    %cst_171 = arith.constant dense<0.000000e+00> : vector<18x64xf32>
    %343 = tpu.matmul %340, %342, %cst_171 {dimension_numbers = #tpu.dot_dimension_numbers<[1], [0], [0], [1], [0, 0, 1, 1], [], []>} : vector<18x32xf32>, vector<32x64xf32>, vector<18x64xf32> -> vector<18x64xf32>
    %c1_172 = arith.constant 1 : index
    %c0_173 = arith.constant 0 : index
    %c0_174 = arith.constant 0 : index
    %344 = vector.load %arg14[%c1_172, %c0_173, %c0_174] : memref<2x1x64xf32, #tpu.memory_space<vmem>>, vector<1x1x64xf32>
    %345 = vector.shape_cast %344 : vector<1x1x64xf32> to vector<1x64xf32>
    %346 = vector.broadcast %345 : vector<1x64xf32> to vector<18x64xf32>
    %347 = arith.addf %343, %346 : vector<18x64xf32>
    %cst_175 = arith.constant 0.000000e+00 : f32
    %348 = vector.broadcast %cst_175 : f32 to vector<18x64xf32>
    %349 = arith.maximumf %347, %348 : vector<18x64xf32>
    %c1_176 = arith.constant 1 : index
    %c0_177 = arith.constant 0 : index
    %c0_178 = arith.constant 0 : index
    %350 = vector.load %arg15[%c1_176, %c0_177, %c0_178] : memref<2x64x32xf32, #tpu.memory_space<vmem>>, vector<1x64x32xf32>
    %351 = vector.shape_cast %350 : vector<1x64x32xf32> to vector<64x32xf32>
    %cst_179 = arith.constant dense<0.000000e+00> : vector<18x32xf32>
    %352 = tpu.matmul %349, %351, %cst_179 {dimension_numbers = #tpu.dot_dimension_numbers<[1], [0], [0], [1], [0, 0, 1, 1], [], []>} : vector<18x64xf32>, vector<64x32xf32>, vector<18x32xf32> -> vector<18x32xf32>
    %353 = arith.addf %314, %352 : vector<18x32xf32>
    %c1_180 = arith.constant 1 : index
    %c0_181 = arith.constant 0 : index
    %c0_182 = arith.constant 0 : index
    %354 = vector.load %arg16[%c1_180, %c0_181, %c0_182] : memref<2x1x32xf32, #tpu.memory_space<vmem>>, vector<1x1x32xf32>
    %355 = vector.shape_cast %354 : vector<1x1x32xf32> to vector<1x32xf32>
    %356 = vector.broadcast %355 : vector<1x32xf32> to vector<18x32xf32>
    %357 = arith.addf %353, %356 : vector<18x32xf32>
    %c0_183 = arith.constant 0 : index
    %c0_184 = arith.constant 0 : index
    %c0_185 = arith.constant 0 : index
    %358 = vector.load %arg17[%c0_183, %c0_184, %c0_185] : memref<2x1x32xf32, #tpu.memory_space<vmem>>, vector<1x1x32xf32>
    %359 = vector.shape_cast %358 : vector<1x1x32xf32> to vector<1x32xf32>
    %c1_186 = arith.constant 1 : index
    %c0_187 = arith.constant 0 : index
    %c0_188 = arith.constant 0 : index
    %360 = vector.load %arg17[%c1_186, %c0_187, %c0_188] : memref<2x1x32xf32, #tpu.memory_space<vmem>>, vector<1x1x32xf32>
    %361 = vector.shape_cast %360 : vector<1x1x32xf32> to vector<1x32xf32>
    %cst_189 = arith.constant dense<0.000000e+00> : vector<18xf32>
    %362 = vector.multi_reduction <add>, %357, %cst_189 [1] : vector<18x32xf32> to vector<18xf32>
    %363 = vector.shape_cast %362 : vector<18xf32> to vector<18x1xf32>
    %cst_190 = arith.constant 3.200000e+01 : f32
    %364 = vector.broadcast %cst_190 : f32 to vector<18x1xf32>
    %365 = arith.divf %363, %364 : vector<18x1xf32>
    %366 = vector.broadcast %365 : vector<18x1xf32> to vector<18x32xf32>
    %367 = arith.subf %357, %366 : vector<18x32xf32>
    %368 = arith.mulf %367, %367 : vector<18x32xf32>
    %cst_191 = arith.constant dense<0.000000e+00> : vector<18xf32>
    %369 = vector.multi_reduction <add>, %368, %cst_191 [1] : vector<18x32xf32> to vector<18xf32>
    %370 = vector.shape_cast %369 : vector<18xf32> to vector<18x1xf32>
    %cst_192 = arith.constant 3.200000e+01 : f32
    %371 = vector.broadcast %cst_192 : f32 to vector<18x1xf32>
    %372 = arith.divf %370, %371 : vector<18x1xf32>
    %373 = vector.broadcast %365 : vector<18x1xf32> to vector<18x32xf32>
    %374 = arith.subf %357, %373 : vector<18x32xf32>
    %cst_193 = arith.constant 9.99999974E-6 : f32
    %375 = vector.broadcast %cst_193 : f32 to vector<18x1xf32>
    %376 = arith.addf %372, %375 : vector<18x1xf32>
    %377 = math.rsqrt %376 : vector<18x1xf32>
    %378 = vector.broadcast %377 : vector<18x1xf32> to vector<18x32xf32>
    %379 = arith.mulf %374, %378 : vector<18x32xf32>
    %380 = vector.broadcast %359 : vector<1x32xf32> to vector<18x32xf32>
    %381 = arith.mulf %379, %380 : vector<18x32xf32>
    %382 = vector.broadcast %361 : vector<1x32xf32> to vector<18x32xf32>
    %383 = arith.addf %381, %382 : vector<18x32xf32>
    %c0_194 = arith.constant 0 : index
    %c0_195 = arith.constant 0 : index
    %384 = vector.load %arg2[%c0_194, %c0_195] : memref<16x32xf32, #tpu.memory_space<vmem>>, vector<16x32xf32>
    %c0_196 = arith.constant 0 : index
    %c0_197 = arith.constant 0 : index
    %c0_198 = arith.constant 0 : index
    %385 = vector.load %arg18[%c0_196, %c0_197, %c0_198] : memref<4x1x32xf32, #tpu.memory_space<vmem>>, vector<1x1x32xf32>
    %386 = vector.shape_cast %385 : vector<1x1x32xf32> to vector<1x32xf32>
    %c1_199 = arith.constant 1 : index
    %c0_200 = arith.constant 0 : index
    %c0_201 = arith.constant 0 : index
    %387 = vector.load %arg18[%c1_199, %c0_200, %c0_201] : memref<4x1x32xf32, #tpu.memory_space<vmem>>, vector<1x1x32xf32>
    %388 = vector.shape_cast %387 : vector<1x1x32xf32> to vector<1x32xf32>
    %cst_202 = arith.constant dense<0.000000e+00> : vector<16xf32>
    %389 = vector.multi_reduction <add>, %384, %cst_202 [1] : vector<16x32xf32> to vector<16xf32>
    %390 = vector.shape_cast %389 : vector<16xf32> to vector<16x1xf32>
    %cst_203 = arith.constant 3.200000e+01 : f32
    %391 = vector.broadcast %cst_203 : f32 to vector<16x1xf32>
    %392 = arith.divf %390, %391 : vector<16x1xf32>
    %393 = vector.broadcast %392 : vector<16x1xf32> to vector<16x32xf32>
    %394 = arith.subf %384, %393 : vector<16x32xf32>
    %395 = arith.mulf %394, %394 : vector<16x32xf32>
    %cst_204 = arith.constant dense<0.000000e+00> : vector<16xf32>
    %396 = vector.multi_reduction <add>, %395, %cst_204 [1] : vector<16x32xf32> to vector<16xf32>
    %397 = vector.shape_cast %396 : vector<16xf32> to vector<16x1xf32>
    %cst_205 = arith.constant 3.200000e+01 : f32
    %398 = vector.broadcast %cst_205 : f32 to vector<16x1xf32>
    %399 = arith.divf %397, %398 : vector<16x1xf32>
    %400 = vector.broadcast %392 : vector<16x1xf32> to vector<16x32xf32>
    %401 = arith.subf %384, %400 : vector<16x32xf32>
    %cst_206 = arith.constant 9.99999974E-6 : f32
    %402 = vector.broadcast %cst_206 : f32 to vector<16x1xf32>
    %403 = arith.addf %399, %402 : vector<16x1xf32>
    %404 = math.rsqrt %403 : vector<16x1xf32>
    %405 = vector.broadcast %404 : vector<16x1xf32> to vector<16x32xf32>
    %406 = arith.mulf %401, %405 : vector<16x32xf32>
    %407 = vector.broadcast %386 : vector<1x32xf32> to vector<16x32xf32>
    %408 = arith.mulf %406, %407 : vector<16x32xf32>
    %409 = vector.broadcast %388 : vector<1x32xf32> to vector<16x32xf32>
    %410 = arith.addf %408, %409 : vector<16x32xf32>
    %c0_207 = arith.constant 0 : index
    %c0_208 = arith.constant 0 : index
    %c0_209 = arith.constant 0 : index
    %411 = vector.load %arg19[%c0_207, %c0_208, %c0_209] : memref<6x32x32xf32, #tpu.memory_space<vmem>>, vector<1x32x32xf32>
    %412 = vector.shape_cast %411 : vector<1x32x32xf32> to vector<32x32xf32>
    %cst_210 = arith.constant dense<0.000000e+00> : vector<16x32xf32>
    %413 = tpu.matmul %410, %412, %cst_210 {dimension_numbers = #tpu.dot_dimension_numbers<[1], [0], [0], [1], [0, 0, 1, 1], [], []>} : vector<16x32xf32>, vector<32x32xf32>, vector<16x32xf32> -> vector<16x32xf32>
    %c0_211 = arith.constant 0 : index
    %c0_212 = arith.constant 0 : index
    %c0_213 = arith.constant 0 : index
    %414 = vector.load %arg20[%c0_211, %c0_212, %c0_213] : memref<6x1x32xf32, #tpu.memory_space<vmem>>, vector<1x1x32xf32>
    %415 = vector.shape_cast %414 : vector<1x1x32xf32> to vector<1x32xf32>
    %416 = vector.broadcast %415 : vector<1x32xf32> to vector<16x32xf32>
    %417 = arith.addf %413, %416 : vector<16x32xf32>
    %c1_214 = arith.constant 1 : index
    %c0_215 = arith.constant 0 : index
    %c0_216 = arith.constant 0 : index
    %418 = vector.load %arg19[%c1_214, %c0_215, %c0_216] : memref<6x32x32xf32, #tpu.memory_space<vmem>>, vector<1x32x32xf32>
    %419 = vector.shape_cast %418 : vector<1x32x32xf32> to vector<32x32xf32>
    %cst_217 = arith.constant dense<0.000000e+00> : vector<16x32xf32>
    %420 = tpu.matmul %410, %419, %cst_217 {dimension_numbers = #tpu.dot_dimension_numbers<[1], [0], [0], [1], [0, 0, 1, 1], [], []>} : vector<16x32xf32>, vector<32x32xf32>, vector<16x32xf32> -> vector<16x32xf32>
    %c1_218 = arith.constant 1 : index
    %c0_219 = arith.constant 0 : index
    %c0_220 = arith.constant 0 : index
    %421 = vector.load %arg20[%c1_218, %c0_219, %c0_220] : memref<6x1x32xf32, #tpu.memory_space<vmem>>, vector<1x1x32xf32>
    %422 = vector.shape_cast %421 : vector<1x1x32xf32> to vector<1x32xf32>
    %423 = vector.broadcast %422 : vector<1x32xf32> to vector<16x32xf32>
    %424 = arith.addf %420, %423 : vector<16x32xf32>
    %c2_221 = arith.constant 2 : index
    %c0_222 = arith.constant 0 : index
    %c0_223 = arith.constant 0 : index
    %425 = vector.load %arg19[%c2_221, %c0_222, %c0_223] : memref<6x32x32xf32, #tpu.memory_space<vmem>>, vector<1x32x32xf32>
    %426 = vector.shape_cast %425 : vector<1x32x32xf32> to vector<32x32xf32>
    %cst_224 = arith.constant dense<0.000000e+00> : vector<16x32xf32>
    %427 = tpu.matmul %410, %426, %cst_224 {dimension_numbers = #tpu.dot_dimension_numbers<[1], [0], [0], [1], [0, 0, 1, 1], [], []>} : vector<16x32xf32>, vector<32x32xf32>, vector<16x32xf32> -> vector<16x32xf32>
    %c2_225 = arith.constant 2 : index
    %c0_226 = arith.constant 0 : index
    %c0_227 = arith.constant 0 : index
    %428 = vector.load %arg20[%c2_225, %c0_226, %c0_227] : memref<6x1x32xf32, #tpu.memory_space<vmem>>, vector<1x1x32xf32>
    %429 = vector.shape_cast %428 : vector<1x1x32xf32> to vector<1x32xf32>
    %430 = vector.broadcast %429 : vector<1x32xf32> to vector<16x32xf32>
    %431 = arith.addf %427, %430 : vector<16x32xf32>
    %c0_228 = arith.constant 0 : index
    %c0_229 = arith.constant 0 : index
    %c0_230 = arith.constant 0 : index
    %432 = vector.load %arg21[%c0_228, %c0_229, %c0_230] : memref<2x32x32xf32, #tpu.memory_space<vmem>>, vector<1x32x32xf32>
    %433 = vector.shape_cast %432 : vector<1x32x32xf32> to vector<32x32xf32>
    %c0_231 = arith.constant 0 : index
    %c0_232 = arith.constant 0 : index
    %c0_233 = arith.constant 0 : index
    %434 = vector.load %arg22[%c0_231, %c0_232, %c0_233] : memref<2x1x32xf32, #tpu.memory_space<vmem>>, vector<1x1x32xf32>
    %435 = vector.shape_cast %434 : vector<1x1x32xf32> to vector<1x32xf32>
    %436 = vector.broadcast %4 : vector<1x32xf32> to vector<16x32xf32>
    %437 = arith.mulf %417, %436 : vector<16x32xf32>
    %cst_234 = arith.constant dense<0.000000e+00> : vector<16x16xf32>
    %438 = tpu.matmul %437, %424, %cst_234 {dimension_numbers = #tpu.dot_dimension_numbers<[1], [1], [0], [0], [0, 0, 1, 0], [], []>} : vector<16x32xf32>, vector<16x32xf32>, vector<16x16xf32> -> vector<16x16xf32>
    %cst_235 = arith.constant 0.353553385 : f32
    %439 = vector.broadcast %cst_235 : f32 to vector<16x16xf32>
    %440 = arith.mulf %438, %439 : vector<16x16xf32>
    %441 = arith.addf %440, %1 : vector<16x16xf32>
    %cst_236 = arith.constant dense<0xFF800000> : vector<16xf32>
    %442 = vector.multi_reduction <maximumf>, %441, %cst_236 [1] : vector<16x16xf32> to vector<16xf32>
    %443 = vector.shape_cast %442 : vector<16xf32> to vector<16x1xf32>
    %444 = vector.broadcast %443 : vector<16x1xf32> to vector<16x16xf32>
    %445 = arith.subf %441, %444 : vector<16x16xf32>
    %446 = math.exp %445 : vector<16x16xf32>
    %cst_237 = arith.constant dense<0.000000e+00> : vector<16xf32>
    %447 = vector.multi_reduction <add>, %446, %cst_237 [1] : vector<16x16xf32> to vector<16xf32>
    %448 = vector.shape_cast %447 : vector<16xf32> to vector<16x1xf32>
    %449 = vector.broadcast %448 : vector<16x1xf32> to vector<16x16xf32>
    %450 = arith.divf %446, %449 : vector<16x16xf32>
    %451 = vector.broadcast %4 : vector<1x32xf32> to vector<16x32xf32>
    %452 = arith.mulf %431, %451 : vector<16x32xf32>
    %cst_238 = arith.constant dense<0.000000e+00> : vector<16x32xf32>
    %453 = tpu.matmul %450, %452, %cst_238 {dimension_numbers = #tpu.dot_dimension_numbers<[1], [0], [0], [1], [0, 0, 1, 1], [], []>} : vector<16x16xf32>, vector<16x32xf32>, vector<16x32xf32> -> vector<16x32xf32>
    %454 = vector.broadcast %6 : vector<1x32xf32> to vector<16x32xf32>
    %455 = arith.mulf %417, %454 : vector<16x32xf32>
    %cst_239 = arith.constant dense<0.000000e+00> : vector<16x16xf32>
    %456 = tpu.matmul %455, %424, %cst_239 {dimension_numbers = #tpu.dot_dimension_numbers<[1], [1], [0], [0], [0, 0, 1, 0], [], []>} : vector<16x32xf32>, vector<16x32xf32>, vector<16x16xf32> -> vector<16x16xf32>
    %cst_240 = arith.constant 0.353553385 : f32
    %457 = vector.broadcast %cst_240 : f32 to vector<16x16xf32>
    %458 = arith.mulf %456, %457 : vector<16x16xf32>
    %459 = arith.addf %458, %1 : vector<16x16xf32>
    %cst_241 = arith.constant dense<0xFF800000> : vector<16xf32>
    %460 = vector.multi_reduction <maximumf>, %459, %cst_241 [1] : vector<16x16xf32> to vector<16xf32>
    %461 = vector.shape_cast %460 : vector<16xf32> to vector<16x1xf32>
    %462 = vector.broadcast %461 : vector<16x1xf32> to vector<16x16xf32>
    %463 = arith.subf %459, %462 : vector<16x16xf32>
    %464 = math.exp %463 : vector<16x16xf32>
    %cst_242 = arith.constant dense<0.000000e+00> : vector<16xf32>
    %465 = vector.multi_reduction <add>, %464, %cst_242 [1] : vector<16x16xf32> to vector<16xf32>
    %466 = vector.shape_cast %465 : vector<16xf32> to vector<16x1xf32>
    %467 = vector.broadcast %466 : vector<16x1xf32> to vector<16x16xf32>
    %468 = arith.divf %464, %467 : vector<16x16xf32>
    %469 = vector.broadcast %6 : vector<1x32xf32> to vector<16x32xf32>
    %470 = arith.mulf %431, %469 : vector<16x32xf32>
    %cst_243 = arith.constant dense<0.000000e+00> : vector<16x32xf32>
    %471 = tpu.matmul %468, %470, %cst_243 {dimension_numbers = #tpu.dot_dimension_numbers<[1], [0], [0], [1], [0, 0, 1, 1], [], []>} : vector<16x16xf32>, vector<16x32xf32>, vector<16x32xf32> -> vector<16x32xf32>
    %472 = arith.addf %453, %471 : vector<16x32xf32>
    %473 = vector.broadcast %8 : vector<1x32xf32> to vector<16x32xf32>
    %474 = arith.mulf %417, %473 : vector<16x32xf32>
    %cst_244 = arith.constant dense<0.000000e+00> : vector<16x16xf32>
    %475 = tpu.matmul %474, %424, %cst_244 {dimension_numbers = #tpu.dot_dimension_numbers<[1], [1], [0], [0], [0, 0, 1, 0], [], []>} : vector<16x32xf32>, vector<16x32xf32>, vector<16x16xf32> -> vector<16x16xf32>
    %cst_245 = arith.constant 0.353553385 : f32
    %476 = vector.broadcast %cst_245 : f32 to vector<16x16xf32>
    %477 = arith.mulf %475, %476 : vector<16x16xf32>
    %478 = arith.addf %477, %1 : vector<16x16xf32>
    %cst_246 = arith.constant dense<0xFF800000> : vector<16xf32>
    %479 = vector.multi_reduction <maximumf>, %478, %cst_246 [1] : vector<16x16xf32> to vector<16xf32>
    %480 = vector.shape_cast %479 : vector<16xf32> to vector<16x1xf32>
    %481 = vector.broadcast %480 : vector<16x1xf32> to vector<16x16xf32>
    %482 = arith.subf %478, %481 : vector<16x16xf32>
    %483 = math.exp %482 : vector<16x16xf32>
    %cst_247 = arith.constant dense<0.000000e+00> : vector<16xf32>
    %484 = vector.multi_reduction <add>, %483, %cst_247 [1] : vector<16x16xf32> to vector<16xf32>
    %485 = vector.shape_cast %484 : vector<16xf32> to vector<16x1xf32>
    %486 = vector.broadcast %485 : vector<16x1xf32> to vector<16x16xf32>
    %487 = arith.divf %483, %486 : vector<16x16xf32>
    %488 = vector.broadcast %8 : vector<1x32xf32> to vector<16x32xf32>
    %489 = arith.mulf %431, %488 : vector<16x32xf32>
    %cst_248 = arith.constant dense<0.000000e+00> : vector<16x32xf32>
    %490 = tpu.matmul %487, %489, %cst_248 {dimension_numbers = #tpu.dot_dimension_numbers<[1], [0], [0], [1], [0, 0, 1, 1], [], []>} : vector<16x16xf32>, vector<16x32xf32>, vector<16x32xf32> -> vector<16x32xf32>
    %491 = arith.addf %472, %490 : vector<16x32xf32>
    %492 = vector.broadcast %10 : vector<1x32xf32> to vector<16x32xf32>
    %493 = arith.mulf %417, %492 : vector<16x32xf32>
    %cst_249 = arith.constant dense<0.000000e+00> : vector<16x16xf32>
    %494 = tpu.matmul %493, %424, %cst_249 {dimension_numbers = #tpu.dot_dimension_numbers<[1], [1], [0], [0], [0, 0, 1, 0], [], []>} : vector<16x32xf32>, vector<16x32xf32>, vector<16x16xf32> -> vector<16x16xf32>
    %cst_250 = arith.constant 0.353553385 : f32
    %495 = vector.broadcast %cst_250 : f32 to vector<16x16xf32>
    %496 = arith.mulf %494, %495 : vector<16x16xf32>
    %497 = arith.addf %496, %1 : vector<16x16xf32>
    %cst_251 = arith.constant dense<0xFF800000> : vector<16xf32>
    %498 = vector.multi_reduction <maximumf>, %497, %cst_251 [1] : vector<16x16xf32> to vector<16xf32>
    %499 = vector.shape_cast %498 : vector<16xf32> to vector<16x1xf32>
    %500 = vector.broadcast %499 : vector<16x1xf32> to vector<16x16xf32>
    %501 = arith.subf %497, %500 : vector<16x16xf32>
    %502 = math.exp %501 : vector<16x16xf32>
    %cst_252 = arith.constant dense<0.000000e+00> : vector<16xf32>
    %503 = vector.multi_reduction <add>, %502, %cst_252 [1] : vector<16x16xf32> to vector<16xf32>
    %504 = vector.shape_cast %503 : vector<16xf32> to vector<16x1xf32>
    %505 = vector.broadcast %504 : vector<16x1xf32> to vector<16x16xf32>
    %506 = arith.divf %502, %505 : vector<16x16xf32>
    %507 = vector.broadcast %10 : vector<1x32xf32> to vector<16x32xf32>
    %508 = arith.mulf %431, %507 : vector<16x32xf32>
    %cst_253 = arith.constant dense<0.000000e+00> : vector<16x32xf32>
    %509 = tpu.matmul %506, %508, %cst_253 {dimension_numbers = #tpu.dot_dimension_numbers<[1], [0], [0], [1], [0, 0, 1, 1], [], []>} : vector<16x16xf32>, vector<16x32xf32>, vector<16x32xf32> -> vector<16x32xf32>
    %510 = arith.addf %491, %509 : vector<16x32xf32>
    %cst_254 = arith.constant dense<0.000000e+00> : vector<16x32xf32>
    %511 = tpu.matmul %510, %433, %cst_254 {dimension_numbers = #tpu.dot_dimension_numbers<[1], [0], [0], [1], [0, 0, 1, 1], [], []>} : vector<16x32xf32>, vector<32x32xf32>, vector<16x32xf32> -> vector<16x32xf32>
    %512 = vector.broadcast %435 : vector<1x32xf32> to vector<16x32xf32>
    %513 = arith.addf %511, %512 : vector<16x32xf32>
    %514 = arith.addf %384, %513 : vector<16x32xf32>
    %c0_255 = arith.constant 0 : index
    %c0_256 = arith.constant 0 : index
    %c0_257 = arith.constant 0 : index
    %515 = vector.load %arg23[%c0_255, %c0_256, %c0_257] : memref<4x1x32xf32, #tpu.memory_space<vmem>>, vector<1x1x32xf32>
    %516 = vector.shape_cast %515 : vector<1x1x32xf32> to vector<1x32xf32>
    %c1_258 = arith.constant 1 : index
    %c0_259 = arith.constant 0 : index
    %c0_260 = arith.constant 0 : index
    %517 = vector.load %arg23[%c1_258, %c0_259, %c0_260] : memref<4x1x32xf32, #tpu.memory_space<vmem>>, vector<1x1x32xf32>
    %518 = vector.shape_cast %517 : vector<1x1x32xf32> to vector<1x32xf32>
    %cst_261 = arith.constant dense<0.000000e+00> : vector<16xf32>
    %519 = vector.multi_reduction <add>, %514, %cst_261 [1] : vector<16x32xf32> to vector<16xf32>
    %520 = vector.shape_cast %519 : vector<16xf32> to vector<16x1xf32>
    %cst_262 = arith.constant 3.200000e+01 : f32
    %521 = vector.broadcast %cst_262 : f32 to vector<16x1xf32>
    %522 = arith.divf %520, %521 : vector<16x1xf32>
    %523 = vector.broadcast %522 : vector<16x1xf32> to vector<16x32xf32>
    %524 = arith.subf %514, %523 : vector<16x32xf32>
    %525 = arith.mulf %524, %524 : vector<16x32xf32>
    %cst_263 = arith.constant dense<0.000000e+00> : vector<16xf32>
    %526 = vector.multi_reduction <add>, %525, %cst_263 [1] : vector<16x32xf32> to vector<16xf32>
    %527 = vector.shape_cast %526 : vector<16xf32> to vector<16x1xf32>
    %cst_264 = arith.constant 3.200000e+01 : f32
    %528 = vector.broadcast %cst_264 : f32 to vector<16x1xf32>
    %529 = arith.divf %527, %528 : vector<16x1xf32>
    %530 = vector.broadcast %522 : vector<16x1xf32> to vector<16x32xf32>
    %531 = arith.subf %514, %530 : vector<16x32xf32>
    %cst_265 = arith.constant 9.99999974E-6 : f32
    %532 = vector.broadcast %cst_265 : f32 to vector<16x1xf32>
    %533 = arith.addf %529, %532 : vector<16x1xf32>
    %534 = math.rsqrt %533 : vector<16x1xf32>
    %535 = vector.broadcast %534 : vector<16x1xf32> to vector<16x32xf32>
    %536 = arith.mulf %531, %535 : vector<16x32xf32>
    %537 = vector.broadcast %516 : vector<1x32xf32> to vector<16x32xf32>
    %538 = arith.mulf %536, %537 : vector<16x32xf32>
    %539 = vector.broadcast %518 : vector<1x32xf32> to vector<16x32xf32>
    %540 = arith.addf %538, %539 : vector<16x32xf32>
    %c0_266 = arith.constant 0 : index
    %c0_267 = arith.constant 0 : index
    %c0_268 = arith.constant 0 : index
    %541 = vector.load %arg24[%c0_266, %c0_267, %c0_268] : memref<2x32x32xf32, #tpu.memory_space<vmem>>, vector<1x32x32xf32>
    %542 = vector.shape_cast %541 : vector<1x32x32xf32> to vector<32x32xf32>
    %cst_269 = arith.constant dense<0.000000e+00> : vector<16x32xf32>
    %543 = tpu.matmul %540, %542, %cst_269 {dimension_numbers = #tpu.dot_dimension_numbers<[1], [0], [0], [1], [0, 0, 1, 1], [], []>} : vector<16x32xf32>, vector<32x32xf32>, vector<16x32xf32> -> vector<16x32xf32>
    %c0_270 = arith.constant 0 : index
    %c0_271 = arith.constant 0 : index
    %c0_272 = arith.constant 0 : index
    %544 = vector.load %arg25[%c0_270, %c0_271, %c0_272] : memref<2x1x32xf32, #tpu.memory_space<vmem>>, vector<1x1x32xf32>
    %545 = vector.shape_cast %544 : vector<1x1x32xf32> to vector<1x32xf32>
    %546 = vector.broadcast %545 : vector<1x32xf32> to vector<16x32xf32>
    %547 = arith.addf %543, %546 : vector<16x32xf32>
    %c0_273 = arith.constant 0 : index
    %c0_274 = arith.constant 0 : index
    %c0_275 = arith.constant 0 : index
    %548 = vector.load %arg26[%c0_273, %c0_274, %c0_275] : memref<4x32x32xf32, #tpu.memory_space<vmem>>, vector<1x32x32xf32>
    %549 = vector.shape_cast %548 : vector<1x32x32xf32> to vector<32x32xf32>
    %cst_276 = arith.constant dense<0.000000e+00> : vector<18x32xf32>
    %550 = tpu.matmul %383, %549, %cst_276 {dimension_numbers = #tpu.dot_dimension_numbers<[1], [0], [0], [1], [0, 0, 1, 1], [], []>} : vector<18x32xf32>, vector<32x32xf32>, vector<18x32xf32> -> vector<18x32xf32>
    %c0_277 = arith.constant 0 : index
    %c0_278 = arith.constant 0 : index
    %c0_279 = arith.constant 0 : index
    %551 = vector.load %arg27[%c0_277, %c0_278, %c0_279] : memref<4x1x32xf32, #tpu.memory_space<vmem>>, vector<1x1x32xf32>
    %552 = vector.shape_cast %551 : vector<1x1x32xf32> to vector<1x32xf32>
    %553 = vector.broadcast %552 : vector<1x32xf32> to vector<18x32xf32>
    %554 = arith.addf %550, %553 : vector<18x32xf32>
    %c1_280 = arith.constant 1 : index
    %c0_281 = arith.constant 0 : index
    %c0_282 = arith.constant 0 : index
    %555 = vector.load %arg26[%c1_280, %c0_281, %c0_282] : memref<4x32x32xf32, #tpu.memory_space<vmem>>, vector<1x32x32xf32>
    %556 = vector.shape_cast %555 : vector<1x32x32xf32> to vector<32x32xf32>
    %cst_283 = arith.constant dense<0.000000e+00> : vector<18x32xf32>
    %557 = tpu.matmul %383, %556, %cst_283 {dimension_numbers = #tpu.dot_dimension_numbers<[1], [0], [0], [1], [0, 0, 1, 1], [], []>} : vector<18x32xf32>, vector<32x32xf32>, vector<18x32xf32> -> vector<18x32xf32>
    %c1_284 = arith.constant 1 : index
    %c0_285 = arith.constant 0 : index
    %c0_286 = arith.constant 0 : index
    %558 = vector.load %arg27[%c1_284, %c0_285, %c0_286] : memref<4x1x32xf32, #tpu.memory_space<vmem>>, vector<1x1x32xf32>
    %559 = vector.shape_cast %558 : vector<1x1x32xf32> to vector<1x32xf32>
    %560 = vector.broadcast %559 : vector<1x32xf32> to vector<18x32xf32>
    %561 = arith.addf %557, %560 : vector<18x32xf32>
    %c0_287 = arith.constant 0 : index
    %c0_288 = arith.constant 0 : index
    %c0_289 = arith.constant 0 : index
    %562 = vector.load %arg28[%c0_287, %c0_288, %c0_289] : memref<2x32x32xf32, #tpu.memory_space<vmem>>, vector<1x32x32xf32>
    %563 = vector.shape_cast %562 : vector<1x32x32xf32> to vector<32x32xf32>
    %c0_290 = arith.constant 0 : index
    %c0_291 = arith.constant 0 : index
    %c0_292 = arith.constant 0 : index
    %564 = vector.load %arg29[%c0_290, %c0_291, %c0_292] : memref<2x1x32xf32, #tpu.memory_space<vmem>>, vector<1x1x32xf32>
    %565 = vector.shape_cast %564 : vector<1x1x32xf32> to vector<1x32xf32>
    %566 = vector.broadcast %4 : vector<1x32xf32> to vector<16x32xf32>
    %567 = arith.mulf %547, %566 : vector<16x32xf32>
    %cst_293 = arith.constant dense<0.000000e+00> : vector<16x18xf32>
    %568 = tpu.matmul %567, %554, %cst_293 {dimension_numbers = #tpu.dot_dimension_numbers<[1], [1], [0], [0], [0, 0, 1, 0], [], []>} : vector<16x32xf32>, vector<18x32xf32>, vector<16x18xf32> -> vector<16x18xf32>
    %cst_294 = arith.constant 0.353553385 : f32
    %569 = vector.broadcast %cst_294 : f32 to vector<16x18xf32>
    %570 = arith.mulf %568, %569 : vector<16x18xf32>
    %571 = arith.addf %570, %2 : vector<16x18xf32>
    %cst_295 = arith.constant dense<0xFF800000> : vector<16xf32>
    %572 = vector.multi_reduction <maximumf>, %571, %cst_295 [1] : vector<16x18xf32> to vector<16xf32>
    %573 = vector.shape_cast %572 : vector<16xf32> to vector<16x1xf32>
    %574 = vector.broadcast %573 : vector<16x1xf32> to vector<16x18xf32>
    %575 = arith.subf %571, %574 : vector<16x18xf32>
    %576 = math.exp %575 : vector<16x18xf32>
    %cst_296 = arith.constant dense<0.000000e+00> : vector<16xf32>
    %577 = vector.multi_reduction <add>, %576, %cst_296 [1] : vector<16x18xf32> to vector<16xf32>
    %578 = vector.shape_cast %577 : vector<16xf32> to vector<16x1xf32>
    %579 = vector.broadcast %578 : vector<16x1xf32> to vector<16x18xf32>
    %580 = arith.divf %576, %579 : vector<16x18xf32>
    %581 = vector.broadcast %4 : vector<1x32xf32> to vector<18x32xf32>
    %582 = arith.mulf %561, %581 : vector<18x32xf32>
    %cst_297 = arith.constant dense<0.000000e+00> : vector<16x32xf32>
    %583 = tpu.matmul %580, %582, %cst_297 {dimension_numbers = #tpu.dot_dimension_numbers<[1], [0], [0], [1], [0, 0, 1, 1], [], []>} : vector<16x18xf32>, vector<18x32xf32>, vector<16x32xf32> -> vector<16x32xf32>
    %584 = vector.broadcast %6 : vector<1x32xf32> to vector<16x32xf32>
    %585 = arith.mulf %547, %584 : vector<16x32xf32>
    %cst_298 = arith.constant dense<0.000000e+00> : vector<16x18xf32>
    %586 = tpu.matmul %585, %554, %cst_298 {dimension_numbers = #tpu.dot_dimension_numbers<[1], [1], [0], [0], [0, 0, 1, 0], [], []>} : vector<16x32xf32>, vector<18x32xf32>, vector<16x18xf32> -> vector<16x18xf32>
    %cst_299 = arith.constant 0.353553385 : f32
    %587 = vector.broadcast %cst_299 : f32 to vector<16x18xf32>
    %588 = arith.mulf %586, %587 : vector<16x18xf32>
    %589 = arith.addf %588, %2 : vector<16x18xf32>
    %cst_300 = arith.constant dense<0xFF800000> : vector<16xf32>
    %590 = vector.multi_reduction <maximumf>, %589, %cst_300 [1] : vector<16x18xf32> to vector<16xf32>
    %591 = vector.shape_cast %590 : vector<16xf32> to vector<16x1xf32>
    %592 = vector.broadcast %591 : vector<16x1xf32> to vector<16x18xf32>
    %593 = arith.subf %589, %592 : vector<16x18xf32>
    %594 = math.exp %593 : vector<16x18xf32>
    %cst_301 = arith.constant dense<0.000000e+00> : vector<16xf32>
    %595 = vector.multi_reduction <add>, %594, %cst_301 [1] : vector<16x18xf32> to vector<16xf32>
    %596 = vector.shape_cast %595 : vector<16xf32> to vector<16x1xf32>
    %597 = vector.broadcast %596 : vector<16x1xf32> to vector<16x18xf32>
    %598 = arith.divf %594, %597 : vector<16x18xf32>
    %599 = vector.broadcast %6 : vector<1x32xf32> to vector<18x32xf32>
    %600 = arith.mulf %561, %599 : vector<18x32xf32>
    %cst_302 = arith.constant dense<0.000000e+00> : vector<16x32xf32>
    %601 = tpu.matmul %598, %600, %cst_302 {dimension_numbers = #tpu.dot_dimension_numbers<[1], [0], [0], [1], [0, 0, 1, 1], [], []>} : vector<16x18xf32>, vector<18x32xf32>, vector<16x32xf32> -> vector<16x32xf32>
    %602 = arith.addf %583, %601 : vector<16x32xf32>
    %603 = vector.broadcast %8 : vector<1x32xf32> to vector<16x32xf32>
    %604 = arith.mulf %547, %603 : vector<16x32xf32>
    %cst_303 = arith.constant dense<0.000000e+00> : vector<16x18xf32>
    %605 = tpu.matmul %604, %554, %cst_303 {dimension_numbers = #tpu.dot_dimension_numbers<[1], [1], [0], [0], [0, 0, 1, 0], [], []>} : vector<16x32xf32>, vector<18x32xf32>, vector<16x18xf32> -> vector<16x18xf32>
    %cst_304 = arith.constant 0.353553385 : f32
    %606 = vector.broadcast %cst_304 : f32 to vector<16x18xf32>
    %607 = arith.mulf %605, %606 : vector<16x18xf32>
    %608 = arith.addf %607, %2 : vector<16x18xf32>
    %cst_305 = arith.constant dense<0xFF800000> : vector<16xf32>
    %609 = vector.multi_reduction <maximumf>, %608, %cst_305 [1] : vector<16x18xf32> to vector<16xf32>
    %610 = vector.shape_cast %609 : vector<16xf32> to vector<16x1xf32>
    %611 = vector.broadcast %610 : vector<16x1xf32> to vector<16x18xf32>
    %612 = arith.subf %608, %611 : vector<16x18xf32>
    %613 = math.exp %612 : vector<16x18xf32>
    %cst_306 = arith.constant dense<0.000000e+00> : vector<16xf32>
    %614 = vector.multi_reduction <add>, %613, %cst_306 [1] : vector<16x18xf32> to vector<16xf32>
    %615 = vector.shape_cast %614 : vector<16xf32> to vector<16x1xf32>
    %616 = vector.broadcast %615 : vector<16x1xf32> to vector<16x18xf32>
    %617 = arith.divf %613, %616 : vector<16x18xf32>
    %618 = vector.broadcast %8 : vector<1x32xf32> to vector<18x32xf32>
    %619 = arith.mulf %561, %618 : vector<18x32xf32>
    %cst_307 = arith.constant dense<0.000000e+00> : vector<16x32xf32>
    %620 = tpu.matmul %617, %619, %cst_307 {dimension_numbers = #tpu.dot_dimension_numbers<[1], [0], [0], [1], [0, 0, 1, 1], [], []>} : vector<16x18xf32>, vector<18x32xf32>, vector<16x32xf32> -> vector<16x32xf32>
    %621 = arith.addf %602, %620 : vector<16x32xf32>
    %622 = vector.broadcast %10 : vector<1x32xf32> to vector<16x32xf32>
    %623 = arith.mulf %547, %622 : vector<16x32xf32>
    %cst_308 = arith.constant dense<0.000000e+00> : vector<16x18xf32>
    %624 = tpu.matmul %623, %554, %cst_308 {dimension_numbers = #tpu.dot_dimension_numbers<[1], [1], [0], [0], [0, 0, 1, 0], [], []>} : vector<16x32xf32>, vector<18x32xf32>, vector<16x18xf32> -> vector<16x18xf32>
    %cst_309 = arith.constant 0.353553385 : f32
    %625 = vector.broadcast %cst_309 : f32 to vector<16x18xf32>
    %626 = arith.mulf %624, %625 : vector<16x18xf32>
    %627 = arith.addf %626, %2 : vector<16x18xf32>
    %cst_310 = arith.constant dense<0xFF800000> : vector<16xf32>
    %628 = vector.multi_reduction <maximumf>, %627, %cst_310 [1] : vector<16x18xf32> to vector<16xf32>
    %629 = vector.shape_cast %628 : vector<16xf32> to vector<16x1xf32>
    %630 = vector.broadcast %629 : vector<16x1xf32> to vector<16x18xf32>
    %631 = arith.subf %627, %630 : vector<16x18xf32>
    %632 = math.exp %631 : vector<16x18xf32>
    %cst_311 = arith.constant dense<0.000000e+00> : vector<16xf32>
    %633 = vector.multi_reduction <add>, %632, %cst_311 [1] : vector<16x18xf32> to vector<16xf32>
    %634 = vector.shape_cast %633 : vector<16xf32> to vector<16x1xf32>
    %635 = vector.broadcast %634 : vector<16x1xf32> to vector<16x18xf32>
    %636 = arith.divf %632, %635 : vector<16x18xf32>
    %637 = vector.broadcast %10 : vector<1x32xf32> to vector<18x32xf32>
    %638 = arith.mulf %561, %637 : vector<18x32xf32>
    %cst_312 = arith.constant dense<0.000000e+00> : vector<16x32xf32>
    %639 = tpu.matmul %636, %638, %cst_312 {dimension_numbers = #tpu.dot_dimension_numbers<[1], [0], [0], [1], [0, 0, 1, 1], [], []>} : vector<16x18xf32>, vector<18x32xf32>, vector<16x32xf32> -> vector<16x32xf32>
    %640 = arith.addf %621, %639 : vector<16x32xf32>
    %cst_313 = arith.constant dense<0.000000e+00> : vector<16x32xf32>
    %641 = tpu.matmul %640, %563, %cst_313 {dimension_numbers = #tpu.dot_dimension_numbers<[1], [0], [0], [1], [0, 0, 1, 1], [], []>} : vector<16x32xf32>, vector<32x32xf32>, vector<16x32xf32> -> vector<16x32xf32>
    %642 = vector.broadcast %565 : vector<1x32xf32> to vector<16x32xf32>
    %643 = arith.addf %641, %642 : vector<16x32xf32>
    %644 = arith.addf %514, %643 : vector<16x32xf32>
    %c0_314 = arith.constant 0 : index
    %c0_315 = arith.constant 0 : index
    %c0_316 = arith.constant 0 : index
    %645 = vector.load %arg30[%c0_314, %c0_315, %c0_316] : memref<4x1x32xf32, #tpu.memory_space<vmem>>, vector<1x1x32xf32>
    %646 = vector.shape_cast %645 : vector<1x1x32xf32> to vector<1x32xf32>
    %c1_317 = arith.constant 1 : index
    %c0_318 = arith.constant 0 : index
    %c0_319 = arith.constant 0 : index
    %647 = vector.load %arg30[%c1_317, %c0_318, %c0_319] : memref<4x1x32xf32, #tpu.memory_space<vmem>>, vector<1x1x32xf32>
    %648 = vector.shape_cast %647 : vector<1x1x32xf32> to vector<1x32xf32>
    %cst_320 = arith.constant dense<0.000000e+00> : vector<16xf32>
    %649 = vector.multi_reduction <add>, %644, %cst_320 [1] : vector<16x32xf32> to vector<16xf32>
    %650 = vector.shape_cast %649 : vector<16xf32> to vector<16x1xf32>
    %cst_321 = arith.constant 3.200000e+01 : f32
    %651 = vector.broadcast %cst_321 : f32 to vector<16x1xf32>
    %652 = arith.divf %650, %651 : vector<16x1xf32>
    %653 = vector.broadcast %652 : vector<16x1xf32> to vector<16x32xf32>
    %654 = arith.subf %644, %653 : vector<16x32xf32>
    %655 = arith.mulf %654, %654 : vector<16x32xf32>
    %cst_322 = arith.constant dense<0.000000e+00> : vector<16xf32>
    %656 = vector.multi_reduction <add>, %655, %cst_322 [1] : vector<16x32xf32> to vector<16xf32>
    %657 = vector.shape_cast %656 : vector<16xf32> to vector<16x1xf32>
    %cst_323 = arith.constant 3.200000e+01 : f32
    %658 = vector.broadcast %cst_323 : f32 to vector<16x1xf32>
    %659 = arith.divf %657, %658 : vector<16x1xf32>
    %660 = vector.broadcast %652 : vector<16x1xf32> to vector<16x32xf32>
    %661 = arith.subf %644, %660 : vector<16x32xf32>
    %cst_324 = arith.constant 9.99999974E-6 : f32
    %662 = vector.broadcast %cst_324 : f32 to vector<16x1xf32>
    %663 = arith.addf %659, %662 : vector<16x1xf32>
    %664 = math.rsqrt %663 : vector<16x1xf32>
    %665 = vector.broadcast %664 : vector<16x1xf32> to vector<16x32xf32>
    %666 = arith.mulf %661, %665 : vector<16x32xf32>
    %667 = vector.broadcast %646 : vector<1x32xf32> to vector<16x32xf32>
    %668 = arith.mulf %666, %667 : vector<16x32xf32>
    %669 = vector.broadcast %648 : vector<1x32xf32> to vector<16x32xf32>
    %670 = arith.addf %668, %669 : vector<16x32xf32>
    %c0_325 = arith.constant 0 : index
    %c0_326 = arith.constant 0 : index
    %c0_327 = arith.constant 0 : index
    %671 = vector.load %arg31[%c0_325, %c0_326, %c0_327] : memref<2x32x64xf32, #tpu.memory_space<vmem>>, vector<1x32x64xf32>
    %672 = vector.shape_cast %671 : vector<1x32x64xf32> to vector<32x64xf32>
    %cst_328 = arith.constant dense<0.000000e+00> : vector<16x64xf32>
    %673 = tpu.matmul %670, %672, %cst_328 {dimension_numbers = #tpu.dot_dimension_numbers<[1], [0], [0], [1], [0, 0, 1, 1], [], []>} : vector<16x32xf32>, vector<32x64xf32>, vector<16x64xf32> -> vector<16x64xf32>
    %c0_329 = arith.constant 0 : index
    %c0_330 = arith.constant 0 : index
    %c0_331 = arith.constant 0 : index
    %674 = vector.load %arg32[%c0_329, %c0_330, %c0_331] : memref<2x1x64xf32, #tpu.memory_space<vmem>>, vector<1x1x64xf32>
    %675 = vector.shape_cast %674 : vector<1x1x64xf32> to vector<1x64xf32>
    %676 = vector.broadcast %675 : vector<1x64xf32> to vector<16x64xf32>
    %677 = arith.addf %673, %676 : vector<16x64xf32>
    %cst_332 = arith.constant 0.000000e+00 : f32
    %678 = vector.broadcast %cst_332 : f32 to vector<16x64xf32>
    %679 = arith.maximumf %677, %678 : vector<16x64xf32>
    %c0_333 = arith.constant 0 : index
    %c0_334 = arith.constant 0 : index
    %c0_335 = arith.constant 0 : index
    %680 = vector.load %arg33[%c0_333, %c0_334, %c0_335] : memref<2x64x32xf32, #tpu.memory_space<vmem>>, vector<1x64x32xf32>
    %681 = vector.shape_cast %680 : vector<1x64x32xf32> to vector<64x32xf32>
    %cst_336 = arith.constant dense<0.000000e+00> : vector<16x32xf32>
    %682 = tpu.matmul %679, %681, %cst_336 {dimension_numbers = #tpu.dot_dimension_numbers<[1], [0], [0], [1], [0, 0, 1, 1], [], []>} : vector<16x64xf32>, vector<64x32xf32>, vector<16x32xf32> -> vector<16x32xf32>
    %683 = arith.addf %644, %682 : vector<16x32xf32>
    %c0_337 = arith.constant 0 : index
    %c0_338 = arith.constant 0 : index
    %c0_339 = arith.constant 0 : index
    %684 = vector.load %arg34[%c0_337, %c0_338, %c0_339] : memref<2x1x32xf32, #tpu.memory_space<vmem>>, vector<1x1x32xf32>
    %685 = vector.shape_cast %684 : vector<1x1x32xf32> to vector<1x32xf32>
    %686 = vector.broadcast %685 : vector<1x32xf32> to vector<16x32xf32>
    %687 = arith.addf %683, %686 : vector<16x32xf32>
    %c2_340 = arith.constant 2 : index
    %c0_341 = arith.constant 0 : index
    %c0_342 = arith.constant 0 : index
    %688 = vector.load %arg18[%c2_340, %c0_341, %c0_342] : memref<4x1x32xf32, #tpu.memory_space<vmem>>, vector<1x1x32xf32>
    %689 = vector.shape_cast %688 : vector<1x1x32xf32> to vector<1x32xf32>
    %c3_343 = arith.constant 3 : index
    %c0_344 = arith.constant 0 : index
    %c0_345 = arith.constant 0 : index
    %690 = vector.load %arg18[%c3_343, %c0_344, %c0_345] : memref<4x1x32xf32, #tpu.memory_space<vmem>>, vector<1x1x32xf32>
    %691 = vector.shape_cast %690 : vector<1x1x32xf32> to vector<1x32xf32>
    %cst_346 = arith.constant dense<0.000000e+00> : vector<16xf32>
    %692 = vector.multi_reduction <add>, %687, %cst_346 [1] : vector<16x32xf32> to vector<16xf32>
    %693 = vector.shape_cast %692 : vector<16xf32> to vector<16x1xf32>
    %cst_347 = arith.constant 3.200000e+01 : f32
    %694 = vector.broadcast %cst_347 : f32 to vector<16x1xf32>
    %695 = arith.divf %693, %694 : vector<16x1xf32>
    %696 = vector.broadcast %695 : vector<16x1xf32> to vector<16x32xf32>
    %697 = arith.subf %687, %696 : vector<16x32xf32>
    %698 = arith.mulf %697, %697 : vector<16x32xf32>
    %cst_348 = arith.constant dense<0.000000e+00> : vector<16xf32>
    %699 = vector.multi_reduction <add>, %698, %cst_348 [1] : vector<16x32xf32> to vector<16xf32>
    %700 = vector.shape_cast %699 : vector<16xf32> to vector<16x1xf32>
    %cst_349 = arith.constant 3.200000e+01 : f32
    %701 = vector.broadcast %cst_349 : f32 to vector<16x1xf32>
    %702 = arith.divf %700, %701 : vector<16x1xf32>
    %703 = vector.broadcast %695 : vector<16x1xf32> to vector<16x32xf32>
    %704 = arith.subf %687, %703 : vector<16x32xf32>
    %cst_350 = arith.constant 9.99999974E-6 : f32
    %705 = vector.broadcast %cst_350 : f32 to vector<16x1xf32>
    %706 = arith.addf %702, %705 : vector<16x1xf32>
    %707 = math.rsqrt %706 : vector<16x1xf32>
    %708 = vector.broadcast %707 : vector<16x1xf32> to vector<16x32xf32>
    %709 = arith.mulf %704, %708 : vector<16x32xf32>
    %710 = vector.broadcast %689 : vector<1x32xf32> to vector<16x32xf32>
    %711 = arith.mulf %709, %710 : vector<16x32xf32>
    %712 = vector.broadcast %691 : vector<1x32xf32> to vector<16x32xf32>
    %713 = arith.addf %711, %712 : vector<16x32xf32>
    %c3_351 = arith.constant 3 : index
    %c0_352 = arith.constant 0 : index
    %c0_353 = arith.constant 0 : index
    %714 = vector.load %arg19[%c3_351, %c0_352, %c0_353] : memref<6x32x32xf32, #tpu.memory_space<vmem>>, vector<1x32x32xf32>
    %715 = vector.shape_cast %714 : vector<1x32x32xf32> to vector<32x32xf32>
    %cst_354 = arith.constant dense<0.000000e+00> : vector<16x32xf32>
    %716 = tpu.matmul %713, %715, %cst_354 {dimension_numbers = #tpu.dot_dimension_numbers<[1], [0], [0], [1], [0, 0, 1, 1], [], []>} : vector<16x32xf32>, vector<32x32xf32>, vector<16x32xf32> -> vector<16x32xf32>
    %c3_355 = arith.constant 3 : index
    %c0_356 = arith.constant 0 : index
    %c0_357 = arith.constant 0 : index
    %717 = vector.load %arg20[%c3_355, %c0_356, %c0_357] : memref<6x1x32xf32, #tpu.memory_space<vmem>>, vector<1x1x32xf32>
    %718 = vector.shape_cast %717 : vector<1x1x32xf32> to vector<1x32xf32>
    %719 = vector.broadcast %718 : vector<1x32xf32> to vector<16x32xf32>
    %720 = arith.addf %716, %719 : vector<16x32xf32>
    %c4_358 = arith.constant 4 : index
    %c0_359 = arith.constant 0 : index
    %c0_360 = arith.constant 0 : index
    %721 = vector.load %arg19[%c4_358, %c0_359, %c0_360] : memref<6x32x32xf32, #tpu.memory_space<vmem>>, vector<1x32x32xf32>
    %722 = vector.shape_cast %721 : vector<1x32x32xf32> to vector<32x32xf32>
    %cst_361 = arith.constant dense<0.000000e+00> : vector<16x32xf32>
    %723 = tpu.matmul %713, %722, %cst_361 {dimension_numbers = #tpu.dot_dimension_numbers<[1], [0], [0], [1], [0, 0, 1, 1], [], []>} : vector<16x32xf32>, vector<32x32xf32>, vector<16x32xf32> -> vector<16x32xf32>
    %c4_362 = arith.constant 4 : index
    %c0_363 = arith.constant 0 : index
    %c0_364 = arith.constant 0 : index
    %724 = vector.load %arg20[%c4_362, %c0_363, %c0_364] : memref<6x1x32xf32, #tpu.memory_space<vmem>>, vector<1x1x32xf32>
    %725 = vector.shape_cast %724 : vector<1x1x32xf32> to vector<1x32xf32>
    %726 = vector.broadcast %725 : vector<1x32xf32> to vector<16x32xf32>
    %727 = arith.addf %723, %726 : vector<16x32xf32>
    %c5_365 = arith.constant 5 : index
    %c0_366 = arith.constant 0 : index
    %c0_367 = arith.constant 0 : index
    %728 = vector.load %arg19[%c5_365, %c0_366, %c0_367] : memref<6x32x32xf32, #tpu.memory_space<vmem>>, vector<1x32x32xf32>
    %729 = vector.shape_cast %728 : vector<1x32x32xf32> to vector<32x32xf32>
    %cst_368 = arith.constant dense<0.000000e+00> : vector<16x32xf32>
    %730 = tpu.matmul %713, %729, %cst_368 {dimension_numbers = #tpu.dot_dimension_numbers<[1], [0], [0], [1], [0, 0, 1, 1], [], []>} : vector<16x32xf32>, vector<32x32xf32>, vector<16x32xf32> -> vector<16x32xf32>
    %c5_369 = arith.constant 5 : index
    %c0_370 = arith.constant 0 : index
    %c0_371 = arith.constant 0 : index
    %731 = vector.load %arg20[%c5_369, %c0_370, %c0_371] : memref<6x1x32xf32, #tpu.memory_space<vmem>>, vector<1x1x32xf32>
    %732 = vector.shape_cast %731 : vector<1x1x32xf32> to vector<1x32xf32>
    %733 = vector.broadcast %732 : vector<1x32xf32> to vector<16x32xf32>
    %734 = arith.addf %730, %733 : vector<16x32xf32>
    %c1_372 = arith.constant 1 : index
    %c0_373 = arith.constant 0 : index
    %c0_374 = arith.constant 0 : index
    %735 = vector.load %arg21[%c1_372, %c0_373, %c0_374] : memref<2x32x32xf32, #tpu.memory_space<vmem>>, vector<1x32x32xf32>
    %736 = vector.shape_cast %735 : vector<1x32x32xf32> to vector<32x32xf32>
    %c1_375 = arith.constant 1 : index
    %c0_376 = arith.constant 0 : index
    %c0_377 = arith.constant 0 : index
    %737 = vector.load %arg22[%c1_375, %c0_376, %c0_377] : memref<2x1x32xf32, #tpu.memory_space<vmem>>, vector<1x1x32xf32>
    %738 = vector.shape_cast %737 : vector<1x1x32xf32> to vector<1x32xf32>
    %739 = vector.broadcast %4 : vector<1x32xf32> to vector<16x32xf32>
    %740 = arith.mulf %720, %739 : vector<16x32xf32>
    %cst_378 = arith.constant dense<0.000000e+00> : vector<16x16xf32>
    %741 = tpu.matmul %740, %727, %cst_378 {dimension_numbers = #tpu.dot_dimension_numbers<[1], [1], [0], [0], [0, 0, 1, 0], [], []>} : vector<16x32xf32>, vector<16x32xf32>, vector<16x16xf32> -> vector<16x16xf32>
    %cst_379 = arith.constant 0.353553385 : f32
    %742 = vector.broadcast %cst_379 : f32 to vector<16x16xf32>
    %743 = arith.mulf %741, %742 : vector<16x16xf32>
    %744 = arith.addf %743, %1 : vector<16x16xf32>
    %cst_380 = arith.constant dense<0xFF800000> : vector<16xf32>
    %745 = vector.multi_reduction <maximumf>, %744, %cst_380 [1] : vector<16x16xf32> to vector<16xf32>
    %746 = vector.shape_cast %745 : vector<16xf32> to vector<16x1xf32>
    %747 = vector.broadcast %746 : vector<16x1xf32> to vector<16x16xf32>
    %748 = arith.subf %744, %747 : vector<16x16xf32>
    %749 = math.exp %748 : vector<16x16xf32>
    %cst_381 = arith.constant dense<0.000000e+00> : vector<16xf32>
    %750 = vector.multi_reduction <add>, %749, %cst_381 [1] : vector<16x16xf32> to vector<16xf32>
    %751 = vector.shape_cast %750 : vector<16xf32> to vector<16x1xf32>
    %752 = vector.broadcast %751 : vector<16x1xf32> to vector<16x16xf32>
    %753 = arith.divf %749, %752 : vector<16x16xf32>
    %754 = vector.broadcast %4 : vector<1x32xf32> to vector<16x32xf32>
    %755 = arith.mulf %734, %754 : vector<16x32xf32>
    %cst_382 = arith.constant dense<0.000000e+00> : vector<16x32xf32>
    %756 = tpu.matmul %753, %755, %cst_382 {dimension_numbers = #tpu.dot_dimension_numbers<[1], [0], [0], [1], [0, 0, 1, 1], [], []>} : vector<16x16xf32>, vector<16x32xf32>, vector<16x32xf32> -> vector<16x32xf32>
    %757 = vector.broadcast %6 : vector<1x32xf32> to vector<16x32xf32>
    %758 = arith.mulf %720, %757 : vector<16x32xf32>
    %cst_383 = arith.constant dense<0.000000e+00> : vector<16x16xf32>
    %759 = tpu.matmul %758, %727, %cst_383 {dimension_numbers = #tpu.dot_dimension_numbers<[1], [1], [0], [0], [0, 0, 1, 0], [], []>} : vector<16x32xf32>, vector<16x32xf32>, vector<16x16xf32> -> vector<16x16xf32>
    %cst_384 = arith.constant 0.353553385 : f32
    %760 = vector.broadcast %cst_384 : f32 to vector<16x16xf32>
    %761 = arith.mulf %759, %760 : vector<16x16xf32>
    %762 = arith.addf %761, %1 : vector<16x16xf32>
    %cst_385 = arith.constant dense<0xFF800000> : vector<16xf32>
    %763 = vector.multi_reduction <maximumf>, %762, %cst_385 [1] : vector<16x16xf32> to vector<16xf32>
    %764 = vector.shape_cast %763 : vector<16xf32> to vector<16x1xf32>
    %765 = vector.broadcast %764 : vector<16x1xf32> to vector<16x16xf32>
    %766 = arith.subf %762, %765 : vector<16x16xf32>
    %767 = math.exp %766 : vector<16x16xf32>
    %cst_386 = arith.constant dense<0.000000e+00> : vector<16xf32>
    %768 = vector.multi_reduction <add>, %767, %cst_386 [1] : vector<16x16xf32> to vector<16xf32>
    %769 = vector.shape_cast %768 : vector<16xf32> to vector<16x1xf32>
    %770 = vector.broadcast %769 : vector<16x1xf32> to vector<16x16xf32>
    %771 = arith.divf %767, %770 : vector<16x16xf32>
    %772 = vector.broadcast %6 : vector<1x32xf32> to vector<16x32xf32>
    %773 = arith.mulf %734, %772 : vector<16x32xf32>
    %cst_387 = arith.constant dense<0.000000e+00> : vector<16x32xf32>
    %774 = tpu.matmul %771, %773, %cst_387 {dimension_numbers = #tpu.dot_dimension_numbers<[1], [0], [0], [1], [0, 0, 1, 1], [], []>} : vector<16x16xf32>, vector<16x32xf32>, vector<16x32xf32> -> vector<16x32xf32>
    %775 = arith.addf %756, %774 : vector<16x32xf32>
    %776 = vector.broadcast %8 : vector<1x32xf32> to vector<16x32xf32>
    %777 = arith.mulf %720, %776 : vector<16x32xf32>
    %cst_388 = arith.constant dense<0.000000e+00> : vector<16x16xf32>
    %778 = tpu.matmul %777, %727, %cst_388 {dimension_numbers = #tpu.dot_dimension_numbers<[1], [1], [0], [0], [0, 0, 1, 0], [], []>} : vector<16x32xf32>, vector<16x32xf32>, vector<16x16xf32> -> vector<16x16xf32>
    %cst_389 = arith.constant 0.353553385 : f32
    %779 = vector.broadcast %cst_389 : f32 to vector<16x16xf32>
    %780 = arith.mulf %778, %779 : vector<16x16xf32>
    %781 = arith.addf %780, %1 : vector<16x16xf32>
    %cst_390 = arith.constant dense<0xFF800000> : vector<16xf32>
    %782 = vector.multi_reduction <maximumf>, %781, %cst_390 [1] : vector<16x16xf32> to vector<16xf32>
    %783 = vector.shape_cast %782 : vector<16xf32> to vector<16x1xf32>
    %784 = vector.broadcast %783 : vector<16x1xf32> to vector<16x16xf32>
    %785 = arith.subf %781, %784 : vector<16x16xf32>
    %786 = math.exp %785 : vector<16x16xf32>
    %cst_391 = arith.constant dense<0.000000e+00> : vector<16xf32>
    %787 = vector.multi_reduction <add>, %786, %cst_391 [1] : vector<16x16xf32> to vector<16xf32>
    %788 = vector.shape_cast %787 : vector<16xf32> to vector<16x1xf32>
    %789 = vector.broadcast %788 : vector<16x1xf32> to vector<16x16xf32>
    %790 = arith.divf %786, %789 : vector<16x16xf32>
    %791 = vector.broadcast %8 : vector<1x32xf32> to vector<16x32xf32>
    %792 = arith.mulf %734, %791 : vector<16x32xf32>
    %cst_392 = arith.constant dense<0.000000e+00> : vector<16x32xf32>
    %793 = tpu.matmul %790, %792, %cst_392 {dimension_numbers = #tpu.dot_dimension_numbers<[1], [0], [0], [1], [0, 0, 1, 1], [], []>} : vector<16x16xf32>, vector<16x32xf32>, vector<16x32xf32> -> vector<16x32xf32>
    %794 = arith.addf %775, %793 : vector<16x32xf32>
    %795 = vector.broadcast %10 : vector<1x32xf32> to vector<16x32xf32>
    %796 = arith.mulf %720, %795 : vector<16x32xf32>
    %cst_393 = arith.constant dense<0.000000e+00> : vector<16x16xf32>
    %797 = tpu.matmul %796, %727, %cst_393 {dimension_numbers = #tpu.dot_dimension_numbers<[1], [1], [0], [0], [0, 0, 1, 0], [], []>} : vector<16x32xf32>, vector<16x32xf32>, vector<16x16xf32> -> vector<16x16xf32>
    %cst_394 = arith.constant 0.353553385 : f32
    %798 = vector.broadcast %cst_394 : f32 to vector<16x16xf32>
    %799 = arith.mulf %797, %798 : vector<16x16xf32>
    %800 = arith.addf %799, %1 : vector<16x16xf32>
    %cst_395 = arith.constant dense<0xFF800000> : vector<16xf32>
    %801 = vector.multi_reduction <maximumf>, %800, %cst_395 [1] : vector<16x16xf32> to vector<16xf32>
    %802 = vector.shape_cast %801 : vector<16xf32> to vector<16x1xf32>
    %803 = vector.broadcast %802 : vector<16x1xf32> to vector<16x16xf32>
    %804 = arith.subf %800, %803 : vector<16x16xf32>
    %805 = math.exp %804 : vector<16x16xf32>
    %cst_396 = arith.constant dense<0.000000e+00> : vector<16xf32>
    %806 = vector.multi_reduction <add>, %805, %cst_396 [1] : vector<16x16xf32> to vector<16xf32>
    %807 = vector.shape_cast %806 : vector<16xf32> to vector<16x1xf32>
    %808 = vector.broadcast %807 : vector<16x1xf32> to vector<16x16xf32>
    %809 = arith.divf %805, %808 : vector<16x16xf32>
    %810 = vector.broadcast %10 : vector<1x32xf32> to vector<16x32xf32>
    %811 = arith.mulf %734, %810 : vector<16x32xf32>
    %cst_397 = arith.constant dense<0.000000e+00> : vector<16x32xf32>
    %812 = tpu.matmul %809, %811, %cst_397 {dimension_numbers = #tpu.dot_dimension_numbers<[1], [0], [0], [1], [0, 0, 1, 1], [], []>} : vector<16x16xf32>, vector<16x32xf32>, vector<16x32xf32> -> vector<16x32xf32>
    %813 = arith.addf %794, %812 : vector<16x32xf32>
    %cst_398 = arith.constant dense<0.000000e+00> : vector<16x32xf32>
    %814 = tpu.matmul %813, %736, %cst_398 {dimension_numbers = #tpu.dot_dimension_numbers<[1], [0], [0], [1], [0, 0, 1, 1], [], []>} : vector<16x32xf32>, vector<32x32xf32>, vector<16x32xf32> -> vector<16x32xf32>
    %815 = vector.broadcast %738 : vector<1x32xf32> to vector<16x32xf32>
    %816 = arith.addf %814, %815 : vector<16x32xf32>
    %817 = arith.addf %687, %816 : vector<16x32xf32>
    %c2_399 = arith.constant 2 : index
    %c0_400 = arith.constant 0 : index
    %c0_401 = arith.constant 0 : index
    %818 = vector.load %arg23[%c2_399, %c0_400, %c0_401] : memref<4x1x32xf32, #tpu.memory_space<vmem>>, vector<1x1x32xf32>
    %819 = vector.shape_cast %818 : vector<1x1x32xf32> to vector<1x32xf32>
    %c3_402 = arith.constant 3 : index
    %c0_403 = arith.constant 0 : index
    %c0_404 = arith.constant 0 : index
    %820 = vector.load %arg23[%c3_402, %c0_403, %c0_404] : memref<4x1x32xf32, #tpu.memory_space<vmem>>, vector<1x1x32xf32>
    %821 = vector.shape_cast %820 : vector<1x1x32xf32> to vector<1x32xf32>
    %cst_405 = arith.constant dense<0.000000e+00> : vector<16xf32>
    %822 = vector.multi_reduction <add>, %817, %cst_405 [1] : vector<16x32xf32> to vector<16xf32>
    %823 = vector.shape_cast %822 : vector<16xf32> to vector<16x1xf32>
    %cst_406 = arith.constant 3.200000e+01 : f32
    %824 = vector.broadcast %cst_406 : f32 to vector<16x1xf32>
    %825 = arith.divf %823, %824 : vector<16x1xf32>
    %826 = vector.broadcast %825 : vector<16x1xf32> to vector<16x32xf32>
    %827 = arith.subf %817, %826 : vector<16x32xf32>
    %828 = arith.mulf %827, %827 : vector<16x32xf32>
    %cst_407 = arith.constant dense<0.000000e+00> : vector<16xf32>
    %829 = vector.multi_reduction <add>, %828, %cst_407 [1] : vector<16x32xf32> to vector<16xf32>
    %830 = vector.shape_cast %829 : vector<16xf32> to vector<16x1xf32>
    %cst_408 = arith.constant 3.200000e+01 : f32
    %831 = vector.broadcast %cst_408 : f32 to vector<16x1xf32>
    %832 = arith.divf %830, %831 : vector<16x1xf32>
    %833 = vector.broadcast %825 : vector<16x1xf32> to vector<16x32xf32>
    %834 = arith.subf %817, %833 : vector<16x32xf32>
    %cst_409 = arith.constant 9.99999974E-6 : f32
    %835 = vector.broadcast %cst_409 : f32 to vector<16x1xf32>
    %836 = arith.addf %832, %835 : vector<16x1xf32>
    %837 = math.rsqrt %836 : vector<16x1xf32>
    %838 = vector.broadcast %837 : vector<16x1xf32> to vector<16x32xf32>
    %839 = arith.mulf %834, %838 : vector<16x32xf32>
    %840 = vector.broadcast %819 : vector<1x32xf32> to vector<16x32xf32>
    %841 = arith.mulf %839, %840 : vector<16x32xf32>
    %842 = vector.broadcast %821 : vector<1x32xf32> to vector<16x32xf32>
    %843 = arith.addf %841, %842 : vector<16x32xf32>
    %c1_410 = arith.constant 1 : index
    %c0_411 = arith.constant 0 : index
    %c0_412 = arith.constant 0 : index
    %844 = vector.load %arg24[%c1_410, %c0_411, %c0_412] : memref<2x32x32xf32, #tpu.memory_space<vmem>>, vector<1x32x32xf32>
    %845 = vector.shape_cast %844 : vector<1x32x32xf32> to vector<32x32xf32>
    %cst_413 = arith.constant dense<0.000000e+00> : vector<16x32xf32>
    %846 = tpu.matmul %843, %845, %cst_413 {dimension_numbers = #tpu.dot_dimension_numbers<[1], [0], [0], [1], [0, 0, 1, 1], [], []>} : vector<16x32xf32>, vector<32x32xf32>, vector<16x32xf32> -> vector<16x32xf32>
    %c1_414 = arith.constant 1 : index
    %c0_415 = arith.constant 0 : index
    %c0_416 = arith.constant 0 : index
    %847 = vector.load %arg25[%c1_414, %c0_415, %c0_416] : memref<2x1x32xf32, #tpu.memory_space<vmem>>, vector<1x1x32xf32>
    %848 = vector.shape_cast %847 : vector<1x1x32xf32> to vector<1x32xf32>
    %849 = vector.broadcast %848 : vector<1x32xf32> to vector<16x32xf32>
    %850 = arith.addf %846, %849 : vector<16x32xf32>
    %c2_417 = arith.constant 2 : index
    %c0_418 = arith.constant 0 : index
    %c0_419 = arith.constant 0 : index
    %851 = vector.load %arg26[%c2_417, %c0_418, %c0_419] : memref<4x32x32xf32, #tpu.memory_space<vmem>>, vector<1x32x32xf32>
    %852 = vector.shape_cast %851 : vector<1x32x32xf32> to vector<32x32xf32>
    %cst_420 = arith.constant dense<0.000000e+00> : vector<18x32xf32>
    %853 = tpu.matmul %383, %852, %cst_420 {dimension_numbers = #tpu.dot_dimension_numbers<[1], [0], [0], [1], [0, 0, 1, 1], [], []>} : vector<18x32xf32>, vector<32x32xf32>, vector<18x32xf32> -> vector<18x32xf32>
    %c2_421 = arith.constant 2 : index
    %c0_422 = arith.constant 0 : index
    %c0_423 = arith.constant 0 : index
    %854 = vector.load %arg27[%c2_421, %c0_422, %c0_423] : memref<4x1x32xf32, #tpu.memory_space<vmem>>, vector<1x1x32xf32>
    %855 = vector.shape_cast %854 : vector<1x1x32xf32> to vector<1x32xf32>
    %856 = vector.broadcast %855 : vector<1x32xf32> to vector<18x32xf32>
    %857 = arith.addf %853, %856 : vector<18x32xf32>
    %c3_424 = arith.constant 3 : index
    %c0_425 = arith.constant 0 : index
    %c0_426 = arith.constant 0 : index
    %858 = vector.load %arg26[%c3_424, %c0_425, %c0_426] : memref<4x32x32xf32, #tpu.memory_space<vmem>>, vector<1x32x32xf32>
    %859 = vector.shape_cast %858 : vector<1x32x32xf32> to vector<32x32xf32>
    %cst_427 = arith.constant dense<0.000000e+00> : vector<18x32xf32>
    %860 = tpu.matmul %383, %859, %cst_427 {dimension_numbers = #tpu.dot_dimension_numbers<[1], [0], [0], [1], [0, 0, 1, 1], [], []>} : vector<18x32xf32>, vector<32x32xf32>, vector<18x32xf32> -> vector<18x32xf32>
    %c3_428 = arith.constant 3 : index
    %c0_429 = arith.constant 0 : index
    %c0_430 = arith.constant 0 : index
    %861 = vector.load %arg27[%c3_428, %c0_429, %c0_430] : memref<4x1x32xf32, #tpu.memory_space<vmem>>, vector<1x1x32xf32>
    %862 = vector.shape_cast %861 : vector<1x1x32xf32> to vector<1x32xf32>
    %863 = vector.broadcast %862 : vector<1x32xf32> to vector<18x32xf32>
    %864 = arith.addf %860, %863 : vector<18x32xf32>
    %c1_431 = arith.constant 1 : index
    %c0_432 = arith.constant 0 : index
    %c0_433 = arith.constant 0 : index
    %865 = vector.load %arg28[%c1_431, %c0_432, %c0_433] : memref<2x32x32xf32, #tpu.memory_space<vmem>>, vector<1x32x32xf32>
    %866 = vector.shape_cast %865 : vector<1x32x32xf32> to vector<32x32xf32>
    %c1_434 = arith.constant 1 : index
    %c0_435 = arith.constant 0 : index
    %c0_436 = arith.constant 0 : index
    %867 = vector.load %arg29[%c1_434, %c0_435, %c0_436] : memref<2x1x32xf32, #tpu.memory_space<vmem>>, vector<1x1x32xf32>
    %868 = vector.shape_cast %867 : vector<1x1x32xf32> to vector<1x32xf32>
    %869 = vector.broadcast %4 : vector<1x32xf32> to vector<16x32xf32>
    %870 = arith.mulf %850, %869 : vector<16x32xf32>
    %cst_437 = arith.constant dense<0.000000e+00> : vector<16x18xf32>
    %871 = tpu.matmul %870, %857, %cst_437 {dimension_numbers = #tpu.dot_dimension_numbers<[1], [1], [0], [0], [0, 0, 1, 0], [], []>} : vector<16x32xf32>, vector<18x32xf32>, vector<16x18xf32> -> vector<16x18xf32>
    %cst_438 = arith.constant 0.353553385 : f32
    %872 = vector.broadcast %cst_438 : f32 to vector<16x18xf32>
    %873 = arith.mulf %871, %872 : vector<16x18xf32>
    %874 = arith.addf %873, %2 : vector<16x18xf32>
    %cst_439 = arith.constant dense<0xFF800000> : vector<16xf32>
    %875 = vector.multi_reduction <maximumf>, %874, %cst_439 [1] : vector<16x18xf32> to vector<16xf32>
    %876 = vector.shape_cast %875 : vector<16xf32> to vector<16x1xf32>
    %877 = vector.broadcast %876 : vector<16x1xf32> to vector<16x18xf32>
    %878 = arith.subf %874, %877 : vector<16x18xf32>
    %879 = math.exp %878 : vector<16x18xf32>
    %cst_440 = arith.constant dense<0.000000e+00> : vector<16xf32>
    %880 = vector.multi_reduction <add>, %879, %cst_440 [1] : vector<16x18xf32> to vector<16xf32>
    %881 = vector.shape_cast %880 : vector<16xf32> to vector<16x1xf32>
    %882 = vector.broadcast %881 : vector<16x1xf32> to vector<16x18xf32>
    %883 = arith.divf %879, %882 : vector<16x18xf32>
    %884 = vector.broadcast %4 : vector<1x32xf32> to vector<18x32xf32>
    %885 = arith.mulf %864, %884 : vector<18x32xf32>
    %cst_441 = arith.constant dense<0.000000e+00> : vector<16x32xf32>
    %886 = tpu.matmul %883, %885, %cst_441 {dimension_numbers = #tpu.dot_dimension_numbers<[1], [0], [0], [1], [0, 0, 1, 1], [], []>} : vector<16x18xf32>, vector<18x32xf32>, vector<16x32xf32> -> vector<16x32xf32>
    %887 = vector.broadcast %6 : vector<1x32xf32> to vector<16x32xf32>
    %888 = arith.mulf %850, %887 : vector<16x32xf32>
    %cst_442 = arith.constant dense<0.000000e+00> : vector<16x18xf32>
    %889 = tpu.matmul %888, %857, %cst_442 {dimension_numbers = #tpu.dot_dimension_numbers<[1], [1], [0], [0], [0, 0, 1, 0], [], []>} : vector<16x32xf32>, vector<18x32xf32>, vector<16x18xf32> -> vector<16x18xf32>
    %cst_443 = arith.constant 0.353553385 : f32
    %890 = vector.broadcast %cst_443 : f32 to vector<16x18xf32>
    %891 = arith.mulf %889, %890 : vector<16x18xf32>
    %892 = arith.addf %891, %2 : vector<16x18xf32>
    %cst_444 = arith.constant dense<0xFF800000> : vector<16xf32>
    %893 = vector.multi_reduction <maximumf>, %892, %cst_444 [1] : vector<16x18xf32> to vector<16xf32>
    %894 = vector.shape_cast %893 : vector<16xf32> to vector<16x1xf32>
    %895 = vector.broadcast %894 : vector<16x1xf32> to vector<16x18xf32>
    %896 = arith.subf %892, %895 : vector<16x18xf32>
    %897 = math.exp %896 : vector<16x18xf32>
    %cst_445 = arith.constant dense<0.000000e+00> : vector<16xf32>
    %898 = vector.multi_reduction <add>, %897, %cst_445 [1] : vector<16x18xf32> to vector<16xf32>
    %899 = vector.shape_cast %898 : vector<16xf32> to vector<16x1xf32>
    %900 = vector.broadcast %899 : vector<16x1xf32> to vector<16x18xf32>
    %901 = arith.divf %897, %900 : vector<16x18xf32>
    %902 = vector.broadcast %6 : vector<1x32xf32> to vector<18x32xf32>
    %903 = arith.mulf %864, %902 : vector<18x32xf32>
    %cst_446 = arith.constant dense<0.000000e+00> : vector<16x32xf32>
    %904 = tpu.matmul %901, %903, %cst_446 {dimension_numbers = #tpu.dot_dimension_numbers<[1], [0], [0], [1], [0, 0, 1, 1], [], []>} : vector<16x18xf32>, vector<18x32xf32>, vector<16x32xf32> -> vector<16x32xf32>
    %905 = arith.addf %886, %904 : vector<16x32xf32>
    %906 = vector.broadcast %8 : vector<1x32xf32> to vector<16x32xf32>
    %907 = arith.mulf %850, %906 : vector<16x32xf32>
    %cst_447 = arith.constant dense<0.000000e+00> : vector<16x18xf32>
    %908 = tpu.matmul %907, %857, %cst_447 {dimension_numbers = #tpu.dot_dimension_numbers<[1], [1], [0], [0], [0, 0, 1, 0], [], []>} : vector<16x32xf32>, vector<18x32xf32>, vector<16x18xf32> -> vector<16x18xf32>
    %cst_448 = arith.constant 0.353553385 : f32
    %909 = vector.broadcast %cst_448 : f32 to vector<16x18xf32>
    %910 = arith.mulf %908, %909 : vector<16x18xf32>
    %911 = arith.addf %910, %2 : vector<16x18xf32>
    %cst_449 = arith.constant dense<0xFF800000> : vector<16xf32>
    %912 = vector.multi_reduction <maximumf>, %911, %cst_449 [1] : vector<16x18xf32> to vector<16xf32>
    %913 = vector.shape_cast %912 : vector<16xf32> to vector<16x1xf32>
    %914 = vector.broadcast %913 : vector<16x1xf32> to vector<16x18xf32>
    %915 = arith.subf %911, %914 : vector<16x18xf32>
    %916 = math.exp %915 : vector<16x18xf32>
    %cst_450 = arith.constant dense<0.000000e+00> : vector<16xf32>
    %917 = vector.multi_reduction <add>, %916, %cst_450 [1] : vector<16x18xf32> to vector<16xf32>
    %918 = vector.shape_cast %917 : vector<16xf32> to vector<16x1xf32>
    %919 = vector.broadcast %918 : vector<16x1xf32> to vector<16x18xf32>
    %920 = arith.divf %916, %919 : vector<16x18xf32>
    %921 = vector.broadcast %8 : vector<1x32xf32> to vector<18x32xf32>
    %922 = arith.mulf %864, %921 : vector<18x32xf32>
    %cst_451 = arith.constant dense<0.000000e+00> : vector<16x32xf32>
    %923 = tpu.matmul %920, %922, %cst_451 {dimension_numbers = #tpu.dot_dimension_numbers<[1], [0], [0], [1], [0, 0, 1, 1], [], []>} : vector<16x18xf32>, vector<18x32xf32>, vector<16x32xf32> -> vector<16x32xf32>
    %924 = arith.addf %905, %923 : vector<16x32xf32>
    %925 = vector.broadcast %10 : vector<1x32xf32> to vector<16x32xf32>
    %926 = arith.mulf %850, %925 : vector<16x32xf32>
    %cst_452 = arith.constant dense<0.000000e+00> : vector<16x18xf32>
    %927 = tpu.matmul %926, %857, %cst_452 {dimension_numbers = #tpu.dot_dimension_numbers<[1], [1], [0], [0], [0, 0, 1, 0], [], []>} : vector<16x32xf32>, vector<18x32xf32>, vector<16x18xf32> -> vector<16x18xf32>
    %cst_453 = arith.constant 0.353553385 : f32
    %928 = vector.broadcast %cst_453 : f32 to vector<16x18xf32>
    %929 = arith.mulf %927, %928 : vector<16x18xf32>
    %930 = arith.addf %929, %2 : vector<16x18xf32>
    %cst_454 = arith.constant dense<0xFF800000> : vector<16xf32>
    %931 = vector.multi_reduction <maximumf>, %930, %cst_454 [1] : vector<16x18xf32> to vector<16xf32>
    %932 = vector.shape_cast %931 : vector<16xf32> to vector<16x1xf32>
    %933 = vector.broadcast %932 : vector<16x1xf32> to vector<16x18xf32>
    %934 = arith.subf %930, %933 : vector<16x18xf32>
    %935 = math.exp %934 : vector<16x18xf32>
    %cst_455 = arith.constant dense<0.000000e+00> : vector<16xf32>
    %936 = vector.multi_reduction <add>, %935, %cst_455 [1] : vector<16x18xf32> to vector<16xf32>
    %937 = vector.shape_cast %936 : vector<16xf32> to vector<16x1xf32>
    %938 = vector.broadcast %937 : vector<16x1xf32> to vector<16x18xf32>
    %939 = arith.divf %935, %938 : vector<16x18xf32>
    %940 = vector.broadcast %10 : vector<1x32xf32> to vector<18x32xf32>
    %941 = arith.mulf %864, %940 : vector<18x32xf32>
    %cst_456 = arith.constant dense<0.000000e+00> : vector<16x32xf32>
    %942 = tpu.matmul %939, %941, %cst_456 {dimension_numbers = #tpu.dot_dimension_numbers<[1], [0], [0], [1], [0, 0, 1, 1], [], []>} : vector<16x18xf32>, vector<18x32xf32>, vector<16x32xf32> -> vector<16x32xf32>
    %943 = arith.addf %924, %942 : vector<16x32xf32>
    %cst_457 = arith.constant dense<0.000000e+00> : vector<16x32xf32>
    %944 = tpu.matmul %943, %866, %cst_457 {dimension_numbers = #tpu.dot_dimension_numbers<[1], [0], [0], [1], [0, 0, 1, 1], [], []>} : vector<16x32xf32>, vector<32x32xf32>, vector<16x32xf32> -> vector<16x32xf32>
    %945 = vector.broadcast %868 : vector<1x32xf32> to vector<16x32xf32>
    %946 = arith.addf %944, %945 : vector<16x32xf32>
    %947 = arith.addf %817, %946 : vector<16x32xf32>
    %c2_458 = arith.constant 2 : index
    %c0_459 = arith.constant 0 : index
    %c0_460 = arith.constant 0 : index
    %948 = vector.load %arg30[%c2_458, %c0_459, %c0_460] : memref<4x1x32xf32, #tpu.memory_space<vmem>>, vector<1x1x32xf32>
    %949 = vector.shape_cast %948 : vector<1x1x32xf32> to vector<1x32xf32>
    %c3_461 = arith.constant 3 : index
    %c0_462 = arith.constant 0 : index
    %c0_463 = arith.constant 0 : index
    %950 = vector.load %arg30[%c3_461, %c0_462, %c0_463] : memref<4x1x32xf32, #tpu.memory_space<vmem>>, vector<1x1x32xf32>
    %951 = vector.shape_cast %950 : vector<1x1x32xf32> to vector<1x32xf32>
    %cst_464 = arith.constant dense<0.000000e+00> : vector<16xf32>
    %952 = vector.multi_reduction <add>, %947, %cst_464 [1] : vector<16x32xf32> to vector<16xf32>
    %953 = vector.shape_cast %952 : vector<16xf32> to vector<16x1xf32>
    %cst_465 = arith.constant 3.200000e+01 : f32
    %954 = vector.broadcast %cst_465 : f32 to vector<16x1xf32>
    %955 = arith.divf %953, %954 : vector<16x1xf32>
    %956 = vector.broadcast %955 : vector<16x1xf32> to vector<16x32xf32>
    %957 = arith.subf %947, %956 : vector<16x32xf32>
    %958 = arith.mulf %957, %957 : vector<16x32xf32>
    %cst_466 = arith.constant dense<0.000000e+00> : vector<16xf32>
    %959 = vector.multi_reduction <add>, %958, %cst_466 [1] : vector<16x32xf32> to vector<16xf32>
    %960 = vector.shape_cast %959 : vector<16xf32> to vector<16x1xf32>
    %cst_467 = arith.constant 3.200000e+01 : f32
    %961 = vector.broadcast %cst_467 : f32 to vector<16x1xf32>
    %962 = arith.divf %960, %961 : vector<16x1xf32>
    %963 = vector.broadcast %955 : vector<16x1xf32> to vector<16x32xf32>
    %964 = arith.subf %947, %963 : vector<16x32xf32>
    %cst_468 = arith.constant 9.99999974E-6 : f32
    %965 = vector.broadcast %cst_468 : f32 to vector<16x1xf32>
    %966 = arith.addf %962, %965 : vector<16x1xf32>
    %967 = math.rsqrt %966 : vector<16x1xf32>
    %968 = vector.broadcast %967 : vector<16x1xf32> to vector<16x32xf32>
    %969 = arith.mulf %964, %968 : vector<16x32xf32>
    %970 = vector.broadcast %949 : vector<1x32xf32> to vector<16x32xf32>
    %971 = arith.mulf %969, %970 : vector<16x32xf32>
    %972 = vector.broadcast %951 : vector<1x32xf32> to vector<16x32xf32>
    %973 = arith.addf %971, %972 : vector<16x32xf32>
    %c1_469 = arith.constant 1 : index
    %c0_470 = arith.constant 0 : index
    %c0_471 = arith.constant 0 : index
    %974 = vector.load %arg31[%c1_469, %c0_470, %c0_471] : memref<2x32x64xf32, #tpu.memory_space<vmem>>, vector<1x32x64xf32>
    %975 = vector.shape_cast %974 : vector<1x32x64xf32> to vector<32x64xf32>
    %cst_472 = arith.constant dense<0.000000e+00> : vector<16x64xf32>
    %976 = tpu.matmul %973, %975, %cst_472 {dimension_numbers = #tpu.dot_dimension_numbers<[1], [0], [0], [1], [0, 0, 1, 1], [], []>} : vector<16x32xf32>, vector<32x64xf32>, vector<16x64xf32> -> vector<16x64xf32>
    %c1_473 = arith.constant 1 : index
    %c0_474 = arith.constant 0 : index
    %c0_475 = arith.constant 0 : index
    %977 = vector.load %arg32[%c1_473, %c0_474, %c0_475] : memref<2x1x64xf32, #tpu.memory_space<vmem>>, vector<1x1x64xf32>
    %978 = vector.shape_cast %977 : vector<1x1x64xf32> to vector<1x64xf32>
    %979 = vector.broadcast %978 : vector<1x64xf32> to vector<16x64xf32>
    %980 = arith.addf %976, %979 : vector<16x64xf32>
    %cst_476 = arith.constant 0.000000e+00 : f32
    %981 = vector.broadcast %cst_476 : f32 to vector<16x64xf32>
    %982 = arith.maximumf %980, %981 : vector<16x64xf32>
    %c1_477 = arith.constant 1 : index
    %c0_478 = arith.constant 0 : index
    %c0_479 = arith.constant 0 : index
    %983 = vector.load %arg33[%c1_477, %c0_478, %c0_479] : memref<2x64x32xf32, #tpu.memory_space<vmem>>, vector<1x64x32xf32>
    %984 = vector.shape_cast %983 : vector<1x64x32xf32> to vector<64x32xf32>
    %cst_480 = arith.constant dense<0.000000e+00> : vector<16x32xf32>
    %985 = tpu.matmul %982, %984, %cst_480 {dimension_numbers = #tpu.dot_dimension_numbers<[1], [0], [0], [1], [0, 0, 1, 1], [], []>} : vector<16x64xf32>, vector<64x32xf32>, vector<16x32xf32> -> vector<16x32xf32>
    %986 = arith.addf %947, %985 : vector<16x32xf32>
    %c1_481 = arith.constant 1 : index
    %c0_482 = arith.constant 0 : index
    %c0_483 = arith.constant 0 : index
    %987 = vector.load %arg34[%c1_481, %c0_482, %c0_483] : memref<2x1x32xf32, #tpu.memory_space<vmem>>, vector<1x1x32xf32>
    %988 = vector.shape_cast %987 : vector<1x1x32xf32> to vector<1x32xf32>
    %989 = vector.broadcast %988 : vector<1x32xf32> to vector<16x32xf32>
    %990 = arith.addf %986, %989 : vector<16x32xf32>
    %c0_484 = arith.constant 0 : index
    %c0_485 = arith.constant 0 : index
    %c0_486 = arith.constant 0 : index
    %991 = vector.load %arg35[%c0_484, %c0_485, %c0_486] : memref<2x1x32xf32, #tpu.memory_space<vmem>>, vector<1x1x32xf32>
    %992 = vector.shape_cast %991 : vector<1x1x32xf32> to vector<1x32xf32>
    %c1_487 = arith.constant 1 : index
    %c0_488 = arith.constant 0 : index
    %c0_489 = arith.constant 0 : index
    %993 = vector.load %arg35[%c1_487, %c0_488, %c0_489] : memref<2x1x32xf32, #tpu.memory_space<vmem>>, vector<1x1x32xf32>
    %994 = vector.shape_cast %993 : vector<1x1x32xf32> to vector<1x32xf32>
    %cst_490 = arith.constant dense<0.000000e+00> : vector<16xf32>
    %995 = vector.multi_reduction <add>, %990, %cst_490 [1] : vector<16x32xf32> to vector<16xf32>
    %996 = vector.shape_cast %995 : vector<16xf32> to vector<16x1xf32>
    %cst_491 = arith.constant 3.200000e+01 : f32
    %997 = vector.broadcast %cst_491 : f32 to vector<16x1xf32>
    %998 = arith.divf %996, %997 : vector<16x1xf32>
    %999 = vector.broadcast %998 : vector<16x1xf32> to vector<16x32xf32>
    %1000 = arith.subf %990, %999 : vector<16x32xf32>
    %1001 = arith.mulf %1000, %1000 : vector<16x32xf32>
    %cst_492 = arith.constant dense<0.000000e+00> : vector<16xf32>
    %1002 = vector.multi_reduction <add>, %1001, %cst_492 [1] : vector<16x32xf32> to vector<16xf32>
    %1003 = vector.shape_cast %1002 : vector<16xf32> to vector<16x1xf32>
    %cst_493 = arith.constant 3.200000e+01 : f32
    %1004 = vector.broadcast %cst_493 : f32 to vector<16x1xf32>
    %1005 = arith.divf %1003, %1004 : vector<16x1xf32>
    %1006 = vector.broadcast %998 : vector<16x1xf32> to vector<16x32xf32>
    %1007 = arith.subf %990, %1006 : vector<16x32xf32>
    %cst_494 = arith.constant 9.99999974E-6 : f32
    %1008 = vector.broadcast %cst_494 : f32 to vector<16x1xf32>
    %1009 = arith.addf %1005, %1008 : vector<16x1xf32>
    %1010 = math.rsqrt %1009 : vector<16x1xf32>
    %1011 = vector.broadcast %1010 : vector<16x1xf32> to vector<16x32xf32>
    %1012 = arith.mulf %1007, %1011 : vector<16x32xf32>
    %1013 = vector.broadcast %992 : vector<1x32xf32> to vector<16x32xf32>
    %1014 = arith.mulf %1012, %1013 : vector<16x32xf32>
    %1015 = vector.broadcast %994 : vector<1x32xf32> to vector<16x32xf32>
    %1016 = arith.addf %1014, %1015 : vector<16x32xf32>
    %c0_495 = arith.constant 0 : index
    %c0_496 = arith.constant 0 : index
    %c0_497 = arith.constant 0 : index
    %1017 = vector.load %arg36[%c0_495, %c0_496, %c0_497] : memref<2x1x32xf32, #tpu.memory_space<vmem>>, vector<1x1x32xf32>
    %1018 = vector.shape_cast %1017 : vector<1x1x32xf32> to vector<1x32xf32>
    %c1_498 = arith.constant 1 : index
    %c0_499 = arith.constant 0 : index
    %c0_500 = arith.constant 0 : index
    %1019 = vector.load %arg36[%c1_498, %c0_499, %c0_500] : memref<2x1x32xf32, #tpu.memory_space<vmem>>, vector<1x1x32xf32>
    %1020 = vector.shape_cast %1019 : vector<1x1x32xf32> to vector<1x32xf32>
    %cst_501 = arith.constant dense<0.000000e+00> : vector<16xf32>
    %1021 = vector.multi_reduction <add>, %1016, %cst_501 [1] : vector<16x32xf32> to vector<16xf32>
    %1022 = vector.shape_cast %1021 : vector<16xf32> to vector<16x1xf32>
    %cst_502 = arith.constant 3.200000e+01 : f32
    %1023 = vector.broadcast %cst_502 : f32 to vector<16x1xf32>
    %1024 = arith.divf %1022, %1023 : vector<16x1xf32>
    %1025 = vector.broadcast %1024 : vector<16x1xf32> to vector<16x32xf32>
    %1026 = arith.subf %1016, %1025 : vector<16x32xf32>
    %1027 = arith.mulf %1026, %1026 : vector<16x32xf32>
    %cst_503 = arith.constant dense<0.000000e+00> : vector<16xf32>
    %1028 = vector.multi_reduction <add>, %1027, %cst_503 [1] : vector<16x32xf32> to vector<16xf32>
    %1029 = vector.shape_cast %1028 : vector<16xf32> to vector<16x1xf32>
    %cst_504 = arith.constant 3.200000e+01 : f32
    %1030 = vector.broadcast %cst_504 : f32 to vector<16x1xf32>
    %1031 = arith.divf %1029, %1030 : vector<16x1xf32>
    %1032 = vector.broadcast %1024 : vector<16x1xf32> to vector<16x32xf32>
    %1033 = arith.subf %1016, %1032 : vector<16x32xf32>
    %cst_505 = arith.constant 9.99999974E-6 : f32
    %1034 = vector.broadcast %cst_505 : f32 to vector<16x1xf32>
    %1035 = arith.addf %1031, %1034 : vector<16x1xf32>
    %1036 = math.rsqrt %1035 : vector<16x1xf32>
    %1037 = vector.broadcast %1036 : vector<16x1xf32> to vector<16x32xf32>
    %1038 = arith.mulf %1033, %1037 : vector<16x32xf32>
    %1039 = vector.broadcast %1018 : vector<1x32xf32> to vector<16x32xf32>
    %1040 = arith.mulf %1038, %1039 : vector<16x32xf32>
    %1041 = vector.broadcast %1020 : vector<1x32xf32> to vector<16x32xf32>
    %1042 = arith.addf %1040, %1041 : vector<16x32xf32>
    %c0_506 = arith.constant 0 : index
    %c0_507 = arith.constant 0 : index
    %1043 = vector.load %arg37[%c0_506, %c0_507] : memref<32x128xf32, #tpu.memory_space<vmem>>, vector<32x128xf32>
    %cst_508 = arith.constant dense<0.000000e+00> : vector<16x128xf32>
    %1044 = tpu.matmul %1042, %1043, %cst_508 {dimension_numbers = #tpu.dot_dimension_numbers<[1], [0], [0], [1], [0, 0, 1, 1], [], []>} : vector<16x32xf32>, vector<32x128xf32>, vector<16x128xf32> -> vector<16x128xf32>
    %c0_509 = arith.constant 0 : index
    %c0_510 = arith.constant 0 : index
    %1045 = vector.load %arg38[%c0_509, %c0_510] : memref<1x128xf32, #tpu.memory_space<vmem>>, vector<1x128xf32>
    %1046 = vector.broadcast %1045 : vector<1x128xf32> to vector<16x128xf32>
    %1047 = arith.addf %1044, %1046 : vector<16x128xf32>
    %c0_511 = arith.constant 0 : index
    %c0_512 = arith.constant 0 : index
    %1048 = vector.load %arg39[%c0_511, %c0_512] : memref<16x128xf32, #tpu.memory_space<vmem>>, vector<16x128xf32>
    tpu.vector_store %arg39[%c0_511, %c0_512], %1047 {strides = array<i32>} : memref<16x128xf32, #tpu.memory_space<vmem>>, vector<16x128xf32>,
    return
  }
  func.func @transform_0(%arg0: i32) -> (i32, i32) {
    %c0_i32 = arith.constant 0 : i32
    %c0_i32_0 = arith.constant 0 : i32
    %c0_i32_1 = arith.constant 0 : i32
    return %c0_i32, %c0_i32_0 : i32, i32
  }
  func.func @transform_1(%arg0: i32) -> (i32, i32) {
    %c0_i32 = arith.constant 0 : i32
    %c0_i32_0 = arith.constant 0 : i32
    %c0_i32_1 = arith.constant 0 : i32
    return %c0_i32, %c0_i32_0 : i32, i32
  }
  func.func @transform_2(%arg0: i32) -> (i32, i32) {
    %c0_i32 = arith.constant 0 : i32
    %c0_i32_0 = arith.constant 0 : i32
    %c0_i32_1 = arith.constant 0 : i32
    return %c0_i32, %c0_i32_0 : i32, i32
  }
  func.func @transform_3(%arg0: i32) -> (i32, i32) {
    %c0_i32 = arith.constant 0 : i32
    %c0_i32_0 = arith.constant 0 : i32
    %c0_i32_1 = arith.constant 0 : i32
    return %c0_i32, %c0_i32_0 : i32, i32
  }
  func.func @transform_4(%arg0: i32) -> (i32, i32) {
    %c0_i32 = arith.constant 0 : i32
    %c0_i32_0 = arith.constant 0 : i32
    %c0_i32_1 = arith.constant 0 : i32
    return %c0_i32, %c0_i32_0 : i32, i32
  }
  func.func @transform_5(%arg0: i32) -> (i32, i32, i32) {
    %c0_i32 = arith.constant 0 : i32
    %c0_i32_0 = arith.constant 0 : i32
    %c0_i32_1 = arith.constant 0 : i32
    %c0_i32_2 = arith.constant 0 : i32
    return %c0_i32, %c0_i32_0, %c0_i32_1 : i32, i32, i32
  }
  func.func @transform_6(%arg0: i32) -> (i32, i32, i32) {
    %c0_i32 = arith.constant 0 : i32
    %c0_i32_0 = arith.constant 0 : i32
    %c0_i32_1 = arith.constant 0 : i32
    %c0_i32_2 = arith.constant 0 : i32
    return %c0_i32, %c0_i32_0, %c0_i32_1 : i32, i32, i32
  }
  func.func @transform_7(%arg0: i32) -> (i32, i32, i32) {
    %c0_i32 = arith.constant 0 : i32
    %c0_i32_0 = arith.constant 0 : i32
    %c0_i32_1 = arith.constant 0 : i32
    %c0_i32_2 = arith.constant 0 : i32
    return %c0_i32, %c0_i32_0, %c0_i32_1 : i32, i32, i32
  }
  func.func @transform_8(%arg0: i32) -> (i32, i32, i32) {
    %c0_i32 = arith.constant 0 : i32
    %c0_i32_0 = arith.constant 0 : i32
    %c0_i32_1 = arith.constant 0 : i32
    %c0_i32_2 = arith.constant 0 : i32
    return %c0_i32, %c0_i32_0, %c0_i32_1 : i32, i32, i32
  }
  func.func @transform_9(%arg0: i32) -> (i32, i32, i32) {
    %c0_i32 = arith.constant 0 : i32
    %c0_i32_0 = arith.constant 0 : i32
    %c0_i32_1 = arith.constant 0 : i32
    %c0_i32_2 = arith.constant 0 : i32
    return %c0_i32, %c0_i32_0, %c0_i32_1 : i32, i32, i32
  }
  func.func @transform_10(%arg0: i32) -> (i32, i32, i32) {
    %c0_i32 = arith.constant 0 : i32
    %c0_i32_0 = arith.constant 0 : i32
    %c0_i32_1 = arith.constant 0 : i32
    %c0_i32_2 = arith.constant 0 : i32
    return %c0_i32, %c0_i32_0, %c0_i32_1 : i32, i32, i32
  }
  func.func @transform_11(%arg0: i32) -> (i32, i32, i32) {
    %c0_i32 = arith.constant 0 : i32
    %c0_i32_0 = arith.constant 0 : i32
    %c0_i32_1 = arith.constant 0 : i32
    %c0_i32_2 = arith.constant 0 : i32
    return %c0_i32, %c0_i32_0, %c0_i32_1 : i32, i32, i32
  }
  func.func @transform_12(%arg0: i32) -> (i32, i32, i32) {
    %c0_i32 = arith.constant 0 : i32
    %c0_i32_0 = arith.constant 0 : i32
    %c0_i32_1 = arith.constant 0 : i32
    %c0_i32_2 = arith.constant 0 : i32
    return %c0_i32, %c0_i32_0, %c0_i32_1 : i32, i32, i32
  }
  func.func @transform_13(%arg0: i32) -> (i32, i32, i32) {
    %c0_i32 = arith.constant 0 : i32
    %c0_i32_0 = arith.constant 0 : i32
    %c0_i32_1 = arith.constant 0 : i32
    %c0_i32_2 = arith.constant 0 : i32
    return %c0_i32, %c0_i32_0, %c0_i32_1 : i32, i32, i32
  }
  func.func @transform_14(%arg0: i32) -> (i32, i32, i32) {
    %c0_i32 = arith.constant 0 : i32
    %c0_i32_0 = arith.constant 0 : i32
    %c0_i32_1 = arith.constant 0 : i32
    %c0_i32_2 = arith.constant 0 : i32
    return %c0_i32, %c0_i32_0, %c0_i32_1 : i32, i32, i32
  }
  func.func @transform_15(%arg0: i32) -> (i32, i32, i32) {
    %c0_i32 = arith.constant 0 : i32
    %c0_i32_0 = arith.constant 0 : i32
    %c0_i32_1 = arith.constant 0 : i32
    %c0_i32_2 = arith.constant 0 : i32
    return %c0_i32, %c0_i32_0, %c0_i32_1 : i32, i32, i32
  }
  func.func @transform_16(%arg0: i32) -> (i32, i32, i32) {
    %c0_i32 = arith.constant 0 : i32
    %c0_i32_0 = arith.constant 0 : i32
    %c0_i32_1 = arith.constant 0 : i32
    %c0_i32_2 = arith.constant 0 : i32
    return %c0_i32, %c0_i32_0, %c0_i32_1 : i32, i32, i32
  }
  func.func @transform_17(%arg0: i32) -> (i32, i32, i32) {
    %c0_i32 = arith.constant 0 : i32
    %c0_i32_0 = arith.constant 0 : i32
    %c0_i32_1 = arith.constant 0 : i32
    %c0_i32_2 = arith.constant 0 : i32
    return %c0_i32, %c0_i32_0, %c0_i32_1 : i32, i32, i32
  }
  func.func @transform_18(%arg0: i32) -> (i32, i32, i32) {
    %c0_i32 = arith.constant 0 : i32
    %c0_i32_0 = arith.constant 0 : i32
    %c0_i32_1 = arith.constant 0 : i32
    %c0_i32_2 = arith.constant 0 : i32
    return %c0_i32, %c0_i32_0, %c0_i32_1 : i32, i32, i32
  }
  func.func @transform_19(%arg0: i32) -> (i32, i32, i32) {
    %c0_i32 = arith.constant 0 : i32
    %c0_i32_0 = arith.constant 0 : i32
    %c0_i32_1 = arith.constant 0 : i32
    %c0_i32_2 = arith.constant 0 : i32
    return %c0_i32, %c0_i32_0, %c0_i32_1 : i32, i32, i32
  }
  func.func @transform_20(%arg0: i32) -> (i32, i32, i32) {
    %c0_i32 = arith.constant 0 : i32
    %c0_i32_0 = arith.constant 0 : i32
    %c0_i32_1 = arith.constant 0 : i32
    %c0_i32_2 = arith.constant 0 : i32
    return %c0_i32, %c0_i32_0, %c0_i32_1 : i32, i32, i32
  }
  func.func @transform_21(%arg0: i32) -> (i32, i32, i32) {
    %c0_i32 = arith.constant 0 : i32
    %c0_i32_0 = arith.constant 0 : i32
    %c0_i32_1 = arith.constant 0 : i32
    %c0_i32_2 = arith.constant 0 : i32
    return %c0_i32, %c0_i32_0, %c0_i32_1 : i32, i32, i32
  }
  func.func @transform_22(%arg0: i32) -> (i32, i32, i32) {
    %c0_i32 = arith.constant 0 : i32
    %c0_i32_0 = arith.constant 0 : i32
    %c0_i32_1 = arith.constant 0 : i32
    %c0_i32_2 = arith.constant 0 : i32
    return %c0_i32, %c0_i32_0, %c0_i32_1 : i32, i32, i32
  }
  func.func @transform_23(%arg0: i32) -> (i32, i32, i32) {
    %c0_i32 = arith.constant 0 : i32
    %c0_i32_0 = arith.constant 0 : i32
    %c0_i32_1 = arith.constant 0 : i32
    %c0_i32_2 = arith.constant 0 : i32
    return %c0_i32, %c0_i32_0, %c0_i32_1 : i32, i32, i32
  }
  func.func @transform_24(%arg0: i32) -> (i32, i32, i32) {
    %c0_i32 = arith.constant 0 : i32
    %c0_i32_0 = arith.constant 0 : i32
    %c0_i32_1 = arith.constant 0 : i32
    %c0_i32_2 = arith.constant 0 : i32
    return %c0_i32, %c0_i32_0, %c0_i32_1 : i32, i32, i32
  }
  func.func @transform_25(%arg0: i32) -> (i32, i32, i32) {
    %c0_i32 = arith.constant 0 : i32
    %c0_i32_0 = arith.constant 0 : i32
    %c0_i32_1 = arith.constant 0 : i32
    %c0_i32_2 = arith.constant 0 : i32
    return %c0_i32, %c0_i32_0, %c0_i32_1 : i32, i32, i32
  }
  func.func @transform_26(%arg0: i32) -> (i32, i32, i32) {
    %c0_i32 = arith.constant 0 : i32
    %c0_i32_0 = arith.constant 0 : i32
    %c0_i32_1 = arith.constant 0 : i32
    %c0_i32_2 = arith.constant 0 : i32
    return %c0_i32, %c0_i32_0, %c0_i32_1 : i32, i32, i32
  }
  func.func @transform_27(%arg0: i32) -> (i32, i32, i32) {
    %c0_i32 = arith.constant 0 : i32
    %c0_i32_0 = arith.constant 0 : i32
    %c0_i32_1 = arith.constant 0 : i32
    %c0_i32_2 = arith.constant 0 : i32
    return %c0_i32, %c0_i32_0, %c0_i32_1 : i32, i32, i32
  }
  func.func @transform_28(%arg0: i32) -> (i32, i32, i32) {
    %c0_i32 = arith.constant 0 : i32
    %c0_i32_0 = arith.constant 0 : i32
    %c0_i32_1 = arith.constant 0 : i32
    %c0_i32_2 = arith.constant 0 : i32
    return %c0_i32, %c0_i32_0, %c0_i32_1 : i32, i32, i32
  }
  func.func @transform_29(%arg0: i32) -> (i32, i32, i32) {
    %c0_i32 = arith.constant 0 : i32
    %c0_i32_0 = arith.constant 0 : i32
    %c0_i32_1 = arith.constant 0 : i32
    %c0_i32_2 = arith.constant 0 : i32
    return %c0_i32, %c0_i32_0, %c0_i32_1 : i32, i32, i32
  }
  func.func @transform_30(%arg0: i32) -> (i32, i32, i32) {
    %c0_i32 = arith.constant 0 : i32
    %c0_i32_0 = arith.constant 0 : i32
    %c0_i32_1 = arith.constant 0 : i32
    %c0_i32_2 = arith.constant 0 : i32
    return %c0_i32, %c0_i32_0, %c0_i32_1 : i32, i32, i32
  }
  func.func @transform_31(%arg0: i32) -> (i32, i32, i32) {
    %c0_i32 = arith.constant 0 : i32
    %c0_i32_0 = arith.constant 0 : i32
    %c0_i32_1 = arith.constant 0 : i32
    %c0_i32_2 = arith.constant 0 : i32
    return %c0_i32, %c0_i32_0, %c0_i32_1 : i32, i32, i32
  }
  func.func @transform_32(%arg0: i32) -> (i32, i32, i32) {
    %c0_i32 = arith.constant 0 : i32
    %c0_i32_0 = arith.constant 0 : i32
    %c0_i32_1 = arith.constant 0 : i32
    %c0_i32_2 = arith.constant 0 : i32
    return %c0_i32, %c0_i32_0, %c0_i32_1 : i32, i32, i32
  }
  func.func @transform_33(%arg0: i32) -> (i32, i32, i32) {
    %c0_i32 = arith.constant 0 : i32
    %c0_i32_0 = arith.constant 0 : i32
    %c0_i32_1 = arith.constant 0 : i32
    %c0_i32_2 = arith.constant 0 : i32
    return %c0_i32, %c0_i32_0, %c0_i32_1 : i32, i32, i32
  }
  func.func @transform_34(%arg0: i32) -> (i32, i32, i32) {
    %c0_i32 = arith.constant 0 : i32
    %c0_i32_0 = arith.constant 0 : i32
    %c0_i32_1 = arith.constant 0 : i32
    %c0_i32_2 = arith.constant 0 : i32
    return %c0_i32, %c0_i32_0, %c0_i32_1 : i32, i32, i32
  }
  func.func @transform_35(%arg0: i32) -> (i32, i32, i32) {
    %c0_i32 = arith.constant 0 : i32
    %c0_i32_0 = arith.constant 0 : i32
    %c0_i32_1 = arith.constant 0 : i32
    %c0_i32_2 = arith.constant 0 : i32
    return %c0_i32, %c0_i32_0, %c0_i32_1 : i32, i32, i32
  }
  func.func @transform_36(%arg0: i32) -> (i32, i32) {
    %c0_i32 = arith.constant 0 : i32
    %c0_i32_0 = arith.constant 0 : i32
    %c0_i32_1 = arith.constant 0 : i32
    return %c0_i32, %c0_i32_0 : i32, i32
  }
  func.func @transform_37(%arg0: i32) -> (i32, i32) {
    %c0_i32 = arith.constant 0 : i32
    %c0_i32_0 = arith.constant 0 : i32
    %c0_i32_1 = arith.constant 0 : i32
    return %c0_i32, %c0_i32_0 : i32, i32
  }
  func.func @transform_38(%arg0: i32) -> (i32, i32) {
    %c0_i32 = arith.constant 0 : i32
    %c0_i32_0 = arith.constant 0 : i32
    %c0_i32_1 = arith.constant 0 : i32
    return %c0_i32, %c0_i32_0 : i32, i32
  }
}

</mosaic_0001>

<bundles_post_ra>
// kernel: prefix_lm_forward.2
= control target key start
LH: loop header
LB: loop body
LE: loop exit
PB: predicated region body
PF: predicated region fallthrough
CT: control target
= control target key end

     0   :  { %s2991_s0 = inlined_call_operand.vmem [shape: f32[8,192], index: 0, kind: input, shape index: {}]   ;;  %s2992_s1 = inlined_call_operand.vmem [shape: f32[9,8,8], index: 1, kind: input, shape index: {}]   ;;  %s2993_s2 = inlined_call_operand.vmem [shape: f32[8,32], index: 2, kind: input, shape index: {}]   ;;  %s2994_s3 = inlined_call_operand.vmem [shape: f32[192,64], index: 3, kind: input, shape index: {}]   ;;  %s2995_s4 = inlined_call_operand.vmem [shape: f32[1,64], index: 4, kind: input, shape index: {}]   ;;  %s2996_s5 = inlined_call_operand.vmem [shape: f32[64,64], index: 5, kind: input, shape index: {}]   ;;  %s2997_s6 = inlined_call_operand.vmem [shape: f32[1,64], index: 6, kind: input, shape index: {}]   ;;  %s2998_s7 = inlined_call_operand.hbm [shape: f32[9,64,64], index: 7, kind: input, shape index: {}]   ;;  %s2999_s8 = inlined_call_operand.vmem [shape: f32[1,64], index: 8, kind: input, shape index: {}]   ;;  %s3000_s9 = inlined_call_operand.vmem [shape: f32[64,256], index: 9, kind: input, shape index: {}]   ;;  %s3001_s10 = inlined_call_operand.vmem [shape: f32[1,256], index: 10, kind: input, shape index: {}]   ;;  %s3002_s11 = inlined_call_operand.vmem [shape: f32[64,256], index: 11, kind: input, shape index: {}]   ;;  %s3003_s12 = inlined_call_operand.vmem [shape: f32[1,256], index: 12, kind: input, shape index: {}]   ;;  %s3004_s13 = inlined_call_operand.vmem [shape: f32[256,128], index: 13, kind: input, shape index: {}]   ;;  %s3005_s14 = inlined_call_operand.vmem [shape: f32[1,128], index: 14, kind: input, shape index: {}]   ;;  %s3006_s15 = inlined_call_operand.vmem [shape: f32[9,128,128], index: 15, kind: input, shape index: {}]   ;;  %s3007_s16 = inlined_call_operand.vmem [shape: f32[1,128], index: 16, kind: input, shape index: {}]   ;;  %s3008_s17 = inlined_call_operand.vmem [shape: f32[128,32], index: 17, kind: input, shape index: {}]   ;;  %s3009_s18 = inlined_call_operand.vmem [shape: f32[1,32], index: 18, kind: input, shape index: {}]   ;;  %s3010_s19 = inlined_call_operand.vmem [shape: f32[256,32], index: 19, kind: input, shape index: {}]   ;;  %s3011_s20 = inlined_call_operand.hbm [shape: f32[1,32], index: 20, kind: input, shape index: {}]   ;;  %s3012_s21 = inlined_call_operand.vmem [shape: f32[8,32], index: 21, kind: output, shape index: {}]  }
   0x1   :  { %3017 = sst [smem:[#allocation8_spill]] %s2991_s0 }
   0x2   :  { %3018 = sst [smem:[#allocation9_spill]] %s2992_s1 }
   0x3   :  { %3019 = sst [smem:[#allocation10_spill]] %s2993_s2 }
   0x4   :  { %3020 = sst [smem:[#allocation11_spill]] %s2994_s3 }
   0x5   :  { %3021 = sst [smem:[#allocation12_spill]] %s2995_s4 }
   0x6   :  { %3022 = sst [smem:[#allocation13_spill]] %s2996_s5 }
   0x7   :  { %26 = vsyncpa [#allocation3], 0  ;;  %s46_s26 = sshll.u32 %s2998_s7, 4  ;;  %s47_s26 = int_to_ptr.hbm [resolvable:$true] %s46_s26 }
   0x8   :  { %27 = vsyncpa [#allocation5], 0  ;;  %s1828_s27 = smov [#allocation2]   ;;  %s84_s0 = sshll.u32 %s3011_s20, 4  ;;  %s85_s0 = int_to_ptr.hbm [resolvable:$true] %s84_s0 }
   0x9   :  { %s48_s3 = sshll.u32 %s1828_s27, 4  ;;  %s1829_s4 = smov 128   ;;  %s49_s3 = int_to_ptr.vmem [resolvable:$true] %s48_s3 }
   0xa   :  { %s1830_s30 = smov 8   ;;  %s1831_s5 = smov [#allocation4]  }
   0xb   :  { %54 = dma.hbm_to_vmem [thread:$0]  %s47_s26, 9216, %s49_s3, [#allocation3], %s1829_s4, %s1829_s4, %s1830_s30  }
   0xc   :  { %s86_s22 = sshll.u32 %s1831_s5, 4  ;;  %s87_s22 = int_to_ptr.vmem [resolvable:$true] %s86_s22 }
   0xd   :  { %89 = dma.hbm_to_vmem [thread:$0]  %s85_s0, 16, %s87_s22, [#allocation5]  }
   0xe   :  { %1824 = dma.done.wait [#allocation3], 9216  }
   0xf   :  { %1825 = vsyncadd [#allocation3], 4294958080 }
  0x10   :  { %1826 = dma.done.wait [#allocation5], 16  }
  0x11   :  { %1827 = vsyncadd [#allocation5], 4294967280  ;;  %s3023_s1 = sld [smem:[#allocation11_spill]]  ;;  %vm128_vm0 = vcmask 523264   ;;  %v275_v34 = vld [vmem:[#allocation2 + $0x38] sm:$0xff]  ;;  %v274_v36 = vld [vmem:[#allocation2 + $0x30] sm:$0xff] }
  0x12   :  { %s3024_s3 = sld [smem:[#allocation13_spill]]  ;;  %v336_v35 = vld [vmem:[#allocation2 + $0x78] sm:$0xff]  ;;  %287 = vmatpush.msra.mxu3 %v275_v34  ;;  %v335_v37 = vld [vmem:[#allocation2 + $0x70] sm:$0xff]  ;;  %v273_v38 = vld [vmem:[#allocation2 + $0x28] sm:$0xff]  ;;  %vm244_vm1 = vcmask 64512   ;;  %vm1588_vm2 = vcmask 261120  }
  0x13   :  { %s3025_s24 = sld [smem:[#allocation8_spill]]  ;;  %v334_v39 = vld [vmem:[#allocation2 + $0x68] sm:$0xff]  ;;  %v272_v40 = vld [vmem:[#allocation2 + $0x20] sm:$0xff]  ;;  %v271_v42 = vld [vmem:[#allocation2 + $0x18] sm:$0xff] }
  0x14   :  { %288 = vmatpush.msra.mxu3 %v274_v36  ;;  %v333_v41 = vld [vmem:[#allocation2 + $0x60] sm:$0xff]  ;;  %v332_v43 = vld [vmem:[#allocation2 + $0x58] sm:$0xff]  ;;  %v270_v49 = vld [vmem:[#allocation2 + $0x10] sm:$0xff]  ;;  %s3027_s5 = sld [smem:[#allocation9_spill]] }
  0x15   :  { %v331_v50 = vld [vmem:[#allocation2 + $0x50] sm:$0xff]  ;;  %v269_v51 = vld [vmem:[#allocation2 + $0x8] sm:$0xff]  ;;  %v268_v53 = vld [vmem:[#allocation2] sm:$0xff]  ;;  %s3028_s22 = sld [smem:[#allocation10_spill]] }
  0x16   :  { %289 = vmatpush.msra.mxu3 %v273_v38  ;;  %v330_v52 = vld [vmem:[#allocation2 + $0x48] sm:$0xff]  ;;  %v329_v54 = vld [vmem:[#allocation2 + $0x40] sm:$0xff]  ;;  %v452_v61 = vld [vmem:[#allocation2 + $0xf8] sm:$0xff] }
  0x17   :  { %v115_v0 = vld [vmem:[%s3023_s1 + $0x78] sm:$0xff]  ;;  %v114_v1 = vld [vmem:[%s3023_s1 + $0x70] sm:$0xff]  ;;  %v113_v2 = vld [vmem:[%s3023_s1 + $0x68] sm:$0xff] }
  0x18   :  { %132 = vmatpush.msra.mxu0 %v115_v0  ;;  %v123_v3 = vld [vmem:[%s3023_s1 + $0xb8] sm:$0xff]  ;;  %v112_v4 = vld [vmem:[%s3023_s1 + $0x60] sm:$0xff]  ;;  %v122_v5 = vld [vmem:[%s3023_s1 + $0xb0] sm:$0xff]  ;;  %290 = vmatpush.msra.mxu3 %v272_v40 }
  0x19   :  { %160 = vmatpush.msra.mxu1 %v123_v3  ;;  %v121_v6 = vld [vmem:[%s3023_s1 + $0xa8] sm:$0xff]  ;;  %v111_v7 = vld [vmem:[%s3023_s1 + $0x58] sm:$0xff]  ;;  %v120_v8 = vld [vmem:[%s3023_s1 + $0xa0] sm:$0xff] }
  0x1a   :  { %133 = vmatpush.msra.mxu0 %v114_v1  ;;  %v110_v9 = vld [vmem:[%s3023_s1 + $0x50] sm:$0xff]  ;;  %v109_v10 = vld [vmem:[%s3023_s1 + $0x48] sm:$0xff]  ;;  %v179_v11 = vld [vmem:[%s3024_s3 + $0x38] sm:$0xff]  ;;  %291 = vmatpush.msra.mxu3 %v271_v42 }
  0x1b   :  { %161 = vmatpush.msra.mxu1 %v122_v5  ;;  %v119_v12 = vld [vmem:[%s3023_s1 + $0x98] sm:$0xff]  ;;  %v118_v13 = vld [vmem:[%s3023_s1 + $0x90] sm:$0xff]  ;;  %230 = vmatpush.msra.mxu2 %v179_v11  ;;  %v108_v15 = vld [vmem:[%s3023_s1 + $0x40] sm:$0xff] }
  0x1c   :  { %134 = vmatpush.msra.mxu0 %v113_v2  ;;  %v178_v14 = vld [vmem:[%s3024_s3 + $0x30] sm:$0xff]  ;;  %v177_v16 = vld [vmem:[%s3024_s3 + $0x28] sm:$0xff]  ;;  %v176_v17 = vld [vmem:[%s3024_s3 + $0x20] sm:$0xff]  ;;  %292 = vmatpush.msra.mxu3 %v270_v49 }
  0x1d   :  { %162 = vmatpush.msra.mxu1 %v121_v6  ;;  %231 = vmatpush.msra.mxu2 %v178_v14  ;;  %v117_v18 = vld [vmem:[%s3023_s1 + $0x88] sm:$0xff]  ;;  %v107_v19 = vld [vmem:[%s3023_s1 + $0x38] sm:$0xff]  ;;  %v116_v21 = vld [vmem:[%s3023_s1 + $0x80] sm:$0xff] }
  0x1e   :  { %135 = vmatpush.msra.mxu0 %v112_v4  ;;  %v175_v20 = vld [vmem:[%s3024_s3 + $0x18] sm:$0xff]  ;;  %v106_v22 = vld [vmem:[%s3023_s1 + $0x30] sm:$0xff]  ;;  %v99_v23 = vld [vmem:[%s3025_s24 + $0x8] sm:$0xff]  ;;  %293 = vmatpush.msra.mxu3 %v269_v51 }
  0x1f   :  { %163 = vmatpush.msra.mxu1 %v120_v8  ;;  %232 = vmatpush.msra.mxu2 %v177_v16  ;;  %v105_v24 = vld [vmem:[%s3023_s1 + $0x28] sm:$0xff]  ;;  %v104_v25 = vld [vmem:[%s3023_s1 + $0x20] sm:$0xff]  ;;  %v103_v26 = vld [vmem:[%s3023_s1 + $0x18] sm:$0xff] }
  0x20   :  { %136 = vmatpush.msra.mxu0 %v111_v7  ;;  %v102_v27 = vld [vmem:[%s3023_s1 + $0x10] sm:$0xff]  ;;  %v101_v28 = vld [vmem:[%s3023_s1 + $0x8] sm:$0xff]  ;;  %v100_v29 = vld [vmem:[%s3023_s1] sm:$0xff]  ;;  %294 = vmatpush.msra.mxu3 %v268_v53 }
  0x21   :  { %164 = vmatpush.msra.mxu1 %v119_v12  ;;  %233 = vmatpush.msra.mxu2 %v176_v17  ;;  %v98_v30 = vld [vmem:[%s3025_s24] sm:$0xff]  ;;  %v174_v31 = vld [vmem:[%s3024_s3 + $0x10] sm:$0xff]  ;;  %v173_v32 = vld [vmem:[%s3024_s3 + $0x8] sm:$0xff]  ;;  %s3026_s24 = sld [smem:[#allocation12_spill]] }
  0x22   :  { %137 = vmatpush.msra.mxu0 %v110_v9  ;;  %v172_v33 = vld [vmem:[%s3024_s3] sm:$0xff]  ;;  %v2071_v60 = vld [vmem:[%s3027_s5 + $0x10] sm:$0xff]  ;;  %v394_v62 = vld [vmem:[#allocation2 + $0xb8] sm:$0xff] }
  0x23   :  { %165 = vmatpush.msra.mxu1 %v118_v13  ;;  %234 = vmatpush.msra.mxu2 %v175_v20  ;;  %v1770_v55 = vld [vmem:[%s2997_s6] ss:$0 sm:$0xff]  ;;  %v451_v63 = vld [vmem:[#allocation2 + $0xf0] sm:$0xff]  ;;  %v450_v1 = vld [vmem:[#allocation2 + $0xe8] sm:$0xff] }
  0x24   :  { %138 = vmatpush.msra.mxu0 %v109_v10  ;;  %v2066_v59 = vld [vmem:[%s3027_s5] sm:$0xff]  ;;  %v393_v0 = vld [vmem:[#allocation2 + $0xb0] sm:$0xff]  ;;  %v392_v2 = vld [vmem:[#allocation2 + $0xa8] sm:$0xff] }
  0x25   :  { %166 = vmatpush.msra.mxu1 %v117_v18  ;;  %235 = vmatpush.msra.mxu2 %v174_v31  ;;  %v449_v3 = vld [vmem:[#allocation2 + $0xe0] sm:$0xff]  ;;  %v2085_v5 = vld [vmem:[%s3027_s5 + $0x8] sm:$0xff]  ;;  %v448_v6 = vld [vmem:[#allocation2 + $0xd8] sm:$0xff] }
  0x26   :  { %139 = vmatpush.msra.mxu0 %v108_v15  ;;  %v391_v4 = vld [vmem:[#allocation2 + $0xa0] sm:$0xff]  ;;  %v390_v7 = vld [vmem:[#allocation2 + $0x98] sm:$0xff]  ;;  %v447_v8 = vld [vmem:[#allocation2 + $0xd0] sm:$0xff] }
  0x27   :  { %167 = vmatpush.msra.mxu1 %v116_v21  ;;  %236 = vmatpush.msra.mxu2 %v173_v32  ;;  %v1769_v44 = vld [vmem:[%s3026_s24] ss:$0 sm:$0xff]  ;;  %v389_v9 = vld [vmem:[#allocation2 + $0x90] sm:$0xff]  ;;  %v446_v10 = vld [vmem:[#allocation2 + $0xc8] sm:$0xff] }
  0x28   :  { %140 = vmatpush.msra.mxu0 %v107_v19  ;;  %1596 = vmatmul.msk.f32.vlgmr.msra.gmra.mxu1 %vm128_vm0, %v99_v23  ;;  %v388_v11 = vld [vmem:[#allocation2 + $0x88] sm:$0xff]  ;;  %v445_v12 = vld [vmem:[#allocation2 + $0xc0] sm:$0xff]  ;;  %v510_v14 = vld [vmem:[#allocation2 + $0x138] sm:$0xff] }
  0x29   :  { %237 = vmatpush.msra.mxu2 %v172_v33  ;;  %v387_v13 = vld [vmem:[#allocation2 + $0x80] sm:$0xff]  ;;  %v509_v17 = vld [vmem:[#allocation2 + $0x130] sm:$0xff]  ;;  %v508_v18 = vld [vmem:[#allocation2 + $0x128] sm:$0xff] }
  0x2a   :  { %141 = vmatpush.msra.mxu0 %v106_v22  ;;  %v507_v19 = vld [vmem:[#allocation2 + $0x120] sm:$0xff]  ;;  %v2096_v20 = vld [vmem:[%s3027_s5 + $0x18] sm:$0xff]  ;;  %v2101_v21 = vld [vmem:[%s3027_s5 + $0x28] sm:$0xff] }
  0x2b   :  { %348 = vmatpush.msrb.mxu2 %v336_v35  ;;  %v506_v22 = vld [vmem:[#allocation2 + $0x118] sm:$0xff]  ;;  %v2111_v31 = vld [vmem:[%s3027_s5 + $0x20] sm:$0xff]  ;;  %v563_v33 = vld [vmem:[#allocation2 + $0x150] sm:$0xff] }
  0x2c   :  { %142 = vmatpush.msra.mxu0 %v105_v24  ;;  %v568_v23 = vld [vmem:[#allocation2 + $0x178] sm:$0xff]  ;;  %v562_v34 = vld [vmem:[#allocation2 + $0x148] sm:$0xff]  ;;  %v561_v35 = vld [vmem:[#allocation2 + $0x140] sm:$0xff] }
  0x2d   :  { %349 = vmatpush.msrb.mxu2 %v335_v37  ;;  %v564_v32 = vld [vmem:[#allocation2 + $0x158] sm:$0xff]  ;;  %v625_v38 = vld [vmem:[#allocation2 + $0x1b0] sm:$0xff]  ;;  %v1771_v42 = vld [vmem:[%s2999_s8] ss:$0 sm:$0xff] }
  0x2e   :  { %143 = vmatpush.msra.mxu0 %v104_v25  ;;  %v505_v25 = vld [vmem:[#allocation2 + $0x110] sm:$0xff]  ;;  %v626_v37 = vld [vmem:[#allocation2 + $0x1b8] sm:$0xff] }
  0x2f   :  { %350 = vmatpush.msrb.mxu2 %v334_v39  ;;  %v624_v39 = vld [vmem:[#allocation2 + $0x1a8] sm:$0xff]  ;;  %v742_v51 = vld [vmem:[#allocation2 + $0x238] sm:$0xff]  ;;  %v741_v53 = vld [vmem:[#allocation2 + $0x230] sm:$0xff] }
  0x30   :  { %144 = vmatpush.msra.mxu0 %v103_v26  ;;  %v567_v26 = vld [vmem:[#allocation2 + $0x170] sm:$0xff] }
  0x31   :  { %351 = vmatpush.msrb.mxu2 %v333_v41 }
  0x32   :  { %145 = vmatpush.msra.mxu0 %v102_v27  ;;  %v504_v27 = vld [vmem:[#allocation2 + $0x108] sm:$0xff] }
  0x33   :  { %352 = vmatpush.msrb.mxu2 %v332_v43 }
  0x34   :  { %146 = vmatpush.msra.mxu0 %v101_v28  ;;  %v566_v28 = vld [vmem:[#allocation2 + $0x168] sm:$0xff] }
  0x35   :  { %353 = vmatpush.msrb.mxu2 %v331_v50  ;;  %v2134_v50 = vld [vmem:[%s3027_s5 + $0x30] sm:$0xff] }
  0x36   :  { %147 = vmatpush.msra.mxu0 %v100_v29  ;;  %v503_v29 = vld [vmem:[#allocation2 + $0x100] sm:$0xff] }
  0x37   :  { %148 = vmatmul.f32.vlgmr.msra.gmra.mxu0 %v98_v30  ;;  %354 = vmatpush.msrb.mxu2 %v330_v52  ;;  %v565_v30 = vld [vmem:[#allocation2 + $0x160] sm:$0xff] }
  0x39   :  { %355 = vmatpush.msrb.mxu2 %v329_v54  ;;  %v740_v54 = vld [vmem:[#allocation2 + $0x228] sm:$0xff] }
  0xa5   :  { %v169_v46 = vpop.f32.mrf.mxu1 }
  0xb4   :  { %v149_v45 = vpop.f32.mrf.mxu0 }
  0xb5   :  { %v150_v47 = vadd.f32 %v1769_v44, %v149_v45  ;;  %v2124_v45 = vld [vmem:[%s3027_s5 + $0x40] sm:$0xff] }
  0xb7   :  { %v2054_v48 = vadd.f32 %v169_v46, %v150_v47 }
  0xb9   :  { %1597 = vmatmul.msk.f32.vlgmr.msra.gmra.mxu2 %vm128_vm0, %v2054_v48 }
 0x13c   :  { %v239_v56 = vpop.f32.mrf.mxu2 }
 0x13d   :  { %v240_v57 = vadd.f32 %v1770_v55, %v239_v56  ;;  %v739_v55 = vld [vmem:[#allocation2 + $0x220] sm:$0xff]  ;;  %v2142_v56 = vld [vmem:[%s3027_s5 + $0x38] sm:$0xff] }
 0x13f   :  { %v2061_v58 = vmax.f32 %v240_v57, 0.0  ;;  %v738_v57 = vld [vmem:[#allocation2 + $0x218] sm:$0xff] }
 0x141   :  { %263 = vmatpush.msrb.mxu1 %v2061_v58  ;;  %381 = vmatpush.msrb.mxu0 %v2061_v58 }
 0x142   :  { %439 = vmatpush.msrb.mxu3 %v2061_v58  ;;  %497 = vmatpush.msra.mxu2 %v2061_v58 }
 0x143   :  { %1598 = vmatmul.msk.f32.vlgmr.msrb.gmra.mxu1 %vm244_vm1, %v2066_v59  ;;  %1604 = vmatmul.msk.f32.vlgmr.msrb.gmra.mxu0 %vm244_vm1, %v2071_v60 }
 0x144   :  { %323 = vmatpush.msra.mxu1 %v2061_v58  ;;  %464 = vmatpush.msra.mxu0 %v452_v61  ;;  %v736_v61 = vld [vmem:[#allocation2 + $0x208] sm:$0xff] }
 0x146   :  { %406 = vmatpush.msrb.mxu1 %v394_v62  ;;  %465 = vmatpush.msra.mxu0 %v451_v63  ;;  %v623_v62 = vld [vmem:[#allocation2 + $0x1a0] sm:$0xff]  ;;  %v684_v63 = vld [vmem:[#allocation2 + $0x1f8] sm:$0xff] }
 0x148   :  { %407 = vmatpush.msrb.mxu1 %v393_v0  ;;  %466 = vmatpush.msra.mxu0 %v450_v1  ;;  %v735_v0 = vld [vmem:[#allocation2 + $0x200] sm:$0xff]  ;;  %v622_v1 = vld [vmem:[#allocation2 + $0x198] sm:$0xff] }
 0x14a   :  { %408 = vmatpush.msrb.mxu1 %v392_v2  ;;  %467 = vmatpush.msra.mxu0 %v449_v3  ;;  %v214_v2 = vld [vmem:[%s3002_s11 + $0x78] sm:$0xff]  ;;  %v683_v3 = vld [vmem:[#allocation2 + $0x1f0] sm:$0xff] }
 0x14b   :  { %1601 = vmatmul.msk.f32.vlgmr.msra.gmra.mxu1 %vm244_vm1, %v2085_v5 }
 0x14c   :  { %409 = vmatpush.msrb.mxu1 %v391_v4  ;;  %468 = vmatpush.msra.mxu0 %v448_v6  ;;  %v621_v4 = vld [vmem:[#allocation2 + $0x190] sm:$0xff]  ;;  %v212_v6 = vld [vmem:[%s3002_s11 + $0x68] sm:$0xff] }
 0x14e   :  { %410 = vmatpush.msrb.mxu1 %v390_v7  ;;  %469 = vmatpush.msra.mxu0 %v447_v8  ;;  %v682_v7 = vld [vmem:[#allocation2 + $0x1e8] sm:$0xff] }
 0x14f   :  { %v620_v8 = vld [vmem:[#allocation2 + $0x188] sm:$0xff] }
 0x150   :  { %411 = vmatpush.msrb.mxu1 %v389_v9  ;;  %470 = vmatpush.msra.mxu0 %v446_v10  ;;  %v210_v9 = vld [vmem:[%s3002_s11 + $0x58] sm:$0xff]  ;;  %v681_v10 = vld [vmem:[#allocation2 + $0x1e0] sm:$0xff] }
 0x152   :  { %412 = vmatpush.msrb.mxu1 %v388_v11  ;;  %471 = vmatpush.msra.mxu0 %v445_v12  ;;  %v619_v11 = vld [vmem:[#allocation2 + $0x180] sm:$0xff]  ;;  %v208_v12 = vld [vmem:[%s3002_s11 + $0x48] sm:$0xff] }
 0x154   :  { %413 = vmatpush.msrb.mxu1 %v387_v13  ;;  %613 = vmatpush.msrb.mxu0 %v2061_v58  ;;  %v680_v13 = vld [vmem:[#allocation2 + $0x1d8] sm:$0xff] }
 0x156   :  { %555 = vmatpush.msra.mxu1 %v2061_v58 }
 0x1c0   :  { %v265_v15 = vpop.f32.mrf.mxu1  ;;  %v383_v16 = vpop.f32.mrf.mxu0 }
 0x1c1   :  { %1599 = vmatmul.msk.f32.vlgmr.msra.gmra.mxu3 %vm128_vm0, %v265_v15  ;;  %1605 = vmatmul.msk.f32.vlgmr.msrb.gmra.mxu1 %vm128_vm0, %v383_v16  ;;  %v679_v15 = vld [vmem:[#allocation2 + $0x1d0] sm:$0xff]  ;;  %v204_v16 = vld [vmem:[%s3002_s11 + $0x28] sm:$0xff] }
 0x1c2   :  { %522 = vmatpush.msra.mxu3 %v510_v14  ;;  %638 = vmatpush.msrb.mxu1 %v626_v37  ;;  %v206_v14 = vld [vmem:[%s3002_s11 + $0x38] sm:$0xff] }
 0x1c4   :  { %523 = vmatpush.msra.mxu3 %v509_v17  ;;  %639 = vmatpush.msrb.mxu1 %v625_v38  ;;  %v678_v17 = vld [vmem:[#allocation2 + $0x1c8] sm:$0xff] }
 0x1c6   :  { %524 = vmatpush.msra.mxu3 %v508_v18  ;;  %640 = vmatpush.msrb.mxu1 %v624_v39  ;;  %v202_v18 = vld [vmem:[%s3002_s11 + $0x18] sm:$0xff] }
 0x1c8   :  { %525 = vmatpush.msra.mxu3 %v507_v19  ;;  %v325_v24 = vpop.f32.mrf.mxu1  ;;  %641 = vmatpush.msrb.mxu1 %v623_v62  ;;  %v677_v19 = vld [vmem:[#allocation2 + $0x1c0] sm:$0xff]  ;;  %v880_v62 = vld [vmem:[%s3004_s13 + $0x78] sm:$0xff] }
 0x1c9   :  { %1607 = vmatmul.msk.f32.vlgmr.msrb.gmra.mxu3 %vm244_vm1, %v2096_v20  ;;  %1613 = vmatmul.msk.f32.vlgmr.msra.gmra.mxu1 %vm244_vm1, %v2101_v21 }
 0x1ca   :  { %1602 = vmatmul.msk.f32.vlgmr.msrb.gmra.mxu2 %vm128_vm0, %v325_v24  ;;  %526 = vmatpush.msra.mxu3 %v506_v22  ;;  %v213_v22 = vld [vmem:[%s3002_s11 + $0x70] sm:$0xff]  ;;  %v211_v24 = vld [vmem:[%s3002_s11 + $0x60] sm:$0xff] }
 0x1cb   :  { %580 = vmatpush.msrb.mxu2 %v568_v23  ;;  %642 = vmatpush.msrb.mxu1 %v622_v1  ;;  %v200_v23 = vld [vmem:[%s3002_s11 + $0x8] sm:$0xff] }
 0x1cc   :  { %527 = vmatpush.msra.mxu3 %v505_v25  ;;  %v209_v25 = vld [vmem:[%s3002_s11 + $0x50] sm:$0xff]  ;;  %v878_v1 = vld [vmem:[%s3004_s13 + $0x68] sm:$0xff] }
 0x1cd   :  { %581 = vmatpush.msrb.mxu2 %v567_v26  ;;  %643 = vmatpush.msrb.mxu1 %v621_v4  ;;  %v207_v26 = vld [vmem:[%s3002_s11 + $0x40] sm:$0xff] }
 0x1ce   :  { %528 = vmatpush.msra.mxu3 %v504_v27  ;;  %v205_v27 = vld [vmem:[%s3002_s11 + $0x30] sm:$0xff]  ;;  %v877_v4 = vld [vmem:[%s3004_s13 + $0x60] sm:$0xff] }
 0x1cf   :  { %582 = vmatpush.msrb.mxu2 %v566_v28  ;;  %644 = vmatpush.msrb.mxu1 %v620_v8  ;;  %v203_v28 = vld [vmem:[%s3002_s11 + $0x20] sm:$0xff]  ;;  %v892_v8 = vld [vmem:[%s3004_s13 + $0xd8] sm:$0xff] }
 0x1d0   :  { %529 = vmatpush.msra.mxu3 %v503_v29  ;;  %v201_v29 = vld [vmem:[%s3002_s11 + $0x10] sm:$0xff] }
 0x1d1   :  { %583 = vmatpush.msrb.mxu2 %v565_v30  ;;  %645 = vmatpush.msrb.mxu1 %v619_v11  ;;  %v199_v30 = vld [vmem:[%s3002_s11] sm:$0xff]  ;;  %v874_v11 = vld [vmem:[%s3004_s13 + $0x48] sm:$0xff] }
 0x1d2   :  { %671 = vmatpush.msrb.mxu3 %v2061_v58  ;;  %1610 = vmatmul.msk.f32.vlgmr.msra.gmra.mxu2 %vm244_vm1, %v2111_v31 }
 0x1d3   :  { %584 = vmatpush.msrb.mxu2 %v564_v32 }
 0x1d5   :  { %585 = vmatpush.msrb.mxu2 %v563_v33 }
 0x1d7   :  { %586 = vmatpush.msrb.mxu2 %v562_v34 }
 0x1d9   :  { %587 = vmatpush.msrb.mxu2 %v561_v35 }
 0x1db   :  { %729 = vmatpush.msra.mxu2 %v2061_v58  ;;  %v737_v58 = vld [vmem:[#allocation2 + $0x210] sm:$0xff] }
 0x23e   :  { %v415_v36 = vpop.f32.mrf.mxu1 }
 0x244   :  { %v296_v40 = vpop.f32.mrf.mxu3 }
 0x245   :  { %v302_v43 = vadd.f32 %v1771_v42, %v296_v40  ;;  %v197_v42 = vld [vmem:[%s3000_s9 + $0x78] sm:$0xff] }
 0x246   :  { %v557_v41 = vpop.f32.mrf.mxu1 }
 0x247   :  { %1614 = vmatmul.msk.f32.vlgmr.msrb.gmra.mxu2 %vm128_vm0, %v557_v41  ;;  %v196_v41 = vld [vmem:[%s3000_s9 + $0x70] sm:$0xff] }
 0x248   :  { %784 = vmatpush.msra.mxu1 %v196_v41  ;;  %804 = vmatpush.msrb.mxu2 %v197_v42  ;;  %v1662_v41 = vld [vmem:[%s3006_s15 + $0x178] sm:$0xff]  ;;  %v1661_v42 = vld [vmem:[%s3006_s15 + $0x170] sm:$0xff] }
 0x24c   :  { %v441_v44 = vpop.f32.mrf.mxu3 }
 0x24d   :  { %v357_v46 = vpop.f32.mrf.mxu2  ;;  %1608 = vmatmul.msk.f32.vlgmr.msra.gmra.mxu0 %vm128_vm0, %v441_v44  ;;  %v195_v44 = vld [vmem:[%s3000_s9 + $0x68] sm:$0xff] }
 0x24e   :  { %v360_v47 = vadd.f32 %v357_v46, %v302_v43  ;;  %696 = vmatpush.msra.mxu0 %v684_v63  ;;  %v194_v43 = vld [vmem:[%s3000_s9 + $0x60] sm:$0xff]  ;;  %v193_v46 = vld [vmem:[%s3000_s9 + $0x58] sm:$0xff]  ;;  %805 = vmatpush.msrb.mxu2 %v195_v44  ;;  %v879_v63 = vld [vmem:[%s3004_s13 + $0x70] sm:$0xff] }
 0x24f   :  { %1622 = vmatmul.msk.f32.vlgmr.msra.gmra.mxu2 %vm244_vm1, %v2124_v45  ;;  %785 = vmatpush.msra.mxu1 %v194_v43  ;;  %v1660_v43 = vld [vmem:[%s3006_s15 + $0x168] sm:$0xff]  ;;  %v1659_v44 = vld [vmem:[%s3006_s15 + $0x160] sm:$0xff] }
 0x250   :  { %v2129_v49 = vadd.f32 %v415_v36, %v360_v47  ;;  %697 = vmatpush.msra.mxu0 %v683_v3  ;;  %v190_v47 = vld [vmem:[%s3000_s9 + $0x40] sm:$0xff]  ;;  %806 = vmatpush.msrb.mxu2 %v193_v46  ;;  %v894_v3 = vld [vmem:[%s3004_s13 + $0xe8] sm:$0xff]  ;;  %v1657_v46 = vld [vmem:[%s3006_s15 + $0x150] sm:$0xff] }
 0x252   :  { %698 = vmatpush.msra.mxu0 %v682_v7  ;;  %v876_v7 = vld [vmem:[%s3004_s13 + $0x58] sm:$0xff] }
 0x254   :  { %699 = vmatpush.msra.mxu0 %v681_v10  ;;  %v891_v10 = vld [vmem:[%s3004_s13 + $0xd0] sm:$0xff] }
 0x255   :  { %v499_v52 = vpop.f32.mrf.mxu2  ;;  %1616 = vmatmul.msk.f32.vlgmr.msrb.gmra.mxu0 %vm244_vm1, %v2134_v50 }
 0x256   :  { %1611 = vmatmul.msk.f32.vlgmr.msra.gmra.mxu3 %vm128_vm0, %v499_v52  ;;  %700 = vmatpush.msra.mxu0 %v680_v13  ;;  %v189_v52 = vld [vmem:[%s3000_s9 + $0x38] sm:$0xff]  ;;  %v873_v13 = vld [vmem:[%s3004_s13 + $0x40] sm:$0xff] }
 0x257   :  { %754 = vmatpush.msra.mxu3 %v742_v51  ;;  %v188_v51 = vld [vmem:[%s3000_s9 + $0x30] sm:$0xff] }
 0x258   :  { %701 = vmatpush.msra.mxu0 %v679_v15  ;;  %v872_v15 = vld [vmem:[%s3004_s13 + $0x38] sm:$0xff] }
 0x259   :  { %755 = vmatpush.msra.mxu3 %v741_v53  ;;  %v186_v53 = vld [vmem:[%s3000_s9 + $0x20] sm:$0xff] }
 0x25a   :  { %702 = vmatpush.msra.mxu0 %v678_v17  ;;  %v871_v17 = vld [vmem:[%s3004_s13 + $0x30] sm:$0xff] }
 0x25b   :  { %756 = vmatpush.msra.mxu3 %v740_v54  ;;  %v187_v54 = vld [vmem:[%s3000_s9 + $0x28] sm:$0xff] }
 0x25c   :  { %703 = vmatpush.msra.mxu0 %v677_v19 }
 0x25d   :  { %757 = vmatpush.msra.mxu3 %v739_v55  ;;  %v184_v55 = vld [vmem:[%s3000_s9 + $0x10] sm:$0xff] }
 0x25e   :  { %1619 = vmatmul.msk.f32.vlgmr.msrb.gmra.mxu3 %vm244_vm1, %v2142_v56  ;;  %829 = vmatpush.msrb.mxu0 %v213_v22  ;;  %v869_v22 = vld [vmem:[%s3004_s13 + $0x20] sm:$0xff] }
 0x25f   :  { %758 = vmatpush.msra.mxu3 %v738_v57  ;;  %v185_v57 = vld [vmem:[%s3000_s9 + $0x18] sm:$0xff] }
 0x260   :  { %830 = vmatpush.msrb.mxu0 %v211_v24 }
 0x261   :  { %759 = vmatpush.msra.mxu3 %v737_v58  ;;  %v182_v58 = vld [vmem:[%s3000_s9] sm:$0xff] }
 0x262   :  { %831 = vmatpush.msrb.mxu0 %v209_v25 }
 0x263   :  { %760 = vmatpush.msra.mxu3 %v736_v61  ;;  %v183_v61 = vld [vmem:[%s3000_s9 + $0x8] sm:$0xff] }
 0x264   :  { %832 = vmatpush.msrb.mxu0 %v207_v26 }
 0x265   :  { %761 = vmatpush.msra.mxu3 %v735_v0  ;;  %v896_v0 = vld [vmem:[%s3004_s13 + $0xf8] sm:$0xff] }
 0x266   :  { %833 = vmatpush.msrb.mxu0 %v205_v27 }
 0x267   :  { %849 = vmatpush.msrb.mxu3 %v214_v2  ;;  %v895_v2 = vld [vmem:[%s3004_s13 + $0xf0] sm:$0xff] }
 0x268   :  { %834 = vmatpush.msrb.mxu0 %v203_v28 }
 0x269   :  { %850 = vmatpush.msrb.mxu3 %v212_v6  ;;  %v893_v6 = vld [vmem:[%s3004_s13 + $0xe0] sm:$0xff] }
 0x26a   :  { %835 = vmatpush.msrb.mxu0 %v201_v29  ;;  %v868_v29 = vld [vmem:[%s3004_s13 + $0x18] sm:$0xff] }
 0x26b   :  { %851 = vmatpush.msrb.mxu3 %v210_v9  ;;  %v875_v9 = vld [vmem:[%s3004_s13 + $0x50] sm:$0xff] }
 0x26c   :  { %836 = vmatpush.msrb.mxu0 %v199_v30  ;;  %v887_v30 = vld [vmem:[%s3004_s13 + $0xb0] sm:$0xff] }
 0x26d   :  { %852 = vmatpush.msrb.mxu3 %v208_v12  ;;  %v890_v12 = vld [vmem:[%s3004_s13 + $0xc8] sm:$0xff] }
 0x26f   :  { %853 = vmatpush.msrb.mxu3 %v206_v14  ;;  %v889_v14 = vld [vmem:[%s3004_s13 + $0xc0] sm:$0xff] }
 0x271   :  { %854 = vmatpush.msrb.mxu3 %v204_v16  ;;  %v888_v16 = vld [vmem:[%s3004_s13 + $0xb8] sm:$0xff] }
 0x273   :  { %855 = vmatpush.msrb.mxu3 %v202_v18  ;;  %v870_v18 = vld [vmem:[%s3004_s13 + $0x28] sm:$0xff] }
 0x275   :  { %856 = vmatpush.msrb.mxu3 %v200_v23 }
 0x2ca   :  { %v473_v32 = vpop.f32.mrf.mxu0  ;;  %v589_v33 = vpop.f32.mrf.mxu2 }
 0x2cb   :  { %v476_v34 = vadd.f32 %v473_v32, %v2129_v49  ;;  %v191_v49 = vld [vmem:[%s3000_s9 + $0x48] sm:$0xff]  ;;  %v867_v32 = vld [vmem:[%s3004_s13 + $0x10] sm:$0xff] }
 0x2cc   :  { %807 = vmatpush.msrb.mxu2 %v191_v49  ;;  %v198_v49 = vld [vmem:[%s3001_s10] sm:$0x3] }
 0x2ce   :  { %808 = vmatpush.msrb.mxu2 %v189_v52 }
 0x2d0   :  { %809 = vmatpush.msrb.mxu2 %v187_v54 }
 0x2d2   :  { %v615_v35 = vpop.f32.mrf.mxu0  ;;  %v731_v36 = vpop.f32.mrf.mxu2  ;;  %810 = vmatpush.msrb.mxu2 %v185_v57 }
 0x2d3   :  { %1617 = vmatmul.msk.f32.vlgmr.msrb.gmra.mxu1 %vm128_vm0, %v615_v35  ;;  %1623 = vmatmul.msk.f32.vlgmr.msra.gmra.mxu3 %vm128_vm0, %v731_v36  ;;  %v885_v35 = vld [vmem:[%s3004_s13 + $0xa0] sm:$0xff] }
 0x2d4   :  { %811 = vmatpush.msrb.mxu2 %v183_v61  ;;  %v865_v36 = vld [vmem:[%s3004_s13] sm:$0xff] }
 0x2d6   :  { %972 = vmatpush.msra.mxu2 %v896_v0 }
 0x2d8   :  { %973 = vmatpush.msra.mxu2 %v895_v2 }
 0x2d9   :  { %v531_v37 = vpop.f32.mrf.mxu3 }
 0x2da   :  { %v534_v38 = vadd.f32 %v531_v37, %v476_v34  ;;  %974 = vmatpush.msra.mxu2 %v894_v3  ;;  %v866_v34 = vld [vmem:[%s3004_s13 + $0x8] sm:$0xff]  ;;  %v884_v37 = vld [vmem:[%s3004_s13 + $0x98] sm:$0xff] }
 0x2db   :  { %1627 = vmatmul.msk.f32.vlgmr.msrb.gmra.mxu3 %vm128_vm0, %v2054_v48 }
 0x2dc   :  { %v2199_v39 = vadd.f32 %v589_v33, %v534_v38  ;;  %975 = vmatpush.msra.mxu2 %v893_v6  ;;  %v886_v33 = vld [vmem:[%s3004_s13 + $0xa8] sm:$0xff]  ;;  %v883_v38 = vld [vmem:[%s3004_s13 + $0x90] sm:$0xff] }
 0x2de   :  { %976 = vmatpush.msra.mxu2 %v892_v8  ;;  %v1655_v8 = vld [vmem:[%s3006_s15 + $0x140] sm:$0xff] }
 0x2e0   :  { %977 = vmatpush.msra.mxu2 %v891_v10  ;;  %v1653_v10 = vld [vmem:[%s3006_s15 + $0x130] sm:$0xff] }
 0x2e1   :  { %v673_v40 = vpop.f32.mrf.mxu3 }
 0x2e2   :  { %1620 = vmatmul.msk.f32.vlgmr.msra.gmra.mxu0 %vm128_vm0, %v673_v40  ;;  %978 = vmatpush.msra.mxu2 %v890_v12  ;;  %v881_v40 = vld [vmem:[%s3004_s13 + $0x80] sm:$0xff] }
 0x2e3   :  { %v1651_v12 = vld [vmem:[%s3006_s15 + $0x120] sm:$0xff] }
 0x2e4   :  { %979 = vmatpush.msra.mxu2 %v889_v14  ;;  %v1649_v14 = vld [vmem:[%s3006_s15 + $0x110] sm:$0xff] }
 0x2e6   :  { %980 = vmatpush.msra.mxu2 %v888_v16  ;;  %v1647_v16 = vld [vmem:[%s3006_s15 + $0x100] sm:$0xff] }
 0x2e8   :  { %981 = vmatpush.msra.mxu2 %v887_v30  ;;  %v1024_v30 = vld [vmem:[%s3006_s15 + $0x58] sm:$0xff] }
 0x2ea   :  { %1626 = vmatmul.msk.f32.vlgmr.msrb.gmra.mxu0 %vm128_vm0, %v2054_v48  ;;  %v192_v48 = vld [vmem:[%s3000_s9 + $0x50] sm:$0xff]  ;;  %982 = vmatpush.msra.mxu2 %v886_v33  ;;  %v1022_v33 = vld [vmem:[%s3006_s15 + $0x48] sm:$0xff] }
 0x2eb   :  { %786 = vmatpush.msra.mxu1 %v192_v48  ;;  %v1658_v48 = vld [vmem:[%s3006_s15 + $0x158] sm:$0xff] }
 0x2ec   :  { %983 = vmatpush.msra.mxu2 %v885_v35  ;;  %v1021_v35 = vld [vmem:[%s3006_s15 + $0x40] sm:$0xff] }
 0x2ed   :  { %787 = vmatpush.msra.mxu1 %v190_v47  ;;  %v1656_v47 = vld [vmem:[%s3006_s15 + $0x148] sm:$0xff] }
 0x2ee   :  { %984 = vmatpush.msra.mxu2 %v884_v37  ;;  %v1020_v37 = vld [vmem:[%s3006_s15 + $0x38] sm:$0xff] }
 0x2ef   :  { %788 = vmatpush.msra.mxu1 %v188_v51  ;;  %v215_v51 = vld [vmem:[%s3003_s12] sm:$0x3] }
 0x2f0   :  { %985 = vmatpush.msra.mxu2 %v883_v38  ;;  %v817_v52 = vperm.slane %v215_v51, 0  ;;  %v818_v61 = vperm.slane %v215_v51, 1  ;;  %v1019_v38 = vld [vmem:[%s3006_s15 + $0x30] sm:$0xff]  ;;  %v1634_v51 = vld [vmem:[%s3006_s15 + $0xa0] sm:$0xff] }
 0x2f1   :  { %789 = vmatpush.msra.mxu1 %v186_v53  ;;  %v769_v53 = vperm.slane %v198_v49, 0 }
 0x2f3   :  { %790 = vmatpush.msra.mxu1 %v184_v55 }
 0x2f5   :  { %791 = vmatpush.msra.mxu1 %v182_v58 }
 0x2f7   :  { %952 = vmatpush.msrb.mxu1 %v880_v62 }
 0x2f9   :  { %953 = vmatpush.msrb.mxu1 %v879_v63  ;;  %v770_v63 = vperm.slane %v198_v49, 1  ;;  %v1712_v49 = vld [vmem:[%s3006_s15 + $0x2f0] sm:$0xff] }
 0x2fb   :  { %954 = vmatpush.msrb.mxu1 %v878_v1 }
 0x2fd   :  { %955 = vmatpush.msrb.mxu1 %v877_v4 }
 0x2ff   :  { %956 = vmatpush.msrb.mxu1 %v876_v7 }
 0x301   :  { %957 = vmatpush.msrb.mxu1 %v875_v9  ;;  %v1654_v9 = vld [vmem:[%s3006_s15 + $0x138] sm:$0xff] }
 0x303   :  { %958 = vmatpush.msrb.mxu1 %v874_v11  ;;  %v1652_v11 = vld [vmem:[%s3006_s15 + $0x128] sm:$0xff] }
 0x305   :  { %959 = vmatpush.msrb.mxu1 %v873_v13  ;;  %v1650_v13 = vld [vmem:[%s3006_s15 + $0x118] sm:$0xff] }
 0x307   :  { %960 = vmatpush.msrb.mxu1 %v872_v15  ;;  %v1648_v15 = vld [vmem:[%s3006_s15 + $0x108] sm:$0xff] }
 0x309   :  { %961 = vmatpush.msrb.mxu1 %v871_v17  ;;  %v1772_v17 = vld [vmem:[%s3005_s14] ss:$0 sm:$0xff] }
 0x30b   :  { %962 = vmatpush.msrb.mxu1 %v870_v18 }
 0x30d   :  { %963 = vmatpush.msrb.mxu1 %v869_v22  ;;  %v1028_v22 = vld [vmem:[%s3006_s15 + $0x78] sm:$0xff] }
 0x30e   :  { %1029 = vmatpush.msra.mxu3 %v1028_v22  ;;  %v1668_v22 = vld [vmem:[%s3006_s15 + $0x1a0] sm:$0xff] }
 0x30f   :  { %964 = vmatpush.msrb.mxu1 %v868_v29  ;;  %v1645_v29 = vld [vmem:[%s3006_s15 + $0xf8] sm:$0xff] }
 0x311   :  { %965 = vmatpush.msrb.mxu1 %v867_v32  ;;  %v1023_v32 = vld [vmem:[%s3006_s15 + $0x50] sm:$0xff] }
 0x313   :  { %966 = vmatpush.msrb.mxu1 %v866_v34  ;;  %v1642_v34 = vld [vmem:[%s3006_s15 + $0xe0] sm:$0xff] }
 0x315   :  { %967 = vmatpush.msrb.mxu1 %v865_v36  ;;  %v1641_v36 = vld [vmem:[%s3006_s15 + $0xd8] sm:$0xff] }
 0x350   :  { %v647_v19 = vpop.f32.mrf.mxu1 }
 0x351   :  { %v650_v23 = vadd.f32 %v647_v19, %v2199_v39  ;;  %v882_v39 = vld [vmem:[%s3004_s13 + $0x88] sm:$0xff] }
 0x352   :  { %986 = vmatpush.msra.mxu2 %v882_v39  ;;  %v1018_v39 = vld [vmem:[%s3006_s15 + $0x28] sm:$0xff] }
 0x354   :  { %987 = vmatpush.msra.mxu2 %v881_v40  ;;  %v1638_v40 = vld [vmem:[%s3006_s15 + $0xc0] sm:$0xff] }
 0x356   :  { %v763_v26 = vpop.f32.mrf.mxu3 }
 0x35e   :  { %v858_v0 = vpop.f32.mrf.mxu3 }
 0x35f   :  { %v705_v24 = vpop.f32.mrf.mxu0  ;;  %v859_v3 = vadd.f32 %v858_v0, %v818_v61  ;;  %v1677_v61 = vld [vmem:[%s3006_s15 + $0x1e8] sm:$0xff]  ;;  %v1630_v0 = vld [vmem:[%s3006_s15 + $0x80] sm:$0xff] }
 0x360   :  { %v708_v25 = vadd.f32 %v705_v24, %v650_v23  ;;  %v1027_v23 = vld [vmem:[%s3006_s15 + $0x70] sm:$0xff] }
 0x361   :  { %1030 = vmatpush.msra.mxu3 %v1027_v23  ;;  %v1688_v23 = vld [vmem:[%s3006_s15 + $0x238] sm:$0xff] }
 0x362   :  { %v766_v27 = vadd.f32 %v763_v26, %v708_v25  ;;  %v1026_v26 = vld [vmem:[%s3006_s15 + $0x68] sm:$0xff] }
 0x363   :  { %1031 = vmatpush.msra.mxu3 %v1026_v26  ;;  %v1666_v26 = vld [vmem:[%s3006_s15 + $0x190] sm:$0xff] }
 0x364   :  { %v767_v28 = vmax.f32 %v766_v27, 0.0 }
 0x366   :  { %1624 = vmatmul.msk.f32.vlgmr.msra.gmra.mxu1 %vm128_vm0, %v767_v28  ;;  %1625 = vmatmul.msk.f32.vlgmr.msrb.gmra.mxu2 %vm128_vm0, %v767_v28  ;;  %v1025_v28 = vld [vmem:[%s3006_s15 + $0x60] sm:$0xff] }
 0x367   :  { %1148 = vmatpush.msrb.mxu2 %v1662_v41  ;;  %v838_v54 = vpop.f32.mrf.mxu0  ;;  %1032 = vmatpush.msra.mxu3 %v1025_v28  ;;  %v1017_v41 = vld [vmem:[%s3006_s15 + $0x20] sm:$0xff]  ;;  %v1686_v28 = vld [vmem:[%s3006_s15 + $0x228] sm:$0xff] }
 0x368   :  { %v839_v57 = vadd.f32 %v838_v54, %v817_v52  ;;  %v1013_v52 = vld [vmem:[%s3006_s15] sm:$0xff]  ;;  %v1679_v54 = vld [vmem:[%s3006_s15 + $0x1f8] sm:$0xff] }
 0x369   :  { %1149 = vmatpush.msrb.mxu2 %v1661_v42  ;;  %1033 = vmatpush.msra.mxu3 %v1024_v30  ;;  %v1637_v42 = vld [vmem:[%s3006_s15 + $0xb8] sm:$0xff]  ;;  %v1664_v30 = vld [vmem:[%s3006_s15 + $0x180] sm:$0xff] }
 0x36b   :  { %1150 = vmatpush.msrb.mxu2 %v1660_v43  ;;  %1034 = vmatpush.msra.mxu3 %v1023_v32  ;;  %v1016_v43 = vld [vmem:[%s3006_s15 + $0x18] sm:$0xff]  ;;  %v1710_v32 = vld [vmem:[%s3006_s15 + $0x2e0] sm:$0xff] }
 0x36d   :  { %1151 = vmatpush.msrb.mxu2 %v1659_v44  ;;  %1035 = vmatpush.msra.mxu3 %v1022_v33  ;;  %v1636_v44 = vld [vmem:[%s3006_s15 + $0xb0] sm:$0xff]  ;;  %v1709_v33 = vld [vmem:[%s3006_s15 + $0x2d8] sm:$0xff] }
 0x36f   :  { %1152 = vmatpush.msrb.mxu2 %v1658_v48  ;;  %1036 = vmatpush.msra.mxu3 %v1021_v35  ;;  %v1015_v48 = vld [vmem:[%s3006_s15 + $0x10] sm:$0xff] }
 0x370   :  { %v1708_v35 = vld [vmem:[%s3006_s15 + $0x2d0] sm:$0xff] }
 0x371   :  { %1153 = vmatpush.msrb.mxu2 %v1657_v46  ;;  %1037 = vmatpush.msra.mxu3 %v1020_v37  ;;  %v1713_v46 = vld [vmem:[%s3006_s15 + $0x2f8] sm:$0xff]  ;;  %v1707_v37 = vld [vmem:[%s3006_s15 + $0x2c8] sm:$0xff] }
 0x373   :  { %1154 = vmatpush.msrb.mxu2 %v1656_v47  ;;  %1038 = vmatpush.msra.mxu3 %v1019_v38  ;;  %v1014_v47 = vld [vmem:[%s3006_s15 + $0x8] sm:$0xff]  ;;  %v1706_v38 = vld [vmem:[%s3006_s15 + $0x2c0] sm:$0xff] }
 0x375   :  { %1155 = vmatpush.msrb.mxu2 %v1655_v8  ;;  %1039 = vmatpush.msra.mxu3 %v1018_v39  ;;  %v1674_v8 = vld [vmem:[%s3006_s15 + $0x1d0] sm:$0xff] }
 0x376   :  { %v1704_v39 = vld [vmem:[%s3006_s15 + $0x2b0] sm:$0xff] }
 0x377   :  { %1156 = vmatpush.msrb.mxu2 %v1654_v9  ;;  %1040 = vmatpush.msra.mxu3 %v1017_v41  ;;  %v1694_v9 = vld [vmem:[%s3006_s15 + $0x268] sm:$0xff]  ;;  %v1702_v41 = vld [vmem:[%s3006_s15 + $0x2a0] sm:$0xff] }
 0x379   :  { %1157 = vmatpush.msrb.mxu2 %v1653_v10  ;;  %1041 = vmatpush.msra.mxu3 %v1016_v43  ;;  %v1673_v10 = vld [vmem:[%s3006_s15 + $0x1c8] sm:$0xff]  ;;  %v1700_v43 = vld [vmem:[%s3006_s15 + $0x290] sm:$0xff] }
 0x37b   :  { %1158 = vmatpush.msrb.mxu2 %v1652_v11  ;;  %1042 = vmatpush.msra.mxu3 %v1015_v48  ;;  %v1693_v11 = vld [vmem:[%s3006_s15 + $0x260] sm:$0xff] }
 0x37c   :  { %v1698_v48 = vld [vmem:[%s3006_s15 + $0x280] sm:$0xff] }
 0x37d   :  { %1159 = vmatpush.msrb.mxu2 %v1651_v12  ;;  %1043 = vmatpush.msra.mxu3 %v1014_v47  ;;  %v1672_v12 = vld [vmem:[%s3006_s15 + $0x1c0] sm:$0xff] }
 0x37f   :  { %1160 = vmatpush.msrb.mxu2 %v1650_v13  ;;  %1044 = vmatpush.msra.mxu3 %v1013_v52  ;;  %v1692_v13 = vld [vmem:[%s3006_s15 + $0x258] sm:$0xff]  ;;  %v1727_v52 = vld [vmem:[%s3006_s15 + $0x360] sm:$0xff] }
 0x381   :  { %1161 = vmatpush.msrb.mxu2 %v1649_v14  ;;  %1206 = vmatpush.msrb.mxu3 %v1679_v54  ;;  %v1671_v14 = vld [vmem:[%s3006_s15 + $0x1b8] sm:$0xff] }
 0x382   :  { %v1726_v54 = vld [vmem:[%s3006_s15 + $0x358] sm:$0xff] }
 0x383   :  { %1162 = vmatpush.msrb.mxu2 %v1648_v15  ;;  %v1691_v15 = vld [vmem:[%s3006_s15 + $0x250] sm:$0xff] }
 0x385   :  { %1163 = vmatpush.msrb.mxu2 %v1647_v16  ;;  %v1670_v16 = vld [vmem:[%s3006_s15 + $0x1b0] sm:$0xff] }
 0x3e3   :  { %v793_v55 = vpop.f32.mrf.mxu1 }
 0x3e4   :  { %v794_v58 = vadd.f32 %v793_v55, %v769_v53  ;;  %v1711_v53 = vld [vmem:[%s3006_s15 + $0x2e8] sm:$0xff]  ;;  %v1633_v55 = vld [vmem:[%s3006_s15 + $0x98] sm:$0xff] }
 0x3e6   :  { %v2378_v62 = vadd.f32 %v839_v57, %v794_v58  ;;  %v1678_v57 = vld [vmem:[%s3006_s15 + $0x1f0] sm:$0xff] }
 0x3e7   :  { %v1632_v58 = vld [vmem:[%s3006_s15 + $0x90] sm:$0xff]  ;;  %1207 = vmatpush.msrb.mxu3 %v1678_v57  ;;  %v1747_v57 = vld [vmem:[%s3006_s15 + $0x3f8] sm:$0xff] }
 0x3e8   :  { %v863_v1 = vmax.f32 %v2378_v62, 0.0  ;;  %v903_v62 = vld [vmem:[%s3008_s17 + $0x20] sm:$0xff] }
 0x3e9   :  { %v813_v2 = vpop.f32.mrf.mxu2  ;;  %1208 = vmatpush.msrb.mxu3 %v1677_v61  ;;  %v1746_v61 = vld [vmem:[%s3006_s15 + $0x3f0] sm:$0xff] }
 0x3ea   :  { %v814_v4 = vadd.f32 %v813_v2, %v770_v63  ;;  %968 = vmatmul.f32.vlgmr.msrb.gmra.mxu1 %v863_v1  ;;  %v1676_v63 = vld [vmem:[%s3006_s15 + $0x1e0] sm:$0xff]  ;;  %v1696_v2 = vld [vmem:[%s3006_s15 + $0x278] sm:$0xff] }
 0x3eb   :  { %1209 = vmatpush.msrb.mxu3 %v1676_v63  ;;  %v1744_v63 = vld [vmem:[%s3006_s15 + $0x3e0] sm:$0xff] }
 0x3ec   :  { %v2383_v6 = vadd.f32 %v859_v3, %v814_v4  ;;  %v1675_v3 = vld [vmem:[%s3006_s15 + $0x1d8] sm:$0xff]  ;;  %v1695_v4 = vld [vmem:[%s3006_s15 + $0x270] sm:$0xff] }
 0x3ed   :  { %1210 = vmatpush.msrb.mxu3 %v1675_v3  ;;  %v1764_v3 = vld [vmem:[%s3006_s15 + $0x478] sm:$0xff] }
 0x3ee   :  { %v864_v7 = vmax.f32 %v2383_v6, 0.0  ;;  %v901_v6 = vld [vmem:[%s3008_s17 + $0x10] sm:$0xff] }
 0x3ef   :  { %1211 = vmatpush.msrb.mxu3 %v1674_v8  ;;  %v1721_v8 = vld [vmem:[%s3006_s15 + $0x330] sm:$0xff] }
 0x3f0   :  { %988 = vmatmul.f32.vlgmr.msra.gmra.mxu2 %v864_v7 }
 0x3f1   :  { %1212 = vmatpush.msrb.mxu3 %v1673_v10  ;;  %v1742_v10 = vld [vmem:[%s3006_s15 + $0x3d0] sm:$0xff] }
 0x3f3   :  { %1213 = vmatpush.msrb.mxu3 %v1672_v12  ;;  %v1741_v12 = vld [vmem:[%s3006_s15 + $0x3c8] sm:$0xff] }
 0x3f5   :  { %1214 = vmatpush.msrb.mxu3 %v1671_v14  ;;  %v1740_v14 = vld [vmem:[%s3006_s15 + $0x3c0] sm:$0xff] }
 0x3f7   :  { %1215 = vmatpush.msrb.mxu3 %v1670_v16 }
 0x467   :  { %v969_v18 = vpop.f32.mrf.mxu1 }
 0x468   :  { %v970_v19 = vadd.f32 %v1772_v17, %v969_v18  ;;  %v1690_v17 = vld [vmem:[%s3006_s15 + $0x248] sm:$0xff] }
 0x469   :  { %v1669_v18 = vld [vmem:[%s3006_s15 + $0x1a8] sm:$0xff] }
 0x46a   :  { %1216 = vmatpush.msrb.mxu3 %v1669_v18  ;;  %v1717_v18 = vld [vmem:[%s3006_s15 + $0x310] sm:$0xff] }
 0x46c   :  { %1217 = vmatpush.msrb.mxu3 %v1668_v22  ;;  %v1716_v22 = vld [vmem:[%s3006_s15 + $0x308] sm:$0xff] }
 0x473   :  { %v989_v24 = vpop.f32.mrf.mxu2 }
 0x474   :  { %v990_v25 = vadd.f32 %v989_v24, %v970_v19  ;;  %v1689_v19 = vld [vmem:[%s3006_s15 + $0x240] sm:$0xff]  ;;  %v1667_v24 = vld [vmem:[%s3006_s15 + $0x198] sm:$0xff] }
 0x475   :  { %1218 = vmatpush.msrb.mxu3 %v1667_v24  ;;  %v931_v24 = vld [vmem:[%s3010_s19 + $0x78] sm:$0xff] }
 0x476   :  { %v2427_v27 = vmax.f32 %v990_v25, 0.0  ;;  %v1687_v25 = vld [vmem:[%s3006_s15 + $0x230] sm:$0xff] }
 0x477   :  { %1219 = vmatpush.msrb.mxu3 %v1666_v26  ;;  %v930_v26 = vld [vmem:[%s3010_s19 + $0x70] sm:$0xff] }
 0x478   :  { %1008 = vmatpush.msra.mxu0 %v2427_v27  ;;  %1126 = vmatpush.msra.mxu1 %v2427_v27 }
 0x479   :  { %1358 = vmatpush.msra.mxu2 %v2427_v27  ;;  %1628 = vmatmul.msk.f32.vlgmr.msra.gmra.mxu0 %vm244_vm1, %v2066_v59  ;;  %v1644_v59 = vld [vmem:[%s3006_s15 + $0xf0] sm:$0xff] }
 0x47a   :  { %1068 = vmatpush.msrb.mxu0 %v2427_v27  ;;  %1646 = vmatmul.msk.f32.vlgmr.msra.gmra.mxu1 %vm244_vm1, %v2071_v60  ;;  %v1643_v60 = vld [vmem:[%s3006_s15 + $0xe8] sm:$0xff] }
 0x47b   :  { %1184 = vmatpush.msrb.mxu1 %v2427_v27 }
 0x47c   :  { %1090 = vmatpush.msra.mxu0 %v1645_v29  ;;  %v1665_v29 = vld [vmem:[%s3006_s15 + $0x188] sm:$0xff] }
 0x47d   :  { %1242 = vmatpush.msra.mxu1 %v2427_v27  ;;  %1220 = vmatpush.msrb.mxu3 %v1665_v29  ;;  %v929_v29 = vld [vmem:[%s3010_s19 + $0x68] sm:$0xff] }
 0x47e   :  { %1091 = vmatpush.msra.mxu0 %v1644_v59  ;;  %v1685_v59 = vld [vmem:[%s3006_s15 + $0x220] sm:$0xff] }
 0x47f   :  { %1221 = vmatpush.msrb.mxu3 %v1664_v30  ;;  %v1734_v30 = vld [vmem:[%s3006_s15 + $0x390] sm:$0xff] }
 0x480   :  { %1092 = vmatpush.msra.mxu0 %v1643_v60  ;;  %v1684_v60 = vld [vmem:[%s3006_s15 + $0x218] sm:$0xff] }
 0x481   :  { %1629 = vmatmul.msk.f32.vlgmr.msrb.gmra.mxu0 %vm244_vm1, %v2085_v5  ;;  %v1640_v5 = vld [vmem:[%s3006_s15 + $0xd0] sm:$0xff] }
 0x482   :  { %1663 = vmatmul.msk.f32.vlgmr.msrb.gmra.mxu1 %vm244_vm1, %v2096_v20  ;;  %1093 = vmatpush.msra.mxu0 %v1642_v34  ;;  %v1639_v20 = vld [vmem:[%s3006_s15 + $0xc8] sm:$0xff]  ;;  %v1683_v34 = vld [vmem:[%s3006_s15 + $0x210] sm:$0xff] }
 0x483   :  { %1300 = vmatpush.msrb.mxu1 %v2427_v27 }
 0x484   :  { %1094 = vmatpush.msra.mxu0 %v1641_v36  ;;  %v1682_v36 = vld [vmem:[%s3006_s15 + $0x208] sm:$0xff] }
 0x486   :  { %1095 = vmatpush.msra.mxu0 %v1640_v5  ;;  %v1681_v5 = vld [vmem:[%s3006_s15 + $0x200] sm:$0xff] }
 0x488   :  { %1096 = vmatpush.msra.mxu0 %v1639_v20  ;;  %v1705_v20 = vld [vmem:[%s3006_s15 + $0x2b8] sm:$0xff] }
 0x48a   :  { %1680 = vmatmul.msk.f32.vlgmr.msra.gmra.mxu1 %vm244_vm1, %v2111_v31  ;;  %1097 = vmatpush.msra.mxu0 %v1638_v40  ;;  %v1635_v31 = vld [vmem:[%s3006_s15 + $0xa8] sm:$0xff] }
 0x48b   :  { %1322 = vmatpush.msra.mxu1 %v1713_v46  ;;  %v1703_v40 = vld [vmem:[%s3006_s15 + $0x2a8] sm:$0xff] }
 0x48c   :  { %1098 = vmatpush.msra.mxu0 %v1637_v42  ;;  %v1701_v42 = vld [vmem:[%s3006_s15 + $0x298] sm:$0xff] }
 0x48d   :  { %1323 = vmatpush.msra.mxu1 %v1712_v49  ;;  %v1729_v49 = vld [vmem:[%s3006_s15 + $0x370] sm:$0xff] }
 0x48e   :  { %1099 = vmatpush.msra.mxu0 %v1636_v44  ;;  %v1699_v44 = vld [vmem:[%s3006_s15 + $0x288] sm:$0xff] }
 0x48f   :  { %1324 = vmatpush.msra.mxu1 %v1711_v53 }
 0x490   :  { %1100 = vmatpush.msra.mxu0 %v1635_v31  ;;  %v1730_v31 = vld [vmem:[%s3006_s15 + $0x378] sm:$0xff] }
 0x491   :  { %1325 = vmatpush.msra.mxu1 %v1710_v32  ;;  %v1733_v32 = vld [vmem:[%s3006_s15 + $0x388] sm:$0xff] }
 0x492   :  { %1697 = vmatmul.msk.f32.vlgmr.msrb.gmra.mxu1 %vm244_vm1, %v2101_v21  ;;  %1101 = vmatpush.msra.mxu0 %v1634_v51  ;;  %v1631_v21 = vld [vmem:[%s3006_s15 + $0x88] sm:$0xff] }
 0x493   :  { %1326 = vmatpush.msra.mxu1 %v1709_v33  ;;  %v1728_v51 = vld [vmem:[%s3006_s15 + $0x368] sm:$0xff]  ;;  %v1732_v33 = vld [vmem:[%s3006_s15 + $0x380] sm:$0xff] }
 0x494   :  { %1102 = vmatpush.msra.mxu0 %v1633_v55 }
 0x495   :  { %1327 = vmatpush.msra.mxu1 %v1708_v35  ;;  %v926_v35 = vld [vmem:[%s3010_s19 + $0x50] sm:$0xff] }
 0x496   :  { %1103 = vmatpush.msra.mxu0 %v1632_v58  ;;  %v1725_v58 = vld [vmem:[%s3006_s15 + $0x350] sm:$0xff] }
 0x497   :  { %1328 = vmatpush.msra.mxu1 %v1707_v37  ;;  %v925_v37 = vld [vmem:[%s3010_s19 + $0x48] sm:$0xff] }
 0x498   :  { %1104 = vmatpush.msra.mxu0 %v1631_v21  ;;  %v1724_v21 = vld [vmem:[%s3006_s15 + $0x348] sm:$0xff] }
 0x499   :  { %1329 = vmatpush.msra.mxu1 %v1706_v38  ;;  %v1761_v38 = vld [vmem:[%s3006_s15 + $0x460] sm:$0xff] }
 0x49a   :  { %1105 = vmatpush.msra.mxu0 %v1630_v0  ;;  %v1722_v0 = vld [vmem:[%s3006_s15 + $0x338] sm:$0xff] }
 0x49b   :  { %1330 = vmatpush.msra.mxu1 %v1705_v20  ;;  %v924_v20 = vld [vmem:[%s3010_s19 + $0x40] sm:$0xff] }
 0x49c   :  { %1264 = vmatpush.msrb.mxu0 %v1696_v2 }
 0x49d   :  { %1331 = vmatpush.msra.mxu1 %v1704_v39  ;;  %v944_v39 = vld [vmem:[%s3010_s19 + $0xe0] sm:$0xff] }
 0x49e   :  { %1265 = vmatpush.msrb.mxu0 %v1695_v4  ;;  %v1743_v4 = vld [vmem:[%s3006_s15 + $0x3d8] sm:$0xff] }
 0x49f   :  { %1332 = vmatpush.msra.mxu1 %v1703_v40  ;;  %v1760_v40 = vld [vmem:[%s3006_s15 + $0x458] sm:$0xff] }
 0x4a0   :  { %1266 = vmatpush.msrb.mxu0 %v1694_v9  ;;  %v1763_v9 = vld [vmem:[%s3006_s15 + $0x470] sm:$0xff] }
 0x4a1   :  { %1333 = vmatpush.msra.mxu1 %v1702_v41  ;;  %v923_v41 = vld [vmem:[%s3010_s19 + $0x38] sm:$0xff] }
 0x4a2   :  { %1267 = vmatpush.msrb.mxu0 %v1693_v11  ;;  %v1762_v11 = vld [vmem:[%s3006_s15 + $0x468] sm:$0xff] }
 0x4a3   :  { %1334 = vmatpush.msra.mxu1 %v1701_v42  ;;  %v943_v42 = vld [vmem:[%s3010_s19 + $0xd8] sm:$0xff] }
 0x4a4   :  { %1268 = vmatpush.msrb.mxu0 %v1692_v13  ;;  %v1719_v13 = vld [vmem:[%s3006_s15 + $0x320] sm:$0xff] }
 0x4a5   :  { %1335 = vmatpush.msra.mxu1 %v1700_v43  ;;  %v1759_v43 = vld [vmem:[%s3006_s15 + $0x450] sm:$0xff] }
 0x4a6   :  { %1269 = vmatpush.msrb.mxu0 %v1691_v15  ;;  %v1718_v15 = vld [vmem:[%s3006_s15 + $0x318] sm:$0xff] }
 0x4a7   :  { %1336 = vmatpush.msra.mxu1 %v1699_v44  ;;  %v922_v44 = vld [vmem:[%s3010_s19 + $0x30] sm:$0xff] }
 0x4a8   :  { %1270 = vmatpush.msrb.mxu0 %v1690_v17  ;;  %v1739_v17 = vld [vmem:[%s3006_s15 + $0x3b8] sm:$0xff] }
 0x4a9   :  { %1337 = vmatpush.msra.mxu1 %v1698_v48  ;;  %v942_v48 = vld [vmem:[%s3010_s19 + $0xd0] sm:$0xff] }
 0x4aa   :  { %1271 = vmatpush.msrb.mxu0 %v1689_v19  ;;  %v1738_v19 = vld [vmem:[%s3006_s15 + $0x3b0] sm:$0xff] }
 0x4ac   :  { %1272 = vmatpush.msrb.mxu0 %v1688_v23  ;;  %v1715_v23 = vld [vmem:[%s3006_s15 + $0x300] sm:$0xff] }
 0x4ae   :  { %1273 = vmatpush.msrb.mxu0 %v1687_v25  ;;  %v1736_v25 = vld [vmem:[%s3006_s15 + $0x3a0] sm:$0xff] }
 0x4b0   :  { %1274 = vmatpush.msrb.mxu0 %v1686_v28  ;;  %v1735_v28 = vld [vmem:[%s3006_s15 + $0x398] sm:$0xff] }
 0x4b2   :  { %1275 = vmatpush.msrb.mxu0 %v1685_v59  ;;  %v928_v59 = vld [vmem:[%s3010_s19 + $0x60] sm:$0xff] }
 0x4b4   :  { %1276 = vmatpush.msrb.mxu0 %v1684_v60  ;;  %v927_v60 = vld [vmem:[%s3010_s19 + $0x58] sm:$0xff] }
 0x4b6   :  { %1277 = vmatpush.msrb.mxu0 %v1683_v34  ;;  %v947_v34 = vld [vmem:[%s3010_s19 + $0xf8] sm:$0xff] }
 0x4b8   :  { %1278 = vmatpush.msrb.mxu0 %v1682_v36  ;;  %v946_v36 = vld [vmem:[%s3010_s19 + $0xf0] sm:$0xff] }
 0x4ba   :  { %1279 = vmatpush.msrb.mxu0 %v1681_v5  ;;  %v945_v5 = vld [vmem:[%s3010_s19 + $0xe8] sm:$0xff] }
 0x4f6   :  { %v1010_v46 = vpop.f32.mrf.mxu0 }
 0x4f7   :  { %v1128_v47 = vpop.f32.mrf.mxu1  ;;  %1045 = vmatmul.f32.vlgmr.msra.gmra.mxu3 %v1010_v46  ;;  %v1758_v46 = vld [vmem:[%s3006_s15 + $0x448] sm:$0xff] }
 0x4f8   :  { %1164 = vmatmul.f32.vlgmr.msrb.gmra.mxu2 %v1128_v47  ;;  %1416 = vmatpush.msra.mxu3 %v2427_v27  ;;  %v941_v47 = vld [vmem:[%s3010_s19 + $0xc8] sm:$0xff] }
 0x4f9   :  { %1380 = vmatpush.msrb.mxu2 %v1730_v31  ;;  %v921_v31 = vld [vmem:[%s3010_s19 + $0x28] sm:$0xff] }
 0x4fb   :  { %1381 = vmatpush.msrb.mxu2 %v1729_v49  ;;  %v1757_v49 = vld [vmem:[%s3006_s15 + $0x440] sm:$0xff] }
 0x4fd   :  { %1382 = vmatpush.msrb.mxu2 %v1728_v51  ;;  %v920_v51 = vld [vmem:[%s3010_s19 + $0x20] sm:$0xff] }
 0x4fe   :  { %v1070_v53 = vpop.f32.mrf.mxu0 }
 0x4ff   :  { %v1186_v55 = vpop.f32.mrf.mxu1  ;;  %1106 = vmatmul.f32.vlgmr.msra.gmra.mxu0 %v1070_v53  ;;  %1383 = vmatpush.msrb.mxu2 %v1727_v52  ;;  %v940_v52 = vld [vmem:[%s3010_s19 + $0xc0] sm:$0xff]  ;;  %v1756_v53 = vld [vmem:[%s3006_s15 + $0x438] sm:$0xff] }
 0x500   :  { %1222 = vmatmul.f32.vlgmr.msrb.gmra.mxu3 %v1186_v55  ;;  %1714 = vmatmul.msk.f32.vlgmr.msra.gmra.mxu2 %vm244_vm1, %v2134_v50  ;;  %v1745_v50 = vld [vmem:[%s3006_s15 + $0x3e8] sm:$0xff]  ;;  %v939_v55 = vld [vmem:[%s3010_s19 + $0xb8] sm:$0xff] }
 0x501   :  { %1474 = vmatpush.msra.mxu0 %v2427_v27  ;;  %1384 = vmatpush.msrb.mxu2 %v1726_v54  ;;  %v1723_v27 = vld [vmem:[%s3006_s15 + $0x340] sm:$0xff]  ;;  %v919_v54 = vld [vmem:[%s3010_s19 + $0x18] sm:$0xff] }
 0x502   :  { %1438 = vmatpush.msrb.mxu3 %v1747_v57  ;;  %v1755_v57 = vld [vmem:[%s3006_s15 + $0x430] sm:$0xff] }
 0x503   :  { %1385 = vmatpush.msrb.mxu2 %v1725_v58  ;;  %v918_v58 = vld [vmem:[%s3010_s19 + $0x10] sm:$0xff] }
 0x504   :  { %1439 = vmatpush.msrb.mxu3 %v1746_v61  ;;  %v938_v61 = vld [vmem:[%s3010_s19 + $0xb0] sm:$0xff] }
 0x505   :  { %1386 = vmatpush.msrb.mxu2 %v1724_v21  ;;  %v1754_v21 = vld [vmem:[%s3006_s15 + $0x428] sm:$0xff] }
 0x506   :  { %1440 = vmatpush.msrb.mxu3 %v1745_v50  ;;  %v917_v50 = vld [vmem:[%s3010_s19 + $0x8] sm:$0xff] }
 0x507   :  { %v1244_v2 = vpop.f32.mrf.mxu1  ;;  %1387 = vmatpush.msrb.mxu2 %v1723_v27  ;;  %v937_v27 = vld [vmem:[%s3010_s19 + $0xa8] sm:$0xff] }
 0x508   :  { %1731 = vmatmul.msk.f32.vlgmr.msra.gmra.mxu3 %vm244_vm1, %v2142_v56  ;;  %1280 = vmatmul.f32.vlgmr.msrb.gmra.mxu0 %v1244_v2  ;;  %v1720_v56 = vld [vmem:[%s3006_s15 + $0x328] sm:$0xff]  ;;  %v936_v2 = vld [vmem:[%s3010_s19 + $0xa0] sm:$0xff] }
 0x509   :  { %1441 = vmatpush.msrb.mxu3 %v1744_v63  ;;  %1388 = vmatpush.msrb.mxu2 %v1722_v0  ;;  %v1753_v63 = vld [vmem:[%s3006_s15 + $0x420] sm:$0xff] }
 0x50a   :  { %1496 = vmatpush.msrb.mxu0 %v1764_v3  ;;  %v916_v0 = vld [vmem:[%s3010_s19] sm:$0xff]  ;;  %v1752_v3 = vld [vmem:[%s3006_s15 + $0x418] sm:$0xff] }
 0x50b   :  { %1442 = vmatpush.msrb.mxu3 %v1743_v4  ;;  %1389 = vmatpush.msrb.mxu2 %v1721_v8  ;;  %v935_v4 = vld [vmem:[%s3010_s19 + $0x98] sm:$0xff]  ;;  %v1751_v8 = vld [vmem:[%s3006_s15 + $0x410] sm:$0xff] }
 0x50c   :  { %1497 = vmatpush.msrb.mxu0 %v1763_v9  ;;  %v934_v9 = vld [vmem:[%s3010_s19 + $0x90] sm:$0xff] }
 0x50d   :  { %1443 = vmatpush.msrb.mxu3 %v1742_v10  ;;  %1390 = vmatpush.msrb.mxu2 %v1720_v56  ;;  %v1750_v10 = vld [vmem:[%s3006_s15 + $0x408] sm:$0xff] }
 0x50e   :  { %1498 = vmatpush.msrb.mxu0 %v1762_v11  ;;  %v933_v56 = vld [vmem:[%s3010_s19 + $0x88] sm:$0xff]  ;;  %v1749_v11 = vld [vmem:[%s3006_s15 + $0x400] sm:$0xff] }
 0x50f   :  { %v1302_v16 = vpop.f32.mrf.mxu1  ;;  %1444 = vmatpush.msrb.mxu3 %v1741_v12  ;;  %1391 = vmatpush.msrb.mxu2 %v1719_v13  ;;  %v932_v12 = vld [vmem:[%s3010_s19 + $0x80] sm:$0xff]  ;;  %v914_v13 = vld [vmem:[%s3008_s17 + $0x78] sm:$0xff] }
 0x510   :  { %1338 = vmatmul.f32.vlgmr.msra.gmra.mxu1 %v1302_v16  ;;  %1748 = vmatmul.msk.f32.vlgmr.msra.gmra.mxu0 %vm244_vm1, %v2124_v45  ;;  %v1737_v45 = vld [vmem:[%s3006_s15 + $0x3a8] sm:$0xff]  ;;  %v1773_v16 = vld [vmem:[%s3007_s16] ss:$0 sm:$0xff] }
 0x511   :  { %1445 = vmatpush.msrb.mxu3 %v1740_v14  ;;  %1392 = vmatpush.msrb.mxu2 %v1718_v15  ;;  %v913_v14 = vld [vmem:[%s3008_s17 + $0x70] sm:$0xff]  ;;  %v912_v15 = vld [vmem:[%s3008_s17 + $0x68] sm:$0xff] }
 0x512   :  { %1499 = vmatpush.msrb.mxu0 %v1761_v38  ;;  %1521 = vmatpush.msrb.mxu1 %v914_v13  ;;  %v899_v38 = vld [vmem:[%s3008_s17] sm:$0xff] }
 0x513   :  { %1446 = vmatpush.msrb.mxu3 %v1739_v17  ;;  %1393 = vmatpush.msrb.mxu2 %v1717_v18  ;;  %v911_v17 = vld [vmem:[%s3008_s17 + $0x60] sm:$0xff] }
 0x514   :  { %1500 = vmatpush.msrb.mxu0 %v1760_v40  ;;  %1522 = vmatpush.msrb.mxu1 %v913_v14 }
 0x515   :  { %1447 = vmatpush.msrb.mxu3 %v1738_v19  ;;  %1394 = vmatpush.msrb.mxu2 %v1716_v22  ;;  %v910_v19 = vld [vmem:[%s3008_s17 + $0x58] sm:$0xff] }
 0x516   :  { %1501 = vmatpush.msrb.mxu0 %v1759_v43  ;;  %1523 = vmatpush.msrb.mxu1 %v912_v15 }
 0x517   :  { %1448 = vmatpush.msrb.mxu3 %v1737_v45  ;;  %1395 = vmatpush.msrb.mxu2 %v1715_v23 }
 0x518   :  { %1502 = vmatpush.msrb.mxu0 %v1758_v46  ;;  %1524 = vmatpush.msrb.mxu1 %v911_v17 }
 0x519   :  { %1544 = vmatpush.msra.mxu2 %v931_v24  ;;  %1449 = vmatpush.msrb.mxu3 %v1736_v25  ;;  %v909_v24 = vld [vmem:[%s3008_s17 + $0x50] sm:$0xff] }
 0x51a   :  { %1503 = vmatpush.msrb.mxu0 %v1757_v49  ;;  %1525 = vmatpush.msrb.mxu1 %v910_v19  ;;  %v1775_v49 = vld [vmem:[%s3009_s18] ss:$0 sm:$0xff] }
 0x51b   :  { %1545 = vmatpush.msra.mxu2 %v930_v26  ;;  %1450 = vmatpush.msrb.mxu3 %v1735_v28  ;;  %v908_v26 = vld [vmem:[%s3008_s17 + $0x48] sm:$0xff] }
 0x51c   :  { %1504 = vmatpush.msrb.mxu0 %v1756_v53  ;;  %1526 = vmatpush.msrb.mxu1 %v909_v24 }
 0x51d   :  { %1546 = vmatpush.msra.mxu2 %v929_v29  ;;  %1451 = vmatpush.msrb.mxu3 %v1734_v30  ;;  %v907_v29 = vld [vmem:[%s3008_s17 + $0x40] sm:$0xff] }
 0x51e   :  { %1505 = vmatpush.msrb.mxu0 %v1755_v57  ;;  %1527 = vmatpush.msrb.mxu1 %v908_v26 }
 0x51f   :  { %1547 = vmatpush.msra.mxu2 %v928_v59  ;;  %1452 = vmatpush.msrb.mxu3 %v1733_v32 }
 0x520   :  { %1506 = vmatpush.msrb.mxu0 %v1754_v21  ;;  %1528 = vmatpush.msrb.mxu1 %v907_v29 }
 0x521   :  { %1548 = vmatpush.msra.mxu2 %v927_v60  ;;  %1453 = vmatpush.msrb.mxu3 %v1732_v33 }
 0x522   :  { %1507 = vmatpush.msrb.mxu0 %v1753_v63 }
 0x523   :  { %1564 = vmatpush.msra.mxu3 %v947_v34  ;;  %1549 = vmatpush.msra.mxu2 %v926_v35 }
 0x524   :  { %1508 = vmatpush.msrb.mxu0 %v1752_v3 }
 0x525   :  { %1565 = vmatpush.msra.mxu3 %v946_v36  ;;  %1550 = vmatpush.msra.mxu2 %v925_v37  ;;  %v906_v36 = vld [vmem:[%s3008_s17 + $0x38] sm:$0xff]  ;;  %v905_v37 = vld [vmem:[%s3008_s17 + $0x30] sm:$0xff] }
 0x526   :  { %1509 = vmatpush.msrb.mxu0 %v1751_v8  ;;  %1529 = vmatpush.msrb.mxu1 %v906_v36 }
 0x527   :  { %1566 = vmatpush.msra.mxu3 %v945_v5  ;;  %1551 = vmatpush.msra.mxu2 %v924_v20  ;;  %v904_v5 = vld [vmem:[%s3008_s17 + $0x28] sm:$0xff] }
 0x528   :  { %1510 = vmatpush.msrb.mxu0 %v1750_v10  ;;  %1530 = vmatpush.msrb.mxu1 %v905_v37 }
 0x529   :  { %1567 = vmatpush.msra.mxu3 %v944_v39  ;;  %1552 = vmatpush.msra.mxu2 %v923_v41 }
 0x52a   :  { %1511 = vmatpush.msrb.mxu0 %v1749_v11  ;;  %1531 = vmatpush.msrb.mxu1 %v904_v5 }
 0x52b   :  { %1568 = vmatpush.msra.mxu3 %v943_v42  ;;  %1553 = vmatpush.msra.mxu2 %v922_v44 }
 0x52c   :  { %1532 = vmatpush.msrb.mxu1 %v903_v62 }
 0x52d   :  { %1569 = vmatpush.msra.mxu3 %v942_v48  ;;  %1554 = vmatpush.msra.mxu2 %v921_v31  ;;  %v1774_v31 = vld [vmem:[#allocation4] ss:$0 sm:$0xff] }
 0x52f   :  { %1570 = vmatpush.msra.mxu3 %v941_v47  ;;  %1555 = vmatpush.msra.mxu2 %v920_v51 }
 0x531   :  { %1571 = vmatpush.msra.mxu3 %v940_v52  ;;  %1556 = vmatpush.msra.mxu2 %v919_v54 }
 0x533   :  { %1572 = vmatpush.msra.mxu3 %v939_v55  ;;  %1557 = vmatpush.msra.mxu2 %v918_v58  ;;  %v1586_v58 = vld [vmem:[%s3028_s22] sm:$0xff] }
 0x535   :  { %1573 = vmatpush.msra.mxu3 %v938_v61  ;;  %1558 = vmatpush.msra.mxu2 %v917_v50 }
 0x537   :  { %1574 = vmatpush.msra.mxu3 %v937_v27  ;;  %1559 = vmatpush.msra.mxu2 %v916_v0 }
 0x539   :  { %1575 = vmatpush.msra.mxu3 %v936_v2 }
 0x53b   :  { %1576 = vmatpush.msra.mxu3 %v935_v4 }
 0x53d   :  { %1577 = vmatpush.msra.mxu3 %v934_v9 }
 0x53f   :  { %1578 = vmatpush.msra.mxu3 %v933_v56 }
 0x541   :  { %1579 = vmatpush.msra.mxu3 %v932_v12 }
 0x57a   :  { %v1046_v18 = vpop.f32.mrf.mxu3 }
 0x57b   :  { %v1052_v22 = vadd.f32 %v1773_v16, %v1046_v18  ;;  %v1165_v45 = vpop.f32.mrf.mxu2 }
 0x57c   :  { %v1107_v23 = vpop.f32.mrf.mxu0 }
 0x57d   :  { %v1110_v25 = vadd.f32 %v1107_v23, %v1052_v22 }
 0x57f   :  { %v1168_v28 = vadd.f32 %v1165_v45, %v1110_v25 }
 0x583   :  { %v1223_v30 = vpop.f32.mrf.mxu3  ;;  %v1360_v59 = vpop.f32.mrf.mxu2 }
 0x584   :  { %v1226_v32 = vadd.f32 %v1223_v30, %v1168_v28  ;;  %1396 = vmatmul.f32.vlgmr.msrb.gmra.mxu2 %v1360_v59 }
 0x585   :  { %v1281_v60 = vpop.f32.mrf.mxu0 }
 0x586   :  { %v1284_v33 = vadd.f32 %v1281_v60, %v1226_v32 }
 0x58b   :  { %v1418_v34 = vpop.f32.mrf.mxu3 }
 0x58c   :  { %1454 = vmatmul.f32.vlgmr.msrb.gmra.mxu3 %v1418_v34  ;;  %1560 = vmatmul.f32.vlgmr.msra.gmra.mxu2 %v863_v1  ;;  %v902_v1 = vld [vmem:[%s3008_s17 + $0x18] sm:$0xff] }
 0x58d   :  { %v1476_v35 = vpop.f32.mrf.mxu0  ;;  %1533 = vmatpush.msrb.mxu1 %v902_v1  ;;  %v1339_v20 = vpop.f32.mrf.mxu1 }
 0x58e   :  { %1512 = vmatmul.f32.vlgmr.msrb.gmra.mxu0 %v1476_v35  ;;  %v1342_v40 = vadd.f32 %v1339_v20, %v1284_v33 }
 0x58f   :  { %1534 = vmatpush.msrb.mxu1 %v901_v6 }
 0x594   :  { %1580 = vmatmul.f32.vlgmr.msra.gmra.mxu3 %v864_v7  ;;  %v900_v7 = vld [vmem:[%s3008_s17 + $0x8] sm:$0xff] }
 0x595   :  { %1535 = vmatpush.msrb.mxu1 %v900_v7 }
 0x597   :  { %1536 = vmatpush.msrb.mxu1 %v899_v38 }
 0x607   :  { %v1397_v39 = vpop.f32.mrf.mxu2 }
 0x608   :  { %v1400_v41 = vadd.f32 %v1397_v39, %v1342_v40 }
 0x60b   :  { %v1513_v43 = vpop.f32.mrf.mxu0 }
 0x60f   :  { %v1455_v42 = vpop.f32.mrf.mxu3  ;;  %v1561_v47 = vpop.f32.mrf.mxu2 }
 0x610   :  { %v1458_v44 = vadd.f32 %v1455_v42, %v1400_v41  ;;  %v1562_v52 = vadd.f32 %v1774_v31, %v1561_v47 }
 0x612   :  { %v1516_v48 = vadd.f32 %v1513_v43, %v1458_v44 }
 0x614   :  { %v1517_v46 = vmax.f32 %v1516_v48, 0.0 }
 0x616   :  { %1537 = vmatmul.f32.vlgmr.msrb.gmra.mxu1 %v1517_v46 }
 0x617   :  { %v1581_v51 = vpop.f32.mrf.mxu3 }
 0x618   :  { %v1582_v54 = vadd.f32 %v1581_v51, %v1562_v52 }
 0x693   :  { %v1538_v53 = vpop.f32.mrf.mxu1 }
 0x694   :  { %v1539_v55 = vadd.f32 %v1775_v49, %v1538_v53 }
 0x696   :  { %v1584_v57 = vadd.f32 %v1582_v54, %v1539_v55 }
 0x698   :  { %v1585_v61 = vmax.f32 %v1584_v57, 0.0 }
 0x69a   :  { %v1587_v21 = vadd.f32 %v1586_v58, %v1585_v61 }
 0x69c   :  { %1589 = vst.msk [vmem:[%s3012_s21] sm:$0xff] %vm1588_vm2, %v1587_v21 }
 0x69d   :  { %1594 = vsyncpa [#allocation3], 1 }
 0x69e   :  { %1595 = vsyncpa [#allocation5], 1 }

// kernel: prefix_lm_forward.3
= control target key start
LH: loop header
LB: loop body
LE: loop exit
PB: predicated region body
PF: predicated region fallthrough
CT: control target
= control target key end

     0   :  { %s6957_s6 = smov 1   ;;  %s6958_s10 = smov 2   ;;  %s9034_s0 = inlined_call_operand.smem [shape: u32[39], index: -1, kind: input, shape index: {}] }
   0x1   :  { %s7018_s5 = sld [smem:[%s9034_s0]]   ;;  %s6959_s14 = smov 3  }
   0x2   :  { %s7023_s9 = sld [smem:[%s9034_s0 + %s6957_s6]]   ;;  %s6960_s18 = smov 4  }
   0x3   :  { %s7028_s13 = sld [smem:[%s9034_s0 + %s6958_s10]]   ;;  %s6961_s22 = smov 5  }
   0x4   :  { %s7033_s17 = sld [smem:[%s9034_s0 + %s6959_s14]]   ;;  %s6962_s26 = smov 6  }
   0x5   :  { %s7038_s21 = sld [smem:[%s9034_s0 + %s6960_s18]]   ;;  %s6963_s30 = smov 7  }
   0x6   :  { %s7043_s25 = sld [smem:[%s9034_s0 + %s6961_s22]]   ;;  %s6964_s4 = smov 8  }
   0x7   :  { %s7048_s29 = sld [smem:[%s9034_s0 + %s6962_s26]]   ;;  %s6965_s10 = smov 9  }
   0x8   :  { %9056 = sst [smem:[#allocation28_spill]] %s7023_s9  ;;  %s6966_s15 = smov 10  }
   0x9   :  { %9057 = sst [smem:[#allocation29_spill]] %s7028_s13  ;;  %s6967_s20 = smov 11  }
   0xa   :  { %9058 = sst [smem:[#allocation30_spill]] %s7033_s17  ;;  %s6968_s26 = smov 12  }
   0xb   :  { %9059 = sst [smem:[#allocation31_spill]] %s7038_s21  ;;  %s6969_s1 = smov 13  }
   0xc   :  { %9060 = sst [smem:[#allocation32_spill]] %s7043_s25  ;;  %s6970_s7 = smov 14  }
   0xd   :  { %s7053_s3 = sld [smem:[%s9034_s0 + %s6963_s30]]   ;;  %s6972_s22 = smov 16  }
   0xe   :  { %s7058_s8 = sld [smem:[%s9034_s0 + %s6964_s4]]   ;;  %s6973_s28 = smov 17  }
   0xf   :  { %s7063_s14 = sld [smem:[%s9034_s0 + %s6965_s10]]  }
  0x10   :  { %s7068_s19 = sld [smem:[%s9034_s0 + %s6966_s15]]   ;;  %s6971_s15 = smov 15  }
  0x11   :  { %s7073_s24 = sld [smem:[%s9034_s0 + %s6967_s20]]  }
  0x12   :  { %s7078_s30 = sld [smem:[%s9034_s0 + %s6968_s26]]  }
  0x13   :  { %s7083_s6 = sld [smem:[%s9034_s0 + %s6969_s1]]  }
  0x14   :  { %s7088_s12 = sld [smem:[%s9034_s0 + %s6970_s7]]   ;;  %s6974_s7 = smov 18  }
  0x15   :  { %9061 = sst [smem:[#allocation33_spill]] %s7063_s14 }
  0x16   :  { %s7093_s20 = sld [smem:[%s9034_s0 + %s6971_s15]]   ;;  %s6975_s15 = smov 19  }
  0x17   :  { %9062 = sst [smem:[#allocation34_spill]] %s7073_s24 }
  0x18   :  { %9063 = sst [smem:[#allocation35_spill]] %s7078_s30 }
  0x19   :  { %s7098_s27 = sld [smem:[%s9034_s0 + %s6972_s22]]   ;;  %s6976_s22 = smov 20  }
  0x1a   :  { %9064 = sst [smem:[#allocation36_spill]] %s7088_s12 }
  0x1b   :  { %s7103_s4 = sld [smem:[%s9034_s0 + %s6973_s28]]   ;;  %s6977_s28 = smov 21  }
  0x1c   :  { %s7108_s21 = sld [smem:[%s9034_s0 + %s6974_s7]]   ;;  %s6978_s7 = smov 22  }
  0x1d   :  { %s7113_s17 = sld [smem:[%s9034_s0 + %s6975_s15]]   ;;  %s6979_s15 = smov 23  }
  0x1e   :  { %s7118_s9 = sld [smem:[%s9034_s0 + %s6976_s22]]   ;;  %s6980_s22 = smov 24  }
  0x21   :  { %9065 = sst [smem:[#allocation37_spill]] %s7103_s4 }
  0x22   :  { %9066 = sst [smem:[#allocation38_spill]] %s7108_s21 }
  0x23   :  { %9067 = sst [smem:[#allocation39_spill]] %s7113_s17 }
  0x24   :  { %9068 = sst [smem:[#allocation40_spill]] %s7118_s9 }
  0x25   :  { %s7123_s4 = sld [smem:[%s9034_s0 + %s6977_s28]]   ;;  %s6981_s28 = smov 25  }
  0x26   :  { %s7128_s21 = sld [smem:[%s9034_s0 + %s6978_s7]]   ;;  %s6982_s7 = smov 26  }
  0x27   :  { %s7133_s17 = sld [smem:[%s9034_s0 + %s6979_s15]]   ;;  %s6983_s15 = smov 27  }
  0x28   :  { %s7138_s9 = sld [smem:[%s9034_s0 + %s6980_s22]]   ;;  %s6984_s22 = smov 28  }
  0x29   :  { %s7143_s24 = sld [smem:[%s9034_s0 + %s6981_s28]]   ;;  %s6985_s28 = smov 29  }
  0x2a   :  { %s7158_s12 = sld [smem:[%s9034_s0 + %s6984_s22]]   ;;  %s6988_s22 = smov 32  }
  0x2b   :  { %s7178_s30 = sld [smem:[%s9034_s0 + %s6988_s22]]   ;;  %s6992_s22 = smov 36  }
  0x2c   :  { %9069 = sst [smem:[#allocation41_spill]] %s7128_s21 }
  0x2d   :  { %9070 = sst [smem:[#allocation42_spill]] %s7133_s17 }
  0x2e   :  { %s7148_s21 = sld [smem:[%s9034_s0 + %s6982_s7]]   ;;  %s6986_s7 = smov 30  }
  0x2f   :  { %9071 = sst [smem:[#allocation43_spill]] %s7143_s24 }
  0x30   :  { %s7153_s17 = sld [smem:[%s9034_s0 + %s6983_s15]]   ;;  %s6987_s15 = smov 31  }
  0x31   :  { %s7163_s24 = sld [smem:[%s9034_s0 + %s6985_s28]]   ;;  %s6989_s28 = smov 33  }
  0x32   :  { %9076 = sst [smem:[#allocation48_spill]] %s7178_s30 }
  0x33   :  { %s7198_s30 = sld [smem:[%s9034_s0 + %s6992_s22]]  }
  0x34   :  { %9072 = sst [smem:[#allocation44_spill]] %s7148_s21 }
  0x35   :  { %s7168_s21 = sld [smem:[%s9034_s0 + %s6986_s7]]   ;;  %s6990_s7 = smov 34  }
  0x36   :  { %9073 = sst [smem:[#allocation45_spill]] %s7153_s17 }
  0x37   :  { %9074 = sst [smem:[#allocation46_spill]] %s7163_s24 }
  0x38   :  { %s7173_s17 = sld [smem:[%s9034_s0 + %s6987_s15]]   ;;  %s6991_s15 = smov 35  }
  0x39   :  { %s7183_s24 = sld [smem:[%s9034_s0 + %s6989_s28]]   ;;  %s6993_s28 = smov 37  }
  0x3a   :  { %s7193_s14 = sld [smem:[%s9034_s0 + %s6991_s15]]  }
  0x3b   :  { %9075 = sst [smem:[#allocation47_spill]] %s7168_s21 }
  0x3c   :  { %s7188_s21 = sld [smem:[%s9034_s0 + %s6990_s7]]   ;;  %s6994_s7 = smov 38  }
  0x3d   :  { %s7203_s13 = sld [smem:[%s9034_s0 + %s6993_s28]]  }
  0x3e   :  { %s7208_s25 = sld [smem:[%s9034_s0 + %s6994_s7]]  }
  0x3f   :  { %82 = vsyncpa [#allocation3], 0 }
  0x40   :  { %83 = vsyncpa [#allocation5], 0 }
  0x41   :  { %84 = vsyncpa [#allocation8], 0 }
  0x42   :  { %85 = vsyncpa [#allocation11], 0 }
  0x43   :  { %86 = vsyncpa [#allocation14], 0 }
  0x44   :  { %87 = vsyncpa [#allocation17], 0 }
  0x45   :  { %88 = vsyncpa [#allocation20], 0  ;;  %s130_s15 = sshll.u32 %s7083_s6, 4  ;;  %s6995_s16 = smov [#allocation4]   ;;  %s131_s15 = int_to_ptr.hbm [resolvable:$true] %s130_s15 }
  0x46   :  { %s132_s18 = sshll.u32 %s6995_s16, 4  ;;  %s158_s22 = sshll.u32 %s7098_s27, 4  ;;  %s133_s18 = int_to_ptr.vmem [resolvable:$true] %s132_s18  ;;  %s159_s22 = int_to_ptr.hbm [resolvable:$true] %s158_s22 }
  0x47   :  { %s6655_s23 = sshra.s32 %s131_s15, 4  ;;  %s6659_s26 = scalar_lea.hbm %s7083_s6, 2  ;;  %s6656_s23 = int_to_ptr.hbm [resolvable:$true] %s6655_s23 }
  0x48   :  { %s6657_s0 = scalar_lea.hbm %s6656_s23, 2  ;;  %p6660_p1 = scmp.lt.s32.totalorder %s6656_s23, %s7083_s6 }
  0x49   :  { %p6658_p0 = scmp.ne.s32.totalorder %s6656_s23, %s6657_s0  ;;  %p6661_p2 = scmp.lt.s32.totalorder %s6659_s26, %s6657_s0 }
  0x4b   :  { %p6662_p3 = por %p6661_p2, %p6660_p1 }
  0x4d   :  { %p6663_p4 = pnand %p6662_p3, %p6658_p0 }
  0x4f   :  { %6666 = shalt.err (!%p6663_p4)
}
  0x50   :  { %s6996_s28 = smov 16   ;;  %s6997_s1 = smov 1  }
  0x51   :  { %138 = dma.hbm_to_vmem [thread:$0]  %s131_s15, 32, %s133_s18, [#allocation5], %s6996_s28, %s6996_s28, %s6997_s1  }
  0x52   :  { %s6998_s2 = smov [#allocation7]   ;;  %s196_s10 = sshll.u32 %s7138_s9, 4  ;;  %s7218_s10 = int_to_ptr.hbm [resolvable:$true] %s196_s10 }
  0x53   :  { %s160_s7 = sshll.u32 %s6998_s2, 4  ;;  %s6679_s6 = sshra.s32 %s159_s22, 4  ;;  %s161_s7 = int_to_ptr.vmem [resolvable:$true] %s160_s7  ;;  %s6680_s6 = int_to_ptr.hbm [resolvable:$true] %s6679_s6 }
  0x54   :  { %s6681_s11 = scalar_lea.hbm %s6680_s6, 2  ;;  %s6683_s16 = scalar_lea.hbm %s7098_s27, 2 }
  0x55   :  { %p6682_p5 = scmp.ne.s32.totalorder %s6680_s6, %s6681_s11  ;;  %p6684_p6 = scmp.lt.s32.totalorder %s6680_s6, %s7098_s27 }
  0x56   :  { %p6685_p7 = scmp.lt.s32.totalorder %s6683_s16, %s6681_s11 }
  0x58   :  { %p6686_p8 = por %p6685_p7, %p6684_p6 }
  0x5a   :  { %p6687_p9 = pnand %p6686_p8, %p6682_p5 }
  0x5c   :  { %6690 = shalt.err (!%p6687_p9)
}
  0x5d   :  { %166 = dma.hbm_to_vmem [thread:$0]  %s159_s22, 32, %s161_s7, [#allocation8], %s6996_s28, %s6996_s28, %s6997_s1  }
  0x5e   :  { %s232_s15 = sshll.u32 %s7173_s17, 4  ;;  %s6999_s18 = smov [#allocation10]   ;;  %s7226_s15 = int_to_ptr.hbm [resolvable:$true] %s232_s15 }
  0x5f   :  { %s198_s23 = sshll.u32 %s6999_s18, 4  ;;  %s6703_s0 = sshra.s32 %s7218_s10, 4  ;;  %s199_s23 = int_to_ptr.vmem [resolvable:$true] %s198_s23  ;;  %s6704_s0 = int_to_ptr.hbm [resolvable:$true] %s6703_s0 }
  0x60   :  { %s6705_s27 = scalar_lea.hbm %s6704_s0, 2  ;;  %s6707_s26 = scalar_lea.hbm %s7138_s9, 2 }
  0x61   :  { %p6706_p10 = scmp.ne.s32.totalorder %s6704_s0, %s6705_s27  ;;  %p6708_p11 = scmp.lt.s32.totalorder %s6704_s0, %s7138_s9 }
  0x62   :  { %p6709_p12 = scmp.lt.s32.totalorder %s6707_s26, %s6705_s27 }
  0x64   :  { %p6710_p13 = por %p6709_p12, %p6708_p11 }
  0x66   :  { %p6711_p0 = pnand %p6710_p13, %p6706_p10 }
  0x68   :  { %6714 = shalt.err (!%p6711_p0)
}
  0x69   :  { %204 = dma.hbm_to_vmem [thread:$0]  %s7218_s10, 32, %s199_s23, [#allocation11], %s6996_s28, %s6996_s28, %s6997_s1  }
  0x6a   :  { %s7000_s22 = smov [#allocation13]   ;;  %s260_s7 = sshll.u32 %s7188_s21, 4  ;;  %s7236_s7 = int_to_ptr.hbm [resolvable:$true] %s260_s7 }
  0x6b   :  { %s234_s2 = sshll.u32 %s7000_s22, 4  ;;  %s6727_s9 = sshra.s32 %s7226_s15, 4  ;;  %s235_s2 = int_to_ptr.vmem [resolvable:$true] %s234_s2  ;;  %s6728_s9 = int_to_ptr.hbm [resolvable:$true] %s6727_s9 }
  0x6c   :  { %s6729_s6 = scalar_lea.hbm %s6728_s9, 2  ;;  %s6731_s11 = scalar_lea.hbm %s7173_s17, 2 }
  0x6d   :  { %p6730_p1 = scmp.ne.s32.totalorder %s6728_s9, %s6729_s6  ;;  %p6732_p2 = scmp.lt.s32.totalorder %s6728_s9, %s7173_s17 }
  0x6e   :  { %p6733_p3 = scmp.lt.s32.totalorder %s6731_s11, %s6729_s6 }
  0x70   :  { %p6734_p4 = por %p6733_p3, %p6732_p2 }
  0x72   :  { %p6735_p5 = pnand %p6734_p4, %p6730_p1 }
  0x74   :  { %6738 = shalt.err (!%p6735_p5)
}
  0x75   :  { %240 = dma.hbm_to_vmem [thread:$0]  %s7226_s15, 32, %s235_s2, [#allocation14], %s6996_s28, %s6996_s28, %s6997_s1  }
  0x76   :  { %s113_s10 = sshll.u32 %s7068_s19, 4  ;;  %s7001_s16 = smov [#allocation16]   ;;  %s7246_s10 = int_to_ptr.hbm [resolvable:$true] %s113_s10 }
  0x77   :  { %s262_s18 = sshll.u32 %s7001_s16, 4  ;;  %s6751_s17 = sshra.s32 %s7236_s7, 4  ;;  %s263_s18 = int_to_ptr.vmem [resolvable:$true] %s262_s18  ;;  %s6752_s17 = int_to_ptr.hbm [resolvable:$true] %s6751_s17 }
  0x78   :  { %s6753_s23 = scalar_lea.hbm %s6752_s17, 2  ;;  %s6755_s0 = scalar_lea.hbm %s7188_s21, 2 }
  0x79   :  { %p6754_p6 = scmp.ne.s32.totalorder %s6752_s17, %s6753_s23  ;;  %p6756_p7 = scmp.lt.s32.totalorder %s6752_s17, %s7188_s21 }
  0x7a   :  { %p6757_p8 = scmp.lt.s32.totalorder %s6755_s0, %s6753_s23 }
  0x7c   :  { %p6758_p9 = por %p6757_p8, %p6756_p7 }
  0x7e   :  { %p6759_p10 = pnand %p6758_p9, %p6754_p6 }
  0x80   :  { %6762 = shalt.err (!%p6759_p10)
}
  0x81   :  { %268 = dma.hbm_to_vmem [thread:$0]  %s7236_s7, 32, %s263_s18, [#allocation17], %s6996_s28, %s6996_s28, %s6997_s1  }
  0x82   :  { %s7002_s15 = smov [#allocation2]   ;;  %s145_s26 = sshll.u32 %s7093_s20, 4  ;;  %s7256_s26 = int_to_ptr.hbm [resolvable:$true] %s145_s26 }
  0x83   :  { %s115_s27 = sshll.u32 %s7002_s15, 4  ;;  %s6775_s21 = sshra.s32 %s7246_s10, 4  ;;  %s116_s27 = int_to_ptr.vmem [resolvable:$true] %s115_s27  ;;  %s6776_s21 = int_to_ptr.hbm [resolvable:$true] %s6775_s21 }
  0x84   :  { %s6777_s22 = scalar_lea.hbm %s6776_s21, 2  ;;  %s6779_s2 = scalar_lea.hbm %s7068_s19, 2 }
  0x85   :  { %p6778_p11 = scmp.ne.s32.totalorder %s6776_s21, %s6777_s22  ;;  %p6780_p12 = scmp.lt.s32.totalorder %s6776_s21, %s7068_s19 }
  0x86   :  { %p6781_p13 = scmp.lt.s32.totalorder %s6779_s2, %s6777_s22 }
  0x88   :  { %p6782_p0 = por %p6781_p13, %p6780_p12 }
  0x8a   :  { %p6783_p1 = pnand %p6782_p0, %p6778_p11 }
  0x8c   :  { %6786 = shalt.err (!%p6783_p1)
}
  0x8d   :  { %121 = dma.hbm_to_vmem [thread:$0]  %s7246_s10, 32, %s116_s27, [#allocation3], %s6996_s28, %s6996_s28, %s6997_s1  }
  0x8e   :  { %s179_s7 = sshll.u32 %s7123_s4, 4  ;;  %s7003_s9 = smov [#allocation6]   ;;  %s7266_s7 = int_to_ptr.hbm [resolvable:$true] %s179_s7 }
  0x8f   :  { %s147_s6 = sshll.u32 %s7003_s9, 4  ;;  %s6799_s19 = sshra.s32 %s7256_s26, 4  ;;  %s148_s6 = int_to_ptr.vmem [resolvable:$true] %s147_s6  ;;  %s6800_s19 = int_to_ptr.hbm [resolvable:$true] %s6799_s19 }
  0x90   :  { %s6801_s11 = scalar_lea.hbm %s6800_s19, 2  ;;  %s6803_s16 = scalar_lea.hbm %s7093_s20, 2 }
  0x91   :  { %p6802_p2 = scmp.ne.s32.totalorder %s6800_s19, %s6801_s11  ;;  %p6804_p3 = scmp.lt.s32.totalorder %s6800_s19, %s7093_s20 }
  0x92   :  { %p6805_p4 = scmp.lt.s32.totalorder %s6803_s16, %s6801_s11 }
  0x94   :  { %p6806_p5 = por %p6805_p4, %p6804_p3 }
  0x96   :  { %p6807_p6 = pnand %p6806_p5, %p6802_p2 }
  0x98   :  { %6810 = shalt.err (!%p6807_p6)
}
  0x99   :  { %153 = dma.hbm_to_vmem [thread:$0]  %s7256_s26, 32, %s148_s6, [#allocation5], %s6996_s28, %s6996_s28, %s6997_s1  }
  0x9a   :  { %s7004_s10 = smov [#allocation9]   ;;  %s215_s17 = sshll.u32 %s7158_s12, 4  ;;  %s7276_s17 = int_to_ptr.hbm [resolvable:$true] %s215_s17 }
  0x9b   :  { %s181_s18 = sshll.u32 %s7004_s10, 4  ;;  %s6823_s20 = sshra.s32 %s7266_s7, 4  ;;  %s182_s18 = int_to_ptr.vmem [resolvable:$true] %s181_s18  ;;  %s6824_s20 = int_to_ptr.hbm [resolvable:$true] %s6823_s20 }
  0x9c   :  { %s6825_s23 = scalar_lea.hbm %s6824_s20, 2  ;;  %s6827_s0 = scalar_lea.hbm %s7123_s4, 2 }
  0x9d   :  { %p6826_p7 = scmp.ne.s32.totalorder %s6824_s20, %s6825_s23  ;;  %p6828_p8 = scmp.lt.s32.totalorder %s6824_s20, %s7123_s4 }
  0x9e   :  { %p6829_p9 = scmp.lt.s32.totalorder %s6827_s0, %s6825_s23 }
  0xa0   :  { %p6830_p10 = por %p6829_p9, %p6828_p8 }
  0xa2   :  { %p6831_p11 = pnand %p6830_p10, %p6826_p7 }
  0xa4   :  { %6834 = shalt.err (!%p6831_p11)
}
  0xa5   :  { %187 = dma.hbm_to_vmem [thread:$0]  %s7266_s7, 32, %s182_s18, [#allocation8], %s6996_s28, %s6996_s28, %s6997_s1  }
  0xa6   :  { %s247_s15 = sshll.u32 %s7183_s24, 4  ;;  %s7005_s27 = smov [#allocation12]   ;;  %s7286_s15 = int_to_ptr.hbm [resolvable:$true] %s247_s15 }
  0xa7   :  { %s217_s26 = sshll.u32 %s7005_s27, 4  ;;  %s6847_s4 = sshra.s32 %s7276_s17, 4  ;;  %s218_s26 = int_to_ptr.vmem [resolvable:$true] %s217_s26  ;;  %s6848_s4 = int_to_ptr.hbm [resolvable:$true] %s6847_s4 }
  0xa8   :  { %s6849_s21 = scalar_lea.hbm %s6848_s4, 2  ;;  %s6851_s22 = scalar_lea.hbm %s7158_s12, 2 }
  0xa9   :  { %p6850_p12 = scmp.ne.s32.totalorder %s6848_s4, %s6849_s21  ;;  %p6852_p13 = scmp.lt.s32.totalorder %s6848_s4, %s7158_s12 }
  0xaa   :  { %p6853_p0 = scmp.lt.s32.totalorder %s6851_s22, %s6849_s21 }
  0xac   :  { %p6854_p1 = por %p6853_p0, %p6852_p13 }
  0xae   :  { %p6855_p2 = pnand %p6854_p1, %p6850_p12 }
  0xb0   :  { %6858 = shalt.err (!%p6855_p2)
}
  0xb1   :  { %223 = dma.hbm_to_vmem [thread:$0]  %s7276_s17, 32, %s218_s26, [#allocation11], %s6996_s28, %s6996_s28, %s6997_s1  }
  0xb2   :  { %s7006_s2 = smov [#allocation15]   ;;  %s273_s9 = sshll.u32 %s7193_s14, 4  ;;  %s7296_s9 = int_to_ptr.hbm [resolvable:$true] %s273_s9 }
  0xb3   :  { %s249_s7 = sshll.u32 %s7006_s2, 4  ;;  %s6871_s12 = sshra.s32 %s7286_s15, 4  ;;  %s250_s7 = int_to_ptr.vmem [resolvable:$true] %s249_s7  ;;  %s6872_s12 = int_to_ptr.hbm [resolvable:$true] %s6871_s12 }
  0xb4   :  { %s6873_s6 = scalar_lea.hbm %s6872_s12, 2  ;;  %s6875_s19 = scalar_lea.hbm %s7183_s24, 2 }
  0xb5   :  { %p6874_p3 = scmp.ne.s32.totalorder %s6872_s12, %s6873_s6  ;;  %p6876_p4 = scmp.lt.s32.totalorder %s6872_s12, %s7183_s24 }
  0xb6   :  { %p6877_p5 = scmp.lt.s32.totalorder %s6875_s19, %s6873_s6 }
  0xb8   :  { %p6878_p6 = por %p6877_p5, %p6876_p4 }
  0xba   :  { %p6879_p7 = pnand %p6878_p6, %p6874_p3 }
  0xbc   :  { %6882 = shalt.err (!%p6879_p7)
}
  0xbd   :  { %255 = dma.hbm_to_vmem [thread:$0]  %s7286_s15, 32, %s250_s7, [#allocation14], %s6996_s28, %s6996_s28, %s6997_s1  }
  0xbe   :  { %s289_s11 = sshll.u32 %s7203_s13, 4  ;;  %s7007_s16 = smov [#allocation18]   ;;  %s290_s11 = int_to_ptr.hbm [resolvable:$true] %s289_s11 }
  0xbf   :  { %s275_s10 = sshll.u32 %s7007_s16, 4  ;;  %s6895_s18 = sshra.s32 %s7296_s9, 4  ;;  %s276_s10 = int_to_ptr.vmem [resolvable:$true] %s275_s10  ;;  %s6896_s18 = int_to_ptr.hbm [resolvable:$true] %s6895_s18 }
  0xc0   :  { %s6897_s24 = scalar_lea.hbm %s6896_s18, 2  ;;  %s6899_s17 = scalar_lea.hbm %s7193_s14, 2 }
  0xc1   :  { %p6898_p8 = scmp.ne.s32.totalorder %s6896_s18, %s6897_s24  ;;  %p6900_p9 = scmp.lt.s32.totalorder %s6896_s18, %s7193_s14 }
  0xc2   :  { %p6901_p10 = scmp.lt.s32.totalorder %s6899_s17, %s6897_s24 }
  0xc4   :  { %p6902_p11 = por %p6901_p10, %p6900_p9 }
  0xc6   :  { %p6903_p12 = pnand %p6902_p11, %p6898_p8 }
  0xc8   :  { %6906 = shalt.err (!%p6903_p12)
}
  0xc9   :  { %281 = dma.hbm_to_vmem [thread:$0]  %s7296_s9, 32, %s276_s10, [#allocation17], %s6996_s28, %s6996_s28, %s6997_s1  }
  0xca   :  { %s7008_s20 = smov [#allocation19]   ;;  %s6919_s0 = sshra.s32 %s290_s11, 4  ;;  %s6920_s0 = int_to_ptr.hbm [resolvable:$true] %s6919_s0 }
  0xcb   :  { %s291_s23 = sshll.u32 %s7008_s20, 4  ;;  %s6921_s15 = scalar_lea.hbm %s6920_s0, 1  ;;  %s292_s23 = int_to_ptr.vmem [resolvable:$true] %s291_s23 }
  0xcc   :  { %p6922_p13 = scmp.ne.s32.totalorder %s6920_s0, %s6921_s15  ;;  %s6923_s27 = scalar_lea.hbm %s7203_s13, 1 }
  0xcd   :  { %p6924_p0 = scmp.lt.s32.totalorder %s6920_s0, %s7203_s13  ;;  %p6925_p1 = scmp.lt.s32.totalorder %s6923_s27, %s6921_s15 }
  0xcf   :  { %p6926_p2 = por %p6925_p1, %p6924_p0 }
  0xd1   :  { %p6927_p3 = pnand %p6926_p2, %p6922_p13 }
  0xd3   :  { %6930 = shalt.err (!%p6927_p3)
}
  0xd4   :  { %294 = dma.hbm_to_vmem [thread:$0]  %s290_s11, 16, %s292_s23, [#allocation20]  }
  0xd5   :  { %6943 = dma.done.wait [#allocation3], 32  }
  0xd6   :  { %6944 = vsyncadd [#allocation3], 4294967264 }
  0xd7   :  { %6945 = dma.done.wait [#allocation5], 64  }
  0xd8   :  { %6946 = vsyncadd [#allocation5], 4294967232 }
  0xd9   :  { %6947 = dma.done.wait [#allocation8], 64  }
  0xda   :  { %6948 = vsyncadd [#allocation8], 4294967232 }
  0xdb   :  { %6949 = dma.done.wait [#allocation11], 64  }
  0xdc   :  { %6950 = vsyncadd [#allocation11], 4294967232 }
  0xdd   :  { %6951 = dma.done.wait [#allocation14], 64  }
  0xde   :  { %6952 = vsyncadd [#allocation14], 4294967232 }
  0xdf   :  { %6953 = dma.done.wait [#allocation17], 64  }
  0xe0   :  { %6954 = vsyncadd [#allocation17], 4294967232 }
  0xe1   :  { %6955 = dma.done.wait [#allocation20], 16  }
  0xe2   :  { %6956 = vsyncadd [#allocation20], 4294967280  ;;  %vm363_vm0 = vcmask 261120   ;;  %vm370_vm1 = vcmask 254976   ;;  %v357_v0 = vld [vmem:[%s7018_s5] sm:$0xff]  ;;  %v358_v1 = vld [vmem:[%s7018_s5 + $0x8] sm:$0xff] }
  0xe3   :  { %v359_v2 = vld [vmem:[%s7018_s5 + $0x10] sm:$0x3]  ;;  %v364_v3 = vsel %vm363_vm0, %v357_v0, 0.0  ;;  %v367_v5 = vsel %vm363_vm0, %v358_v1, 0.0  ;;  %v7009_v6 = vmov 32.0   ;;  %v453_v28 = vld [vmem:[%s7053_s3 + $0x18] sm:$0xff] }
  0xe4   :  { %v371_v4 = vsel %vm370_vm1, %v359_v2, 0.0  ;;  %365 = vadd.xlane.f32.xlu0 %v364_v3  ;;  %6341 = vrcp.f32 %v7009_v6  ;;  %v5835_v29 = vld [vmem:[%s7053_s3 + $0x38] sm:$0xff]  ;;  %479 = vmatpush.msra.mxu0 %v453_v28  ;;  %v452_v31 = vld [vmem:[%s7053_s3 + $0x10] sm:$0xff]  ;;  %v451_v34 = vld [vmem:[%s7053_s3 + $0x8] sm:$0xff]  ;;  %s9077_s13 = sld [smem:[#allocation32_spill]]  ;;  %vm834_vm12 = vcmask 1041408  }
  0xe5   :  { %372 = vadd.xlane.f32.xlu1 %v371_v4  ;;  %v5843_v30 = vld [vmem:[%s7053_s3 + $0x58] sm:$0xff]  ;;  %515 = vmatpush.msra.mxu1 %v5835_v29  ;;  %v5834_v32 = vld [vmem:[%s7053_s3 + $0x30] sm:$0xff]  ;;  %v5833_v35 = vld [vmem:[%s7053_s3 + $0x28] sm:$0xff]  ;;  %s9078_s14 = sld [smem:[#allocation29_spill]]  ;;  %vm626_vm13 = vcmask 146432   ;;  %vm633_vm14 = vcmask 140288  }
  0xe6   :  { %551 = vmatpush.msra.mxu2 %v5843_v30  ;;  %v5842_v33 = vld [vmem:[%s7053_s3 + $0x50] sm:$0xff]  ;;  %480 = vmatpush.msra.mxu0 %v452_v31  ;;  %v5841_v36 = vld [vmem:[%s7053_s3 + $0x48] sm:$0xff]  ;;  %v450_v37 = vld [vmem:[%s7053_s3] sm:$0xff]  ;;  %s9079_s28 = sld [smem:[#allocation33_spill]] }
  0xe7   :  { %516 = vmatpush.msra.mxu1 %v5834_v32  ;;  %v5832_v38 = vld [vmem:[%s7053_s3 + $0x20] sm:$0xff]  ;;  %s9080_s1 = sld [smem:[#allocation35_spill]] }
  0xe8   :  { %552 = vmatpush.msra.mxu2 %v5842_v33  ;;  %481 = vmatpush.msra.mxu0 %v451_v34  ;;  %v5840_v39 = vld [vmem:[%s7053_s3 + $0x40] sm:$0xff]  ;;  %s9082_s26 = sld [smem:[#allocation34_spill]] }
  0xe9   :  { %517 = vmatpush.msra.mxu1 %v5833_v35  ;;  %v6278_v57 = vld [vmem:[%s7048_s29] ss:$0 sm:$0xff]  ;;  %v6279_v61 = vld [vmem:[%s7048_s29 + $0x1] ss:$0 sm:$0xff]  ;;  %v6283_v28 = vld [vmem:[%s7058_s8 + $0x2] ss:$0 sm:$0xff] }
  0xea   :  { %v6342_v7 = vpop.eup %6341  ;;  %553 = vmatpush.msra.mxu2 %v5841_v36  ;;  %482 = vmatpush.msra.mxu0 %v450_v37  ;;  %v6284_v32 = vld [vmem:[%s9077_s13 + $0x2] ss:$0 sm:$0xff]  ;;  %v6285_v33 = vld [vmem:[%s9077_s13 + $0x1] ss:$0 sm:$0xff]  ;;  %v6286_v34 = vld [vmem:[%s9077_s13] ss:$0 sm:$0xff] }
  0xeb   :  { %v375_v8 = vmul.f32 32.0, %v6342_v7  ;;  %vm379_vm2 = vweird.f32 %v6342_v7  ;;  %518 = vmatpush.msra.mxu1 %v5832_v38  ;;  %s9088_s4 = sld [smem:[#allocation39_spill]] }
  0xec   :  { %368 = vadd.xlane.f32.xlu0 %v367_v5  ;;  %554 = vmatpush.msra.mxu2 %v5840_v39  ;;  %s9089_s21 = sld [smem:[#allocation30_spill]] }
  0xed   :  { %v376_v9 = vsub.f32 1.0, %v375_v8  ;;  %s9090_s22 = sld [smem:[#allocation40_spill]] }
  0xee   :  { %s9091_s2 = sld [smem:[#allocation43_spill]] }
  0xef   :  { %v377_v10 = vmul.f32 %v6342_v7, %v376_v9  ;;  %s9092_s7 = sld [smem:[#allocation42_spill]] }
  0xf0   :  { %s9093_s9 = sld [smem:[#allocation41_spill]] }
  0xf1   :  { %v378_v11 = vadd.f32 %v6342_v7, %v377_v10  ;;  %s9094_s12 = sld [smem:[#allocation44_spill]] }
  0xf2   :  { %s9095_s6 = sld [smem:[#allocation31_spill]] }
  0xf3   :  { %v7321_v12 = vsel %vm379_vm2, %v6342_v7, %v378_v11  ;;  %s9098_s19 = sld [smem:[#allocation45_spill]] }
  0xf4   :  { %s9099_s11 = sld [smem:[#allocation47_spill]] }
  0xf5   :  { %s9100_s16 = sld [smem:[#allocation48_spill]] }
  0xf6   :  { %s9101_s10 = sld [smem:[#allocation46_spill]] }
 0x157   :  { %v366_v13 = vpop.xlane.xlu0 %365 }
 0x158   :  { %v381_v14 = vmul.f32 %v7321_v12, %v366_v13  ;;  %v373_v17 = vpop.xlane.xlu1 %372 }
 0x159   :  { %v383_v21 = vmul.f32 %v7321_v12, %v373_v17 }
 0x15a   :  { %v7324_v15 = vsub.f32 %v357_v0, %v381_v14 }
 0x15b   :  { %v7333_v23 = vsub.f32 %v359_v2, %v383_v21  ;;  %v6282_v21 = vld [vmem:[%s7058_s8 + $0x1] ss:$0 sm:$0xff] }
 0x15c   :  { %v387_v16 = vmul.f32 %v7324_v15, %v7324_v15 }
 0x15d   :  { %v389_v26 = vmul.f32 %v7333_v23, %v7333_v23 }
 0x15e   :  { %v390_v18 = vsel %vm363_vm0, %v387_v16, 0.0 }
 0x15f   :  { %391 = vadd.xlane.f32.xlu1 %v390_v18  ;;  %v369_v19 = vpop.xlane.xlu0 %368  ;;  %v396_v27 = vsel %vm370_vm1, %v389_v26, 0.0  ;;  %v6280_v26 = vld [vmem:[%s7058_s8] ss:$0 sm:$0xff] }
 0x160   :  { %v382_v20 = vmul.f32 %v7321_v12, %v369_v19 }
 0x162   :  { %v7331_v22 = vsub.f32 %v358_v1, %v382_v20 }
 0x164   :  { %v388_v24 = vmul.f32 %v7331_v22, %v7331_v22 }
 0x166   :  { %v393_v25 = vsel %vm363_vm0, %v388_v24, 0.0 }
 0x167   :  { %394 = vadd.xlane.f32.xlu2 %v393_v25 }
 0x16f   :  { %397 = vadd.xlane.f32.xlu2 %v396_v27 }
 0x1d2   :  { %v392_v40 = vpop.xlane.xlu1 %391 }
 0x1d3   :  { %v399_v41 = vmul.f32 %v392_v40, %v7321_v12 }
 0x1d5   :  { %v402_v42 = vadd.f32 1e-05, %v399_v41 }
 0x1d7   :  { %6343 = vrsqrt.f32 %v402_v42  ;;  %vm411_vm4 = vweird.f32 %v402_v42 }
 0x1da   :  { %v395_v43 = vpop.xlane.xlu2 %394 }
 0x1db   :  { %v400_v44 = vmul.f32 %v395_v43, %v7321_v12 }
 0x1dd   :  { %v6344_v45 = vpop.eup %6343  ;;  %v403_v46 = vadd.f32 1e-05, %v400_v44 }
 0x1de   :  { %v406_v47 = vmul.f32 %v6344_v45, %v402_v42  ;;  %vm412_vm3 = vweird.f32 %v6344_v45 }
 0x1df   :  { %6345 = vrsqrt.f32 %v403_v46  ;;  %vm413_vm5 = vmor %vm411_vm4, %vm412_vm3  ;;  %vm421_vm7 = vweird.f32 %v403_v46 }
 0x1e0   :  { %v407_v48 = vmul.f32 %v6344_v45, %v406_v47 }
 0x1e2   :  { %v408_v49 = vmul.f32 0.5, %v407_v48  ;;  %v398_v50 = vpop.xlane.xlu2 %397  ;;  %v7391_v48 = vld [vmem:[%s9077_s13 + $0x3] ss:$0 sm:$0xff] }
 0x1e3   :  { %v401_v51 = vmul.f32 %v398_v50, %v7321_v12 }
 0x1e4   :  { %v409_v52 = vsub.f32 1.5, %v408_v49 }
 0x1e5   :  { %v6346_v53 = vpop.eup %6345  ;;  %v404_v54 = vadd.f32 1e-05, %v401_v51 }
 0x1e6   :  { %v410_v55 = vmul.f32 %v6344_v45, %v409_v52  ;;  %v416_v56 = vmul.f32 %v6346_v53, %v403_v46  ;;  %vm422_vm6 = vweird.f32 %v6346_v53 }
 0x1e7   :  { %6347 = vrsqrt.f32 %v404_v54  ;;  %vm423_vm8 = vmor %vm421_vm7, %vm422_vm6  ;;  %vm431_vm10 = vweird.f32 %v404_v54 }
 0x1e8   :  { %v417_v58 = vmul.f32 %v6346_v53, %v416_v56  ;;  %v414_v59 = vsel %vm413_vm5, %v6344_v45, %v410_v55 }
 0x1e9   :  { %v435_v60 = vmul.f32 %v414_v59, %v7324_v15 }
 0x1ea   :  { %v418_v62 = vmul.f32 0.5, %v417_v58 }
 0x1eb   :  { %v441_v63 = vmul.f32 %v6278_v57, %v435_v60 }
 0x1ec   :  { %v419_v0 = vsub.f32 1.5, %v418_v62 }
 0x1ed   :  { %v6348_v1 = vpop.eup %6347  ;;  %v447_v2 = vadd.f32 %v6279_v61, %v441_v63 }
 0x1ee   :  { %v420_v3 = vmul.f32 %v6346_v53, %v419_v0  ;;  %v426_v4 = vmul.f32 %v6348_v1, %v404_v54  ;;  %vm432_vm9 = vweird.f32 %v6348_v1 }
 0x1ef   :  { %5829 = vmatmul.msk.f32.vlgmr.msra.gmra.mxu0 %vm363_vm0, %v447_v2  ;;  %5837 = vmatmul.msk.f32.vlgmr.msra.gmra.mxu1 %vm363_vm0, %v447_v2  ;;  %vm433_vm11 = vmor %vm431_vm10, %vm432_vm9 }
 0x1f0   :  { %v427_v5 = vmul.f32 %v6348_v1, %v426_v4  ;;  %5845 = vmatmul.msk.f32.vlgmr.msra.gmra.mxu2 %vm363_vm0, %v447_v2  ;;  %v424_v6 = vsel %vm423_vm8, %v6346_v53, %v420_v3 }
 0x1f1   :  { %v436_v7 = vmul.f32 %v424_v6, %v7331_v22  ;;  %v7428_v6 = vld [vmem:[%s9078_s14 + $0x8] sm:$0xff] }
 0x1f2   :  { %v428_v8 = vmul.f32 0.5, %v427_v5 }
 0x1f3   :  { %v442_v9 = vmul.f32 %v6278_v57, %v436_v7 }
 0x1f4   :  { %v429_v10 = vsub.f32 1.5, %v428_v8 }
 0x1f5   :  { %v448_v11 = vadd.f32 %v6279_v61, %v442_v9 }
 0x1f6   :  { %v430_v13 = vmul.f32 %v6348_v1, %v429_v10 }
 0x1f7   :  { %5830 = vmatmul.msk.f32.gmra.mxu0 %vm363_vm0, %v448_v11  ;;  %5838 = vmatmul.msk.f32.gmra.mxu1 %vm363_vm0, %v448_v11 }
 0x1f8   :  { %5846 = vmatmul.msk.f32.gmra.mxu2 %vm363_vm0, %v448_v11  ;;  %v434_v14 = vsel %vm433_vm11, %v6348_v1, %v430_v13  ;;  %v7423_v1 = vld [vmem:[%s9078_s14] sm:$0xff]  ;;  %v7433_v11 = vld [vmem:[%s9078_s14 + $0x10] sm:$0x3] }
 0x1f9   :  { %v437_v15 = vmul.f32 %v434_v14, %v7333_v23 }
 0x1fb   :  { %v443_v16 = vmul.f32 %v6278_v57, %v437_v15 }
 0x1fd   :  { %v449_v17 = vadd.f32 %v6279_v61, %v443_v16 }
 0x1ff   :  { %5831 = vmatmul.msk.f32.gmra.mxu0 %vm363_vm0, %v449_v17  ;;  %5839 = vmatmul.msk.f32.gmra.mxu1 %vm363_vm0, %v449_v17 }
 0x200   :  { %5847 = vmatmul.msk.f32.gmra.mxu2 %vm363_vm0, %v449_v17 }
 0x26c   :  { %v520_v18 = vpop.f32.mrf.mxu1  ;;  %v484_v25 = vpop.f32.mrf.mxu0 }
 0x26d   :  { %v7380_v35 = vadd.f32 %v6280_v26, %v484_v25  ;;  %v521_v36 = vadd.f32 %v6282_v21, %v520_v18 }
 0x26f   :  { %v573_v44 = vmul.f32 %v6286_v34, %v7380_v35  ;;  %v706_v45 = vmul.f32 %v6285_v33, %v7380_v35  ;;  %v905_v61 = vmul.f32 %v6284_v32, %v7380_v35 }
 0x273   :  { %v556_v19 = vpop.f32.mrf.mxu2 }
 0x274   :  { %v523_v20 = vpop.f32.mrf.mxu1  ;;  %v557_v37 = vadd.f32 %v6283_v28, %v556_v19  ;;  %v487_v41 = vpop.f32.mrf.mxu0 }
 0x275   :  { %v524_v27 = vadd.f32 %v6282_v21, %v523_v20  ;;  %v7395_v51 = vadd.f32 %v6280_v26, %v487_v41 }
 0x276   :  { %v822_v47 = vmul.f32 %v6285_v33, %v557_v37  ;;  %v700_v49 = vmul.f32 %v6286_v34, %v557_v37  ;;  %v1021_v50 = vmul.f32 %v6284_v32, %v557_v37  ;;  %v1184_v54 = vmul.f32 %v7391_v48, %v557_v37 }
 0x277   :  { %v574_v55 = vmul.f32 %v6286_v34, %v7395_v51  ;;  %v707_v57 = vmul.f32 %v6285_v33, %v7395_v51  ;;  %v906_v62 = vmul.f32 %v6284_v32, %v7395_v51 }
 0x27b   :  { %v559_v22 = vpop.f32.mrf.mxu2 }
 0x27c   :  { %v526_v24 = vpop.f32.mrf.mxu1  ;;  %v560_v30 = vadd.f32 %v6283_v28, %v559_v22  ;;  %v490_v56 = vpop.f32.mrf.mxu0 }
 0x27d   :  { %v527_v23 = vadd.f32 %v6282_v21, %v526_v24  ;;  %v7409_v58 = vadd.f32 %v6280_v26, %v490_v56 }
 0x27e   :  { %v823_v42 = vmul.f32 %v6285_v33, %v560_v30  ;;  %v701_v43 = vmul.f32 %v6286_v34, %v560_v30  ;;  %v1022_v46 = vmul.f32 %v6284_v32, %v560_v30  ;;  %v1185_v53 = vmul.f32 %v7391_v48, %v560_v30 }
 0x27f   :  { %5848 = vmatpush.xpose.msk.msra.mxu3 %vm363_vm0, %v527_v23  ;;  %5854 = vmatpush.xpose.msk.msrb.mxu0 %vm363_vm0, %v527_v23  ;;  %v575_v59 = vmul.f32 %v6286_v34, %v7409_v58  ;;  %v708_v60 = vmul.f32 %v6285_v33, %v7409_v58  ;;  %v907_v63 = vmul.f32 %v6284_v32, %v7409_v58 }
 0x283   :  { %v562_v29 = vpop.f32.mrf.mxu2  ;;  %5849 = vmatpush.xpose.msk.msra.mxu3 %vm363_vm0, %v524_v27  ;;  %5855 = vmatpush.xpose.msk.msrb.mxu0 %vm363_vm0, %v524_v27 }
 0x284   :  { %v563_v31 = vadd.f32 %v6283_v28, %v562_v29 }
 0x286   :  { %v1023_v38 = vmul.f32 %v6284_v32, %v563_v31  ;;  %v824_v39 = vmul.f32 %v6285_v33, %v563_v31  ;;  %v702_v40 = vmul.f32 %v6286_v34, %v563_v31  ;;  %v1186_v52 = vmul.f32 %v7391_v48, %v563_v31 }
 0x287   :  { %5850 = vmatpush.xpose.msk.msra.mxu3 %vm363_vm0, %v521_v36  ;;  %5856 = vmatpush.xpose.msk.msrb.mxu0 %vm363_vm0, %v521_v36 }
 0x288   :  { %5860 = vmatpush.msk.msrb.mxu1 %vm834_vm12, %v824_v39  ;;  %5864 = vmatpush.msk.msrb.mxu2 %vm834_vm12, %v702_v40 }
 0x28a   :  { %852 = vmatpush.msrb.mxu1 %v823_v42  ;;  %890 = vmatpush.msrb.mxu2 %v701_v43 }
 0x28b   :  { %5868 = vmatpush.xpose.msk.msrb.mxu3 %vm363_vm0, %v527_v23  ;;  %5874 = vmatpush.msk.msra.mxu0 %vm834_vm12, %v1023_v38 }
 0x28c   :  { %5851 = vmatmul.msk.f32.vlgmr.msra.gmra.mxu3 %vm363_vm0, %v573_v44  ;;  %5857 = vmatmul.msk.f32.vlgmr.msrb.gmra.mxu0 %vm363_vm0, %v706_v45 }
 0x28d   :  { %1050 = vmatpush.msra.mxu0 %v1022_v46  ;;  %853 = vmatpush.msrb.mxu1 %v822_v47 }
 0x28e   :  { %891 = vmatpush.msrb.mxu2 %v700_v49 }
 0x28f   :  { %5869 = vmatpush.xpose.msk.msrb.mxu3 %vm363_vm0, %v524_v27  ;;  %1051 = vmatpush.msra.mxu0 %v1021_v50 }
 0x290   :  { %5878 = vmatpush.xpose.msk.msra.mxu1 %vm363_vm0, %v527_v23  ;;  %5884 = vmatpush.msk.msra.mxu2 %vm834_vm12, %v1186_v52 }
 0x292   :  { %1213 = vmatpush.msra.mxu2 %v1185_v53 }
 0x293   :  { %5870 = vmatpush.xpose.msk.msrb.mxu3 %vm363_vm0, %v521_v36 }
 0x294   :  { %5879 = vmatpush.xpose.msk.msra.mxu1 %vm363_vm0, %v524_v27  ;;  %1214 = vmatpush.msra.mxu2 %v1184_v54 }
 0x295   :  { %5852 = vmatmul.msk.f32.gmra.mxu3 %vm363_vm0, %v574_v55  ;;  %5858 = vmatmul.msk.f32.gmra.mxu0 %vm363_vm0, %v707_v57 }
 0x298   :  { %5880 = vmatpush.xpose.msk.msra.mxu1 %vm363_vm0, %v521_v36 }
 0x29d   :  { %5853 = vmatmul.msk.f32.gmra.mxu3 %vm363_vm0, %v575_v59  ;;  %5859 = vmatmul.msk.f32.gmra.mxu0 %vm363_vm0, %v708_v60 }
 0x2a5   :  { %5871 = vmatmul.msk.f32.vlgmr.msrb.gmra.mxu3 %vm363_vm0, %v905_v61 }
 0x2ad   :  { %5872 = vmatmul.msk.f32.gmra.mxu3 %vm363_vm0, %v906_v62 }
 0x2b5   :  { %5873 = vmatmul.msk.f32.gmra.mxu3 %vm363_vm0, %v907_v63 }
 0x309   :  { %v735_v0 = vpop.f32.mrf.mxu0 }
 0x30a   :  { %v744_v2 = vmul.f32 0.35355338, %v735_v0 }
 0x30c   :  { %v747_v3 = vadd.f32 %v744_v2, %v7423_v1 }
 0x30e   :  { %v750_v4 = vsel %vm626_vm13, %v747_v3, -inf }
 0x30f   :  { %751 = vmax.xlane.f32.xlu0 %v750_v4  ;;  %v611_v16 = vpop.f32.mrf.mxu3 }
 0x310   :  { %v620_v23 = vmul.f32 0.35355338, %v611_v16 }
 0x312   :  { %v738_v5 = vpop.f32.mrf.mxu0  ;;  %v7439_v28 = vadd.f32 %v620_v23, %v7423_v1 }
 0x313   :  { %v745_v7 = vmul.f32 0.35355338, %v738_v5 }
 0x314   :  { %v627_v33 = vsel %vm626_vm13, %v7439_v28, -inf }
 0x315   :  { %v748_v8 = vadd.f32 %v745_v7, %v7428_v6 }
 0x317   :  { %v753_v9 = vsel %vm626_vm13, %v748_v8, -inf }
 0x318   :  { %754 = vmax.xlane.f32.xlu1 %v753_v9  ;;  %v614_v20 = vpop.f32.mrf.mxu3 }
 0x319   :  { %v621_v34 = vmul.f32 0.35355338, %v614_v20 }
 0x31a   :  { %v741_v10 = vpop.f32.mrf.mxu0 }
 0x31b   :  { %v746_v13 = vmul.f32 0.35355338, %v741_v10  ;;  %v7445_v37 = vadd.f32 %v621_v34, %v7428_v6 }
 0x31d   :  { %v749_v14 = vadd.f32 %v746_v13, %v7433_v11  ;;  %v630_v43 = vsel %vm626_vm13, %v7445_v37, -inf }
 0x31f   :  { %v756_v15 = vsel %vm633_vm14, %v749_v14, -inf }
 0x320   :  { %757 = vmax.xlane.f32.xlu2 %v756_v15  ;;  %v617_v27 = vpop.f32.mrf.mxu3 }
 0x321   :  { %v622_v40 = vmul.f32 0.35355338, %v617_v27  ;;  %v1068_v27 = vmul.f32 %v7391_v48, %v7380_v35 }
 0x323   :  { %v7454_v44 = vadd.f32 %v622_v40, %v7433_v11 }
 0x325   :  { %v634_v46 = vsel %vm633_vm14, %v7454_v44, -inf }
 0x328   :  { %v934_v38 = vpop.f32.mrf.mxu3 }
 0x329   :  { %v943_v41 = vmul.f32 0.35355338, %v934_v38 }
 0x32b   :  { %v7457_v45 = vadd.f32 %v943_v41, %v7423_v1 }
 0x32d   :  { %v949_v47 = vsel %vm626_vm13, %v7457_v45, -inf }
 0x330   :  { %v937_v34 = vpop.f32.mrf.mxu3 }
 0x382   :  { %v752_v17 = vpop.xlane.xlu0 %751 }
 0x383   :  { %v759_v18 = vsub.f32 %v747_v3, %v752_v17 }
 0x385   :  { %v762_v19 = vmul.f32 1.442695, %v759_v18 }
 0x387   :  { %6349 = vpow2.f32 %v762_v19 }
 0x38b   :  { %v755_v21 = vpop.xlane.xlu1 %754 }
 0x38c   :  { %v760_v22 = vsub.f32 %v748_v8, %v755_v21 }
 0x38d   :  { %v6350_v24 = vpop.eup %6349 }
 0x38e   :  { %v764_v25 = vmul.f32 1.442695, %v760_v22  ;;  %v768_v26 = vsel %vm626_vm13, %v6350_v24, 0.0 }
 0x38f   :  { %769 = vadd.xlane.f32.xlu0 %v768_v26 }
 0x390   :  { %6351 = vpow2.f32 %v764_v25 }
 0x393   :  { %v758_v29 = vpop.xlane.xlu2 %757 }
 0x394   :  { %v761_v30 = vsub.f32 %v749_v14, %v758_v29  ;;  %v1069_v29 = vmul.f32 %v7391_v48, %v7395_v51  ;;  %v944_v51 = vmul.f32 0.35355338, %v937_v34 }
 0x396   :  { %v6352_v31 = vpop.eup %6351  ;;  %v766_v32 = vmul.f32 1.442695, %v761_v30  ;;  %v1070_v30 = vmul.f32 %v7391_v48, %v7409_v58 }
 0x397   :  { %v771_v36 = vsel %vm626_vm13, %v6352_v31, 0.0  ;;  %628 = vmax.xlane.f32.xlu0 %v627_v33 }
 0x398   :  { %6353 = vpow2.f32 %v766_v32  ;;  %772 = vadd.xlane.f32.xlu1 %v771_v36 }
 0x39e   :  { %v7447_v39 = vpop.eup %6353 }
 0x39f   :  { %v774_v42 = vsel %vm633_vm14, %v7447_v39, 0.0 }
 0x3a0   :  { %775 = vadd.xlane.f32.xlu2 %v774_v42  ;;  %631 = vmax.xlane.f32.xlu1 %v630_v43 }
 0x3a8   :  { %635 = vmax.xlane.f32.xlu2 %v634_v46  ;;  %950 = vmax.xlane.f32.xlu1 %v949_v47  ;;  %v947_v47 = vadd.f32 %v944_v51, %v7428_v6 }
 0x402   :  { %v770_v49 = vpop.xlane.xlu0 %769 }
 0x403   :  { %6355 = vrcp.f32 %v770_v49  ;;  %v788_v55 = vand.u32 2147483648, %v770_v49  ;;  %v786_v57 = vand.u32 2147483647, %v770_v49  ;;  %vm782_vm2 = vweird.f32 %v770_v49 }
 0x405   :  { %v789_v60 = vor.u32 1.1754944e-38, %v788_v55  ;;  %vm787_vm4 = vcmp.eq.f32.partialorder %v786_v57, 8.507059e+37 }
 0x409   :  { %v6356_v50 = vpop.eup %6355 }
 0x40a   :  { %v778_v52 = vmul.f32 %v6356_v50, %v770_v49  ;;  %vm783_vm15 = vweird.f32 %v6356_v50  ;;  %v629_v38 = vpop.xlane.xlu0 %628  ;;  %v940_v49 = vpop.f32.mrf.mxu3 }
 0x40b   :  { %v773_v53 = vpop.xlane.xlu1 %772  ;;  %vm784_vm3 = vmor %vm782_vm2, %vm783_vm15  ;;  %v637_v40 = vsub.f32 %v7439_v28, %v629_v38 }
 0x40c   :  { %v779_v54 = vsub.f32 1.0, %v778_v52  ;;  %6357 = vrcp.f32 %v773_v53  ;;  %v803_v5 = vand.u32 2147483648, %v773_v53  ;;  %v801_v8 = vand.u32 2147483647, %v773_v53 }
 0x40d   :  { %vm797_vm6 = vweird.f32 %v773_v53  ;;  %v640_v42 = vmul.f32 1.442695, %v637_v40 }
 0x40e   :  { %v780_v56 = vmul.f32 %v6356_v50, %v779_v54  ;;  %v804_v13 = vor.u32 1.1754944e-38, %v803_v5  ;;  %vm802_vm8 = vcmp.eq.f32.partialorder %v801_v8, 8.507059e+37  ;;  %v952_v54 = vsel %vm626_vm13, %v947_v47, -inf }
 0x410   :  { %v781_v59 = vadd.f32 %v6356_v50, %v780_v56 }
 0x412   :  { %v6358_v61 = vpop.eup %6357  ;;  %v785_v62 = vsel %vm784_vm3, %v6356_v50, %v781_v59 }
 0x413   :  { %v793_v63 = vmul.f32 %v6358_v61, %v773_v53  ;;  %v776_v0 = vpop.xlane.xlu2 %775  ;;  %v790_v2 = vsel %vm787_vm4, %v789_v60, %v785_v62  ;;  %vm798_vm5 = vweird.f32 %v6358_v61  ;;  %v632_v48 = vpop.xlane.xlu1 %631  ;;  %v945_v53 = vmul.f32 0.35355338, %v940_v49 }
 0x414   :  { %6359 = vrcp.f32 %v776_v0  ;;  %v791_v3 = vmul.f32 %v6350_v24, %v790_v2  ;;  %vm799_vm7 = vmor %vm797_vm6, %vm798_vm5  ;;  %v818_v19 = vand.u32 2147483648, %v776_v0  ;;  %v816_v21 = vand.u32 2147483647, %v776_v0 }
 0x415   :  { %v794_v4 = vsub.f32 1.0, %v793_v63  ;;  %vm812_vm10 = vweird.f32 %v776_v0  ;;  %v638_v50 = vsub.f32 %v7445_v37, %v632_v48  ;;  %6361 = vpow2.f32 %v640_v42 }
 0x416   :  { %5861 = vmatmul.msk.f32.vlgmr.msrb.gmra.mxu1 %vm626_vm13, %v791_v3  ;;  %v819_v24 = vor.u32 1.1754944e-38, %v818_v19  ;;  %vm817_vm15 = vcmp.eq.f32.partialorder %v816_v21, 8.507059e+37 }
 0x417   :  { %v795_v7 = vmul.f32 %v6358_v61, %v794_v4  ;;  %v642_v55 = vmul.f32 1.442695, %v638_v50 }
 0x419   :  { %v796_v9 = vadd.f32 %v6358_v61, %v795_v7  ;;  %6363 = vpow2.f32 %v642_v55 }
 0x41a   :  { %v6360_v10 = vpop.eup %6359 }
 0x41b   :  { %v808_v14 = vmul.f32 %v6360_v10, %v776_v0  ;;  %v800_v15 = vsel %vm799_vm7, %v6358_v61, %v796_v9  ;;  %vm813_vm9 = vweird.f32 %v6360_v10  ;;  %v636_v43 = vpop.xlane.xlu2 %635  ;;  %v951_v59 = vpop.xlane.xlu1 %950  ;;  %v948_v61 = vadd.f32 %v945_v53, %v7433_v11 }
 0x41c   :  { %v805_v16 = vsel %vm802_vm8, %v804_v13, %v800_v15  ;;  %vm814_vm11 = vmor %vm812_vm10, %vm813_vm9  ;;  %v7492_v37 = vpop.eup %6361 }
 0x41d   :  { %v809_v17 = vsub.f32 1.0, %v808_v14  ;;  %v806_v18 = vmul.f32 %v6352_v31, %v805_v16  ;;  %v955_v62 = vsel %vm633_vm14, %v948_v61, -inf  ;;  %v646_v0 = vsel %vm626_vm13, %v7492_v37, 0.0 }
 0x41f   :  { %5862 = vmatmul.msk.f32.gmra.mxu1 %vm626_vm13, %v806_v18  ;;  %v810_v20 = vmul.f32 %v6360_v10, %v809_v17  ;;  %v7500_v3 = vpop.eup %6363 }
 0x421   :  { %v811_v22 = vadd.f32 %v6360_v10, %v810_v20 }
 0x423   :  { %v815_v23 = vsel %vm814_vm11, %v6360_v10, %v811_v22 }
 0x424   :  { %v820_v25 = vsel %vm817_vm15, %v819_v24, %v815_v23 }
 0x425   :  { %v821_v26 = vmul.f32 %v7447_v39, %v820_v25 }
 0x427   :  { %5863 = vmatmul.msk.f32.gmra.mxu1 %vm626_vm13, %v821_v26 }
 0x42f   :  { %5881 = vmatmul.msk.f32.vlgmr.msra.gmra.mxu1 %vm363_vm0, %v1068_v27 }
 0x437   :  { %5882 = vmatmul.msk.f32.gmra.mxu1 %vm363_vm0, %v1069_v29 }
 0x43f   :  { %5883 = vmatmul.msk.f32.gmra.mxu1 %vm363_vm0, %v1070_v30 }
 0x493   :  { %v7476_v31 = vpop.f32.mrf.mxu1 }
 0x49c   :  { %v7478_v32 = vpop.f32.mrf.mxu1 }
 0x4a4   :  { %v7480_v33 = vpop.f32.mrf.mxu1 }
 0x4ac   :  { %v1097_v35 = vpop.f32.mrf.mxu1 }
 0x4ad   :  { %v1106_v36 = vmul.f32 0.35355338, %v1097_v35 }
 0x4af   :  { %v1109_v39 = vadd.f32 %v1106_v36, %v7423_v1  ;;  %v639_v1 = vsub.f32 %v7454_v44, %v636_v43  ;;  %v958_v44 = vsub.f32 %v7457_v45, %v951_v59  ;;  %v649_v45 = vsel %vm626_vm13, %v7500_v3, 0.0 }
 0x4b1   :  { %v1112_v41 = vsel %vm626_vm13, %v1109_v39, -inf  ;;  %v644_v56 = vmul.f32 1.442695, %v639_v1  ;;  %v961_v2 = vmul.f32 1.442695, %v958_v44 }
 0x4b2   :  { %1113 = vmax.xlane.f32.xlu0 %v1112_v41 }
 0x4b3   :  { %6365 = vpow2.f32 %v644_v56 }
 0x4b4   :  { %v1100_v58 = vpop.f32.mrf.mxu1  ;;  %6367 = vpow2.f32 %v961_v2 }
 0x4b5   :  { %v1107_v46 = vmul.f32 0.35355338, %v1100_v58 }
 0x4b7   :  { %v1110_v52 = vadd.f32 %v1107_v46, %v7428_v6 }
 0x4b9   :  { %v1115_v28 = vsel %vm626_vm13, %v1110_v52, -inf  ;;  %v7502_v4 = vpop.eup %6365 }
 0x4ba   :  { %1116 = vmax.xlane.f32.xlu2 %v1115_v28  ;;  %953 = vmax.xlane.f32.xlu0 %v952_v54  ;;  %v7508_v5 = vpop.eup %6367 }
 0x4bb   :  { %v967_v7 = vsel %vm626_vm13, %v7508_v5, 0.0 }
 0x4bc   :  { %v1103_v57 = vpop.f32.mrf.mxu1 }
 0x4bd   :  { %v1108_v60 = vmul.f32 0.35355338, %v1103_v57 }
 0x4bf   :  { %v1111_v6 = vadd.f32 %v1108_v60, %v7433_v11  ;;  %v652_v11 = vsel %vm633_vm14, %v7502_v4, 0.0 }
 0x4c1   :  { %v1118_v63 = vsel %vm633_vm14, %v1111_v6, -inf }
 0x4c2   :  { %956 = vmax.xlane.f32.xlu2 %v955_v62  ;;  %1119 = vmax.xlane.f32.xlu1 %v1118_v63 }
 0x4c3   :  { %647 = vadd.xlane.f32.xlu0 %v646_v0 }
 0x4ca   :  { %653 = vadd.xlane.f32.xlu2 %v652_v11  ;;  %650 = vadd.xlane.f32.xlu1 %v649_v45 }
 0x4d2   :  { %968 = vadd.xlane.f32.xlu1 %v967_v7 }
 0x525   :  { %v1114_v8 = vpop.xlane.xlu0 %1113 }
 0x526   :  { %v1121_v9 = vsub.f32 %v1109_v39, %v1114_v8 }
 0x528   :  { %v1124_v10 = vmul.f32 1.442695, %v1121_v9 }
 0x52a   :  { %6369 = vpow2.f32 %v1124_v10 }
 0x52d   :  { %v1117_v13 = vpop.xlane.xlu2 %1116  ;;  %v954_v14 = vpop.xlane.xlu0 %953 }
 0x52e   :  { %v1122_v15 = vsub.f32 %v1110_v52, %v1117_v13  ;;  %v959_v16 = vsub.f32 %v947_v47, %v954_v14 }
 0x530   :  { %v7512_v17 = vpop.eup %6369  ;;  %v1126_v18 = vmul.f32 1.442695, %v1122_v15  ;;  %v963_v19 = vmul.f32 1.442695, %v959_v16 }
 0x531   :  { %v1130_v20 = vsel %vm626_vm13, %v7512_v17, 0.0 }
 0x532   :  { %6371 = vpow2.f32 %v1126_v18  ;;  %1131 = vadd.xlane.f32.xlu0 %v1130_v20 }
 0x533   :  { %6373 = vpow2.f32 %v963_v19 }
 0x535   :  { %v957_v21 = vpop.xlane.xlu2 %956  ;;  %v1120_v22 = vpop.xlane.xlu1 %1119 }
 0x536   :  { %v960_v24 = vsub.f32 %v948_v61, %v957_v21  ;;  %v1123_v23 = vsub.f32 %v1111_v6, %v1120_v22  ;;  %v648_v25 = vpop.xlane.xlu0 %647 }
 0x537   :  { %6375 = vrcp.f32 %v648_v25  ;;  %v666_v43 = vand.u32 2147483648, %v648_v25  ;;  %v664_v47 = vand.u32 2147483647, %v648_v25  ;;  %vm660_vm3 = vweird.f32 %v648_v25 }
 0x538   :  { %v7516_v26 = vpop.eup %6371  ;;  %v965_v27 = vmul.f32 1.442695, %v960_v24  ;;  %v1128_v29 = vmul.f32 1.442695, %v1123_v23 }
 0x539   :  { %v7518_v30 = vpop.eup %6373  ;;  %v1133_v34 = vsel %vm626_vm13, %v7516_v26, 0.0  ;;  %v667_v28 = vor.u32 1.1754944e-38, %v666_v43  ;;  %vm665_vm5 = vcmp.eq.f32.partialorder %v664_v47, 8.507059e+37 }
 0x53a   :  { %6377 = vpow2.f32 %v965_v27  ;;  %1134 = vadd.xlane.f32.xlu2 %v1133_v34  ;;  %v970_v35 = vsel %vm626_vm13, %v7518_v30, 0.0 }
 0x53b   :  { %6379 = vpow2.f32 %v1128_v29  ;;  %971 = vadd.xlane.f32.xlu0 %v970_v35 }
 0x53d   :  { %v6376_v36 = vpop.eup %6375  ;;  %v7524_v38 = vpop.xlane.xlu2 %653 }
 0x53e   :  { %v651_v39 = vpop.xlane.xlu1 %650  ;;  %v656_v51 = vmul.f32 %v6376_v36, %v648_v25  ;;  %6381 = vrcp.f32 %v7524_v38  ;;  %vm661_vm2 = vweird.f32 %v6376_v36  ;;  %vm690_vm11 = vweird.f32 %v7524_v38 }
 0x53f   :  { %6383 = vrcp.f32 %v651_v39  ;;  %vm662_vm4 = vmor %vm660_vm3, %vm661_vm2  ;;  %v681_v61 = vand.u32 2147483648, %v651_v39  ;;  %v679_v44 = vand.u32 2147483647, %v651_v39  ;;  %vm675_vm7 = vweird.f32 %v651_v39 }
 0x540   :  { %v7527_v40 = vpop.eup %6377  ;;  %v657_v41 = vsub.f32 1.0, %v656_v51  ;;  %v696_v13 = vand.u32 2147483648, %v7524_v38  ;;  %v694_v16 = vand.u32 2147483647, %v7524_v38 }
 0x541   :  { %v7529_v48 = vpop.eup %6379  ;;  %v973_v58 = vsel %vm633_vm14, %v7527_v40, 0.0  ;;  %v682_v11 = vor.u32 1.1754944e-38, %v681_v61  ;;  %vm680_vm9 = vcmp.eq.f32.partialorder %v679_v44, 8.507059e+37 }
 0x542   :  { %v658_v42 = vmul.f32 %v6376_v36, %v657_v41  ;;  %974 = vadd.xlane.f32.xlu2 %v973_v58  ;;  %v1136_v46 = vsel %vm633_vm14, %v7529_v48, 0.0  ;;  %v697_v21 = vor.u32 1.1754944e-38, %v696_v13  ;;  %v567_v13 = vld [vmem:[%s9079_s28 + $0x10] sm:$0xff] }
 0x543   :  { %1137 = vadd.xlane.f32.xlu1 %v1136_v46 }
 0x544   :  { %v6382_v49 = vpop.eup %6381  ;;  %v659_v50 = vadd.f32 %v6376_v36, %v658_v42 }
 0x545   :  { %v6384_v52 = vpop.eup %6383  ;;  %v686_v1 = vmul.f32 %v6382_v49, %v7524_v38  ;;  %vm691_vm10 = vweird.f32 %v6382_v49 }
 0x546   :  { %v969_v53 = vpop.xlane.xlu1 %968  ;;  %v671_v54 = vmul.f32 %v6384_v52, %v651_v39  ;;  %v663_v56 = vsel %vm662_vm4, %v6376_v36, %v659_v50  ;;  %vm676_vm6 = vweird.f32 %v6384_v52  ;;  %vm692_vm2 = vmor %vm690_vm11, %vm691_vm10 }
 0x547   :  { %6385 = vrcp.f32 %v969_v53  ;;  %v687_v55 = vsub.f32 1.0, %v686_v1  ;;  %v668_v59 = vsel %vm665_vm5, %v667_v28, %v663_v56  ;;  %vm677_vm8 = vmor %vm675_vm7, %vm676_vm6  ;;  %v985_v15 = vand.u32 2147483647, %v969_v53 }
 0x548   :  { %v672_v57 = vsub.f32 1.0, %v671_v54  ;;  %v669_v60 = vmul.f32 %v7492_v37, %v668_v59  ;;  %v987_v37 = vand.u32 2147483648, %v969_v53  ;;  %vm981_vm3 = vweird.f32 %v969_v53 }
 0x549   :  { %v688_v62 = vmul.f32 %v6382_v49, %v687_v55  ;;  %vm986_vm5 = vcmp.eq.f32.partialorder %v985_v15, 8.507059e+37  ;;  %vm695_vm6 = vcmp.eq.f32.partialorder %v694_v16, 8.507059e+37 }
 0x54a   :  { %v673_v6 = vmul.f32 %v6384_v52, %v672_v57  ;;  %5865 = vmatmul.msk.f32.vlgmr.msrb.gmra.mxu2 %vm626_vm13, %v669_v60  ;;  %v988_v20 = vor.u32 1.1754944e-38, %v987_v37 }
 0x54b   :  { %v689_v9 = vadd.f32 %v6382_v49, %v688_v62 }
 0x54c   :  { %v674_v0 = vadd.f32 %v6384_v52, %v673_v6 }
 0x54d   :  { %v6386_v63 = vpop.eup %6385  ;;  %v693_v19 = vsel %vm692_vm2, %v6382_v49, %v689_v9 }
 0x54e   :  { %v977_v2 = vmul.f32 %v6386_v63, %v969_v53  ;;  %v678_v45 = vsel %vm677_vm8, %v6384_v52, %v674_v0  ;;  %vm982_vm15 = vweird.f32 %v6386_v63 }
 0x54f   :  { %v683_v8 = vsel %vm680_vm9, %v682_v11, %v678_v45  ;;  %vm983_vm4 = vmor %vm981_vm3, %vm982_vm15 }
 0x550   :  { %v978_v7 = vsub.f32 1.0, %v977_v2  ;;  %v684_v10 = vmul.f32 %v7500_v3, %v683_v8  ;;  %v698_v3 = vsel %vm695_vm6, %v697_v21, %v693_v19 }
 0x551   :  { %v699_v25 = vmul.f32 %v7502_v4, %v698_v3 }
 0x552   :  { %v979_v14 = vmul.f32 %v6386_v63, %v978_v7  ;;  %5866 = vmatmul.msk.f32.gmra.mxu2 %vm626_vm13, %v684_v10  ;;  %v568_v10 = vld [vmem:[%s9079_s28 + $0x18] sm:$0xff] }
 0x553   :  { %1252 = vmatpush.msra.mxu3 %v568_v10 }
 0x554   :  { %v980_v18 = vadd.f32 %v6386_v63, %v979_v14 }
 0x555   :  { %1253 = vmatpush.msra.mxu3 %v567_v13 }
 0x556   :  { %v984_v22 = vsel %vm983_vm4, %v6386_v63, %v980_v18 }
 0x557   :  { %v989_v24 = vsel %vm986_vm5, %v988_v20, %v984_v22 }
 0x558   :  { %v990_v23 = vmul.f32 %v7508_v5, %v989_v24 }
 0x55a   :  { %5875 = vmatmul.msk.f32.vlgmr.msra.gmra.mxu0 %vm626_vm13, %v990_v23  ;;  %5867 = vmatmul.msk.f32.gmra.mxu2 %vm626_vm13, %v699_v25 }
 0x5a5   :  { %v1132_v27 = vpop.xlane.xlu0 %1131 }
 0x5a6   :  { %6387 = vrcp.f32 %v1132_v27  ;;  %v1150_v51 = vand.u32 2147483648, %v1132_v27  ;;  %vm1144_vm8 = vweird.f32 %v1132_v27  ;;  %v1148_v5 = vand.u32 2147483647, %v1132_v27 }
 0x5a8   :  { %v1151_v47 = vor.u32 1.1754944e-38, %v1150_v51  ;;  %vm1149_vm10 = vcmp.eq.f32.partialorder %v1148_v5, 8.507059e+37 }
 0x5ac   :  { %v6388_v29 = vpop.eup %6387 }
 0x5ad   :  { %v1140_v34 = vmul.f32 %v6388_v29, %v1132_v27  ;;  %v1135_v35 = vpop.xlane.xlu2 %1134  ;;  %vm1145_vm7 = vweird.f32 %v6388_v29 }
 0x5ae   :  { %6389 = vrcp.f32 %v1135_v35  ;;  %v972_v36 = vpop.xlane.xlu0 %971  ;;  %vm1146_vm9 = vmor %vm1144_vm8, %vm1145_vm7  ;;  %v1163_v28 = vand.u32 2147483647, %v1135_v35  ;;  %v1165_v54 = vand.u32 2147483648, %v1135_v35  ;;  %vm1159_vm2 = vweird.f32 %v1135_v35 }
 0x5af   :  { %v1141_v38 = vsub.f32 1.0, %v1140_v34  ;;  %6391 = vrcp.f32 %v972_v36  ;;  %v1002_v55 = vand.u32 2147483648, %v972_v36  ;;  %v1000_v60 = vand.u32 2147483647, %v972_v36 }
 0x5b0   :  { %vm996_vm3 = vweird.f32 %v972_v36  ;;  %v1166_v62 = vor.u32 1.1754944e-38, %v1165_v54  ;;  %vm1164_vm6 = vcmp.eq.f32.partialorder %v1163_v28, 8.507059e+37  ;;  %v6287_v28 = vld [vmem:[#allocation2] ss:$0 sm:$0xff] }
 0x5b1   :  { %v1142_v39 = vmul.f32 %v6388_v29, %v1141_v38  ;;  %v1003_v0 = vor.u32 1.1754944e-38, %v1002_v55  ;;  %vm1001_vm7 = vcmp.eq.f32.partialorder %v1000_v60, 8.507059e+37  ;;  %v565_v38 = vld [vmem:[%s9079_s28] sm:$0xff] }
 0x5b3   :  { %v1143_v41 = vadd.f32 %v6388_v29, %v1142_v39 }
 0x5b4   :  { %v6390_v4 = vpop.eup %6389 }
 0x5b5   :  { %v6392_v58 = vpop.eup %6391  ;;  %v1147_v42 = vsel %vm1146_vm9, %v6388_v29, %v1143_v41  ;;  %v1155_v43 = vmul.f32 %v6390_v4, %v1135_v35  ;;  %v7547_v46 = vpop.xlane.xlu2 %974  ;;  %vm1160_vm11 = vweird.f32 %v6390_v4 }
 0x5b6   :  { %v992_v49 = vmul.f32 %v6392_v58, %v972_v36  ;;  %6393 = vrcp.f32 %v7547_v46  ;;  %v7550_v50 = vpop.xlane.xlu1 %1137  ;;  %v1152_v53 = vsel %vm1149_vm10, %v1151_v47, %v1147_v42  ;;  %vm997_vm15 = vweird.f32 %v6392_v58  ;;  %vm1161_vm4 = vmor %vm1159_vm2, %vm1160_vm11  ;;  %v566_v36 = vld [vmem:[%s9079_s28 + $0x8] sm:$0xff] }
 0x5b7   :  { %v1156_v52 = vsub.f32 1.0, %v1155_v43  ;;  %6395 = vrcp.f32 %v7550_v50  ;;  %v1153_v56 = vmul.f32 %v7512_v17, %v1152_v53  ;;  %vm998_vm5 = vmor %vm996_vm3, %vm997_vm15  ;;  %v1017_v14 = vand.u32 2147483648, %v7547_v46  ;;  %1254 = vmatpush.msra.mxu3 %v566_v36 }
 0x5b8   :  { %v993_v1 = vsub.f32 1.0, %v992_v49  ;;  %v1180_v19 = vand.u32 2147483648, %v7550_v50  ;;  %v1015_v20 = vand.u32 2147483647, %v7547_v46  ;;  %vm1011_vm10 = vweird.f32 %v7547_v46 }
 0x5b9   :  { %v1157_v57 = vmul.f32 %v6390_v4, %v1156_v52  ;;  %5885 = vmatmul.msk.f32.vlgmr.msra.gmra.mxu2 %vm626_vm13, %v1153_v56  ;;  %vm1174_vm11 = vweird.f32 %v7550_v50  ;;  %1255 = vmatpush.msra.mxu3 %v565_v38  ;;  %v6629_v56 = vld [vmem:[%s7018_s5] sm:$0xff] }
 0x5ba   :  { %v994_v59 = vmul.f32 %v6392_v58, %v993_v1  ;;  %v1181_v24 = vor.u32 1.1754944e-38, %v1180_v19  ;;  %vm1016_vm2 = vcmp.eq.f32.partialorder %v1015_v20, 8.507059e+37 }
 0x5bb   :  { %v1158_v61 = vadd.f32 %v6390_v4, %v1157_v57 }
 0x5bc   :  { %v6394_v6 = vpop.eup %6393  ;;  %v995_v44 = vadd.f32 %v6392_v58, %v994_v59 }
 0x5bd   :  { %v6396_v63 = vpop.eup %6395  ;;  %v1007_v17 = vmul.f32 %v6394_v6, %v7547_v46  ;;  %v1162_v2 = vsel %vm1161_vm4, %v6390_v4, %v1158_v61  ;;  %vm1012_vm8 = vweird.f32 %v6394_v6  ;;  %v6630_v61 = vld [vmem:[%s7018_s5 + $0x8] sm:$0xff] }
 0x5be   :  { %v1170_v11 = vmul.f32 %v6396_v63, %v7550_v50  ;;  %v999_v45 = vsel %vm998_vm5, %v6392_v58, %v995_v44  ;;  %v1167_v7 = vsel %vm1164_vm6, %v1166_v62, %v1162_v2  ;;  %vm1175_vm9 = vweird.f32 %v6396_v63  ;;  %vm1013_vm15 = vmor %vm1011_vm10, %vm1012_vm8 }
 0x5bf   :  { %v1008_v8 = vsub.f32 1.0, %v1007_v17  ;;  %v1004_v9 = vsel %vm1001_vm7, %v1003_v0, %v999_v45  ;;  %v1168_v37 = vmul.f32 %v7516_v26, %v1167_v7  ;;  %v1178_v26 = vand.u32 2147483647, %v7550_v50  ;;  %vm1176_vm3 = vmor %vm1174_vm11, %vm1175_vm9 }
 0x5c0   :  { %v1171_v15 = vsub.f32 1.0, %v1170_v11  ;;  %v1005_v16 = vmul.f32 %v7518_v30, %v1004_v9  ;;  %v1018_v30 = vor.u32 1.1754944e-38, %v1017_v14 }
 0x5c1   :  { %v1009_v18 = vmul.f32 %v6394_v6, %v1008_v8  ;;  %5886 = vmatmul.msk.f32.gmra.mxu2 %vm626_vm13, %v1168_v37  ;;  %vm1179_vm4 = vcmp.eq.f32.partialorder %v1178_v26, 8.507059e+37  ;;  %v1352_v26 = vld [vmem:[%s9080_s1 + $0x10] sm:$0xff] }
 0x5c2   :  { %v1172_v21 = vmul.f32 %v6396_v63, %v1171_v15  ;;  %5876 = vmatmul.msk.f32.gmra.mxu0 %vm626_vm13, %v1005_v16 }
 0x5c3   :  { %v1010_v22 = vadd.f32 %v6394_v6, %v1009_v18 }
 0x5c4   :  { %v1173_v3 = vadd.f32 %v6396_v63, %v1172_v21  ;;  %v1353_v21 = vld [vmem:[%s9080_s1 + $0x18] sm:$0xff] }
 0x5c5   :  { %v1014_v23 = vsel %vm1013_vm15, %v6394_v6, %v1010_v22  ;;  %1379 = vmatpush.msrb.mxu0 %v1353_v21  ;;  %v1351_v22 = vld [vmem:[%s9080_s1 + $0x8] sm:$0xff] }
 0x5c6   :  { %v1019_v25 = vsel %vm1016_vm2, %v1018_v30, %v1014_v23  ;;  %v1177_v27 = vsel %vm1176_vm3, %v6396_v63, %v1173_v3  ;;  %v6631_v63 = vld [vmem:[%s7018_s5 + $0x10] sm:$0x3]  ;;  %s9081_s5 = sld [smem:[#allocation36_spill]]  ;;  %v1350_v30 = vld [vmem:[%s9080_s1] sm:$0xff]  ;;  %vm1404_vm3 = vcmask 523264  }
 0x5c7   :  { %v1020_v29 = vmul.f32 %v7527_v40, %v1019_v25  ;;  %v1182_v34 = vsel %vm1179_vm4, %v1181_v24, %v1177_v27  ;;  %1380 = vmatpush.msrb.mxu0 %v1352_v26 }
 0x5c8   :  { %v1183_v35 = vmul.f32 %v7529_v48, %v1182_v34 }
 0x5c9   :  { %1381 = vmatpush.msrb.mxu0 %v1351_v22 }
 0x5ca   :  { %5877 = vmatmul.msk.f32.gmra.mxu0 %vm626_vm13, %v1020_v29  ;;  %5887 = vmatmul.msk.f32.gmra.mxu2 %vm626_vm13, %v1183_v35 }
 0x5cb   :  { %1382 = vmatpush.msrb.mxu0 %v1350_v30  ;;  %v6291_v30 = vld [vmem:[#allocation6] ss:$0 sm:$0xff] }
 0x5cc   :  { %v1403_v36 = vld [vmem:[%s9081_s5 + $0x38] sm:$0xff]  ;;  %v1402_v38 = vld [vmem:[%s9081_s5 + $0x30] sm:$0xff] }
 0x5cd   :  { %v893_v39 = vpop.f32.mrf.mxu2  ;;  %1422 = vmatpush.msrb.mxu1 %v1403_v36 }
 0x5ce   :  { %v894_v4 = vadd.f32 %v893_v39, %v7476_v31 }
 0x5cf   :  { %1423 = vmatpush.msrb.mxu1 %v1402_v38 }
 0x5d5   :  { %v896_v51 = vpop.f32.mrf.mxu2 }
 0x5d6   :  { %v897_v48 = vadd.f32 %v896_v51, %v7478_v32  ;;  %v1401_v51 = vld [vmem:[%s9081_s5 + $0x28] sm:$0xff] }
 0x5d7   :  { %v1053_v5 = vpop.f32.mrf.mxu0  ;;  %1424 = vmatpush.msrb.mxu1 %v1401_v51 }
 0x5d8   :  { %v1062_v58 = vadd.f32 %v1053_v5, %v894_v4 }
 0x5dd   :  { %v899_v41 = vpop.f32.mrf.mxu2 }
 0x5de   :  { %v900_v52 = vadd.f32 %v899_v41, %v7480_v33 }
 0x63c   :  { %v1216_v42 = vpop.f32.mrf.mxu2 }
 0x63d   :  { %v1225_v40 = vadd.f32 %v1216_v42, %v1062_v58  ;;  %v1400_v58 = vld [vmem:[%s9081_s5 + $0x20] sm:$0xff] }
 0x63e   :  { %1425 = vmatpush.msrb.mxu1 %v1400_v58 }
 0x63f   :  { %v1056_v43 = vpop.f32.mrf.mxu0  ;;  %5888 = vmatmul.msk.f32.vlgmr.msra.gmra.mxu3 %vm363_vm0, %v1225_v40 }
 0x640   :  { %v1063_v46 = vadd.f32 %v1056_v43, %v897_v48  ;;  %v1399_v48 = vld [vmem:[%s9081_s5 + $0x18] sm:$0xff] }
 0x641   :  { %1426 = vmatpush.msrb.mxu1 %v1399_v48 }
 0x644   :  { %v1219_v47 = vpop.f32.mrf.mxu2 }
 0x645   :  { %v1226_v49 = vadd.f32 %v1219_v47, %v1063_v46 }
 0x647   :  { %5889 = vmatmul.msk.f32.gmra.mxu3 %vm363_vm0, %v1226_v49  ;;  %v1059_v50 = vpop.f32.mrf.mxu0  ;;  %v6288_v49 = vld [vmem:[%s9082_s26] ss:$0 sm:$0xff] }
 0x648   :  { %v1064_v1 = vadd.f32 %v1059_v50, %v900_v52 }
 0x64d   :  { %v1222_v31 = vpop.f32.mrf.mxu2 }
 0x64e   :  { %v1227_v53 = vadd.f32 %v1222_v31, %v1064_v1  ;;  %v6289_v31 = vld [vmem:[%s9082_s26 + $0x1] ss:$0 sm:$0xff] }
 0x650   :  { %5890 = vmatmul.msk.f32.gmra.mxu3 %vm363_vm0, %v1227_v53 }
 0x6c2   :  { %v1257_v54 = vpop.f32.mrf.mxu3 }
 0x6c3   :  { %v1258_v55 = vadd.f32 %v6287_v28, %v1257_v54 }
 0x6c5   :  { %v7582_v32 = vadd.f32 %v6629_v56, %v1258_v55 }
 0x6c7   :  { %v1272_v57 = vsel %vm363_vm0, %v7582_v32, 0.0 }
 0x6c8   :  { %1273 = vadd.xlane.f32.xlu0 %v1272_v57 }
 0x6ca   :  { %v1260_v59 = vpop.f32.mrf.mxu3 }
 0x6cb   :  { %v1261_v60 = vadd.f32 %v6287_v28, %v1260_v59 }
 0x6cd   :  { %v7587_v33 = vadd.f32 %v6630_v61, %v1261_v60 }
 0x6cf   :  { %v1275_v6 = vsel %vm363_vm0, %v7587_v33, 0.0 }
 0x6d0   :  { %1276 = vadd.xlane.f32.xlu1 %v1275_v6 }
 0x6d3   :  { %v1263_v44 = vpop.f32.mrf.mxu3 }
 0x6d4   :  { %v1264_v62 = vadd.f32 %v6287_v28, %v1263_v44 }
 0x6d6   :  { %v7592_v0 = vadd.f32 %v6631_v63, %v1264_v62 }
 0x6d8   :  { %v1278_v17 = vsel %vm370_vm1, %v7592_v0, 0.0 }
 0x6d9   :  { %1279 = vadd.xlane.f32.xlu2 %v1278_v17 }
 0x73b   :  { %v1274_v2 = vpop.xlane.xlu0 %1273 }
 0x73c   :  { %v1281_v11 = vmul.f32 %v1274_v2, %v7321_v12 }
 0x73e   :  { %v1284_v45 = vsub.f32 %v7582_v32, %v1281_v11 }
 0x740   :  { %v1287_v7 = vmul.f32 %v1284_v45, %v1284_v45 }
 0x742   :  { %v1290_v8 = vsel %vm363_vm0, %v1287_v7, 0.0 }
 0x743   :  { %v1277_v9 = vpop.xlane.xlu1 %1276  ;;  %1291 = vadd.xlane.f32.xlu0 %v1290_v8 }
 0x744   :  { %v1282_v37 = vmul.f32 %v1277_v9, %v7321_v12  ;;  %v1398_v9 = vld [vmem:[%s9081_s5 + $0x10] sm:$0xff] }
 0x745   :  { %1427 = vmatpush.msrb.mxu1 %v1398_v9 }
 0x746   :  { %v7601_v10 = vsub.f32 %v7587_v33, %v1282_v37  ;;  %v1397_v37 = vld [vmem:[%s9081_s5 + $0x8] sm:$0xff] }
 0x747   :  { %1428 = vmatpush.msrb.mxu1 %v1397_v37 }
 0x748   :  { %v1288_v13 = vmul.f32 %v7601_v10, %v7601_v10 }
 0x74a   :  { %v1293_v14 = vsel %vm363_vm0, %v1288_v13, 0.0  ;;  %v6290_v13 = vld [vmem:[#allocation4] ss:$0 sm:$0xff] }
 0x74b   :  { %1294 = vadd.xlane.f32.xlu1 %v1293_v14 }
 0x74c   :  { %v1280_v15 = vpop.xlane.xlu2 %1279 }
 0x74d   :  { %v1283_v16 = vmul.f32 %v1280_v15, %v7321_v12 }
 0x74f   :  { %v7608_v18 = vsub.f32 %v7592_v0, %v1283_v16 }
 0x751   :  { %v1289_v19 = vmul.f32 %v7608_v18, %v7608_v18 }
 0x753   :  { %v1296_v20 = vsel %vm370_vm1, %v1289_v19, 0.0 }
 0x754   :  { %1297 = vadd.xlane.f32.xlu2 %v1296_v20 }
 0x7b6   :  { %v1292_v3 = vpop.xlane.xlu0 %1291 }
 0x7b7   :  { %v1299_v24 = vmul.f32 %v1292_v3, %v7321_v12 }
 0x7b9   :  { %v1302_v23 = vadd.f32 1e-05, %v1299_v24 }
 0x7bb   :  { %6397 = vrsqrt.f32 %v1302_v23  ;;  %vm1311_vm6 = vweird.f32 %v1302_v23 }
 0x7be   :  { %v1295_v25 = vpop.xlane.xlu1 %1294 }
 0x7bf   :  { %v1300_v27 = vmul.f32 %v1295_v25, %v7321_v12 }
 0x7c1   :  { %v6398_v29 = vpop.eup %6397  ;;  %v1303_v34 = vadd.f32 1e-05, %v1300_v27 }
 0x7c2   :  { %v1306_v35 = vmul.f32 %v6398_v29, %v1302_v23  ;;  %vm1312_vm5 = vweird.f32 %v6398_v29 }
 0x7c3   :  { %6399 = vrsqrt.f32 %v1303_v34  ;;  %vm1313_vm7 = vmor %vm1311_vm6, %vm1312_vm5  ;;  %vm1321_vm9 = vweird.f32 %v1303_v34 }
 0x7c4   :  { %v1307_v39 = vmul.f32 %v6398_v29, %v1306_v35 }
 0x7c6   :  { %v1308_v41 = vmul.f32 0.5, %v1307_v39 }
 0x7c7   :  { %v1298_v5 = vpop.xlane.xlu2 %1297 }
 0x7c8   :  { %v1301_v4 = vmul.f32 %v1298_v5, %v7321_v12  ;;  %v1309_v42 = vsub.f32 1.5, %v1308_v41 }
 0x7c9   :  { %v6400_v40 = vpop.eup %6399 }
 0x7ca   :  { %v1304_v43 = vadd.f32 1e-05, %v1301_v4  ;;  %v1310_v46 = vmul.f32 %v6398_v29, %v1309_v42  ;;  %v1316_v47 = vmul.f32 %v6400_v40, %v1303_v34  ;;  %vm1322_vm8 = vweird.f32 %v6400_v40 }
 0x7cb   :  { %vm1323_vm10 = vmor %vm1321_vm9, %vm1322_vm8 }
 0x7cc   :  { %6401 = vrsqrt.f32 %v1304_v43  ;;  %v1314_v50 = vsel %vm1313_vm7, %v6398_v29, %v1310_v46  ;;  %v1317_v52 = vmul.f32 %v6400_v40, %v1316_v47  ;;  %vm1331_vm15 = vweird.f32 %v1304_v43 }
 0x7cd   :  { %v1335_v1 = vmul.f32 %v1314_v50, %v1284_v45 }
 0x7ce   :  { %v1318_v53 = vmul.f32 0.5, %v1317_v52  ;;  %v5911_v52 = vld [vmem:[%s7053_s3 + $0x98] sm:$0xff] }
 0x7cf   :  { %v1341_v28 = vmul.f32 %v6288_v49, %v1335_v1  ;;  %v5903_v1 = vld [vmem:[%s7053_s3 + $0x78] sm:$0xff]  ;;  %1599 = vmatpush.msrb.mxu3 %v5911_v52 }
 0x7d0   :  { %v1319_v54 = vsub.f32 1.5, %v1318_v53  ;;  %1563 = vmatpush.msrb.mxu2 %v5903_v1  ;;  %v5902_v53 = vld [vmem:[%s7053_s3 + $0x70] sm:$0xff] }
 0x7d1   :  { %v1347_v56 = vadd.f32 %v6289_v31, %v1341_v28  ;;  %v5910_v28 = vld [vmem:[%s7053_s3 + $0x90] sm:$0xff] }
 0x7d2   :  { %v6402_v55 = vpop.eup %6401  ;;  %v1320_v57 = vmul.f32 %v6400_v40, %v1319_v54  ;;  %v5918_v54 = vld [vmem:[%s7053_s3 + $0xb0] sm:$0xff]  ;;  %1564 = vmatpush.msrb.mxu2 %v5902_v53  ;;  %1600 = vmatpush.msrb.mxu3 %v5910_v28  ;;  %v6296_v28 = vld [vmem:[%s7058_s8 + $0x4] ss:$0 sm:$0xff] }
 0x7d3   :  { %v1326_v59 = vmul.f32 %v6402_v55, %v1304_v43  ;;  %5892 = vmatmul.msk.f32.vlgmr.msrb.gmra.mxu0 %vm363_vm0, %v1347_v56  ;;  %vm1332_vm11 = vweird.f32 %v6402_v55  ;;  %v5909_v56 = vld [vmem:[%s7053_s3 + $0x88] sm:$0xff] }
 0x7d4   :  { %v1324_v60 = vsel %vm1323_vm10, %v6400_v40, %v1320_v57  ;;  %vm1333_vm2 = vmor %vm1331_vm15, %vm1332_vm11  ;;  %v5917_v57 = vld [vmem:[%s7053_s3 + $0xa8] sm:$0xff]  ;;  %1601 = vmatpush.msrb.mxu3 %v5909_v56 }
 0x7d5   :  { %v1327_v61 = vmul.f32 %v6402_v55, %v1326_v59  ;;  %v1336_v6 = vmul.f32 %v1324_v60, %v7601_v10  ;;  %v1396_v10 = vld [vmem:[%s9081_s5] sm:$0xff] }
 0x7d6   :  { %1429 = vmatpush.msrb.mxu1 %v1396_v10  ;;  %v5900_v59 = vld [vmem:[%s7053_s3 + $0x60] sm:$0xff] }
 0x7d7   :  { %v1328_v44 = vmul.f32 0.5, %v1327_v61  ;;  %v1342_v62 = vmul.f32 %v6288_v49, %v1336_v6  ;;  %v5908_v60 = vld [vmem:[%s7053_s3 + $0x80] sm:$0xff] }
 0x7d8   :  { %v5916_v61 = vld [vmem:[%s7053_s3 + $0xa0] sm:$0xff]  ;;  %1602 = vmatpush.msrb.mxu3 %v5908_v60 }
 0x7d9   :  { %v1329_v63 = vsub.f32 1.5, %v1328_v44  ;;  %v1348_v17 = vadd.f32 %v6289_v31, %v1342_v62  ;;  %v6633_v60 = vld [vmem:[%s9077_s13] ss:$0 sm:$0xff] }
 0x7db   :  { %v1330_v2 = vmul.f32 %v6402_v55, %v1329_v63  ;;  %5893 = vmatmul.msk.f32.gmra.mxu0 %vm363_vm0, %v1348_v17 }
 0x7dd   :  { %v1334_v11 = vsel %vm1333_vm2, %v6402_v55, %v1330_v2  ;;  %v5901_v55 = vld [vmem:[%s7053_s3 + $0x68] sm:$0xff] }
 0x7de   :  { %v1337_v45 = vmul.f32 %v1334_v11, %v7608_v18  ;;  %1565 = vmatpush.msrb.mxu2 %v5901_v55 }
 0x7e0   :  { %v1343_v7 = vmul.f32 %v6288_v49, %v1337_v45  ;;  %1566 = vmatpush.msrb.mxu2 %v5900_v59 }
 0x7e2   :  { %v1349_v8 = vadd.f32 %v6289_v31, %v1343_v7  ;;  %v5919_v31 = vld [vmem:[%s7053_s3 + $0xb8] sm:$0xff]  ;;  %s9086_s3 = sld [smem:[#allocation38_spill]] }
 0x7e3   :  { %1635 = vmatpush.msra.mxu0 %v5919_v31  ;;  %v6632_v31 = vld [vmem:[%s9077_s13 + $0x1] ss:$0 sm:$0xff] }
 0x7e4   :  { %5894 = vmatmul.msk.f32.gmra.mxu0 %vm363_vm0, %v1349_v8 }
 0x7e5   :  { %1636 = vmatpush.msra.mxu0 %v5918_v54 }
 0x7e7   :  { %1637 = vmatpush.msra.mxu0 %v5917_v57 }
 0x7e9   :  { %1638 = vmatpush.msra.mxu0 %v5916_v61 }
 0x850   :  { %v1384_v14 = vpop.f32.mrf.mxu0 }
 0x851   :  { %v1385_v15 = vadd.f32 %v6290_v13, %v1384_v14 }
 0x853   :  { %v1393_v16 = vmax.f32 %v1385_v15, 0.0 }
 0x855   :  { %5895 = vmatmul.msk.f32.vlgmr.msrb.gmra.mxu1 %vm1404_vm3, %v1393_v16 }
 0x858   :  { %v1387_v19 = vpop.f32.mrf.mxu0 }
 0x859   :  { %v1388_v20 = vadd.f32 %v6290_v13, %v1387_v19  ;;  %v6292_v19 = vld [vmem:[%s7048_s29 + $0x2] ss:$0 sm:$0xff] }
 0x85b   :  { %v1394_v18 = vmax.f32 %v1388_v20, 0.0 }
 0x85d   :  { %5896 = vmatmul.msk.f32.gmra.mxu1 %vm1404_vm3, %v1394_v18 }
 0x861   :  { %v1390_v21 = vpop.f32.mrf.mxu0 }
 0x862   :  { %v1391_v26 = vadd.f32 %v6290_v13, %v1390_v21 }
 0x864   :  { %v1395_v22 = vmax.f32 %v1391_v26, 0.0  ;;  %v6293_v26 = vld [vmem:[%s7048_s29 + $0x3] ss:$0 sm:$0xff]  ;;  %s9083_s29 = sld [smem:[#allocation28_spill]] }
 0x866   :  { %5897 = vmatmul.msk.f32.gmra.mxu1 %vm1404_vm3, %v1395_v22 }
 0x8d2   :  { %v1431_v3 = vpop.f32.mrf.mxu1 }
 0x8d3   :  { %v1440_v24 = vadd.f32 %v1431_v3, %v7582_v32 }
 0x8d5   :  { %v7639_v23 = vadd.f32 %v6291_v30, %v1440_v24 }
 0x8d7   :  { %v1454_v25 = vsel %vm363_vm0, %v7639_v23, 0.0 }
 0x8d8   :  { %1455 = vadd.xlane.f32.xlu0 %v1454_v25 }
 0x8da   :  { %v1434_v27 = vpop.f32.mrf.mxu1 }
 0x8db   :  { %v1441_v29 = vadd.f32 %v1434_v27, %v7587_v33 }
 0x8dd   :  { %v7644_v34 = vadd.f32 %v6291_v30, %v1441_v29 }
 0x8df   :  { %v1457_v35 = vsel %vm363_vm0, %v7644_v34, 0.0 }
 0x8e0   :  { %1458 = vadd.xlane.f32.xlu1 %v1457_v35 }
 0x8e3   :  { %v1437_v36 = vpop.f32.mrf.mxu1 }
 0x8e4   :  { %v1442_v38 = vadd.f32 %v1437_v36, %v7592_v0 }
 0x8e6   :  { %v7649_v39 = vadd.f32 %v6291_v30, %v1442_v38 }
 0x8e8   :  { %v1460_v32 = vsel %vm370_vm1, %v7649_v39, 0.0 }
 0x8e9   :  { %1461 = vadd.xlane.f32.xlu2 %v1460_v32 }
 0x94b   :  { %v1456_v51 = vpop.xlane.xlu0 %1455 }
 0x94c   :  { %v1463_v41 = vmul.f32 %v1456_v51, %v7321_v12 }
 0x94e   :  { %v7655_v33 = vsub.f32 %v7639_v23, %v1463_v41 }
 0x950   :  { %v1469_v5 = vmul.f32 %v7655_v33, %v7655_v33 }
 0x952   :  { %v1472_v4 = vsel %vm363_vm0, %v1469_v5, 0.0 }
 0x953   :  { %1473 = vadd.xlane.f32.xlu0 %v1472_v4  ;;  %v1459_v0 = vpop.xlane.xlu1 %1458 }
 0x954   :  { %v1464_v58 = vmul.f32 %v1459_v0, %v7321_v12 }
 0x956   :  { %v7662_v42 = vsub.f32 %v7644_v34, %v1464_v58 }
 0x958   :  { %v1470_v40 = vmul.f32 %v7662_v42, %v7662_v42 }
 0x95a   :  { %v1475_v43 = vsel %vm363_vm0, %v1470_v40, 0.0 }
 0x95b   :  { %1476 = vadd.xlane.f32.xlu1 %v1475_v43 }
 0x95c   :  { %v1462_v48 = vpop.xlane.xlu2 %1461 }
 0x95d   :  { %v1465_v46 = vmul.f32 %v1462_v48, %v7321_v12 }
 0x95f   :  { %v7669_v47 = vsub.f32 %v7649_v39, %v1465_v46 }
 0x961   :  { %v1471_v49 = vmul.f32 %v7669_v47, %v7669_v47 }
 0x963   :  { %v1478_v50 = vsel %vm370_vm1, %v1471_v49, 0.0  ;;  %v6294_v49 = vld [vmem:[%s7058_s8 + $0x5] ss:$0 sm:$0xff] }
 0x964   :  { %1479 = vadd.xlane.f32.xlu2 %v1478_v50 }
 0x9c6   :  { %v1474_v6 = vpop.xlane.xlu0 %1473 }
 0x9c7   :  { %v1481_v44 = vmul.f32 %v1474_v6, %v7321_v12  ;;  %v6295_v6 = vld [vmem:[%s7058_s8 + $0x3] ss:$0 sm:$0xff]  ;;  %s9087_s8 = sld [smem:[#allocation37_spill]] }
 0x9c9   :  { %v1484_v62 = vadd.f32 1e-05, %v1481_v44 }
 0x9cb   :  { %6403 = vrsqrt.f32 %v1484_v62  ;;  %vm1493_vm5 = vweird.f32 %v1484_v62 }
 0x9ce   :  { %v1477_v63 = vpop.xlane.xlu1 %1476 }
 0x9cf   :  { %v1482_v17 = vmul.f32 %v1477_v63, %v7321_v12 }
 0x9d1   :  { %v6404_v2 = vpop.eup %6403  ;;  %v1485_v11 = vadd.f32 1e-05, %v1482_v17 }
 0x9d2   :  { %v1488_v45 = vmul.f32 %v6404_v2, %v1484_v62  ;;  %vm1494_vm4 = vweird.f32 %v6404_v2 }
 0x9d3   :  { %6405 = vrsqrt.f32 %v1485_v11  ;;  %vm1495_vm6 = vmor %vm1493_vm5, %vm1494_vm4  ;;  %vm1503_vm8 = vweird.f32 %v1485_v11 }
 0x9d4   :  { %v1489_v7 = vmul.f32 %v6404_v2, %v1488_v45  ;;  %v6634_v45 = vld [vmem:[%s9077_s13 + $0x2] ss:$0 sm:$0xff] }
 0x9d6   :  { %v1490_v8 = vmul.f32 0.5, %v1489_v7 }
 0x9d7   :  { %v1480_v9 = vpop.xlane.xlu2 %1479 }
 0x9d8   :  { %v1483_v37 = vmul.f32 %v1480_v9, %v7321_v12  ;;  %v1491_v10 = vsub.f32 1.5, %v1490_v8 }
 0x9d9   :  { %v6406_v13 = vpop.eup %6405 }
 0x9da   :  { %v1486_v14 = vadd.f32 1e-05, %v1483_v37  ;;  %v1492_v15 = vmul.f32 %v6404_v2, %v1491_v10  ;;  %v1498_v16 = vmul.f32 %v6406_v13, %v1485_v11  ;;  %vm1504_vm7 = vweird.f32 %v6406_v13 }
 0x9db   :  { %vm1505_vm9 = vmor %vm1503_vm8, %vm1504_vm7 }
 0x9dc   :  { %6407 = vrsqrt.f32 %v1486_v14  ;;  %v1496_v20 = vsel %vm1495_vm6, %v6404_v2, %v1492_v15  ;;  %v1499_v18 = vmul.f32 %v6406_v13, %v1498_v16  ;;  %vm1513_vm11 = vweird.f32 %v1486_v14 }
 0x9dd   :  { %v1517_v21 = vmul.f32 %v1496_v20, %v7655_v33 }
 0x9de   :  { %v1500_v22 = vmul.f32 0.5, %v1499_v18 }
 0x9df   :  { %v1523_v30 = vmul.f32 %v6292_v19, %v1517_v21 }
 0x9e0   :  { %v1501_v3 = vsub.f32 1.5, %v1500_v22 }
 0x9e1   :  { %v1529_v25 = vadd.f32 %v6293_v26, %v1523_v30 }
 0x9e2   :  { %v6408_v24 = vpop.eup %6407  ;;  %v1502_v27 = vmul.f32 %v6406_v13, %v1501_v3 }
 0x9e3   :  { %v1508_v29 = vmul.f32 %v6408_v24, %v1486_v14  ;;  %5905 = vmatmul.msk.f32.vlgmr.msrb.gmra.mxu2 %vm363_vm0, %v1529_v25  ;;  %5913 = vmatmul.msk.f32.vlgmr.msrb.gmra.mxu3 %vm363_vm0, %v1529_v25  ;;  %vm1514_vm10 = vweird.f32 %v6408_v24 }
 0x9e4   :  { %v1506_v35 = vsel %vm1505_vm9, %v6406_v13, %v1502_v27  ;;  %5921 = vmatmul.msk.f32.vlgmr.msra.gmra.mxu0 %vm363_vm0, %v1529_v25  ;;  %vm1515_vm15 = vmor %vm1513_vm11, %vm1514_vm10  ;;  %v7765_v27 = vld [vmem:[%s9078_s14 + $0x8] sm:$0xff] }
 0x9e5   :  { %v1509_v36 = vmul.f32 %v6408_v24, %v1508_v29  ;;  %v1518_v38 = vmul.f32 %v1506_v35, %v7662_v42 }
 0x9e7   :  { %v1510_v32 = vmul.f32 0.5, %v1509_v36  ;;  %v1524_v51 = vmul.f32 %v6292_v19, %v1518_v38 }
 0x9e9   :  { %v1511_v41 = vsub.f32 1.5, %v1510_v32  ;;  %v1530_v33 = vadd.f32 %v6293_v26, %v1524_v51  ;;  %v7770_v51 = vld [vmem:[%s9078_s14 + $0x10] sm:$0x3] }
 0x9eb   :  { %v1512_v5 = vmul.f32 %v6408_v24, %v1511_v41  ;;  %5906 = vmatmul.msk.f32.gmra.mxu2 %vm363_vm0, %v1530_v33  ;;  %5914 = vmatmul.msk.f32.gmra.mxu3 %vm363_vm0, %v1530_v33 }
 0x9ec   :  { %5922 = vmatmul.msk.f32.gmra.mxu0 %vm363_vm0, %v1530_v33 }
 0x9ed   :  { %v1516_v4 = vsel %vm1515_vm15, %v6408_v24, %v1512_v5 }
 0x9ee   :  { %v1519_v0 = vmul.f32 %v1516_v4, %v7669_v47  ;;  %v7775_v4 = vld [vmem:[%s9078_s14] sm:$0xff] }
 0x9f0   :  { %v1525_v58 = vmul.f32 %v6292_v19, %v1519_v0 }
 0x9f2   :  { %v1531_v42 = vadd.f32 %v6293_v26, %v1525_v58 }
 0x9f4   :  { %5907 = vmatmul.msk.f32.gmra.mxu2 %vm363_vm0, %v1531_v42  ;;  %5915 = vmatmul.msk.f32.gmra.mxu3 %vm363_vm0, %v1531_v42 }
 0x9f5   :  { %5923 = vmatmul.msk.f32.gmra.mxu0 %vm363_vm0, %v1531_v42 }
 0xa61   :  { %v1640_v40 = vpop.f32.mrf.mxu0 }
 0xa62   :  { %v7708_v47 = vadd.f32 %v6294_v49, %v1640_v40 }
 0xa64   :  { %v1900_v59 = vmul.f32 %v6632_v31, %v7708_v47  ;;  %v1781_v63 = vmul.f32 %v6633_v60, %v7708_v47  ;;  %v2095_v13 = vmul.f32 %v6634_v45, %v7708_v47 }
 0xa66   :  { %v1604_v43 = vpop.f32.mrf.mxu3  ;;  %v1568_v56 = vpop.f32.mrf.mxu2 }
 0xa67   :  { %v7727_v17 = vadd.f32 %v6295_v6, %v1568_v56  ;;  %v1605_v2 = vadd.f32 %v6296_v28, %v1604_v43 }
 0xa69   :  { %v1643_v48 = vpop.f32.mrf.mxu0  ;;  %v1656_v8 = vmul.f32 %v6633_v60, %v7727_v17  ;;  %v1784_v9 = vmul.f32 %v6632_v31, %v7727_v17  ;;  %v1979_v21 = vmul.f32 %v6634_v45, %v7727_v17 }
 0xa6a   :  { %v7704_v52 = vadd.f32 %v6294_v49, %v1643_v48 }
 0xa6c   :  { %v1901_v55 = vmul.f32 %v6632_v31, %v7704_v52  ;;  %v1782_v62 = vmul.f32 %v6633_v60, %v7704_v52  ;;  %v2096_v37 = vmul.f32 %v6634_v45, %v7704_v52 }
 0xa6e   :  { %v1607_v46 = vpop.f32.mrf.mxu3  ;;  %v1571_v11 = vpop.f32.mrf.mxu2 }
 0xa6f   :  { %v1608_v44 = vadd.f32 %v6296_v28, %v1607_v46  ;;  %v7743_v10 = vadd.f32 %v6295_v6, %v1571_v11 }
 0xa71   :  { %v1657_v14 = vmul.f32 %v6633_v60, %v7743_v10  ;;  %v1785_v16 = vmul.f32 %v6632_v31, %v7743_v10  ;;  %v1980_v26 = vmul.f32 %v6634_v45, %v7743_v10 }
 0xa72   :  { %v1646_v50 = vpop.f32.mrf.mxu0 }
 0xa73   :  { %v7706_v1 = vadd.f32 %v6294_v49, %v1646_v50 }
 0xa75   :  { %v1902_v53 = vmul.f32 %v6632_v31, %v7706_v1  ;;  %v1783_v61 = vmul.f32 %v6633_v60, %v7706_v1  ;;  %v2097_v7 = vmul.f32 %v6634_v45, %v7706_v1 }
 0xa77   :  { %5940 = vmatpush.msk.msrb.mxu0 %vm834_vm12, %v1902_v53  ;;  %6222 = vmatpush.msk.msra.mxu3 %vm834_vm12, %v1902_v53  ;;  %v1610_v54 = vpop.f32.mrf.mxu3  ;;  %v1574_v15 = vpop.f32.mrf.mxu2 }
 0xa78   :  { %v1611_v57 = vadd.f32 %v6296_v28, %v1610_v54  ;;  %v7752_v19 = vadd.f32 %v6295_v6, %v1574_v15 }
 0xa79   :  { %1929 = vmatpush.msrb.mxu0 %v1901_v55  ;;  %6223 = vmatpush.msra.mxu3 %v1901_v55 }
 0xa7a   :  { %5928 = vmatpush.xpose.msk.msra.mxu1 %vm363_vm0, %v1611_v57  ;;  %5934 = vmatpush.xpose.msk.msra.mxu2 %vm363_vm0, %v1611_v57  ;;  %v1658_v20 = vmul.f32 %v6633_v60, %v7752_v19  ;;  %v1786_v18 = vmul.f32 %v6632_v31, %v7752_v19  ;;  %v1981_v22 = vmul.f32 %v6634_v45, %v7752_v19 }
 0xa7b   :  { %1930 = vmatpush.msrb.mxu0 %v1900_v59  ;;  %6224 = vmatpush.msra.mxu3 %v1900_v59 }
 0xa7d   :  { %5944 = vmatpush.msk.msra.mxu0 %vm834_vm12, %v1783_v61  ;;  %5958 = vmatpush.xpose.msk.msrb.mxu3 %vm363_vm0, %v1611_v57 }
 0xa7e   :  { %5929 = vmatpush.xpose.msk.msra.mxu1 %vm363_vm0, %v1608_v44  ;;  %5935 = vmatpush.xpose.msk.msra.mxu2 %vm363_vm0, %v1608_v44 }
 0xa7f   :  { %1967 = vmatpush.msra.mxu0 %v1782_v62 }
 0xa81   :  { %1968 = vmatpush.msra.mxu0 %v1781_v63  ;;  %5959 = vmatpush.xpose.msk.msrb.mxu3 %vm363_vm0, %v1608_v44 }
 0xa82   :  { %5930 = vmatpush.xpose.msk.msra.mxu1 %vm363_vm0, %v1605_v2  ;;  %5936 = vmatpush.xpose.msk.msra.mxu2 %vm363_vm0, %v1605_v2 }
 0xa85   :  { %5960 = vmatpush.xpose.msk.msrb.mxu3 %vm363_vm0, %v1605_v2  ;;  %5931 = vmatmul.msk.f32.vlgmr.msra.gmra.mxu1 %vm363_vm0, %v1656_v8 }
 0xa86   :  { %5948 = vmatpush.xpose.msk.msrb.mxu1 %vm363_vm0, %v1611_v57  ;;  %5954 = vmatpush.msk.msrb.mxu2 %vm834_vm12, %v2097_v7 }
 0xa87   :  { %5937 = vmatmul.msk.f32.vlgmr.msra.gmra.mxu2 %vm363_vm0, %v1784_v9 }
 0xa88   :  { %2124 = vmatpush.msrb.mxu2 %v2096_v37 }
 0xa8a   :  { %5949 = vmatpush.xpose.msk.msrb.mxu1 %vm363_vm0, %v1608_v44  ;;  %2125 = vmatpush.msrb.mxu2 %v2095_v13 }
 0xa8d   :  { %5932 = vmatmul.msk.f32.gmra.mxu1 %vm363_vm0, %v1657_v14 }
 0xa8e   :  { %5950 = vmatpush.xpose.msk.msrb.mxu1 %vm363_vm0, %v1605_v2 }
 0xa8f   :  { %5938 = vmatmul.msk.f32.gmra.mxu2 %vm363_vm0, %v1785_v16 }
 0xa95   :  { %5933 = vmatmul.msk.f32.gmra.mxu1 %vm363_vm0, %v1658_v20 }
 0xa97   :  { %5939 = vmatmul.msk.f32.gmra.mxu2 %vm363_vm0, %v1786_v18 }
 0xa9d   :  { %5951 = vmatmul.msk.f32.vlgmr.msrb.gmra.mxu1 %vm363_vm0, %v1979_v21 }
 0xaa5   :  { %5952 = vmatmul.msk.f32.gmra.mxu1 %vm363_vm0, %v1980_v26 }
 0xaad   :  { %5953 = vmatmul.msk.f32.gmra.mxu1 %vm363_vm0, %v1981_v22 }
 0xb02   :  { %v1694_v3 = vpop.f32.mrf.mxu1 }
 0xb03   :  { %v1703_v56 = vmul.f32 0.35355338, %v1694_v3 }
 0xb05   :  { %v7786_v60 = vadd.f32 %v7775_v4, %v1703_v56 }
 0xb07   :  { %v1709_v62 = vsel %vm626_vm13, %v7786_v60, -inf }
 0xb0a   :  { %v1813_v30 = vpop.f32.mrf.mxu2  ;;  %v1697_v36 = vpop.f32.mrf.mxu1 }
 0xb0b   :  { %v1822_v33 = vmul.f32 0.35355338, %v1813_v30  ;;  %v1704_v6 = vmul.f32 0.35355338, %v1697_v36 }
 0xb0d   :  { %v1825_v0 = vadd.f32 %v7775_v4, %v1822_v33  ;;  %v7795_v11 = vadd.f32 %v7765_v27, %v1704_v6 }
 0xb0f   :  { %v1828_v40 = vsel %vm626_vm13, %v1825_v0, -inf  ;;  %v1712_v13 = vsel %vm626_vm13, %v7795_v11, -inf }
 0xb12   :  { %v1816_v24 = vpop.f32.mrf.mxu2  ;;  %v1700_v58 = vpop.f32.mrf.mxu1 }
 0xb13   :  { %v1823_v25 = vmul.f32 0.35355338, %v1816_v24  ;;  %v1705_v42 = vmul.f32 0.35355338, %v1700_v58 }
 0xb15   :  { %v1826_v29 = vadd.f32 %v7765_v27, %v1823_v25  ;;  %v1708_v43 = vadd.f32 %v7770_v51, %v1705_v42 }
 0xb17   :  { %v1831_v35 = vsel %vm626_vm13, %v1826_v29, -inf  ;;  %v1715_v48 = vsel %vm633_vm14, %v1708_v43, -inf }
 0xb18   :  { %1832 = vmax.xlane.f32.xlu0 %v1831_v35 }
 0xb1a   :  { %v1819_v38 = vpop.f32.mrf.mxu2  ;;  %v2008_v31 = vpop.f32.mrf.mxu1 }
 0xb1b   :  { %v1824_v32 = vmul.f32 0.35355338, %v1819_v38  ;;  %v2017_v44 = vmul.f32 0.35355338, %v2008_v31 }
 0xb1d   :  { %v1827_v41 = vadd.f32 %v7770_v51, %v1824_v32  ;;  %v7798_v45 = vadd.f32 %v7775_v4, %v2017_v44 }
 0xb1f   :  { %v1834_v5 = vsel %vm633_vm14, %v1827_v41, -inf  ;;  %v2023_v14 = vsel %vm626_vm13, %v7798_v45, -inf }
 0xb20   :  { %1835 = vmax.xlane.f32.xlu1 %v1834_v5 }
 0xb22   :  { %v2011_v59 = vpop.f32.mrf.mxu1 }
 0xb23   :  { %v2018_v9 = vmul.f32 0.35355338, %v2011_v59 }
 0xb25   :  { %v7805_v20 = vadd.f32 %v7765_v27, %v2018_v9 }
 0xb27   :  { %v2026_v26 = vsel %vm626_vm13, %v7805_v20, -inf }
 0xb28   :  { %1829 = vmax.xlane.f32.xlu1 %v1828_v40 }
 0xb2a   :  { %v2014_v7 = vpop.f32.mrf.mxu1 }
 0xb2b   :  { %v2019_v37 = vmul.f32 0.35355338, %v2014_v7 }
 0xb2d   :  { %v7808_v18 = vadd.f32 %v7770_v51, %v2019_v37 }
 0xb2f   :  { %v2029_v22 = vsel %vm633_vm14, %v7808_v18, -inf }
 0xb30   :  { %1716 = vmax.xlane.f32.xlu1 %v1715_v48 }
 0xb8b   :  { %v1833_v46 = vpop.xlane.xlu0 %1832 }
 0xb8c   :  { %v1838_v49 = vsub.f32 %v1826_v29, %v1833_v46 }
 0xb8e   :  { %v1842_v50 = vmul.f32 1.442695, %v1838_v49 }
 0xb90   :  { %6409 = vpow2.f32 %v1842_v50 }
 0xb93   :  { %v1836_v53 = vpop.xlane.xlu1 %1835 }
 0xb94   :  { %v1839_v28 = vsub.f32 %v1827_v41, %v1836_v53 }
 0xb96   :  { %v7781_v54 = vpop.eup %6409  ;;  %v1844_v55 = vmul.f32 1.442695, %v1839_v28 }
 0xb97   :  { %v1849_v57 = vsel %vm626_vm13, %v7781_v54, 0.0 }
 0xb98   :  { %6411 = vpow2.f32 %v1844_v55  ;;  %1850 = vadd.xlane.f32.xlu2 %v1849_v57 }
 0xb9b   :  { %v1830_v2 = vpop.xlane.xlu1 %1829 }
 0xb9c   :  { %v1837_v8 = vsub.f32 %v1825_v0, %v1830_v2  ;;  %v6638_v2 = vld [vmem:[%s9077_s13 + $0x3] ss:$0 sm:$0xff] }
 0xb9d   :  { %v2139_v7 = vmul.f32 %v6638_v2, %v7727_v17 }
 0xb9e   :  { %v7788_v61 = vpop.eup %6411  ;;  %v1840_v15 = vmul.f32 1.442695, %v1837_v8 }
 0xb9f   :  { %v1852_v63 = vsel %vm633_vm14, %v7788_v61, 0.0 }
 0xba0   :  { %1710 = vmax.xlane.f32.xlu2 %v1709_v62  ;;  %1853 = vadd.xlane.f32.xlu0 %v1852_v63  ;;  %6413 = vpow2.f32 %v1840_v15 }
 0xba3   :  { %v1717_v16 = vpop.xlane.xlu1 %1716 }
 0xba4   :  { %v1720_v21 = vsub.f32 %v1708_v43, %v1717_v16 }
 0xba6   :  { %v1725_v30 = vmul.f32 1.442695, %v1720_v21  ;;  %v7814_v3 = vpop.eup %6413 }
 0xba7   :  { %v1846_v24 = vsel %vm626_vm13, %v7814_v3, 0.0 }
 0xba8   :  { %1713 = vmax.xlane.f32.xlu0 %v1712_v13  ;;  %2024 = vmax.xlane.f32.xlu2 %v2023_v14  ;;  %6415 = vpow2.f32 %v1725_v30  ;;  %v2140_v13 = vmul.f32 %v6638_v2, %v7743_v10  ;;  %v2141_v30 = vmul.f32 %v6638_v2, %v7752_v19  ;;  %v2256_v10 = vmul.f32 %v6638_v2, %v7704_v52 }
 0xbae   :  { %v7818_v25 = vpop.eup %6415 }
 0xbaf   :  { %v1733_v29 = vsel %vm633_vm14, %v7818_v25, 0.0 }
 0xbb0   :  { %2027 = vmax.xlane.f32.xlu0 %v2026_v26  ;;  %2030 = vmax.xlane.f32.xlu2 %v2029_v22 }
 0xbb8   :  { %1847 = vadd.xlane.f32.xlu2 %v1846_v24  ;;  %v2257_v24 = vmul.f32 %v6638_v2, %v7706_v1 }
 0xbc0   :  { %1734 = vadd.xlane.f32.xlu2 %v1733_v29  ;;  %v2255_v29 = vmul.f32 %v6638_v2, %v7708_v47 }
 0xc0b   :  { %v1851_v35 = vpop.xlane.xlu2 %1850 }
 0xc0c   :  { %6417 = vrcp.f32 %v1851_v35  ;;  %v1881_v5 = vand.u32 2147483648, %v1851_v35  ;;  %v1879_v58 = vand.u32 2147483647, %v1851_v35  ;;  %vm1875_vm4 = vweird.f32 %v1851_v35 }
 0xc0e   :  { %v1882_v43 = vor.u32 1.1754944e-38, %v1881_v5  ;;  %vm1880_vm6 = vcmp.eq.f32.partialorder %v1879_v58, 8.507059e+37 }
 0xc12   :  { %v6418_v36 = vpop.eup %6417 }
 0xc13   :  { %v1871_v38 = vmul.f32 %v6418_v36, %v1851_v35  ;;  %v7822_v32 = vpop.xlane.xlu2 %1710  ;;  %v1854_v41 = vpop.xlane.xlu0 %1853  ;;  %vm1876_vm2 = vweird.f32 %v6418_v36 }
 0xc14   :  { %6419 = vrcp.f32 %v1854_v41  ;;  %vm1877_vm5 = vmor %vm1875_vm4, %vm1876_vm2  ;;  %v1896_v28 = vand.u32 2147483648, %v1854_v41  ;;  %v1894_v56 = vand.u32 2147483647, %v1854_v41  ;;  %vm1890_vm8 = vweird.f32 %v1854_v41 }
 0xc15   :  { %v1872_v33 = vsub.f32 1.0, %v1871_v38  ;;  %v1718_v38 = vsub.f32 %v7786_v60, %v7822_v32 }
 0xc16   :  { %v1897_v59 = vor.u32 1.1754944e-38, %v1896_v28  ;;  %vm1895_vm10 = vcmp.eq.f32.partialorder %v1894_v56, 8.507059e+37 }
 0xc17   :  { %v1873_v0 = vmul.f32 %v6418_v36, %v1872_v33  ;;  %v1721_v52 = vmul.f32 1.442695, %v1718_v38 }
 0xc19   :  { %v1874_v42 = vadd.f32 %v6418_v36, %v1873_v0 }
 0xc1a   :  { %v6420_v40 = vpop.eup %6419 }
 0xc1b   :  { %v1878_v48 = vsel %vm1877_vm5, %v6418_v36, %v1874_v42  ;;  %v1886_v46 = vmul.f32 %v6420_v40, %v1854_v41  ;;  %v7824_v49 = vpop.xlane.xlu2 %2024  ;;  %vm1891_vm7 = vweird.f32 %v6420_v40  ;;  %v1714_v33 = vpop.xlane.xlu0 %1713 }
 0xc1c   :  { %v1883_v50 = vsel %vm1880_vm6, %v1882_v43, %v1878_v48  ;;  %vm1892_vm9 = vmor %vm1890_vm8, %vm1891_vm7  ;;  %v1719_v47 = vsub.f32 %v7795_v11, %v1714_v33  ;;  %v2032_v42 = vsub.f32 %v7798_v45, %v7824_v49 }
 0xc1d   :  { %v1887_v31 = vsub.f32 1.0, %v1886_v46  ;;  %v1884_v53 = vmul.f32 %v7781_v54, %v1883_v50 }
 0xc1e   :  { %v2035_v60 = vmul.f32 1.442695, %v2032_v42 }
 0xc1f   :  { %v1888_v55 = vmul.f32 %v6420_v40, %v1887_v31  ;;  %5942 = vmatmul.msk.f32.vlgmr.msra.gmra.mxu3 %vm626_vm13, %v1884_v53 }
 0xc21   :  { %v1889_v57 = vadd.f32 %v6420_v40, %v1888_v55 }
 0xc23   :  { %v7828_v6 = vpop.xlane.xlu2 %2030  ;;  %v1893_v44 = vsel %vm1892_vm9, %v6420_v40, %v1889_v57  ;;  %v1723_v40 = vmul.f32 1.442695, %v1719_v47  ;;  %v2028_v32 = vpop.xlane.xlu0 %2027 }
 0xc24   :  { %v1898_v62 = vsel %vm1895_vm10, %v1897_v59, %v1893_v44  ;;  %v2033_v50 = vsub.f32 %v7805_v20, %v2028_v32 }
 0xc25   :  { %v1899_v63 = vmul.f32 %v7788_v61, %v1898_v62 }
 0xc26   :  { %v2037_v31 = vmul.f32 1.442695, %v2033_v50 }
 0xc27   :  { %5943 = vmatmul.msk.f32.gmra.mxu3 %vm626_vm13, %v1899_v63 }
 0xc2b   :  { %v1848_v54 = vpop.xlane.xlu2 %1847 }
 0xc2c   :  { %6421 = vrcp.f32 %v1848_v54  ;;  %v1866_v14 = vand.u32 2147483648, %v1848_v54  ;;  %v1864_v16 = vand.u32 2147483647, %v1848_v54  ;;  %vm1860_vm15 = vweird.f32 %v1848_v54 }
 0xc2d   :  { %6423 = vpow2.f32 %v1721_v52 }
 0xc2e   :  { %v1867_v21 = vor.u32 1.1754944e-38, %v1866_v14  ;;  %vm1865_vm4 = vcmp.eq.f32.partialorder %v1864_v16, 8.507059e+37  ;;  %6425 = vpow2.f32 %v1723_v40 }
 0xc2f   :  { %5961 = vmatmul.msk.f32.vlgmr.msrb.gmra.mxu3 %vm363_vm0, %v2139_v7  ;;  %6427 = vpow2.f32 %v2035_v60 }
 0xc30   :  { %6429 = vpow2.f32 %v2037_v31 }
 0xc32   :  { %v6422_v8 = vpop.eup %6421 }
 0xc33   :  { %v1856_v9 = vmul.f32 %v6422_v8, %v1848_v54  ;;  %vm1861_vm11 = vweird.f32 %v6422_v8  ;;  %v7858_v46 = vpop.eup %6423 }
 0xc34   :  { %vm1862_vm2 = vmor %vm1860_vm15, %vm1861_vm11  ;;  %v1727_v45 = vsel %vm626_vm13, %v7858_v46, 0.0  ;;  %v7867_v28 = vpop.eup %6425 }
 0xc35   :  { %v1857_v37 = vsub.f32 1.0, %v1856_v9  ;;  %v7869_v55 = vpop.eup %6427  ;;  %v1730_v20 = vsel %vm626_vm13, %v7867_v28, 0.0 }
 0xc37   :  { %v1858_v15 = vmul.f32 %v6422_v8, %v1857_v37  ;;  %5962 = vmatmul.msk.f32.gmra.mxu3 %vm363_vm0, %v2140_v13  ;;  %v7892_v13 = vpop.xlane.xlu2 %1734 }
 0xc38   :  { %vm1771_vm9 = vweird.f32 %v7892_v13 }
 0xc39   :  { %v1859_v61 = vadd.f32 %v6422_v8, %v1858_v15 }
 0xc3b   :  { %v1863_v26 = vsel %vm1862_vm2, %v6422_v8, %v1859_v61 }
 0xc3c   :  { %v1868_v17 = vsel %vm1865_vm4, %v1867_v21, %v1863_v26 }
 0xc3d   :  { %v1869_v22 = vmul.f32 %v7814_v3, %v1868_v17 }
 0xc3f   :  { %5941 = vmatmul.msk.f32.vlgmr.msrb.gmra.mxu0 %vm626_vm13, %v1869_v22  ;;  %5963 = vmatmul.msk.f32.gmra.mxu3 %vm363_vm0, %v2141_v30  ;;  %v7902_v30 = vld [vmem:[%s9083_s29 + $0x8] sm:$0xff] }
 0xc40   :  { %5964 = vmatpush.msk.msrb.mxu0 %vm834_vm12, %v2257_v24 }
 0xc42   :  { %2284 = vmatpush.msrb.mxu0 %v2256_v10 }
 0xc44   :  { %2285 = vmatpush.msrb.mxu0 %v2255_v29 }
 0xca2   :  { %v7845_v35 = vpop.f32.mrf.mxu3 }
 0xcaa   :  { %v7847_v36 = vpop.f32.mrf.mxu3 }
 0xcb2   :  { %v2168_v3 = vpop.f32.mrf.mxu3 }
 0xcb3   :  { %v2177_v19 = vmul.f32 0.35355338, %v2168_v3 }
 0xcb5   :  { %v2180_v1 = vadd.f32 %v7775_v4, %v2177_v19 }
 0xcb7   :  { %v2183_v41 = vsel %vm626_vm13, %v2180_v1, -inf }
 0xcb8   :  { %2184 = vmax.xlane.f32.xlu1 %v2183_v41 }
 0xcba   :  { %v2171_v5 = vpop.f32.mrf.mxu3 }
 0xcbb   :  { %v2178_v0 = vmul.f32 0.35355338, %v2171_v5 }
 0xcbd   :  { %v2181_v58 = vadd.f32 %v7765_v27, %v2178_v0  ;;  %v2034_v27 = vsub.f32 %v7808_v18, %v7828_v6  ;;  %v7875_v18 = vpop.eup %6429  ;;  %v7884_v6 = vld [vmem:[%s9083_s29] sm:$0xff] }
 0xcbe   :  { %v2044_v59 = vsel %vm626_vm13, %v7875_v18, 0.0  ;;  %v2611_v44 = vsel %vm363_vm0, %v7884_v6, 0.0 }
 0xcbf   :  { %v2186_v4 = vsel %vm626_vm13, %v2181_v58, -inf  ;;  %v2039_v53 = vmul.f32 1.442695, %v2034_v27 }
 0xcc0   :  { %2187 = vmax.xlane.f32.xlu0 %v2186_v4 }
 0xcc1   :  { %6431 = vpow2.f32 %v2039_v53 }
 0xcc2   :  { %v2174_v43 = vpop.f32.mrf.mxu3 }
 0xcc3   :  { %v2179_v48 = vmul.f32 0.35355338, %v2174_v43 }
 0xcc5   :  { %v2182_v11 = vadd.f32 %v7770_v51, %v2179_v48  ;;  %v2041_v51 = vsel %vm626_vm13, %v7869_v55, 0.0 }
 0xcc7   :  { %v2189_v49 = vsel %vm633_vm14, %v2182_v11, -inf  ;;  %v7877_v56 = vpop.eup %6431 }
 0xcc8   :  { %1728 = vadd.xlane.f32.xlu0 %v1727_v45  ;;  %2190 = vmax.xlane.f32.xlu1 %v2189_v49  ;;  %v2047_v57 = vsel %vm633_vm14, %v7877_v56, 0.0 }
 0xcd0   :  { %2042 = vadd.xlane.f32.xlu0 %v2041_v51  ;;  %1731 = vadd.xlane.f32.xlu1 %v1730_v20 }
 0xcd8   :  { %2048 = vadd.xlane.f32.xlu0 %v2047_v57  ;;  %2045 = vadd.xlane.f32.xlu1 %v2044_v59 }
 0xce0   :  { %2612 = vadd.xlane.f32.xlu0 %v2611_v44 }
 0xd2b   :  { %v2185_v62 = vpop.xlane.xlu1 %2184 }
 0xd2c   :  { %v2192_v63 = vsub.f32 %v2180_v1, %v2185_v62  ;;  %v2614_v1 = vsel %vm363_vm0, %v7902_v30, 0.0 }
 0xd2e   :  { %v2195_v54 = vmul.f32 1.442695, %v2192_v63 }
 0xd30   :  { %6433 = vpow2.f32 %v2195_v54 }
 0xd33   :  { %v2188_v2 = vpop.xlane.xlu0 %2187 }
 0xd34   :  { %v2193_v7 = vsub.f32 %v2181_v58, %v2188_v2 }
 0xd36   :  { %v7888_v8 = vpop.eup %6433  ;;  %v2197_v9 = vmul.f32 1.442695, %v2193_v7 }
 0xd37   :  { %v2201_v37 = vsel %vm626_vm13, %v7888_v8, 0.0 }
 0xd38   :  { %6435 = vpow2.f32 %v2197_v9  ;;  %2202 = vadd.xlane.f32.xlu2 %v2201_v37 }
 0xd39   :  { %6437 = vrcp.f32 %v7892_v13 }
 0xd3b   :  { %v1729_v14 = vpop.xlane.xlu0 %1728  ;;  %v2191_v15 = vpop.xlane.xlu1 %2190 }
 0xd3c   :  { %6439 = vrcp.f32 %v1729_v14  ;;  %v2194_v16 = vsub.f32 %v2182_v11, %v2191_v15  ;;  %v1747_v38 = vand.u32 2147483648, %v1729_v14  ;;  %v1745_v52 = vand.u32 2147483647, %v1729_v14 }
 0xd3d   :  { %vm1741_vm6 = vweird.f32 %v1729_v14 }
 0xd3e   :  { %v7895_v61 = vpop.eup %6435  ;;  %v2199_v21 = vmul.f32 1.442695, %v2194_v16  ;;  %v1748_v42 = vor.u32 1.1754944e-38, %v1747_v38  ;;  %vm1746_vm8 = vcmp.eq.f32.partialorder %v1745_v52, 8.507059e+37 }
 0xd3f   :  { %v2204_v26 = vsel %vm626_vm13, %v7895_v61, 0.0  ;;  %v7899_v17 = vpop.eup %6437 }
 0xd40   :  { %2205 = vadd.xlane.f32.xlu1 %v2204_v26  ;;  %6441 = vpow2.f32 %v2199_v21  ;;  %v1767_v3 = vmul.f32 %v7899_v17, %v7892_v13  ;;  %vm1772_vm15 = vweird.f32 %v7899_v17 }
 0xd42   :  { %v6440_v22 = vpop.eup %6439  ;;  %v1768_v0 = vsub.f32 1.0, %v1767_v3 }
 0xd43   :  { %v1737_v24 = vmul.f32 %v6440_v22, %v1729_v14  ;;  %v2043_v10 = vpop.xlane.xlu0 %2042  ;;  %v1732_v29 = vpop.xlane.xlu1 %1731  ;;  %vm1742_vm5 = vweird.f32 %v6440_v22 }
 0xd44   :  { %6443 = vrcp.f32 %v2043_v10  ;;  %vm1743_vm7 = vmor %vm1741_vm6, %vm1742_vm5  ;;  %v1769_v11 = vmul.f32 %v7899_v17, %v1768_v0  ;;  %v2059_v45 = vand.u32 2147483647, %v2043_v10  ;;  %v2061_v49 = vand.u32 2147483648, %v2043_v10 }
 0xd45   :  { %v1738_v19 = vsub.f32 1.0, %v1737_v24  ;;  %6445 = vrcp.f32 %v1732_v29  ;;  %v1762_v20 = vand.u32 2147483648, %v1732_v29  ;;  %v1760_v57 = vand.u32 2147483647, %v1732_v29 }
 0xd46   :  { %v7908_v41 = vpop.eup %6441  ;;  %vm2055_vm11 = vweird.f32 %v2043_v10  ;;  %v1770_v62 = vadd.f32 %v7899_v17, %v1769_v11  ;;  %vm2060_vm4 = vcmp.eq.f32.partialorder %v2059_v45, 8.507059e+37  ;;  %vm1756_vm5 = vweird.f32 %v1732_v29 }
 0xd47   :  { %v1739_v33 = vmul.f32 %v6440_v22, %v1738_v19  ;;  %v2207_v5 = vsel %vm633_vm14, %v7908_v41, 0.0  ;;  %v1763_v9 = vor.u32 1.1754944e-38, %v1762_v20 }
 0xd48   :  { %2615 = vadd.xlane.f32.xlu1 %v2614_v1  ;;  %2208 = vadd.xlane.f32.xlu2 %v2207_v5 }
 0xd49   :  { %v1740_v47 = vadd.f32 %v6440_v22, %v1739_v33  ;;  %v1775_v33 = vand.u32 2147483647, %v7892_v13 }
 0xd4a   :  { %v6444_v58 = vpop.eup %6443 }
 0xd4b   :  { %v6446_v4 = vpop.eup %6445  ;;  %v1744_v40 = vsel %vm1743_vm7, %v6440_v22, %v1740_v47  ;;  %v2051_v60 = vmul.f32 %v6444_v58, %v2043_v10  ;;  %v7912_v32 = vpop.xlane.xlu0 %2048  ;;  %vm2056_vm14 = vweird.f32 %v6444_v58  ;;  %vm1761_vm7 = vcmp.eq.f32.partialorder %v1760_v57, 8.507059e+37 }
 0xd4c   :  { %v7914_v43 = vpop.xlane.xlu1 %2045  ;;  %v1749_v48 = vsel %vm1746_vm8, %v1748_v42, %v1744_v40  ;;  %v1752_v50 = vmul.f32 %v6446_v4, %v1732_v29  ;;  %6447 = vrcp.f32 %v7912_v32  ;;  %vm1757_vm10 = vweird.f32 %v6446_v4  ;;  %vm2057_vm2 = vmor %vm2055_vm11, %vm2056_vm14 }
 0xd4d   :  { %v2052_v27 = vsub.f32 1.0, %v2051_v60  ;;  %6449 = vrcp.f32 %v7914_v43  ;;  %v1750_v53 = vmul.f32 %v7858_v46, %v1749_v48  ;;  %v2062_v46 = vor.u32 1.1754944e-38, %v2061_v49  ;;  %vm1758_vm6 = vmor %vm1756_vm5, %vm1757_vm10 }
 0xd4e   :  { %v1753_v31 = vsub.f32 1.0, %v1752_v50  ;;  %v1777_v22 = vand.u32 2147483648, %v7892_v13  ;;  %vm7938_vm8 = vmor %vm1771_vm9, %vm1772_vm15  ;;  %v2076_v52 = vand.u32 2147483648, %v7914_v43  ;;  %vm2070_vm9 = vweird.f32 %v7914_v43 }
 0xd4f   :  { %v2053_v51 = vmul.f32 %v6444_v58, %v2052_v27  ;;  %5945 = vmatmul.msk.f32.vlgmr.msra.gmra.mxu0 %vm626_vm13, %v1750_v53  ;;  %vm1776_vm10 = vcmp.eq.f32.partialorder %v1775_v33, 8.507059e+37  ;;  %v2091_v60 = vand.u32 2147483648, %v7912_v32  ;;  %v2089_v11 = vand.u32 2147483647, %v7912_v32 }
 0xd50   :  { %v1754_v59 = vmul.f32 %v6446_v4, %v1753_v31  ;;  %v1778_v47 = vor.u32 1.1754944e-38, %v1777_v22  ;;  %v2077_v42 = vor.u32 1.1754944e-38, %v2076_v52  ;;  %v2668_v52 = vld [vmem:[%s9086_s3 + $0x18] sm:$0xff] }
 0xd51   :  { %v2054_v44 = vadd.f32 %v6444_v58, %v2053_v51  ;;  %v2092_v45 = vor.u32 1.1754944e-38, %v2091_v60  ;;  %2691 = vmatpush.msra.mxu0 %v2668_v52 }
 0xd52   :  { %v6448_v63 = vpop.eup %6447  ;;  %v1755_v54 = vadd.f32 %v6446_v4, %v1754_v59 }
 0xd53   :  { %v6450_v2 = vpop.eup %6449  ;;  %v2058_v7 = vsel %vm2057_vm2, %v6444_v58, %v2054_v44  ;;  %v2081_v37 = vmul.f32 %v6448_v63, %v7912_v32  ;;  %v2613_v14 = vpop.xlane.xlu0 %2612  ;;  %vm2086_vm2 = vweird.f32 %v6448_v63 }
 0xd54   :  { %v2063_v15 = vsel %vm2060_vm4, %v2062_v46, %v2058_v7  ;;  %v2066_v16 = vmul.f32 %v6450_v2, %v7914_v43  ;;  %v2617_v21 = vmul.f32 %v2613_v14, %v7321_v12  ;;  %v1759_v26 = vsel %vm1758_vm6, %v6446_v4, %v1755_v54 }
 0xd55   :  { %v2082_v24 = vsub.f32 1.0, %v2081_v37  ;;  %v1764_v10 = vsel %vm1761_vm7, %v1763_v9, %v1759_v26  ;;  %v2064_v29 = vmul.f32 %v7869_v55, %v2063_v15  ;;  %v1774_v55 = vsel %vm7938_vm8, %v7899_v17, %v1770_v62 }
 0xd56   :  { %v2067_v3 = vsub.f32 1.0, %v2066_v16  ;;  %v7931_v19 = vsub.f32 %v7884_v6, %v2617_v21  ;;  %v1765_v1 = vmul.f32 %v7867_v28, %v1764_v10  ;;  %v2074_v28 = vand.u32 2147483647, %v7914_v43 }
 0xd57   :  { %5955 = vmatmul.msk.f32.vlgmr.msrb.gmra.mxu2 %vm626_vm13, %v2064_v29  ;;  %v2083_v6 = vmul.f32 %v6448_v63, %v2082_v24  ;;  %vm2071_vm14 = vweird.f32 %v6450_v2  ;;  %v1779_v17 = vsel %vm1776_vm10, %v1778_v47, %v1774_v55  ;;  %vm2085_vm4 = vweird.f32 %v7912_v32 }
 0xd58   :  { %v2068_v5 = vmul.f32 %v6450_v2, %v2067_v3  ;;  %5946 = vmatmul.msk.f32.gmra.mxu0 %vm626_vm13, %v1765_v1  ;;  %v2621_v0 = vmul.f32 %v7931_v19, %v7931_v19  ;;  %vm2072_vm11 = vmor %vm2070_vm9, %vm2071_vm14  ;;  %vm2075_vm15 = vcmp.eq.f32.partialorder %v2074_v28, 8.507059e+37  ;;  %v1780_v50 = vmul.f32 %v7818_v25, %v1779_v17  ;;  %v2667_v28 = vld [vmem:[%s9086_s3 + $0x10] sm:$0xff] }
 0xd59   :  { %v2084_v40 = vadd.f32 %v6448_v63, %v2083_v6  ;;  %vm2087_vm5 = vmor %vm2085_vm4, %vm2086_vm2  ;;  %vm2090_vm6 = vcmp.eq.f32.partialorder %v2089_v11, 8.507059e+37  ;;  %2692 = vmatpush.msra.mxu0 %v2667_v28 }
 0xd5a   :  { %v2623_v13 = vsel %vm363_vm0, %v2621_v0, 0.0  ;;  %v2069_v58 = vadd.f32 %v6450_v2, %v2068_v5  ;;  %v2666_v0 = vld [vmem:[%s9086_s3 + $0x8] sm:$0xff] }
 0xd5b   :  { %2624 = vadd.xlane.f32.xlu2 %v2623_v13  ;;  %v2088_v27 = vsel %vm2087_vm5, %v6448_v63, %v2084_v40  ;;  %2693 = vmatpush.msra.mxu0 %v2666_v0 }
 0xd5c   :  { %v2073_v4 = vsel %vm2072_vm11, %v6450_v2, %v2069_v58  ;;  %v2093_v49 = vsel %vm2090_vm6, %v2092_v45, %v2088_v27  ;;  %v2665_v58 = vld [vmem:[%s9086_s3] sm:$0xff] }
 0xd5d   :  { %v2078_v48 = vsel %vm2075_vm15, %v2077_v42, %v2073_v4  ;;  %v2094_v31 = vmul.f32 %v7877_v56, %v2093_v49  ;;  %v5927_v42 = vld [vmem:[%s9079_s28 + $0x38] sm:$0xff]  ;;  %2694 = vmatpush.msra.mxu0 %v2665_v58  ;;  %v5985_v58 = vld [vmem:[%s9081_s5 + $0x68] sm:$0xff] }
 0xd5e   :  { %v2079_v43 = vmul.f32 %v7875_v18, %v2078_v48  ;;  %2323 = vmatpush.msra.mxu1 %v5927_v42  ;;  %v5984_v42 = vld [vmem:[%s9081_s5 + $0x60] sm:$0xff] }
 0xd60   :  { %5947 = vmatmul.msk.f32.gmra.mxu0 %vm626_vm13, %v1780_v50  ;;  %5956 = vmatmul.msk.f32.gmra.mxu2 %vm626_vm13, %v2079_v43 }
 0xd68   :  { %5957 = vmatmul.msk.f32.gmra.mxu2 %vm626_vm13, %v2094_v31 }
 0xdab   :  { %v2203_v53 = vpop.xlane.xlu2 %2202 }
 0xdac   :  { %6451 = vrcp.f32 %v2203_v53  ;;  %v2221_v20 = vand.u32 2147483648, %v2203_v53  ;;  %v2219_v59 = vand.u32 2147483647, %v2203_v53  ;;  %vm2215_vm8 = vweird.f32 %v2203_v53 }
 0xdae   :  { %v2222_v63 = vor.u32 1.1754944e-38, %v2221_v20  ;;  %vm2220_vm9 = vcmp.eq.f32.partialorder %v2219_v59, 8.507059e+37  ;;  %v5926_v20 = vld [vmem:[%s9079_s28 + $0x30] sm:$0xff]  ;;  %v5924_v59 = vld [vmem:[%s9079_s28 + $0x20] sm:$0xff] }
 0xdaf   :  { %2324 = vmatpush.msra.mxu1 %v5926_v20  ;;  %v6301_v20 = vld [vmem:[%s9088_s4 + $0x1] ss:$0 sm:$0xff] }
 0xdb2   :  { %v6452_v25 = vpop.eup %6451 }
 0xdb3   :  { %v2211_v51 = vmul.f32 %v6452_v25, %v2203_v53  ;;  %v2206_v18 = vpop.xlane.xlu1 %2205  ;;  %vm2216_vm7 = vweird.f32 %v6452_v25 }
 0xdb4   :  { %6453 = vrcp.f32 %v2206_v18  ;;  %vm2217_vm14 = vmor %vm2215_vm8, %vm2216_vm7  ;;  %v2236_v14 = vand.u32 2147483648, %v2206_v18  ;;  %v2234_v26 = vand.u32 2147483647, %v2206_v18  ;;  %vm2230_vm11 = vweird.f32 %v2206_v18 }
 0xdb5   :  { %v2212_v32 = vsub.f32 1.0, %v2211_v51 }
 0xdb6   :  { %v2237_v10 = vor.u32 1.1754944e-38, %v2236_v14  ;;  %vm2235_vm2 = vcmp.eq.f32.partialorder %v2234_v26, 8.507059e+37 }
 0xdb7   :  { %v2213_v57 = vmul.f32 %v6452_v25, %v2212_v32  ;;  %v1932_v32 = vpop.f32.mrf.mxu0 }
 0xdb9   :  { %v2214_v44 = vadd.f32 %v6452_v25, %v2213_v57  ;;  %v5925_v57 = vld [vmem:[%s9079_s28 + $0x28] sm:$0xff] }
 0xdba   :  { %v6454_v62 = vpop.eup %6453  ;;  %2325 = vmatpush.msra.mxu1 %v5925_v57  ;;  %v6299_v57 = vld [vmem:[%s9088_s4] ss:$0 sm:$0xff] }
 0xdbb   :  { %v2218_v46 = vsel %vm2217_vm14, %v6452_v25, %v2214_v44  ;;  %v2226_v56 = vmul.f32 %v6454_v62, %v2206_v18  ;;  %v2616_v54 = vpop.xlane.xlu1 %2615  ;;  %v2209_v7 = vpop.xlane.xlu2 %2208  ;;  %vm2231_vm10 = vweird.f32 %v6454_v62  ;;  %v6298_v25 = vld [vmem:[%s9087_s8 + $0x1] ss:$0 sm:$0xff] }
 0xdbc   :  { %v2223_v2 = vsel %vm2220_vm9, %v2222_v63, %v2218_v46  ;;  %v2618_v9 = vmul.f32 %v2616_v54, %v7321_v12  ;;  %6455 = vrcp.f32 %v2209_v7  ;;  %vm2232_vm15 = vmor %vm2230_vm11, %vm2231_vm10  ;;  %v2251_v55 = vand.u32 2147483648, %v2209_v7  ;;  %2326 = vmatpush.msra.mxu1 %v5924_v59  ;;  %v5997_v63 = vld [vmem:[%s9086_s3 + $0x38] sm:$0xff]  ;;  %v5995_v46 = vld [vmem:[%s9086_s3 + $0x28] sm:$0xff] }
 0xdbd   :  { %v2227_v37 = vsub.f32 1.0, %v2226_v56  ;;  %v2224_v16 = vmul.f32 %v7888_v8, %v2223_v2  ;;  %v2249_v5 = vand.u32 2147483647, %v2209_v7  ;;  %vm2245_vm5 = vweird.f32 %v2209_v7  ;;  %v5994_v56 = vld [vmem:[%s9086_s3 + $0x20] sm:$0xff] }
 0xdbe   :  { %v7965_v15 = vsub.f32 %v7902_v30, %v2618_v9  ;;  %v2252_v13 = vor.u32 1.1754944e-38, %v2251_v55  ;;  %2724 = vmatpush.msrb.mxu1 %v5997_v63  ;;  %v8051_v63 = vld [vmem:[%s9077_s13 + $0x1] ss:$0 sm:$0xff] }
 0xdbf   :  { %v2228_v21 = vmul.f32 %v6454_v62, %v2227_v37  ;;  %5965 = vmatmul.msk.f32.vlgmr.msrb.gmra.mxu0 %vm626_vm13, %v2224_v16  ;;  %vm2250_vm7 = vcmp.eq.f32.partialorder %v2249_v5, 8.507059e+37 }
 0xdc0   :  { %v2622_v22 = vmul.f32 %v7965_v15, %v7965_v15 }
 0xdc1   :  { %v2229_v24 = vadd.f32 %v6454_v62, %v2228_v21 }
 0xdc2   :  { %v2626_v29 = vsel %vm363_vm0, %v2622_v22, 0.0  ;;  %v6456_v30 = vpop.eup %6455 }
 0xdc3   :  { %2627 = vadd.xlane.f32.xlu0 %v2626_v29  ;;  %v2233_v8 = vsel %vm2232_vm15, %v6454_v62, %v2229_v24  ;;  %v2241_v3 = vmul.f32 %v6456_v30, %v2209_v7  ;;  %vm2246_vm4 = vweird.f32 %v6456_v30 }
 0xdc4   :  { %v2238_v1 = vsel %vm2235_vm2, %v2237_v10, %v2233_v8  ;;  %vm2247_vm6 = vmor %vm2245_vm5, %vm2246_vm4  ;;  %vm2814_vm2 = vcmask 130048  }
 0xdc5   :  { %v2239_v38 = vmul.f32 %v7895_v61, %v2238_v1  ;;  %v2242_v33 = vsub.f32 1.0, %v2241_v3 }
 0xdc7   :  { %v2243_v6 = vmul.f32 %v6456_v30, %v2242_v33  ;;  %5966 = vmatmul.msk.f32.gmra.mxu0 %vm626_vm13, %v2239_v38 }
 0xdc9   :  { %v2244_v47 = vadd.f32 %v6456_v30, %v2243_v6 }
 0xdcb   :  { %v2248_v61 = vsel %vm2247_vm6, %v6456_v30, %v2244_v47 }
 0xdcc   :  { %v2253_v17 = vsel %vm2250_vm7, %v2252_v13, %v2248_v61  ;;  %v1970_v44 = vpop.f32.mrf.mxu0 }
 0xdcd   :  { %v2254_v40 = vmul.f32 %v7908_v41, %v2253_v17  ;;  %v6297_v41 = vld [vmem:[%s9087_s8] ss:$0 sm:$0xff]  ;;  %v1971_v14 = vadd.f32 %v1970_v44, %v1932_v32  ;;  %v5983_v17 = vld [vmem:[%s9081_s5 + $0x58] sm:$0xff] }
 0xdce   :  { %v2625_v4 = vpop.xlane.xlu2 %2624 }
 0xdcf   :  { %v2629_v60 = vmul.f32 %v2625_v4, %v7321_v12  ;;  %5967 = vmatmul.msk.f32.gmra.mxu0 %vm626_vm13, %v2254_v40  ;;  %v5982_v4 = vld [vmem:[%s9081_s5 + $0x50] sm:$0xff]  ;;  %v6300_v40 = vld [vmem:[#allocation2 + $0x1] ss:$0 sm:$0xff] }
 0xdd1   :  { %v2631_v48 = vadd.f32 1e-05, %v2629_v60  ;;  %v5981_v60 = vld [vmem:[%s9081_s5 + $0x48] sm:$0xff] }
 0xdd3   :  { %6457 = vrsqrt.f32 %v2631_v48  ;;  %vm2639_vm8 = vweird.f32 %v2631_v48 }
 0xdd5   :  { %v1973_v62 = vpop.f32.mrf.mxu0 }
 0xdd6   :  { %v1974_v10 = vadd.f32 %v1973_v62, %v7845_v35 }
 0xdd9   :  { %v6458_v50 = vpop.eup %6457 }
 0xdda   :  { %v2634_v43 = vmul.f32 %v6458_v50, %v2631_v48  ;;  %vm2640_vm14 = vweird.f32 %v6458_v50  ;;  %v2127_v54 = vpop.f32.mrf.mxu2 }
 0xddb   :  { %vm2641_vm9 = vmor %vm2639_vm8, %vm2640_vm14  ;;  %v2136_v16 = vadd.f32 %v2127_v54, %v1971_v14 }
 0xddc   :  { %v2635_v11 = vmul.f32 %v6458_v50, %v2634_v43  ;;  %v5980_v43 = vld [vmem:[%s9081_s5 + $0x40] sm:$0xff] }
 0xddd   :  { %v1976_v2 = vpop.f32.mrf.mxu0 }
 0xdde   :  { %v2636_v27 = vmul.f32 0.5, %v2635_v11  ;;  %v1977_v55 = vadd.f32 %v1976_v2, %v7847_v36  ;;  %v5987_v36 = vld [vmem:[%s9081_s5 + $0x78] sm:$0xff] }
 0xddf   :  { %2496 = vmatpush.msra.mxu3 %v5987_v36  ;;  %v5974_v36 = vld [vmem:[%s9080_s1 + $0x28] sm:$0xff] }
 0xde0   :  { %v2637_v45 = vsub.f32 1.5, %v2636_v27 }
 0xde2   :  { %v2638_v49 = vmul.f32 %v6458_v50, %v2637_v45 }
 0xde3   :  { %v2130_v22 = vpop.f32.mrf.mxu2 }
 0xde4   :  { %v2642_v31 = vsel %vm2641_vm9, %v6458_v50, %v2638_v49  ;;  %v2137_v30 = vadd.f32 %v2130_v22, %v1974_v10 }
 0xde5   :  { %v2653_v53 = vmul.f32 %v2642_v31, %v7931_v19  ;;  %v5996_v19 = vld [vmem:[%s9086_s3 + $0x30] sm:$0xff] }
 0xde6   :  { %2725 = vmatpush.msrb.mxu1 %v5996_v19 }
 0xde7   :  { %v2658_v51 = vmul.f32 %v6297_v41, %v2653_v53 }
 0xde8   :  { %2726 = vmatpush.msrb.mxu1 %v5995_v46 }
 0xde9   :  { %v7985_v18 = vadd.f32 %v6298_v25, %v2658_v51 }
 0xdea   :  { %2727 = vmatpush.msrb.mxu1 %v5994_v56 }
 0xdeb   :  { %5992 = vmatmul.msk.f32.vlgmr.msra.gmra.mxu0 %vm363_vm0, %v7985_v18  ;;  %v2133_v52 = vpop.f32.mrf.mxu2 }
 0xdec   :  { %v2138_v35 = vadd.f32 %v2133_v52, %v1977_v55 }
 0xe36   :  { %v2628_v7 = vpop.xlane.xlu0 %2627 }
 0xe37   :  { %v2630_v9 = vmul.f32 %v2628_v7, %v7321_v12 }
 0xe39   :  { %v2632_v37 = vadd.f32 1e-05, %v2630_v9 }
 0xe3b   :  { %6459 = vrsqrt.f32 %v2632_v37  ;;  %vm2649_vm10 = vweird.f32 %v2632_v37 }
 0xe3c   :  { %v2287_v21 = vpop.f32.mrf.mxu0 }
 0xe3d   :  { %v2296_v26 = vadd.f32 %v2287_v21, %v2136_v16 }
 0xe3f   :  { %5968 = vmatmul.msk.f32.vlgmr.msra.gmra.mxu1 %vm363_vm0, %v2296_v26 }
 0xe41   :  { %v6460_v24 = vpop.eup %6459 }
 0xe42   :  { %v2644_v29 = vmul.f32 %v6460_v24, %v2632_v37  ;;  %vm2650_vm11 = vweird.f32 %v6460_v24 }
 0xe43   :  { %vm2651_vm15 = vmor %vm2649_vm10, %vm2650_vm11 }
 0xe44   :  { %v2645_v8 = vmul.f32 %v6460_v24, %v2644_v29  ;;  %v2290_v3 = vpop.f32.mrf.mxu0 }
 0xe45   :  { %v2297_v38 = vadd.f32 %v2290_v3, %v2137_v30 }
 0xe46   :  { %v2646_v1 = vmul.f32 0.5, %v2645_v8 }
 0xe47   :  { %5969 = vmatmul.msk.f32.gmra.mxu1 %vm363_vm0, %v2297_v38  ;;  %v8083_v38 = vld [vmem:[%s9089_s21] sm:$0xff] }
 0xe48   :  { %v2647_v33 = vsub.f32 1.5, %v2646_v1 }
 0xe4a   :  { %v2648_v28 = vmul.f32 %v6460_v24, %v2647_v33 }
 0xe4c   :  { %v2652_v6 = vsel %vm2651_vm15, %v6460_v24, %v2648_v28  ;;  %v2293_v5 = vpop.f32.mrf.mxu0 }
 0xe4d   :  { %v2654_v0 = vmul.f32 %v2652_v6, %v7965_v15  ;;  %v2298_v47 = vadd.f32 %v2293_v5, %v2138_v35  ;;  %v5986_v15 = vld [vmem:[%s9081_s5 + $0x70] sm:$0xff]  ;;  %v8091_v35 = vld [vmem:[%s9089_s21 + $0x8] sm:$0xff] }
 0xe4e   :  { %2497 = vmatpush.msra.mxu3 %v5986_v15  ;;  %v5973_v15 = vld [vmem:[%s9080_s1 + $0x20] sm:$0xff] }
 0xe4f   :  { %v2659_v13 = vmul.f32 %v6297_v41, %v2654_v0  ;;  %5970 = vmatmul.msk.f32.gmra.mxu1 %vm363_vm0, %v2298_v47  ;;  %v5976_v47 = vld [vmem:[%s9080_s1 + $0x38] sm:$0xff] }
 0xe50   :  { %2498 = vmatpush.msra.mxu3 %v5985_v58  ;;  %2453 = vmatpush.msra.mxu2 %v5976_v47 }
 0xe51   :  { %v8003_v61 = vadd.f32 %v6298_v25, %v2659_v13  ;;  %v5975_v13 = vld [vmem:[%s9080_s1 + $0x30] sm:$0xff] }
 0xe52   :  { %2499 = vmatpush.msra.mxu3 %v5984_v42  ;;  %2454 = vmatpush.msra.mxu2 %v5975_v13 }
 0xe53   :  { %5993 = vmatmul.msk.f32.gmra.mxu0 %vm363_vm0, %v8003_v61 }
 0xe54   :  { %2500 = vmatpush.msra.mxu3 %v5983_v17  ;;  %2455 = vmatpush.msra.mxu2 %v5974_v36 }
 0xe56   :  { %2501 = vmatpush.msra.mxu3 %v5982_v4  ;;  %2456 = vmatpush.msra.mxu2 %v5973_v15  ;;  %v6004_v4 = vld [vmem:[%s9086_s3 + $0x58] sm:$0xff] }
 0xe57   :  { %5999 = vmatmul.msk.f32.vlgmr.msrb.gmra.mxu1 %vm363_vm0, %v7985_v18 }
 0xe58   :  { %2502 = vmatpush.msra.mxu3 %v5981_v60  ;;  %2757 = vmatpush.msrb.mxu2 %v6004_v4 }
 0xe5a   :  { %2503 = vmatpush.msra.mxu3 %v5980_v43 }
 0xe5f   :  { %6000 = vmatmul.msk.f32.gmra.mxu1 %vm363_vm0, %v8003_v61 }
 0xebc   :  { %v2328_v48 = vpop.f32.mrf.mxu1 }
 0xebd   :  { %v2329_v50 = vadd.f32 %v6300_v40, %v2328_v48 }
 0xebf   :  { %v8020_v11 = vadd.f32 %v2329_v50, %v7639_v23 }
 0xec1   :  { %v2344_v27 = vsel %vm363_vm0, %v8020_v11, 0.0 }
 0xec2   :  { %2345 = vadd.xlane.f32.xlu1 %v2344_v27 }
 0xec4   :  { %v2331_v45 = vpop.f32.mrf.mxu1 }
 0xec5   :  { %v2332_v49 = vadd.f32 %v6300_v40, %v2331_v45 }
 0xec7   :  { %v8025_v41 = vadd.f32 %v2332_v49, %v7644_v34  ;;  %v2696_v34 = vpop.f32.mrf.mxu0 }
 0xec8   :  { %v8042_v62 = vadd.f32 %v6299_v57, %v2696_v34 }
 0xec9   :  { %v2347_v31 = vsel %vm363_vm0, %v8025_v41, 0.0 }
 0xeca   :  { %2348 = vadd.xlane.f32.xlu2 %v2347_v31  ;;  %v2865_v19 = vmul.f32 %v8051_v63, %v8042_v62 }
 0xecc   :  { %v2334_v53 = vpop.f32.mrf.mxu1 }
 0xecd   :  { %v2335_v25 = vadd.f32 %v6300_v40, %v2334_v53  ;;  %v6003_v53 = vld [vmem:[%s9086_s3 + $0x50] sm:$0xff] }
 0xece   :  { %2758 = vmatpush.msrb.mxu2 %v6003_v53 }
 0xecf   :  { %v8030_v51 = vadd.f32 %v2335_v25, %v7649_v39  ;;  %v6002_v25 = vld [vmem:[%s9086_s3 + $0x48] sm:$0xff] }
 0xed0   :  { %v2699_v46 = vpop.f32.mrf.mxu0  ;;  %2759 = vmatpush.msrb.mxu2 %v6002_v25 }
 0xed1   :  { %v2350_v23 = vsel %vm370_vm1, %v8030_v51, 0.0  ;;  %v8056_v56 = vadd.f32 %v6299_v57, %v2699_v46  ;;  %v6001_v57 = vld [vmem:[%s9086_s3 + $0x40] sm:$0xff] }
 0xed2   :  { %2351 = vadd.xlane.f32.xlu0 %v2350_v23  ;;  %2760 = vmatpush.msrb.mxu2 %v6001_v57 }
 0xed3   :  { %v2866_v54 = vmul.f32 %v8051_v63, %v8056_v56 }
 0xed4   :  { %v2729_v32 = vpop.f32.mrf.mxu1 }
 0xed5   :  { %v8044_v39 = vadd.f32 %v6301_v20, %v2729_v32 }
 0xedc   :  { %v2732_v59 = vpop.f32.mrf.mxu1 }
 0xedd   :  { %v8036_v44 = vadd.f32 %v6301_v20, %v2732_v59 }
 0xedf   :  { %6008 = vmatpush.xpose.msk.msrb.mxu3 %vm363_vm0, %v8036_v44  ;;  %6012 = vmatpush.xpose.msk.msrb.mxu0 %vm363_vm0, %v8036_v44 }
 0xee3   :  { %6009 = vmatpush.xpose.msk.msrb.mxu3 %vm363_vm0, %v8044_v39  ;;  %6013 = vmatpush.xpose.msk.msrb.mxu0 %vm363_vm0, %v8044_v39 }
 0xee6   :  { %6014 = vmatmul.msk.f32.vlgmr.msrb.gmra.mxu0 %vm363_vm0, %v2865_v19  ;;  %v6302_v19 = vld [vmem:[%s9082_s26 + $0x2] ss:$0 sm:$0xff] }
 0xeee   :  { %6015 = vmatmul.msk.f32.gmra.mxu0 %vm363_vm0, %v2866_v54 }
 0xf35   :  { %v2346_v2 = vpop.xlane.xlu1 %2345 }
 0xf36   :  { %v2353_v7 = vmul.f32 %v2346_v2, %v7321_v12 }
 0xf38   :  { %v8063_v9 = vsub.f32 %v8020_v11, %v2353_v7  ;;  %v6303_v7 = vld [vmem:[%s9082_s26 + $0x3] ss:$0 sm:$0xff] }
 0xf3a   :  { %v2359_v37 = vmul.f32 %v8063_v9, %v8063_v9 }
 0xf3c   :  { %v2362_v14 = vsel %vm363_vm0, %v2359_v37, 0.0 }
 0xf3d   :  { %v2349_v16 = vpop.xlane.xlu2 %2348  ;;  %2363 = vadd.xlane.f32.xlu1 %v2362_v14 }
 0xf3e   :  { %v2354_v21 = vmul.f32 %v2349_v16, %v7321_v12 }
 0xf40   :  { %v8070_v26 = vsub.f32 %v8025_v41, %v2354_v21 }
 0xf42   :  { %v2360_v22 = vmul.f32 %v8070_v26, %v8070_v26 }
 0xf44   :  { %v2365_v24 = vsel %vm363_vm0, %v2360_v22, 0.0 }
 0xf45   :  { %2366 = vadd.xlane.f32.xlu2 %v2365_v24  ;;  %v2352_v10 = vpop.xlane.xlu0 %2351 }
 0xf46   :  { %v2355_v29 = vmul.f32 %v2352_v10, %v7321_v12 }
 0xf48   :  { %v8077_v30 = vsub.f32 %v8030_v51, %v2355_v29 }
 0xf4a   :  { %v2361_v8 = vmul.f32 %v8077_v30, %v8077_v30 }
 0xf4c   :  { %v2368_v3 = vsel %vm370_vm1, %v2361_v8, 0.0 }
 0xf4d   :  { %2369 = vadd.xlane.f32.xlu0 %v2368_v3 }
 0xf63   :  { %v2890_v1 = vpop.f32.mrf.mxu0 }
 0xf64   :  { %v2896_v33 = vmul.f32 0.35355338, %v2890_v1 }
 0xf66   :  { %v8086_v52 = vadd.f32 %v2896_v33, %v8083_v38 }
 0xf68   :  { %v2900_v55 = vsel %vm2814_vm2, %v8086_v52, -inf }
 0xf69   :  { %2901 = vmax.xlane.f32.xlu1 %v2900_v55 }
 0xf6b   :  { %v2893_v28 = vpop.f32.mrf.mxu0 }
 0xf6c   :  { %v2897_v6 = vmul.f32 0.35355338, %v2893_v28 }
 0xf6e   :  { %v8094_v5 = vadd.f32 %v2897_v6, %v8091_v35 }
 0xf70   :  { %v2903_v0 = vsel %vm2814_vm2, %v8094_v5, -inf }
 0xf71   :  { %2904 = vmax.xlane.f32.xlu2 %v2903_v0 }
 0xfb0   :  { %v2364_v58 = vpop.xlane.xlu1 %2363 }
 0xfb1   :  { %v2371_v42 = vmul.f32 %v2364_v58, %v7321_v12 }
 0xfb3   :  { %v2374_v17 = vadd.f32 1e-05, %v2371_v42 }
 0xfb5   :  { %6461 = vrsqrt.f32 %v2374_v17  ;;  %vm2383_vm5 = vweird.f32 %v2374_v17 }
 0xfb8   :  { %v2367_v40 = vpop.xlane.xlu2 %2366 }
 0xfb9   :  { %v2372_v60 = vmul.f32 %v2367_v40, %v7321_v12 }
 0xfbb   :  { %v6462_v48 = vpop.eup %6461  ;;  %v2375_v50 = vadd.f32 1e-05, %v2372_v60 }
 0xfbc   :  { %v2378_v43 = vmul.f32 %v6462_v48, %v2374_v17  ;;  %vm2384_vm4 = vweird.f32 %v6462_v48 }
 0xfbd   :  { %6463 = vrsqrt.f32 %v2375_v50  ;;  %vm2385_vm6 = vmor %vm2383_vm5, %vm2384_vm4  ;;  %vm2393_vm8 = vweird.f32 %v2375_v50 }
 0xfbe   :  { %v2379_v27 = vmul.f32 %v6462_v48, %v2378_v43 }
 0xfc0   :  { %v2380_v45 = vmul.f32 0.5, %v2379_v27  ;;  %v2370_v49 = vpop.xlane.xlu0 %2369 }
 0xfc1   :  { %v2373_v31 = vmul.f32 %v2370_v49, %v7321_v12 }
 0xfc2   :  { %v2381_v23 = vsub.f32 1.5, %v2380_v45 }
 0xfc3   :  { %v6464_v32 = vpop.eup %6463  ;;  %v2376_v20 = vadd.f32 1e-05, %v2373_v31 }
 0xfc4   :  { %v2382_v59 = vmul.f32 %v6462_v48, %v2381_v23  ;;  %v2388_v34 = vmul.f32 %v6464_v32, %v2375_v50  ;;  %vm2394_vm7 = vweird.f32 %v6464_v32 }
 0xfc5   :  { %6465 = vrsqrt.f32 %v2376_v20  ;;  %vm2395_vm14 = vmor %vm2393_vm8, %vm2394_vm7  ;;  %vm2403_vm10 = vweird.f32 %v2376_v20 }
 0xfc6   :  { %v2386_v46 = vsel %vm2385_vm6, %v6462_v48, %v2382_v59  ;;  %v2389_v54 = vmul.f32 %v6464_v32, %v2388_v34  ;;  %v8139_v34 = vld [vmem:[%s9077_s13] ss:$0 sm:$0xff] }
 0xfc7   :  { %v2407_v2 = vmul.f32 %v2386_v46, %v8063_v9 }
 0xfc8   :  { %v2390_v37 = vmul.f32 0.5, %v2389_v54 }
 0xfc9   :  { %v2413_v14 = vmul.f32 %v6302_v19, %v2407_v2  ;;  %v6305_v2 = vld [vmem:[%s9088_s4 + $0x2] ss:$0 sm:$0xff] }
 0xfca   :  { %v2391_v16 = vsub.f32 1.5, %v2390_v37 }
 0xfcb   :  { %v6466_v21 = vpop.eup %6465  ;;  %v2419_v22 = vadd.f32 %v6303_v7, %v2413_v14 }
 0xfcc   :  { %v2392_v24 = vmul.f32 %v6464_v32, %v2391_v16  ;;  %v2398_v10 = vmul.f32 %v6466_v21, %v2376_v20  ;;  %vm2404_vm9 = vweird.f32 %v6466_v21 }
 0xfcd   :  { %5977 = vmatmul.msk.f32.vlgmr.msra.gmra.mxu2 %vm363_vm0, %v2419_v22  ;;  %vm2405_vm11 = vmor %vm2403_vm10, %vm2404_vm9 }
 0xfce   :  { %v2396_v29 = vsel %vm2395_vm14, %v6464_v32, %v2392_v24  ;;  %v2399_v8 = vmul.f32 %v6466_v21, %v2398_v10 }
 0xfcf   :  { %v2408_v3 = vmul.f32 %v2396_v29, %v8070_v26 }
 0xfd0   :  { %v2400_v1 = vmul.f32 0.5, %v2399_v8  ;;  %v2774_v8 = vmul.f32 %v8139_v34, %v8056_v56 }
 0xfd1   :  { %v2414_v33 = vmul.f32 %v6302_v19, %v2408_v3 }
 0xfd2   :  { %v2401_v9 = vsub.f32 1.5, %v2400_v1 }
 0xfd3   :  { %v2420_v55 = vadd.f32 %v6303_v7, %v2414_v33  ;;  %v8150_v33 = vld [vmem:[%s9077_s13 + $0x2] ss:$0 sm:$0xff] }
 0xfd4   :  { %v2402_v28 = vmul.f32 %v6466_v21, %v2401_v9 }
 0xfd5   :  { %5978 = vmatmul.msk.f32.gmra.mxu2 %vm363_vm0, %v2420_v55 }
 0xfd6   :  { %v2406_v6 = vsel %vm2405_vm11, %v6466_v21, %v2402_v28 }
 0xfd7   :  { %v2409_v0 = vmul.f32 %v2406_v6, %v8077_v30 }
 0xfd9   :  { %v2415_v47 = vmul.f32 %v6302_v19, %v2409_v0  ;;  %v2773_v19 = vmul.f32 %v8139_v34, %v8042_v62 }
 0xfdb   :  { %v2421_v13 = vadd.f32 %v6303_v7, %v2415_v47 }
 0xfdc   :  { %v2902_v36 = vpop.xlane.xlu1 %2901 }
 0xfdd   :  { %v2906_v15 = vsub.f32 %v8086_v52, %v2902_v36  ;;  %5979 = vmatmul.msk.f32.gmra.mxu2 %vm363_vm0, %v2421_v13 }
 0xfdf   :  { %v2908_v26 = vmul.f32 1.442695, %v2906_v15 }
 0xfe1   :  { %6467 = vpow2.f32 %v2908_v26  ;;  %v8159_v26 = vld [vmem:[%s9077_s13 + $0x3] ss:$0 sm:$0xff] }
 0xfe4   :  { %v2905_v58 = vpop.xlane.xlu2 %2904 }
 0xfe5   :  { %v2907_v42 = vsub.f32 %v8094_v5, %v2905_v58  ;;  %6006 = vmatmul.msk.f32.vlgmr.msrb.gmra.mxu2 %vm363_vm0, %v7985_v18  ;;  %v6304_v5 = vld [vmem:[#allocation4 + $0x1] ss:$0 sm:$0xff] }
 0xfe7   :  { %v8121_v17 = vpop.eup %6467  ;;  %v2910_v4 = vmul.f32 1.442695, %v2907_v42 }
 0xfe8   :  { %v2912_v30 = vsel %vm2814_vm2, %v8121_v17, 0.0 }
 0xfe9   :  { %6469 = vpow2.f32 %v2910_v4  ;;  %2913 = vadd.xlane.f32.xlu0 %v2912_v30 }
 0xfed   :  { %6007 = vmatmul.msk.f32.gmra.mxu2 %vm363_vm0, %v8003_v61 }
 0xfef   :  { %v8127_v52 = vpop.eup %6469 }
 0xff0   :  { %v2915_v40 = vsel %vm2814_vm2, %v8127_v52, 0.0 }
 0xff1   :  { %2916 = vadd.xlane.f32.xlu1 %v2915_v40 }
0x1050   :  { %v2458_v60 = vpop.f32.mrf.mxu2 }
0x1051   :  { %v2459_v18 = vadd.f32 %v6304_v5, %v2458_v60  ;;  %v3125_v60 = vmul.f32 %v8159_v26, %v8056_v56 }
0x1053   :  { %v2467_v48 = vmax.f32 %v2459_v18, 0.0 }
0x1055   :  { %5988 = vmatmul.msk.f32.vlgmr.msra.gmra.mxu3 %vm1404_vm3, %v2467_v48 }
0x1056   :  { %6020 = vmatpush.xpose.msk.msra.mxu3 %vm363_vm0, %v8036_v44 }
0x1058   :  { %v2461_v50 = vpop.f32.mrf.mxu2 }
0x1059   :  { %v2462_v43 = vadd.f32 %v6304_v5, %v2461_v50 }
0x105a   :  { %6021 = vmatpush.xpose.msk.msra.mxu3 %vm363_vm0, %v8044_v39 }
0x105b   :  { %v2468_v61 = vmax.f32 %v2462_v43, 0.0 }
0x105c   :  { %v2914_v27 = vpop.xlane.xlu0 %2913 }
0x105d   :  { %6471 = vrcp.f32 %v2914_v27  ;;  %5989 = vmatmul.msk.f32.gmra.mxu3 %vm1404_vm3, %v2468_v61  ;;  %v2929_v7 = vand.u32 2147483648, %v2914_v27  ;;  %vm2923_vm4 = vweird.f32 %v2914_v27  ;;  %v2927_v14 = vand.u32 2147483647, %v2914_v27 }
0x105f   :  { %v2930_v29 = vor.u32 1.1754944e-38, %v2929_v7  ;;  %vm2928_vm6 = vcmp.eq.f32.partialorder %v2927_v14, 8.507059e+37 }
0x1060   :  { %v2464_v45 = vpop.f32.mrf.mxu2 }
0x1061   :  { %v2465_v49 = vadd.f32 %v6304_v5, %v2464_v45  ;;  %v3009_v5 = vmul.f32 %v8150_v33, %v8056_v56 }
0x1063   :  { %v6472_v31 = vpop.eup %6471  ;;  %v2469_v53 = vmax.f32 %v2465_v49, 0.0 }
0x1064   :  { %v2919_v25 = vmul.f32 %v6472_v31, %v2914_v27  ;;  %v2917_v23 = vpop.xlane.xlu1 %2916  ;;  %vm2924_vm15 = vweird.f32 %v6472_v31 }
0x1065   :  { %6473 = vrcp.f32 %v2917_v23  ;;  %5990 = vmatmul.msk.f32.gmra.mxu3 %vm1404_vm3, %v2469_v53  ;;  %vm2925_vm5 = vmor %vm2923_vm4, %vm2924_vm15  ;;  %v2944_v0 = vand.u32 2147483648, %v2917_v23  ;;  %vm2938_vm8 = vweird.f32 %v2917_v23  ;;  %v2942_v36 = vand.u32 2147483647, %v2917_v23 }
0x1066   :  { %v2920_v32 = vsub.f32 1.0, %v2919_v25 }
0x1067   :  { %v2945_v4 = vor.u32 1.1754944e-38, %v2944_v0  ;;  %vm2943_vm9 = vcmp.eq.f32.partialorder %v2942_v36, 8.507059e+37 }
0x1068   :  { %v2762_v20 = vpop.f32.mrf.mxu2  ;;  %v2921_v57 = vmul.f32 %v6472_v31, %v2920_v32 }
0x1069   :  { %v2763_v24 = vadd.f32 %v6305_v2, %v2762_v20 }
0x106a   :  { %v2922_v54 = vadd.f32 %v6472_v31, %v2921_v57 }
0x106b   :  { %v6474_v59 = vpop.eup %6473  ;;  %v2948_v6 = vmul.f32 %v8051_v63, %v2763_v24  ;;  %v2863_v47 = vmul.f32 %v8139_v34, %v2763_v24  ;;  %v3091_v13 = vmul.f32 %v8150_v33, %v2763_v24 }
0x106c   :  { %v2934_v46 = vmul.f32 %v6474_v59, %v2917_v23  ;;  %v2926_v21 = vsel %vm2925_vm5, %v6472_v31, %v2922_v54  ;;  %vm2939_vm7 = vweird.f32 %v6474_v59 }
0x106d   :  { %6010 = vmatmul.msk.f32.vlgmr.msrb.gmra.mxu3 %vm363_vm0, %v2773_v19  ;;  %v2931_v55 = vsel %vm2928_vm6, %v2930_v29, %v2926_v21  ;;  %vm2940_vm14 = vmor %vm2938_vm8, %vm2939_vm7 }
0x106e   :  { %v2935_v37 = vsub.f32 1.0, %v2934_v46  ;;  %v2932_v15 = vmul.f32 %v8121_v17, %v2931_v55  ;;  %v3008_v17 = vmul.f32 %v8150_v33, %v8042_v62 }
0x1070   :  { %v2765_v16 = vpop.f32.mrf.mxu2  ;;  %v2936_v22 = vmul.f32 %v6474_v59, %v2935_v37 }
0x1071   :  { %v2766_v10 = vadd.f32 %v6305_v2, %v2765_v16 }
0x1072   :  { %v2937_v28 = vadd.f32 %v6474_v59, %v2936_v22 }
0x1073   :  { %v2949_v3 = vmul.f32 %v8051_v63, %v2766_v10  ;;  %v2864_v1 = vmul.f32 %v8139_v34, %v2766_v10  ;;  %v3092_v9 = vmul.f32 %v8150_v33, %v2766_v10  ;;  %v3208_v58 = vmul.f32 %v8159_v26, %v2766_v10 }
0x1074   :  { %v3207_v63 = vmul.f32 %v8159_v26, %v2763_v24  ;;  %v2941_v42 = vsel %vm2940_vm14, %v6474_v59, %v2937_v28 }
0x1075   :  { %6011 = vmatmul.msk.f32.gmra.mxu3 %vm363_vm0, %v2774_v8  ;;  %2970 = vmatpush.msra.mxu1 %v2949_v3  ;;  %v2946_v30 = vsel %vm2943_vm9, %v2945_v4, %v2941_v42 }
0x1076   :  { %2999 = vmatpush.msra.mxu2 %v2864_v1  ;;  %3113 = vmatpush.msra.mxu0 %v3092_v9  ;;  %v2947_v40 = vmul.f32 %v8127_v52, %v2946_v30 }
0x1077   :  { %2971 = vmatpush.msra.mxu1 %v2948_v6 }
0x1078   :  { %3000 = vmatpush.msra.mxu2 %v2863_v47  ;;  %3114 = vmatpush.msra.mxu0 %v3091_v13 }
0x1079   :  { %6016 = vmatmul.msk.f32.vlgmr.msra.gmra.mxu1 %vm2814_vm2, %v2932_v15 }
0x107a   :  { %3229 = vmatpush.msrb.mxu2 %v3208_v58  ;;  %6026 = vmatpush.xpose.msk.msrb.mxu1 %vm363_vm0, %v8036_v44  ;;  %v3124_v44 = vmul.f32 %v8159_v26, %v8042_v62 }
0x107c   :  { %3230 = vmatpush.msrb.mxu2 %v3207_v63  ;;  %v6306_v63 = vld [vmem:[#allocation6 + $0x1] ss:$0 sm:$0xff] }
0x107d   :  { %6022 = vmatmul.msk.f32.vlgmr.msra.gmra.mxu3 %vm363_vm0, %v3008_v17 }
0x107e   :  { %6027 = vmatpush.xpose.msk.msrb.mxu1 %vm363_vm0, %v8044_v39 }
0x1081   :  { %6017 = vmatmul.msk.f32.gmra.mxu1 %vm2814_vm2, %v2947_v40 }
0x1085   :  { %6023 = vmatmul.msk.f32.gmra.mxu3 %vm363_vm0, %v3009_v5 }
0x1089   :  { %6028 = vmatmul.msk.f32.vlgmr.msrb.gmra.mxu1 %vm363_vm0, %v3124_v44 }
0x1091   :  { %6029 = vmatmul.msk.f32.gmra.mxu1 %vm363_vm0, %v3125_v60 }
0x10d8   :  { %v2505_v39 = vpop.f32.mrf.mxu3 }
0x10d9   :  { %v2514_v15 = vadd.f32 %v2505_v39, %v8020_v11 }
0x10db   :  { %v8216_v40 = vadd.f32 %v6306_v63, %v2514_v15 }
0x10dd   :  { %v2528_v11 = vsel %vm363_vm0, %v8216_v40, 0.0 }
0x10e0   :  { %v8183_v18 = vpop.f32.mrf.mxu3 }
0x10e8   :  { %v8185_v52 = vpop.f32.mrf.mxu3 }
0x10f0   :  { %v2804_v48 = vpop.f32.mrf.mxu3 }
0x10f1   :  { %v2810_v50 = vmul.f32 0.35355338, %v2804_v48 }
0x10f3   :  { %v2812_v43 = vadd.f32 %v2810_v50, %v8083_v38 }
0x10f5   :  { %v2815_v61 = vsel %vm2814_vm2, %v2812_v43, -inf }
0x10f6   :  { %v8189_v27 = vpop.f32.mrf.mxu1  ;;  %2816 = vmax.xlane.f32.xlu2 %v2815_v61 }
0x10f8   :  { %v2807_v62 = vpop.f32.mrf.mxu3 }
0x10f9   :  { %v2811_v45 = vmul.f32 0.35355338, %v2807_v62  ;;  %v2515_v62 = vadd.f32 %v8183_v18, %v8025_v41 }
0x10fb   :  { %v2813_v56 = vadd.f32 %v2811_v45, %v8091_v35 }
0x10fd   :  { %v2818_v49 = vsel %vm2814_vm2, %v2813_v56, -inf }
0x10fe   :  { %v8193_v31 = vpop.f32.mrf.mxu1  ;;  %2819 = vmax.xlane.f32.xlu0 %v2818_v49  ;;  %v8238_v49 = vadd.f32 %v6306_v63, %v2515_v62 }
0x1100   :  { %v3033_v53 = vpop.f32.mrf.mxu3 }
0x1101   :  { %v3039_v25 = vmul.f32 0.35355338, %v3033_v53 }
0x1103   :  { %v3041_v23 = vadd.f32 %v3039_v25, %v8083_v38 }
0x1105   :  { %v3043_v32 = vsel %vm2814_vm2, %v3041_v23, -inf }
0x1106   :  { %v3149_v20 = vpop.f32.mrf.mxu1  ;;  %3044 = vmax.xlane.f32.xlu2 %v3043_v32 }
0x1107   :  { %v3155_v57 = vmul.f32 0.35355338, %v3149_v20 }
0x1108   :  { %v3036_v59 = vpop.f32.mrf.mxu3 }
0x1109   :  { %v3157_v19 = vadd.f32 %v3155_v57, %v8083_v38  ;;  %v3040_v46 = vmul.f32 0.35355338, %v3036_v59 }
0x110b   :  { %v3159_v54 = vsel %vm2814_vm2, %v3157_v19, -inf  ;;  %v3042_v37 = vadd.f32 %v3040_v46, %v8091_v35 }
0x110c   :  { %3160 = vmax.xlane.f32.xlu1 %v3159_v54 }
0x110d   :  { %v3046_v16 = vsel %vm2814_vm2, %v3042_v37, -inf }
0x110e   :  { %v3152_v2 = vpop.f32.mrf.mxu1 }
0x110f   :  { %v3156_v7 = vmul.f32 0.35355338, %v3152_v2 }
0x1111   :  { %v3158_v14 = vadd.f32 %v3156_v7, %v8091_v35 }
0x1113   :  { %v3162_v21 = vsel %vm2814_vm2, %v3158_v14, -inf }
0x1114   :  { %3047 = vmax.xlane.f32.xlu1 %v3046_v16  ;;  %3163 = vmax.xlane.f32.xlu0 %v3162_v21 }
0x1169   :  { %v2817_v22 = vpop.xlane.xlu2 %2816 }
0x116a   :  { %v2821_v24 = vsub.f32 %v2812_v43, %v2817_v22  ;;  %v2516_v43 = vadd.f32 %v8185_v52, %v8030_v51  ;;  %v2531_v51 = vsel %vm363_vm0, %v8238_v49, 0.0 }
0x116c   :  { %v2823_v10 = vmul.f32 1.442695, %v2821_v24 }
0x116e   :  { %6475 = vpow2.f32 %v2823_v10 }
0x1171   :  { %v2820_v38 = vpop.xlane.xlu0 %2819 }
0x1172   :  { %v2822_v29 = vsub.f32 %v2813_v56, %v2820_v38  ;;  %v8236_v56 = vadd.f32 %v6306_v63, %v2516_v43 }
0x1174   :  { %v8203_v8 = vpop.eup %6475  ;;  %v2825_v3 = vmul.f32 1.442695, %v2822_v29  ;;  %v2534_v53 = vsel %vm370_vm1, %v8236_v56, 0.0 }
0x1175   :  { %v2827_v1 = vsel %vm2814_vm2, %v8203_v8, 0.0 }
0x1176   :  { %6477 = vpow2.f32 %v2825_v3  ;;  %2828 = vadd.xlane.f32.xlu2 %v2827_v1 }
0x1179   :  { %v3045_v35 = vpop.xlane.xlu2 %3044 }
0x117a   :  { %v3049_v9 = vsub.f32 %v3041_v23, %v3045_v35 }
0x117c   :  { %v8207_v55 = vpop.eup %6477  ;;  %v3051_v28 = vmul.f32 1.442695, %v3049_v9 }
0x117d   :  { %v2830_v6 = vsel %vm2814_vm2, %v8207_v55, 0.0 }
0x117e   :  { %6479 = vpow2.f32 %v3051_v28  ;;  %2831 = vadd.xlane.f32.xlu0 %v2830_v6 }
0x117f   :  { %v3161_v0 = vpop.xlane.xlu1 %3160 }
0x1180   :  { %v3165_v47 = vsub.f32 %v3157_v19, %v3161_v0 }
0x1182   :  { %v3167_v13 = vmul.f32 1.442695, %v3165_v47 }
0x1184   :  { %v8211_v36 = vpop.eup %6479  ;;  %6481 = vpow2.f32 %v3167_v13 }
0x1185   :  { %v3055_v58 = vsel %vm2814_vm2, %v8211_v36, 0.0 }
0x1186   :  { %3056 = vadd.xlane.f32.xlu2 %v3055_v58 }
0x1187   :  { %v3048_v42 = vpop.xlane.xlu1 %3047  ;;  %v3164_v4 = vpop.xlane.xlu0 %3163 }
0x1188   :  { %v3050_v17 = vsub.f32 %v3042_v37, %v3048_v42  ;;  %v3166_v30 = vsub.f32 %v3158_v14, %v3164_v4 }
0x118a   :  { %v8218_v5 = vpop.eup %6481  ;;  %v3053_v44 = vmul.f32 1.442695, %v3050_v17  ;;  %v3169_v60 = vmul.f32 1.442695, %v3166_v30 }
0x118b   :  { %v3171_v48 = vsel %vm2814_vm2, %v8218_v5, 0.0 }
0x118c   :  { %6483 = vpow2.f32 %v3053_v44  ;;  %3172 = vadd.xlane.f32.xlu1 %v3171_v48 }
0x118d   :  { %6485 = vpow2.f32 %v3169_v60 }
0x118e   :  { %2529 = vadd.xlane.f32.xlu2 %v2528_v11 }
0x1192   :  { %v8224_v39 = vpop.eup %6483 }
0x1193   :  { %v8226_v50 = vpop.eup %6485  ;;  %v3058_v61 = vsel %vm2814_vm2, %v8224_v39, 0.0 }
0x1194   :  { %3059 = vadd.xlane.f32.xlu1 %v3058_v61  ;;  %v3174_v45 = vsel %vm2814_vm2, %v8226_v50, 0.0 }
0x1195   :  { %3175 = vadd.xlane.f32.xlu0 %v3174_v45 }
0x119c   :  { %2535 = vadd.xlane.f32.xlu1 %v2534_v53 }
0x119d   :  { %2532 = vadd.xlane.f32.xlu0 %v2531_v51 }
0x11e9   :  { %v2829_v52 = vpop.xlane.xlu2 %2828 }
0x11ea   :  { %6487 = vrcp.f32 %v2829_v52  ;;  %v2844_v32 = vand.u32 2147483648, %v2829_v52  ;;  %v2842_v57 = vand.u32 2147483647, %v2829_v52  ;;  %vm2838_vm11 = vweird.f32 %v2829_v52 }
0x11ec   :  { %v2845_v46 = vor.u32 1.1754944e-38, %v2844_v32  ;;  %vm2843_vm4 = vcmp.eq.f32.partialorder %v2842_v57, 8.507059e+37 }
0x11f0   :  { %v6488_v41 = vpop.eup %6487 }
0x11f1   :  { %v2834_v18 = vmul.f32 %v6488_v41, %v2829_v52  ;;  %v2832_v25 = vpop.xlane.xlu0 %2831  ;;  %vm2839_vm10 = vweird.f32 %v6488_v41 }
0x11f2   :  { %6489 = vrcp.f32 %v2832_v25  ;;  %vm2840_vm15 = vmor %vm2838_vm11, %vm2839_vm10  ;;  %v2859_v21 = vand.u32 2147483648, %v2832_v25  ;;  %v2857_v24 = vand.u32 2147483647, %v2832_v25  ;;  %vm2853_vm6 = vweird.f32 %v2832_v25 }
0x11f3   :  { %v2835_v23 = vsub.f32 1.0, %v2834_v18 }
0x11f4   :  { %v2860_v3 = vor.u32 1.1754944e-38, %v2859_v21  ;;  %vm2858_vm8 = vcmp.eq.f32.partialorder %v2857_v24, 8.507059e+37 }
0x11f5   :  { %v2836_v20 = vmul.f32 %v6488_v41, %v2835_v23 }
0x11f7   :  { %v2837_v59 = vadd.f32 %v6488_v41, %v2836_v20 }
0x11f8   :  { %v6490_v19 = vpop.eup %6489 }
0x11f9   :  { %v2841_v54 = vsel %vm2840_vm15, %v6488_v41, %v2837_v59  ;;  %v2849_v2 = vmul.f32 %v6490_v19, %v2832_v25  ;;  %v3057_v7 = vpop.xlane.xlu2 %3056  ;;  %vm2854_vm5 = vweird.f32 %v6490_v19 }
0x11fa   :  { %v2846_v37 = vsel %vm2843_vm4, %v2845_v46, %v2841_v54  ;;  %6491 = vrcp.f32 %v3057_v7  ;;  %vm2855_vm7 = vmor %vm2853_vm6, %vm2854_vm5  ;;  %v3072_v47 = vand.u32 2147483648, %v3057_v7  ;;  %v3070_v58 = vand.u32 2147483647, %v3057_v7 }
0x11fb   :  { %v2850_v14 = vsub.f32 1.0, %v2849_v2  ;;  %v2847_v16 = vmul.f32 %v8203_v8, %v2846_v37  ;;  %vm3066_vm9 = vweird.f32 %v3057_v7 }
0x11fc   :  { %v3073_v44 = vor.u32 1.1754944e-38, %v3072_v47  ;;  %vm3071_vm11 = vcmp.eq.f32.partialorder %v3070_v58, 8.507059e+37  ;;  %v2768_v47 = vld [vmem:[%s9090_s22] sm:$0xff] }
0x11fd   :  { %v2851_v22 = vmul.f32 %v6490_v19, %v2850_v14  ;;  %6018 = vmatmul.msk.f32.vlgmr.msra.gmra.mxu2 %vm2814_vm2, %v2847_v16  ;;  %v6040_v58 = vld [vmem:[%s9091_s2 + $0x20] sm:$0xff] }
0x11ff   :  { %v2852_v10 = vadd.f32 %v6490_v19, %v2851_v22  ;;  %v3173_v38 = vpop.xlane.xlu1 %3172 }
0x1200   :  { %v6492_v29 = vpop.eup %6491  ;;  %6493 = vrcp.f32 %v3173_v38  ;;  %v3186_v11 = vand.u32 2147483647, %v3173_v38  ;;  %v3188_v43 = vand.u32 2147483648, %v3173_v38  ;;  %vm3182_vm4 = vweird.f32 %v3173_v38 }
0x1201   :  { %v3062_v1 = vmul.f32 %v6492_v29, %v3057_v7  ;;  %v2530_v35 = vpop.xlane.xlu2 %2529  ;;  %v2856_v9 = vsel %vm2855_vm7, %v6490_v19, %v2852_v10  ;;  %vm3067_vm14 = vweird.f32 %v6492_v29 }
0x1202   :  { %v2537_v28 = vmul.f32 %v2530_v35, %v7321_v12  ;;  %v2861_v8 = vsel %vm2858_vm8, %v2860_v3, %v2856_v9  ;;  %vm3068_vm10 = vmor %vm3066_vm9, %vm3067_vm14  ;;  %v3189_v52 = vor.u32 1.1754944e-38, %v3188_v43  ;;  %vm3187_vm6 = vcmp.eq.f32.partialorder %v3186_v11, 8.507059e+37  ;;  %v2771_v3 = vld [vmem:[%s9090_s22 + $0x18] sm:$0xff] }
0x1203   :  { %v3063_v6 = vsub.f32 1.0, %v3062_v1  ;;  %v2862_v0 = vmul.f32 %v8207_v55, %v2861_v8  ;;  %3261 = vmatpush.msrb.mxu3 %v2771_v3  ;;  %v3371_v1 = vld [vmem:[%s9091_s2 + $0x18] sm:$0xff]  ;;  %v2769_v8 = vld [vmem:[%s9090_s22 + $0x8] sm:$0xff] }
0x1204   :  { %v8249_v13 = vsub.f32 %v8216_v40, %v2537_v28  ;;  %v6043_v35 = vld [vmem:[%s9091_s2 + $0x38] sm:$0xff]  ;;  %3397 = vmatpush.msra.mxu1 %v3371_v1  ;;  %v6042_v28 = vld [vmem:[%s9091_s2 + $0x30] sm:$0xff] }
0x1205   :  { %v3064_v15 = vmul.f32 %v6492_v29, %v3063_v6  ;;  %6019 = vmatmul.msk.f32.gmra.mxu2 %vm2814_vm2, %v2862_v0  ;;  %v3369_v6 = vld [vmem:[%s9091_s2 + $0x8] sm:$0xff] }
0x1206   :  { %v6494_v63 = vpop.eup %6493  ;;  %v2543_v30 = vmul.f32 %v8249_v13, %v8249_v13  ;;  %3433 = vmatpush.msra.mxu2 %v6043_v35  ;;  %v6041_v0 = vld [vmem:[%s9091_s2 + $0x28] sm:$0xff] }
0x1207   :  { %v3065_v42 = vadd.f32 %v6492_v29, %v3064_v15  ;;  %v3178_v4 = vmul.f32 %v6494_v63, %v3173_v38  ;;  %v3060_v17 = vpop.xlane.xlu1 %3059  ;;  %vm3183_vm15 = vweird.f32 %v6494_v63  ;;  %v3368_v15 = vld [vmem:[%s9091_s2] sm:$0xff] }
0x1208   :  { %6495 = vrcp.f32 %v3060_v17  ;;  %v3176_v55 = vpop.xlane.xlu0 %3175  ;;  %v2546_v45 = vsel %vm363_vm0, %v2543_v30, 0.0  ;;  %vm3184_vm5 = vmor %vm3182_vm4, %vm3183_vm15  ;;  %v3087_v57 = vand.u32 2147483648, %v3060_v17  ;;  %v3085_v46 = vand.u32 2147483647, %v3060_v17  ;;  %3434 = vmatpush.msra.mxu2 %v6042_v28 }
0x1209   :  { %v3069_v60 = vsel %vm3068_vm10, %v6492_v29, %v3065_v42  ;;  %v3179_v40 = vsub.f32 1.0, %v3178_v4  ;;  %6497 = vrcp.f32 %v3176_v55  ;;  %2547 = vadd.xlane.f32.xlu1 %v2546_v45  ;;  %v3203_v54 = vand.u32 2147483648, %v3176_v55 }
0x120a   :  { %v3074_v48 = vsel %vm3071_vm11, %v3073_v44, %v3069_v60  ;;  %v3201_v7 = vand.u32 2147483647, %v3176_v55  ;;  %vm3081_vm14 = vweird.f32 %v3060_v17  ;;  %v3088_v14 = vor.u32 1.1754944e-38, %v3087_v57  ;;  %3435 = vmatpush.msra.mxu2 %v6041_v0  ;;  %v6310_v57 = vld [vmem:[#allocation9] ss:$0 sm:$0xff] }
0x120b   :  { %v3075_v61 = vmul.f32 %v8211_v36, %v3074_v48  ;;  %v3180_v62 = vmul.f32 %v6494_v63, %v3179_v40  ;;  %vm3197_vm10 = vweird.f32 %v3176_v55  ;;  %vm3086_vm11 = vcmp.eq.f32.partialorder %v3085_v46, 8.507059e+37 }
0x120c   :  { %vm3202_vm4 = vcmp.eq.f32.partialorder %v3201_v7, 8.507059e+37  ;;  %3436 = vmatpush.msra.mxu2 %v6040_v58 }
0x120d   :  { %v3181_v53 = vadd.f32 %v6494_v63, %v3180_v62  ;;  %6024 = vmatmul.msk.f32.vlgmr.msra.gmra.mxu0 %vm2814_vm2, %v3075_v61  ;;  %v8279_v62 = vld [vmem:[#allocation7] ss:$0 sm:$0xff] }
0x120e   :  { %v6496_v51 = vpop.eup %6495 }
0x120f   :  { %v6498_v41 = vpop.eup %6497  ;;  %v3185_v18 = vsel %vm3184_vm5, %v6494_v63, %v3181_v53  ;;  %v3077_v25 = vmul.f32 %v6496_v51, %v3060_v17  ;;  %vm3082_vm7 = vweird.f32 %v6496_v51  ;;  %v8267_v9 = vpop.xlane.xlu1 %2535 }
0x1210   :  { %v3190_v23 = vsel %vm3187_vm6, %v3189_v52, %v3185_v18  ;;  %v3193_v32 = vmul.f32 %v6498_v41, %v3176_v55  ;;  %vm3198_vm8 = vweird.f32 %v6498_v41  ;;  %vm3083_vm9 = vmor %vm3081_vm14, %vm3082_vm7 }
0x1211   :  { %v3191_v36 = vmul.f32 %v8218_v5, %v3190_v23  ;;  %v3078_v20 = vsub.f32 1.0, %v3077_v25  ;;  %vm3199_vm15 = vmor %vm3197_vm10, %vm3198_vm8  ;;  %v3204_v5 = vor.u32 1.1754944e-38, %v3203_v54 }
0x1212   :  { %v3194_v59 = vsub.f32 1.0, %v3193_v32 }
0x1213   :  { %v3079_v19 = vmul.f32 %v6496_v51, %v3078_v20  ;;  %6030 = vmatmul.msk.f32.vlgmr.msrb.gmra.mxu2 %vm2814_vm2, %v3191_v36 }
0x1214   :  { %v3195_v2 = vmul.f32 %v6498_v41, %v3194_v59  ;;  %v2533_v59 = vpop.xlane.xlu0 %2532 }
0x1215   :  { %v3080_v37 = vadd.f32 %v6496_v51, %v3079_v19  ;;  %v2538_v46 = vmul.f32 %v2533_v59, %v7321_v12  ;;  %v3332_v59 = vld [vmem:[%s9092_s7 + $0x8] sm:$0xff] }
0x1216   :  { %v3196_v16 = vadd.f32 %v6498_v41, %v3195_v2  ;;  %v6643_v2 = vld [vmem:[%s9083_s29] sm:$0xff] }
0x1217   :  { %v3084_v21 = vsel %vm3083_vm9, %v6496_v51, %v3080_v37  ;;  %v8281_v51 = vld [vmem:[#allocation7 + $0x1] ss:$0 sm:$0xff]  ;;  %v2541_v7 = vsub.f32 %v8238_v49, %v2538_v46 }
0x1218   :  { %v3089_v22 = vsel %vm3086_vm11, %v3088_v14, %v3084_v21  ;;  %v3200_v24 = vsel %vm3199_vm15, %v6498_v41, %v3196_v16 }
0x1219   :  { %v3090_v10 = vmul.f32 %v8224_v39, %v3089_v22  ;;  %v3205_v38 = vsel %vm3202_vm4, %v3204_v5, %v3200_v24  ;;  %v2770_v39 = vld [vmem:[%s9090_s22 + $0x10] sm:$0xff]  ;;  %v2544_v16 = vmul.f32 %v2541_v7, %v2541_v7  ;;  %v2539_v5 = vmul.f32 %v8267_v9, %v7321_v12  ;;  %v6644_v22 = vld [vmem:[%s9083_s29 + $0x8] sm:$0xff] }
0x121a   :  { %v3206_v29 = vmul.f32 %v8226_v50, %v3205_v38  ;;  %3262 = vmatpush.msrb.mxu3 %v2770_v39  ;;  %v3370_v50 = vld [vmem:[%s9091_s2 + $0x10] sm:$0xff] }
0x121b   :  { %6025 = vmatmul.msk.f32.gmra.mxu0 %vm2814_vm2, %v3090_v10  ;;  %3398 = vmatpush.msra.mxu1 %v3370_v50  ;;  %v2549_v10 = vsel %vm363_vm0, %v2544_v16, 0.0  ;;  %v2542_v38 = vsub.f32 %v8236_v56, %v2539_v5 }
0x121c   :  { %6031 = vmatmul.msk.f32.gmra.mxu2 %vm2814_vm2, %v3206_v29  ;;  %3263 = vmatpush.msrb.mxu3 %v2769_v8 }
0x121d   :  { %3399 = vmatpush.msra.mxu1 %v3369_v6  ;;  %v2545_v29 = vmul.f32 %v2542_v38, %v2542_v38 }
0x121e   :  { %3264 = vmatpush.msrb.mxu3 %v2768_v47 }
0x121f   :  { %3400 = vmatpush.msra.mxu1 %v3368_v15  ;;  %v2552_v3 = vsel %vm370_vm1, %v2545_v29, 0.0 }
0x127c   :  { %v2548_v63 = vpop.xlane.xlu1 %2547 }
0x127d   :  { %v2555_v42 = vmul.f32 %v2548_v63, %v7321_v12 }
0x127f   :  { %v2558_v4 = vadd.f32 1e-05, %v2555_v42 }
0x1280   :  { %v3002_v17 = vpop.f32.mrf.mxu2 }
0x1281   :  { %6499 = vrsqrt.f32 %v2558_v4  ;;  %vm2567_vm6 = vweird.f32 %v2558_v4  ;;  %v3003_v61 = vadd.f32 %v3002_v17, %v8189_v27 }
0x1287   :  { %v6500_v30 = vpop.eup %6499 }
0x1288   :  { %v2562_v44 = vmul.f32 %v6500_v30, %v2558_v4  ;;  %v3005_v60 = vpop.f32.mrf.mxu2  ;;  %vm2568_vm5 = vweird.f32 %v6500_v30 }
0x1289   :  { %vm2569_vm7 = vmor %vm2567_vm6, %vm2568_vm5  ;;  %v3006_v32 = vadd.f32 %v3005_v60, %v8193_v31 }
0x128a   :  { %v2563_v55 = vmul.f32 %v6500_v30, %v2562_v44  ;;  %v3116_v11 = vpop.f32.mrf.mxu0 }
0x128b   :  { %v3122_v53 = vadd.f32 %v3116_v11, %v3003_v61 }
0x128c   :  { %v2564_v40 = vmul.f32 0.5, %v2563_v55 }
0x128e   :  { %v2565_v48 = vsub.f32 1.5, %v2564_v40 }
0x1290   :  { %v2566_v43 = vmul.f32 %v6500_v30, %v2565_v48 }
0x1292   :  { %v2570_v45 = vsel %vm2569_vm7, %v6500_v30, %v2566_v43 }
0x1293   :  { %v2591_v52 = vmul.f32 %v2570_v45, %v8249_v13 }
0x1295   :  { %v2597_v25 = vmul.f32 %v8279_v62, %v2591_v52 }
0x1296   :  { %v3232_v41 = vpop.f32.mrf.mxu2 }
0x1297   :  { %v3238_v18 = vadd.f32 %v3232_v41, %v3122_v53  ;;  %v8287_v23 = vadd.f32 %v8281_v51, %v2597_v25 }
0x1298   :  { %v3119_v27 = vpop.f32.mrf.mxu0 }
0x1299   :  { %6032 = vmatmul.msk.f32.vlgmr.msrb.gmra.mxu3 %vm363_vm0, %v3238_v18  ;;  %6037 = vmatmul.msk.f32.vlgmr.msra.gmra.mxu1 %vm363_vm0, %v8287_v23  ;;  %v3123_v13 = vadd.f32 %v3119_v27, %v3006_v32 }
0x129a   :  { %6045 = vmatmul.msk.f32.vlgmr.msra.gmra.mxu2 %vm363_vm0, %v8287_v23 }
0x129f   :  { %v3235_v36 = vpop.f32.mrf.mxu2 }
0x12a0   :  { %v3239_v20 = vadd.f32 %v3235_v36, %v3123_v13 }
0x12a2   :  { %6033 = vmatmul.msk.f32.gmra.mxu3 %vm363_vm0, %v3239_v20  ;;  %v3334_v20 = vld [vmem:[%s9092_s7 + $0x18] sm:$0xff] }
0x12a3   :  { %3357 = vmatpush.msrb.mxu0 %v3334_v20 }
0x131c   :  { %v3266_v19 = vpop.f32.mrf.mxu3 }
0x131d   :  { %v3267_v54 = vadd.f32 %v6310_v57, %v3266_v19  ;;  %v3331_v19 = vld [vmem:[%s9092_s7] sm:$0xff] }
0x131f   :  { %v8297_v31 = vadd.f32 %v6643_v2, %v3267_v54 }
0x1321   :  { %v3277_v37 = vsel %vm363_vm0, %v8297_v31, 0.0 }
0x1322   :  { %3278 = vadd.xlane.f32.xlu2 %v3277_v37 }
0x1325   :  { %v3269_v14 = vpop.f32.mrf.mxu3 }
0x1326   :  { %v3270_v21 = vadd.f32 %v6310_v57, %v3269_v14  ;;  %v3333_v57 = vld [vmem:[%s9092_s7 + $0x10] sm:$0xff] }
0x1327   :  { %3358 = vmatpush.msrb.mxu0 %v3333_v57 }
0x1328   :  { %v8305_v24 = vadd.f32 %v6644_v22, %v3270_v21 }
0x1329   :  { %3359 = vmatpush.msrb.mxu0 %v3332_v59 }
0x132a   :  { %v3280_v49 = vsel %vm363_vm0, %v8305_v24, 0.0  ;;  %2550 = vadd.xlane.f32.xlu2 %v2549_v10 }
0x132b   :  { %3281 = vadd.xlane.f32.xlu0 %v3280_v49  ;;  %3360 = vmatpush.msrb.mxu0 %v3331_v19 }
0x1333   :  { %2553 = vadd.xlane.f32.xlu0 %v2552_v3  ;;  %v6313_v3 = vld [vmem:[%s9093_s9 + $0x1] ss:$0 sm:$0xff] }
0x1395   :  { %v3279_v1 = vpop.xlane.xlu2 %3278 }
0x1396   :  { %v3283_v35 = vmul.f32 %v3279_v1, %v7321_v12 }
0x1398   :  { %v8314_v39 = vsub.f32 %v8297_v31, %v3283_v35 }
0x139a   :  { %v3287_v9 = vmul.f32 %v8314_v39, %v8314_v39 }
0x139c   :  { %v3289_v56 = vsel %vm363_vm0, %v3287_v9, 0.0 }
0x139d   :  { %3290 = vadd.xlane.f32.xlu1 %v3289_v56  ;;  %v2551_v50 = vpop.xlane.xlu2 %2550 }
0x139e   :  { %v2556_v28 = vmul.f32 %v2551_v50, %v7321_v12  ;;  %v3282_v8 = vpop.xlane.xlu0 %3281 }
0x139f   :  { %v3284_v6 = vmul.f32 %v3282_v8, %v7321_v12 }
0x13a0   :  { %v2559_v0 = vadd.f32 1e-05, %v2556_v28 }
0x13a1   :  { %v8322_v47 = vsub.f32 %v8305_v24, %v3284_v6  ;;  %v3402_v6 = vpop.f32.mrf.mxu1 }
0x13a2   :  { %6501 = vrsqrt.f32 %v2559_v0  ;;  %vm2577_vm8 = vweird.f32 %v2559_v0 }
0x13a3   :  { %v3288_v15 = vmul.f32 %v8322_v47, %v8322_v47 }
0x13a5   :  { %v3292_v58 = vsel %vm363_vm0, %v3288_v15, 0.0 }
0x13a6   :  { %3293 = vadd.xlane.f32.xlu2 %v3292_v58  ;;  %v2554_v63 = vpop.xlane.xlu0 %2553 }
0x13a7   :  { %v2557_v42 = vmul.f32 %v2554_v63, %v7321_v12 }
0x13a8   :  { %v6502_v4 = vpop.eup %6501 }
0x13a9   :  { %v2572_v17 = vmul.f32 %v6502_v4, %v2559_v0  ;;  %v2560_v30 = vadd.f32 1e-05, %v2557_v42  ;;  %vm2578_vm1 = vweird.f32 %v6502_v4 }
0x13aa   :  { %vm2579_vm14 = vmor %vm2577_vm8, %vm2578_vm1 }
0x13ab   :  { %v2573_v44 = vmul.f32 %v6502_v4, %v2572_v17  ;;  %6503 = vrsqrt.f32 %v2560_v30  ;;  %vm2587_vm10 = vweird.f32 %v2560_v30  ;;  %v6309_v17 = vld [vmem:[%s9094_s12] ss:$0 sm:$0xff] }
0x13ad   :  { %v2574_v55 = vmul.f32 0.5, %v2573_v44 }
0x13af   :  { %v2575_v60 = vsub.f32 1.5, %v2574_v55  ;;  %v6311_v55 = vld [vmem:[%s9094_s12 + $0x1] ss:$0 sm:$0xff] }
0x13b1   :  { %v6504_v40 = vpop.eup %6503  ;;  %v2576_v48 = vmul.f32 %v6502_v4, %v2575_v60 }
0x13b2   :  { %v2582_v11 = vmul.f32 %v6504_v40, %v2560_v30  ;;  %vm2588_vm9 = vweird.f32 %v6504_v40 }
0x13b3   :  { %v2580_v43 = vsel %vm2579_vm14, %v6502_v4, %v2576_v48  ;;  %vm2589_vm11 = vmor %vm2587_vm10, %vm2588_vm9 }
0x13b4   :  { %v2592_v61 = vmul.f32 %v2580_v43, %v2541_v7  ;;  %v2583_v45 = vmul.f32 %v6504_v40, %v2582_v11  ;;  %v3403_v11 = vadd.f32 %v6309_v17, %v3402_v6 }
0x13b6   :  { %v2584_v53 = vmul.f32 0.5, %v2583_v45  ;;  %v2598_v52 = vmul.f32 %v8279_v62, %v2592_v61  ;;  %v8366_v61 = vld [vmem:[%s9077_s13 + $0x1] ss:$0 sm:$0xff] }
0x13b8   :  { %v2585_v41 = vsub.f32 1.5, %v2584_v53  ;;  %v8330_v18 = vadd.f32 %v8281_v51, %v2598_v52 }
0x13ba   :  { %v2586_v25 = vmul.f32 %v6504_v40, %v2585_v41  ;;  %6038 = vmatmul.msk.f32.gmra.mxu1 %vm363_vm0, %v8330_v18  ;;  %6046 = vmatmul.msk.f32.gmra.mxu2 %vm363_vm0, %v8330_v18 }
0x13bc   :  { %v2590_v27 = vsel %vm2589_vm11, %v6504_v40, %v2586_v25 }
0x13bd   :  { %v2593_v32 = vmul.f32 %v2590_v27, %v2542_v38  ;;  %v6312_v38 = vld [vmem:[%s9093_s9] ss:$0 sm:$0xff] }
0x13bf   :  { %v2599_v13 = vmul.f32 %v8279_v62, %v2593_v32 }
0x13c1   :  { %v8338_v36 = vadd.f32 %v8281_v51, %v2599_v13 }
0x13c3   :  { %6039 = vmatmul.msk.f32.gmra.mxu1 %vm363_vm0, %v8338_v36  ;;  %6047 = vmatmul.msk.f32.gmra.mxu2 %vm363_vm0, %v8338_v36 }
0x1410   :  { %v3291_v46 = vpop.xlane.xlu1 %3290 }
0x1411   :  { %v3295_v62 = vmul.f32 %v3291_v46, %v7321_v12  ;;  %v6314_v46 = vld [vmem:[#allocation10] ss:$0 sm:$0xff] }
0x1413   :  { %v3297_v51 = vadd.f32 1e-05, %v3295_v62 }
0x1415   :  { %6505 = vrsqrt.f32 %v3297_v51  ;;  %vm3305_vm4 = vweird.f32 %v3297_v51 }
0x1419   :  { %v3294_v54 = vpop.xlane.xlu2 %3293 }
0x141a   :  { %v3296_v2 = vmul.f32 %v3294_v54, %v7321_v12 }
0x141b   :  { %v6506_v7 = vpop.eup %6505 }
0x141c   :  { %v3300_v37 = vmul.f32 %v6506_v7, %v3297_v51  ;;  %v3298_v14 = vadd.f32 1e-05, %v3296_v2  ;;  %vm3306_vm15 = vweird.f32 %v6506_v7 }
0x141d   :  { %vm3307_vm5 = vmor %vm3305_vm4, %vm3306_vm15 }
0x141e   :  { %v3301_v16 = vmul.f32 %v6506_v7, %v3300_v37  ;;  %6507 = vrsqrt.f32 %v3298_v14  ;;  %vm3315_vm7 = vweird.f32 %v3298_v14 }
0x1420   :  { %v3302_v5 = vmul.f32 0.5, %v3301_v16 }
0x1422   :  { %v3303_v21 = vsub.f32 1.5, %v3302_v5 }
0x1424   :  { %v6508_v22 = vpop.eup %6507  ;;  %v3304_v10 = vmul.f32 %v6506_v7, %v3303_v21 }
0x1425   :  { %v3310_v49 = vmul.f32 %v6508_v22, %v3298_v14  ;;  %vm3316_vm6 = vweird.f32 %v6508_v22 }
0x1426   :  { %v3308_v29 = vsel %vm3307_vm5, %v6506_v7, %v3304_v10  ;;  %vm3317_vm1 = vmor %vm3315_vm7, %vm3316_vm6 }
0x1427   :  { %v3319_v1 = vmul.f32 %v3308_v29, %v8314_v39  ;;  %v3311_v35 = vmul.f32 %v6508_v22, %v3310_v49  ;;  %v3438_v39 = vpop.f32.mrf.mxu2  ;;  %v8417_v29 = vld [vmem:[%s9095_s6 + $0x8] sm:$0xff] }
0x1428   :  { %v3439_v52 = vadd.f32 %v6311_v55, %v3438_v39 }
0x1429   :  { %v3324_v9 = vmul.f32 %v6312_v38, %v3319_v1  ;;  %v3312_v56 = vmul.f32 0.5, %v3311_v35 }
0x142a   :  { %v3544_v32 = vmul.f32 %v8139_v34, %v3439_v52  ;;  %v3630_v13 = vmul.f32 %v8366_v61, %v3439_v52  ;;  %v3780_v20 = vmul.f32 %v8150_v33, %v3439_v52  ;;  %v3900_v19 = vmul.f32 %v8159_v26, %v3439_v52 }
0x142b   :  { %v3329_v50 = vadd.f32 %v6313_v3, %v3324_v9  ;;  %v3313_v28 = vsub.f32 1.5, %v3312_v56 }
0x142d   :  { %v3314_v8 = vmul.f32 %v6508_v22, %v3313_v28  ;;  %6035 = vmatmul.msk.f32.vlgmr.msrb.gmra.mxu0 %vm363_vm0, %v3329_v50 }
0x142f   :  { %v3318_v0 = vsel %vm3317_vm1, %v6508_v22, %v3314_v8  ;;  %v8412_v22 = vld [vmem:[%s9095_s6] sm:$0xff] }
0x1430   :  { %v3320_v15 = vmul.f32 %v3318_v0, %v8322_v47 }
0x1432   :  { %v3325_v58 = vmul.f32 %v6312_v38, %v3320_v15 }
0x1434   :  { %v3330_v63 = vadd.f32 %v6313_v3, %v3325_v58 }
0x1436   :  { %6036 = vmatmul.msk.f32.gmra.mxu0 %vm363_vm0, %v3330_v63 }
0x1437   :  { %v3405_v42 = vpop.f32.mrf.mxu1 }
0x1438   :  { %v3406_v60 = vadd.f32 %v6309_v17, %v3405_v42 }
0x143d   :  { %v3441_v4 = vpop.f32.mrf.mxu2 }
0x143e   :  { %v3442_v48 = vadd.f32 %v6311_v55, %v3441_v4 }
0x1440   :  { %v3408_v30 = vpop.f32.mrf.mxu1  ;;  %v3545_v41 = vmul.f32 %v8139_v34, %v3442_v48  ;;  %v3631_v25 = vmul.f32 %v8366_v61, %v3442_v48  ;;  %v3781_v27 = vmul.f32 %v8150_v33, %v3442_v48  ;;  %v3901_v59 = vmul.f32 %v8159_v26, %v3442_v48 }
0x1441   :  { %v3409_v44 = vadd.f32 %v6309_v17, %v3408_v30 }
0x1443   :  { %6048 = vmatpush.xpose.msk.msra.mxu3 %vm363_vm0, %v3409_v44  ;;  %6053 = vmatpush.xpose.msk.msra.mxu0 %vm363_vm0, %v3409_v44 }
0x1444   :  { %6064 = vmatpush.xpose.msk.msrb.mxu2 %vm363_vm0, %v3409_v44 }
0x1446   :  { %v3444_v47 = vpop.f32.mrf.mxu2 }
0x1447   :  { %v3445_v40 = vadd.f32 %v6311_v55, %v3444_v47  ;;  %6049 = vmatpush.xpose.msk.msra.mxu3 %vm363_vm0, %v3406_v60  ;;  %6054 = vmatpush.xpose.msk.msra.mxu0 %vm363_vm0, %v3406_v60 }
0x1448   :  { %6065 = vmatpush.xpose.msk.msrb.mxu2 %vm363_vm0, %v3406_v60 }
0x1449   :  { %v3546_v43 = vmul.f32 %v8139_v34, %v3445_v40  ;;  %v3632_v45 = vmul.f32 %v8366_v61, %v3445_v40  ;;  %v3782_v53 = vmul.f32 %v8150_v33, %v3445_v40  ;;  %v3902_v57 = vmul.f32 %v8159_v26, %v3445_v40 }
0x144b   :  { %6050 = vmatpush.xpose.msk.msra.mxu3 %vm363_vm0, %v3403_v11  ;;  %6055 = vmatpush.xpose.msk.msra.mxu0 %vm363_vm0, %v3403_v11 }
0x144c   :  { %6061 = vmatpush.msk.msrb.mxu1 %vm834_vm12, %v3546_v43  ;;  %6066 = vmatpush.xpose.msk.msrb.mxu2 %vm363_vm0, %v3403_v11 }
0x144e   :  { %3688 = vmatpush.msrb.mxu1 %v3545_v41 }
0x144f   :  { %6058 = vmatpush.msk.msrb.mxu3 %vm834_vm12, %v3632_v45  ;;  %6069 = vmatpush.msk.msrb.mxu0 %vm834_vm12, %v3782_v53 }
0x1450   :  { %3689 = vmatpush.msrb.mxu1 %v3544_v32 }
0x1451   :  { %3656 = vmatpush.msrb.mxu3 %v3631_v25  ;;  %3806 = vmatpush.msrb.mxu0 %v3781_v27 }
0x1452   :  { %6077 = vmatpush.msk.msra.mxu1 %vm834_vm12, %v3902_v57 }
0x1453   :  { %3657 = vmatpush.msrb.mxu3 %v3630_v13  ;;  %3807 = vmatpush.msrb.mxu0 %v3780_v20 }
0x1454   :  { %3926 = vmatpush.msra.mxu1 %v3901_v59 }
0x1456   :  { %3927 = vmatpush.msra.mxu1 %v3900_v19 }
0x14aa   :  { %v3362_v62 = vpop.f32.mrf.mxu0 }
0x14ab   :  { %v8386_v51 = vadd.f32 %v6314_v46, %v3362_v62 }
0x14ad   :  { %v3452_v54 = vmul.f32 %v8139_v34, %v8386_v51  ;;  %v3547_v2 = vmul.f32 %v8366_v61, %v8386_v51  ;;  %v3697_v7 = vmul.f32 %v8150_v33, %v8386_v51 }
0x14af   :  { %6051 = vmatmul.msk.f32.vlgmr.msra.gmra.mxu3 %vm363_vm0, %v3452_v54  ;;  %6056 = vmatmul.msk.f32.vlgmr.msra.gmra.mxu0 %vm363_vm0, %v3547_v2 }
0x14b0   :  { %6067 = vmatmul.msk.f32.vlgmr.msrb.gmra.mxu2 %vm363_vm0, %v3697_v7  ;;  %6072 = vmatpush.xpose.msk.msra.mxu3 %vm363_vm0, %v3409_v44 }
0x14b3   :  { %v3365_v26 = vpop.f32.mrf.mxu0 }
0x14b4   :  { %v8398_v37 = vadd.f32 %v6314_v46, %v3365_v26  ;;  %6073 = vmatpush.xpose.msk.msra.mxu3 %vm363_vm0, %v3406_v60 }
0x14b6   :  { %v3453_v14 = vmul.f32 %v8139_v34, %v8398_v37  ;;  %v3548_v16 = vmul.f32 %v8366_v61, %v8398_v37  ;;  %v3698_v5 = vmul.f32 %v8150_v33, %v8398_v37 }
0x14b8   :  { %6052 = vmatmul.msk.f32.gmra.mxu3 %vm363_vm0, %v3453_v14  ;;  %6057 = vmatmul.msk.f32.gmra.mxu0 %vm363_vm0, %v3548_v16 }
0x14b9   :  { %6068 = vmatmul.msk.f32.gmra.mxu2 %vm363_vm0, %v3698_v5  ;;  %6074 = vmatpush.xpose.msk.msra.mxu3 %vm363_vm0, %v3403_v11 }
0x152c   :  { %v3572_v21 = vpop.f32.mrf.mxu0 }
0x152d   :  { %v3578_v10 = vmul.f32 0.35355338, %v3572_v21 }
0x152f   :  { %v3580_v34 = vadd.f32 %v3578_v10, %v8412_v22 }
0x1531   :  { %v3582_v38 = vsel %vm626_vm13, %v3580_v34, -inf }
0x1532   :  { %3583 = vmax.xlane.f32.xlu0 %v3582_v38  ;;  %v3486_v3 = vpop.f32.mrf.mxu3 }
0x1533   :  { %v3492_v35 = vmul.f32 0.35355338, %v3486_v3  ;;  %v3722_v0 = vpop.f32.mrf.mxu2 }
0x1534   :  { %v3728_v40 = vmul.f32 0.35355338, %v3722_v0 }
0x1535   :  { %v3575_v49 = vpop.f32.mrf.mxu0  ;;  %v8422_v56 = vadd.f32 %v3492_v35, %v8412_v22 }
0x1536   :  { %v3579_v33 = vmul.f32 0.35355338, %v3575_v49  ;;  %v8432_v43 = vadd.f32 %v3728_v40, %v8412_v22 }
0x1537   :  { %v3496_v50 = vsel %vm626_vm13, %v8422_v56, -inf }
0x1538   :  { %v3581_v1 = vadd.f32 %v3579_v33, %v8417_v29  ;;  %v3732_v53 = vsel %vm626_vm13, %v8432_v43, -inf }
0x153a   :  { %v3585_v9 = vsel %vm626_vm13, %v3581_v1, -inf }
0x153b   :  { %3586 = vmax.xlane.f32.xlu1 %v3585_v9  ;;  %v3489_v15 = vpop.f32.mrf.mxu3 }
0x153c   :  { %v3493_v42 = vmul.f32 0.35355338, %v3489_v15  ;;  %v3725_v44 = vpop.f32.mrf.mxu2  ;;  %v8448_v15 = vld [vmem:[%s9077_s13 + $0x3] ss:$0 sm:$0xff] }
0x153d   :  { %v3729_v60 = vmul.f32 0.35355338, %v3725_v44 }
0x153e   :  { %v3495_v30 = vadd.f32 %v3493_v42, %v8417_v29 }
0x153f   :  { %v3731_v11 = vadd.f32 %v3729_v60, %v8417_v29 }
0x1540   :  { %v3499_v47 = vsel %vm626_vm13, %v3495_v30, -inf }
0x1541   :  { %v3735_v45 = vsel %vm626_vm13, %v3731_v11, -inf }
0x1543   :  { %3497 = vmax.xlane.f32.xlu1 %v3496_v50 }
0x15a5   :  { %v3584_v28 = vpop.xlane.xlu0 %3583 }
0x15a6   :  { %v3588_v8 = vsub.f32 %v3580_v34, %v3584_v28 }
0x15a8   :  { %v3590_v6 = vmul.f32 1.442695, %v3588_v8 }
0x15aa   :  { %6509 = vpow2.f32 %v3590_v6 }
0x15ae   :  { %v3587_v58 = vpop.xlane.xlu1 %3586 }
0x15af   :  { %v3589_v63 = vsub.f32 %v3581_v1, %v3587_v58  ;;  %v3817_v58 = vmul.f32 %v8448_v15, %v8386_v51 }
0x15b0   :  { %v6510_v39 = vpop.eup %6509 }
0x15b1   :  { %v3592_v4 = vmul.f32 1.442695, %v3589_v63  ;;  %v3594_v17 = vsel %vm626_vm13, %v6510_v39, 0.0  ;;  %v3818_v63 = vmul.f32 %v8448_v15, %v8398_v37 }
0x15b2   :  { %3595 = vadd.xlane.f32.xlu2 %v3594_v17 }
0x15b3   :  { %6511 = vpow2.f32 %v3592_v4 }
0x15b6   :  { %v3498_v4 = vpop.xlane.xlu1 %3497 }
0x15b7   :  { %v3502_v17 = vsub.f32 %v8422_v56, %v3498_v4 }
0x15b9   :  { %v6512_v55 = vpop.eup %6511 }
0x15ba   :  { %v3597_v48 = vsel %vm626_vm13, %v6512_v55, 0.0  ;;  %3500 = vmax.xlane.f32.xlu2 %v3499_v47 }
0x15bb   :  { %3598 = vadd.xlane.f32.xlu0 %v3597_v48 }
0x15c2   :  { %3736 = vmax.xlane.f32.xlu2 %v3735_v45 }
0x15c3   :  { %3733 = vmax.xlane.f32.xlu0 %v3732_v53 }
0x1625   :  { %v3596_v52 = vpop.xlane.xlu2 %3595 }
0x1626   :  { %6513 = vrcp.f32 %v3596_v52  ;;  %v3611_v57 = vand.u32 2147483648, %v3596_v52  ;;  %v3609_v46 = vand.u32 2147483647, %v3596_v52  ;;  %vm3605_vm14 = vweird.f32 %v3596_v52 }
0x1628   :  { %v3612_v54 = vor.u32 1.1754944e-38, %v3611_v57  ;;  %vm3610_vm10 = vcmp.eq.f32.partialorder %v3609_v46, 8.507059e+37 }
0x162c   :  { %v6514_v41 = vpop.eup %6513 }
0x162d   :  { %v3601_v25 = vmul.f32 %v6514_v41, %v3596_v52  ;;  %v3501_v27 = vpop.xlane.xlu2 %3500  ;;  %vm3606_vm8 = vweird.f32 %v6514_v41 }
0x162e   :  { %v3599_v32 = vpop.xlane.xlu0 %3598  ;;  %v3503_v13 = vsub.f32 %v3495_v30, %v3501_v27  ;;  %vm3607_vm9 = vmor %vm3605_vm14, %vm3606_vm8  ;;  %v3504_v30 = vmul.f32 1.442695, %v3502_v17 }
0x162f   :  { %v3602_v20 = vsub.f32 1.0, %v3601_v25  ;;  %6515 = vrcp.f32 %v3599_v32  ;;  %v3626_v49 = vand.u32 2147483648, %v3599_v32  ;;  %v3624_v1 = vand.u32 2147483647, %v3599_v32 }
0x1630   :  { %v3506_v59 = vmul.f32 1.442695, %v3503_v13  ;;  %vm3620_vm15 = vweird.f32 %v3599_v32 }
0x1631   :  { %v3603_v19 = vmul.f32 %v6514_v41, %v3602_v20  ;;  %v3627_v9 = vor.u32 1.1754944e-38, %v3626_v49  ;;  %vm3625_vm5 = vcmp.eq.f32.partialorder %v3624_v1, 8.507059e+37 }
0x1632   :  { %6517 = vpow2.f32 %v3506_v59 }
0x1633   :  { %v3604_v62 = vadd.f32 %v6514_v41, %v3603_v19 }
0x1635   :  { %v6516_v2 = vpop.eup %6515  ;;  %v3608_v7 = vsel %vm3607_vm9, %v6514_v41, %v3604_v62  ;;  %v3737_v26 = vpop.xlane.xlu2 %3736 }
0x1636   :  { %v3613_v14 = vsel %vm3610_vm10, %v3612_v54, %v3608_v7  ;;  %v3616_v16 = vmul.f32 %v6516_v2, %v3599_v32  ;;  %v3739_v5 = vsub.f32 %v3731_v11, %v3737_v26  ;;  %vm3621_vm11 = vweird.f32 %v6516_v2 }
0x1637   :  { %v3614_v21 = vmul.f32 %v6510_v39, %v3613_v14  ;;  %vm3622_vm4 = vmor %vm3620_vm15, %vm3621_vm11 }
0x1638   :  { %v8437_v10 = vpop.eup %6517  ;;  %v3617_v34 = vsub.f32 1.0, %v3616_v16  ;;  %v3742_v38 = vmul.f32 1.442695, %v3739_v5 }
0x1639   :  { %6059 = vmatmul.msk.f32.vlgmr.msrb.gmra.mxu3 %vm626_vm13, %v3614_v21  ;;  %v3511_v33 = vsel %vm626_vm13, %v8437_v10, 0.0 }
0x163a   :  { %v3618_v3 = vmul.f32 %v6516_v2, %v3617_v34  ;;  %6519 = vpow2.f32 %v3742_v38  ;;  %3512 = vadd.xlane.f32.xlu2 %v3511_v33 }
0x163b   :  { %6521 = vpow2.f32 %v3504_v30 }
0x163c   :  { %v3619_v35 = vadd.f32 %v6516_v2, %v3618_v3 }
0x163e   :  { %v3623_v50 = vsel %vm3622_vm4, %v6516_v2, %v3619_v35 }
0x163f   :  { %v3628_v28 = vsel %vm3625_vm5, %v3627_v9, %v3623_v50 }
0x1640   :  { %v8442_v8 = vpop.eup %6519  ;;  %v3629_v6 = vmul.f32 %v6512_v55, %v3628_v28  ;;  %v3734_v55 = vpop.xlane.xlu0 %3733 }
0x1641   :  { %v3747_v0 = vsel %vm626_vm13, %v8442_v8, 0.0  ;;  %v3738_v47 = vsub.f32 %v8432_v43, %v3734_v55  ;;  %v6522_v45 = vpop.eup %6521 }
0x1642   :  { %6060 = vmatmul.msk.f32.gmra.mxu3 %vm626_vm13, %v3629_v6  ;;  %3748 = vadd.xlane.f32.xlu2 %v3747_v0  ;;  %v3508_v56 = vsel %vm626_vm13, %v6522_v45, 0.0 }
0x1643   :  { %v3740_v40 = vmul.f32 1.442695, %v3738_v47 }
0x1645   :  { %6523 = vpow2.f32 %v3740_v40 }
0x164a   :  { %6075 = vmatmul.msk.f32.vlgmr.msra.gmra.mxu3 %vm363_vm0, %v3817_v58 }
0x1652   :  { %6076 = vmatmul.msk.f32.gmra.mxu3 %vm363_vm0, %v3818_v63 }
0x16ad   :  { %v3513_v41 = vpop.xlane.xlu2 %3512 }
0x16ae   :  { %6525 = vrcp.f32 %v3513_v41  ;;  %vm3534_vm9 = vweird.f32 %v3513_v41  ;;  %v3540_v63 = vand.u32 2147483648, %v3513_v41  ;;  %v3538_v30 = vand.u32 2147483647, %v3513_v41 }
0x16b0   :  { %vm3539_vm15 = vcmp.eq.f32.partialorder %v3538_v30, 8.507059e+37 }
0x16bc   :  { %v8456_v39 = vpop.f32.mrf.mxu3 }
0x16c5   :  { %v8458_v42 = vpop.f32.mrf.mxu3 }
0x16cd   :  { %v3842_v44 = vpop.f32.mrf.mxu3 }
0x16ce   :  { %v3848_v60 = vmul.f32 0.35355338, %v3842_v44 }
0x16d0   :  { %v3850_v51 = vadd.f32 %v3848_v60, %v8412_v22  ;;  %v8467_v22 = vpop.eup %6523 }
0x16d1   :  { %v3744_v43 = vsel %vm626_vm13, %v8467_v22, 0.0  ;;  %v6526_v13 = vpop.eup %6525 }
0x16d2   :  { %v3852_v37 = vsel %vm626_vm13, %v3850_v51, -inf  ;;  %v3530_v46 = vmul.f32 %v6526_v13, %v3513_v41  ;;  %vm3535_vm1 = vweird.f32 %v6526_v13 }
0x16d3   :  { %3853 = vmax.xlane.f32.xlu1 %v3852_v37  ;;  %vm8483_vm10 = vmor %vm3534_vm9, %vm3535_vm1 }
0x16d4   :  { %v3531_v7 = vsub.f32 1.0, %v3530_v46 }
0x16d5   :  { %v3845_v48 = vpop.f32.mrf.mxu3 }
0x16d6   :  { %v3849_v11 = vmul.f32 0.35355338, %v3845_v48  ;;  %v3532_v21 = vmul.f32 %v6526_v13, %v3531_v7  ;;  %v3541_v48 = vor.u32 1.1754944e-38, %v3540_v63  ;;  %v3447_v63 = vld [vmem:[%s9098_s19] sm:$0xff] }
0x16d8   :  { %v3851_v53 = vadd.f32 %v3849_v11, %v8417_v29  ;;  %v8471_v29 = vpop.xlane.xlu2 %3748  ;;  %v3533_v50 = vadd.f32 %v6526_v13, %v3532_v21 }
0x16d9   :  { %vm3770_vm1 = vweird.f32 %v8471_v29 }
0x16da   :  { %v3855_v52 = vsel %vm626_vm13, %v3851_v53, -inf }
0x16db   :  { %3509 = vadd.xlane.f32.xlu1 %v3508_v56  ;;  %3856 = vmax.xlane.f32.xlu0 %v3855_v52 }
0x16e3   :  { %3745 = vadd.xlane.f32.xlu0 %v3744_v43  ;;  %v3776_v43 = vand.u32 2147483648, %v8471_v29 }
0x1746   :  { %v3854_v25 = vpop.xlane.xlu1 %3853 }
0x1747   :  { %v3858_v27 = vsub.f32 %v3850_v51, %v3854_v25  ;;  %v3537_v51 = vsel %vm8483_vm10, %v6526_v13, %v3533_v50  ;;  %v3774_v25 = vand.u32 2147483647, %v8471_v29 }
0x1748   :  { %v3542_v56 = vsel %vm3539_vm15, %v3541_v48, %v3537_v51 }
0x1749   :  { %v3860_v32 = vmul.f32 1.442695, %v3858_v27 }
0x174b   :  { %6527 = vpow2.f32 %v3860_v32  ;;  %v3543_v32 = vmul.f32 %v8437_v10, %v3542_v56 }
0x174e   :  { %v3510_v20 = vpop.xlane.xlu1 %3509  ;;  %v3857_v57 = vpop.xlane.xlu0 %3856 }
0x174f   :  { %6529 = vrcp.f32 %v3510_v20  ;;  %v3859_v59 = vsub.f32 %v3851_v53, %v3857_v57  ;;  %v3525_v34 = vand.u32 2147483648, %v3510_v20  ;;  %v3523_v3 = vand.u32 2147483647, %v3510_v20 }
0x1750   :  { %6531 = vrcp.f32 %v8471_v29  ;;  %vm3519_vm7 = vweird.f32 %v3510_v20 }
0x1751   :  { %v8473_v19 = vpop.eup %6527  ;;  %v3862_v62 = vmul.f32 1.442695, %v3859_v59  ;;  %v3526_v28 = vor.u32 1.1754944e-38, %v3525_v34  ;;  %vm3524_vm14 = vcmp.eq.f32.partialorder %v3523_v3, 8.507059e+37 }
0x1752   :  { %v3864_v54 = vsel %vm626_vm13, %v8473_v19, 0.0 }
0x1753   :  { %3865 = vadd.xlane.f32.xlu1 %v3864_v54  ;;  %6533 = vpow2.f32 %v3862_v62  ;;  %v3450_v54 = vld [vmem:[%s9098_s19 + $0x18] sm:$0xff] }
0x1754   :  { %3958 = vmatpush.msra.mxu2 %v3450_v54 }
0x1755   :  { %v6530_v2 = vpop.eup %6529 }
0x1756   :  { %v3515_v26 = vmul.f32 %v6530_v2, %v3510_v20  ;;  %v3746_v14 = vpop.xlane.xlu0 %3745  ;;  %v6532_v16 = vpop.eup %6531  ;;  %vm3520_vm6 = vweird.f32 %v6530_v2  ;;  %v3777_v20 = vor.u32 1.1754944e-38, %v3776_v43 }
0x1757   :  { %6535 = vrcp.f32 %v3746_v14  ;;  %v3766_v49 = vmul.f32 %v6532_v16, %v8471_v29  ;;  %vm3521_vm8 = vmor %vm3519_vm7, %vm3520_vm6  ;;  %v3761_v60 = vand.u32 2147483648, %v3746_v14  ;;  %v3759_v40 = vand.u32 2147483647, %v3746_v14 }
0x1758   :  { %v3516_v5 = vsub.f32 1.0, %v3515_v26  ;;  %vm3755_vm4 = vweird.f32 %v3746_v14  ;;  %vm3771_vm6 = vweird.f32 %v6532_v16 }
0x1759   :  { %v8478_v38 = vpop.eup %6533  ;;  %v3767_v6 = vsub.f32 1.0, %v3766_v49  ;;  %v3762_v53 = vor.u32 1.1754944e-38, %v3761_v60  ;;  %vm3760_vm7 = vcmp.eq.f32.partialorder %v3759_v40, 8.507059e+37 }
0x175a   :  { %v3517_v33 = vmul.f32 %v6530_v2, %v3516_v5  ;;  %v3867_v1 = vsel %vm626_vm13, %v8478_v38, 0.0 }
0x175b   :  { %3868 = vadd.xlane.f32.xlu0 %v3867_v1  ;;  %v3768_v47 = vmul.f32 %v6532_v16, %v3767_v6 }
0x175c   :  { %v3518_v35 = vadd.f32 %v6530_v2, %v3517_v33 }
0x175d   :  { %v6536_v9 = vpop.eup %6535  ;;  %v3769_v52 = vadd.f32 %v6532_v16, %v3768_v47 }
0x175e   :  { %v3522_v0 = vsel %vm3521_vm8, %v6530_v2, %v3518_v35  ;;  %v3751_v58 = vmul.f32 %v6536_v9, %v3746_v14  ;;  %vm3756_vm11 = vweird.f32 %v6536_v9  ;;  %vm3772_vm8 = vmor %vm3770_vm1, %vm3771_vm6  ;;  %v3449_v2 = vld [vmem:[%s9098_s19 + $0x10] sm:$0xff] }
0x175f   :  { %v3527_v4 = vsel %vm3524_vm14, %v3526_v28, %v3522_v0  ;;  %vm3757_vm5 = vmor %vm3755_vm4, %vm3756_vm11  ;;  %v3773_v13 = vsel %vm3772_vm8, %v6532_v16, %v3769_v52  ;;  %vm3775_vm14 = vcmp.eq.f32.partialorder %v3774_v25, 8.507059e+37  ;;  %3959 = vmatpush.msra.mxu2 %v3449_v2 }
0x1760   :  { %v3528_v44 = vmul.f32 %v6522_v45, %v3527_v4  ;;  %v3752_v55 = vsub.f32 1.0, %v3751_v58  ;;  %v3778_v57 = vsel %vm3775_vm14, %v3777_v20, %v3773_v13 }
0x1761   :  { %v3779_v59 = vmul.f32 %v8442_v8, %v3778_v57 }
0x1762   :  { %v3753_v37 = vmul.f32 %v6536_v9, %v3752_v55  ;;  %6062 = vmatmul.msk.f32.vlgmr.msrb.gmra.mxu1 %vm626_vm13, %v3528_v44 }
0x1764   :  { %v3754_v11 = vadd.f32 %v6536_v9, %v3753_v37 }
0x1766   :  { %v3758_v45 = vsel %vm3757_vm5, %v6536_v9, %v3754_v11  ;;  %v6315_v11 = vld [vmem:[#allocation12] ss:$0 sm:$0xff] }
0x1767   :  { %v3763_v41 = vsel %vm3760_vm7, %v3762_v53, %v3758_v45 }
0x1768   :  { %v3764_v27 = vmul.f32 %v8467_v22, %v3763_v41 }
0x176a   :  { %6063 = vmatmul.msk.f32.gmra.mxu1 %vm626_vm13, %v3543_v32  ;;  %6070 = vmatmul.msk.f32.vlgmr.msrb.gmra.mxu0 %vm626_vm13, %v3764_v27 }
0x1772   :  { %6071 = vmatmul.msk.f32.gmra.mxu0 %vm626_vm13, %v3779_v59 }
0x17c6   :  { %v3866_v29 = vpop.xlane.xlu1 %3865 }
0x17c7   :  { %6537 = vrcp.f32 %v3866_v29  ;;  %v3881_v7 = vand.u32 2147483648, %v3866_v29  ;;  %v3879_v14 = vand.u32 2147483647, %v3866_v29  ;;  %vm3875_vm10 = vweird.f32 %v3866_v29 }
0x17c9   :  { %v3882_v8 = vor.u32 1.1754944e-38, %v3881_v7  ;;  %vm3880_vm15 = vcmp.eq.f32.partialorder %v3879_v14, 8.507059e+37  ;;  %v4073_v14 = vld [vmem:[%s9100_s16 + $0x30] sm:$0xff] }
0x17cd   :  { %v6538_v22 = vpop.eup %6537 }
0x17ce   :  { %v3871_v46 = vmul.f32 %v6538_v22, %v3866_v29  ;;  %v3869_v10 = vpop.xlane.xlu0 %3868  ;;  %vm3876_vm9 = vweird.f32 %v6538_v22 }
0x17cf   :  { %6539 = vrcp.f32 %v3869_v10  ;;  %vm3877_vm11 = vmor %vm3875_vm10, %vm3876_vm9  ;;  %v3896_v1 = vand.u32 2147483648, %v3869_v10  ;;  %v3894_v9 = vand.u32 2147483647, %v3869_v10  ;;  %vm3890_vm5 = vweird.f32 %v3869_v10 }
0x17d0   :  { %v3872_v62 = vsub.f32 1.0, %v3871_v46  ;;  %v4030_v46 = vld [vmem:[%s9099_s11 + $0x10] sm:$0xff] }
0x17d1   :  { %v3897_v28 = vor.u32 1.1754944e-38, %v3896_v1  ;;  %vm3895_vm7 = vcmp.eq.f32.partialorder %v3894_v9, 8.507059e+37 }
0x17d2   :  { %v3873_v26 = vmul.f32 %v6538_v22, %v3872_v62  ;;  %v4028_v62 = vld [vmem:[%s9099_s11] sm:$0xff] }
0x17d4   :  { %v3874_v16 = vadd.f32 %v6538_v22, %v3873_v26  ;;  %v4074_v26 = vld [vmem:[%s9100_s16 + $0x38] sm:$0xff] }
0x17d5   :  { %v6540_v5 = vpop.eup %6539  ;;  %4089 = vmatpush.msrb.mxu3 %v4074_v26 }
0x17d6   :  { %v3878_v21 = vsel %vm3877_vm11, %v6538_v22, %v3874_v16  ;;  %v3886_v49 = vmul.f32 %v6540_v5, %v3869_v10  ;;  %vm3891_vm4 = vweird.f32 %v6540_v5  ;;  %v4031_v22 = vld [vmem:[%s9099_s11 + $0x18] sm:$0xff]  ;;  %v4029_v10 = vld [vmem:[%s9099_s11 + $0x8] sm:$0xff] }
0x17d7   :  { %v3883_v34 = vsel %vm3880_vm15, %v3882_v8, %v3878_v21  ;;  %vm3892_vm6 = vmor %vm3890_vm5, %vm3891_vm4  ;;  %4054 = vmatpush.msra.mxu0 %v4031_v22  ;;  %v4072_v16 = vld [vmem:[%s9100_s16 + $0x28] sm:$0xff]  ;;  %4090 = vmatpush.msrb.mxu3 %v4073_v14  ;;  %v4071_v21 = vld [vmem:[%s9100_s16 + $0x20] sm:$0xff] }
0x17d8   :  { %v3884_v33 = vmul.f32 %v8473_v19, %v3883_v34  ;;  %v3887_v3 = vsub.f32 1.0, %v3886_v49  ;;  %v3448_v19 = vld [vmem:[%s9098_s19 + $0x8] sm:$0xff]  ;;  %v6092_v14 = vld [vmem:[%s9086_s3 + $0x78] sm:$0xff] }
0x17d9   :  { %3960 = vmatpush.msra.mxu2 %v3448_v19  ;;  %4055 = vmatpush.msra.mxu0 %v4030_v46  ;;  %v6317_v19 = vld [vmem:[%s9101_s10 + $0x1] ss:$0 sm:$0xff] }
0x17da   :  { %6078 = vmatmul.msk.f32.vlgmr.msra.gmra.mxu1 %vm626_vm13, %v3884_v33  ;;  %v3888_v35 = vmul.f32 %v6540_v5, %v3887_v3  ;;  %4091 = vmatpush.msrb.mxu3 %v4072_v16  ;;  %v4070_v3 = vld [vmem:[%s9100_s16 + $0x18] sm:$0xff] }
0x17db   :  { %3961 = vmatpush.msra.mxu2 %v3447_v63  ;;  %4056 = vmatpush.msra.mxu0 %v4029_v10  ;;  %v6099_v16 = vld [vmem:[%s9086_s3 + $0x98] sm:$0xff] }
0x17dc   :  { %v3889_v50 = vadd.f32 %v6540_v5, %v3888_v35  ;;  %4092 = vmatpush.msrb.mxu3 %v4071_v21  ;;  %4198 = vmatpush.msrb.mxu1 %v6092_v14  ;;  %v6098_v21 = vld [vmem:[%s9086_s3 + $0x90] sm:$0xff] }
0x17dd   :  { %4057 = vmatpush.msra.mxu0 %v4028_v62  ;;  %4231 = vmatpush.msrb.mxu2 %v6099_v16 }
0x17de   :  { %v3893_v6 = vsel %vm3892_vm6, %v6540_v5, %v3889_v50  ;;  %4093 = vmatpush.msrb.mxu3 %v4070_v3  ;;  %v6104_v3 = vld [vmem:[%s9086_s3 + $0xa8] sm:$0xff] }
0x17df   :  { %v3898_v0 = vsel %vm3895_vm7, %v3897_v28, %v3893_v6  ;;  %v3691_v4 = vpop.f32.mrf.mxu1  ;;  %v6316_v6 = vld [vmem:[%s9101_s10] ss:$0 sm:$0xff]  ;;  %4232 = vmatpush.msrb.mxu2 %v6098_v21  ;;  %v8612_v21 = vld [vmem:[%s9077_s13 + $0x2] ss:$0 sm:$0xff] }
0x17e0   :  { %v3899_v58 = vmul.f32 %v8478_v38, %v3898_v0  ;;  %v3692_v44 = vadd.f32 %v3691_v4, %v8456_v39 }
0x17e2   :  { %6079 = vmatmul.msk.f32.gmra.mxu1 %vm626_vm13, %v3899_v58 }
0x17e7   :  { %v3694_v17 = vpop.f32.mrf.mxu1  ;;  %v3809_v30 = vpop.f32.mrf.mxu0 }
0x17e8   :  { %v3815_v55 = vadd.f32 %v3809_v30, %v3692_v44  ;;  %v3695_v37 = vadd.f32 %v3694_v17, %v8458_v42 }
0x17ef   :  { %v3812_v47 = vpop.f32.mrf.mxu0 }
0x17f0   :  { %v3816_v38 = vadd.f32 %v3812_v47, %v3695_v37 }
0x1857   :  { %v3929_v60 = vpop.f32.mrf.mxu1 }
0x1858   :  { %v3935_v51 = vadd.f32 %v3929_v60, %v3815_v55 }
0x185a   :  { %6080 = vmatmul.msk.f32.vlgmr.msra.gmra.mxu2 %vm363_vm0, %v3935_v51 }
0x185f   :  { %v3932_v40 = vpop.f32.mrf.mxu1 }
0x1860   :  { %v3936_v48 = vadd.f32 %v3932_v40, %v3816_v38  ;;  %v4069_v40 = vld [vmem:[%s9100_s16 + $0x10] sm:$0xff] }
0x1861   :  { %4094 = vmatpush.msrb.mxu3 %v4069_v40 }
0x1862   :  { %6081 = vmatmul.msk.f32.gmra.mxu2 %vm363_vm0, %v3936_v48  ;;  %v4068_v48 = vld [vmem:[%s9100_s16 + $0x8] sm:$0xff] }
0x1863   :  { %4095 = vmatpush.msrb.mxu3 %v4068_v48 }
0x18dd   :  { %v3963_v53 = vpop.f32.mrf.mxu2 }
0x18de   :  { %v3964_v56 = vadd.f32 %v6315_v11, %v3963_v53  ;;  %v6318_v53 = vld [vmem:[#allocation13] ss:$0 sm:$0xff] }
0x18e0   :  { %v8512_v52 = vadd.f32 %v3964_v56, %v8297_v31 }
0x18e2   :  { %v3974_v39 = vsel %vm363_vm0, %v8512_v52, 0.0 }
0x18e3   :  { %3975 = vadd.xlane.f32.xlu1 %v3974_v39 }
0x18e5   :  { %v3966_v45 = vpop.f32.mrf.mxu2 }
0x18e6   :  { %v3967_v43 = vadd.f32 %v6315_v11, %v3966_v45  ;;  %v4067_v11 = vld [vmem:[%s9100_s16] sm:$0xff] }
0x18e7   :  { %4096 = vmatpush.msrb.mxu3 %v4067_v11 }
0x18e8   :  { %v8517_v42 = vadd.f32 %v3967_v43, %v8305_v24 }
0x18ea   :  { %v3977_v41 = vsel %vm363_vm0, %v8517_v42, 0.0 }
0x18eb   :  { %3978 = vadd.xlane.f32.xlu2 %v3977_v41 }
0x1956   :  { %v3976_v25 = vpop.xlane.xlu1 %3975 }
0x1957   :  { %v3980_v31 = vmul.f32 %v3976_v25, %v7321_v12 }
0x1959   :  { %v3982_v27 = vsub.f32 %v8512_v52, %v3980_v31  ;;  %v6319_v31 = vld [vmem:[#allocation15] ss:$0 sm:$0xff] }
0x195b   :  { %v3984_v32 = vmul.f32 %v3982_v27, %v3982_v27 }
0x195d   :  { %v3986_v13 = vsel %vm363_vm0, %v3984_v32, 0.0 }
0x195e   :  { %3987 = vadd.xlane.f32.xlu0 %v3986_v13  ;;  %v3979_v20 = vpop.xlane.xlu2 %3978 }
0x195f   :  { %v3981_v24 = vmul.f32 %v3979_v20, %v7321_v12 }
0x1961   :  { %v3983_v57 = vsub.f32 %v8517_v42, %v3981_v24 }
0x1963   :  { %v3985_v59 = vmul.f32 %v3983_v57, %v3983_v57 }
0x1965   :  { %v3989_v29 = vsel %vm363_vm0, %v3985_v59, 0.0 }
0x1966   :  { %3990 = vadd.xlane.f32.xlu1 %v3989_v29 }
0x19d1   :  { %v3988_v54 = vpop.xlane.xlu0 %3987 }
0x19d2   :  { %v3992_v2 = vmul.f32 %v3988_v54, %v7321_v12 }
0x19d4   :  { %v3994_v7 = vadd.f32 1e-05, %v3992_v2 }
0x19d6   :  { %6541 = vrsqrt.f32 %v3994_v7  ;;  %vm4002_vm8 = vweird.f32 %v3994_v7 }
0x19d9   :  { %v3991_v8 = vpop.xlane.xlu1 %3990 }
0x19da   :  { %v3993_v5 = vmul.f32 %v3991_v8, %v7321_v12  ;;  %v6106_v8 = vld [vmem:[%s9086_s3 + $0xb8] sm:$0xff] }
0x19db   :  { %4264 = vmatpush.msrb.mxu0 %v6106_v8 }
0x19dc   :  { %v6542_v34 = vpop.eup %6541  ;;  %v3995_v33 = vadd.f32 1e-05, %v3993_v5  ;;  %v6091_v5 = vld [vmem:[%s9086_s3 + $0x70] sm:$0xff] }
0x19dd   :  { %v3997_v49 = vmul.f32 %v6542_v34, %v3994_v7  ;;  %vm4003_vm1 = vweird.f32 %v6542_v34  ;;  %4199 = vmatpush.msrb.mxu1 %v6091_v5 }
0x19de   :  { %6543 = vrsqrt.f32 %v3995_v33  ;;  %vm4004_vm14 = vmor %vm4002_vm8, %vm4003_vm1  ;;  %vm4012_vm10 = vweird.f32 %v3995_v33 }
0x19df   :  { %v3998_v1 = vmul.f32 %v6542_v34, %v3997_v49  ;;  %v6090_v49 = vld [vmem:[%s9086_s3 + $0x68] sm:$0xff] }
0x19e0   :  { %4200 = vmatpush.msrb.mxu1 %v6090_v49 }
0x19e1   :  { %v3999_v35 = vmul.f32 0.5, %v3998_v1  ;;  %v6089_v1 = vld [vmem:[%s9086_s3 + $0x60] sm:$0xff] }
0x19e2   :  { %4201 = vmatpush.msrb.mxu1 %v6089_v1 }
0x19e3   :  { %v4000_v9 = vsub.f32 1.5, %v3999_v35  ;;  %v6096_v35 = vld [vmem:[%s9086_s3 + $0x80] sm:$0xff] }
0x19e4   :  { %v6544_v50 = vpop.eup %6543 }
0x19e5   :  { %v4001_v28 = vmul.f32 %v6542_v34, %v4000_v9  ;;  %v4007_v0 = vmul.f32 %v6544_v50, %v3995_v33  ;;  %vm4013_vm9 = vweird.f32 %v6544_v50  ;;  %v6097_v33 = vld [vmem:[%s9086_s3 + $0x88] sm:$0xff]  ;;  %v6103_v9 = vld [vmem:[%s9086_s3 + $0xa0] sm:$0xff] }
0x19e6   :  { %vm4014_vm11 = vmor %vm4012_vm10, %vm4013_vm9  ;;  %4233 = vmatpush.msrb.mxu2 %v6097_v33 }
0x19e7   :  { %v4005_v58 = vsel %vm4004_vm14, %v6542_v34, %v4001_v28  ;;  %v4008_v4 = vmul.f32 %v6544_v50, %v4007_v0  ;;  %v6105_v34 = vld [vmem:[%s9086_s3 + $0xb0] sm:$0xff] }
0x19e8   :  { %v4016_v63 = vmul.f32 %v4005_v58, %v3982_v27  ;;  %4265 = vmatpush.msrb.mxu0 %v6105_v34  ;;  %4234 = vmatpush.msrb.mxu2 %v6096_v35 }
0x19e9   :  { %v4009_v30 = vmul.f32 0.5, %v4008_v4 }
0x19ea   :  { %v4021_v17 = vmul.f32 %v6316_v6, %v4016_v63  ;;  %4266 = vmatpush.msrb.mxu0 %v6104_v3 }
0x19eb   :  { %v4010_v55 = vsub.f32 1.5, %v4009_v30 }
0x19ec   :  { %v4026_v44 = vadd.f32 %v6317_v19, %v4021_v17  ;;  %4267 = vmatpush.msrb.mxu0 %v6103_v9 }
0x19ed   :  { %v4011_v60 = vmul.f32 %v6544_v50, %v4010_v55 }
0x19ee   :  { %6083 = vmatmul.msk.f32.vlgmr.msra.gmra.mxu0 %vm363_vm0, %v4026_v44 }
0x19ef   :  { %v4015_v51 = vsel %vm4014_vm11, %v6544_v50, %v4011_v60 }
0x19f0   :  { %v4017_v47 = vmul.f32 %v4015_v51, %v3983_v57  ;;  %v6320_v51 = vld [vmem:[%s9087_s8 + $0x2] ss:$0 sm:$0xff] }
0x19f2   :  { %v4022_v37 = vmul.f32 %v6316_v6, %v4017_v47 }
0x19f4   :  { %v4027_v38 = vadd.f32 %v6317_v19, %v4022_v37 }
0x19f6   :  { %6084 = vmatmul.msk.f32.gmra.mxu0 %vm363_vm0, %v4027_v38  ;;  %v6321_v38 = vld [vmem:[%s9087_s8 + $0x3] ss:$0 sm:$0xff] }
0x1a6b   :  { %v4059_v56 = vpop.f32.mrf.mxu0 }
0x1a6c   :  { %v4060_v39 = vadd.f32 %v6318_v53, %v4059_v56 }
0x1a6e   :  { %v4065_v45 = vmax.f32 %v4060_v39, 0.0 }
0x1a70   :  { %6085 = vmatmul.msk.f32.vlgmr.msrb.gmra.mxu3 %vm1404_vm3, %v4065_v45 }
0x1a73   :  { %v4062_v43 = vpop.f32.mrf.mxu0 }
0x1a74   :  { %v4063_v41 = vadd.f32 %v6318_v53, %v4062_v43 }
0x1a76   :  { %v4066_v25 = vmax.f32 %v4063_v41, 0.0 }
0x1a78   :  { %6086 = vmatmul.msk.f32.gmra.mxu3 %vm1404_vm3, %v4066_v25 }
0x1af3   :  { %v4098_v27 = vpop.f32.mrf.mxu3 }
0x1af4   :  { %v4104_v32 = vadd.f32 %v4098_v27, %v8512_v52 }
0x1af6   :  { %v8548_v13 = vadd.f32 %v6319_v31, %v4104_v32 }
0x1af8   :  { %v4116_v20 = vsel %vm363_vm0, %v8548_v13, 0.0 }
0x1af9   :  { %4117 = vadd.xlane.f32.xlu2 %v4116_v20  ;;  %v6323_v20 = vld [vmem:[%s9088_s4 + $0x5] ss:$0 sm:$0xff] }
0x1afb   :  { %v4101_v24 = vpop.f32.mrf.mxu3 }
0x1afc   :  { %v4105_v57 = vadd.f32 %v4101_v24, %v8517_v42 }
0x1afe   :  { %v8553_v59 = vadd.f32 %v6319_v31, %v4105_v57 }
0x1b00   :  { %v4119_v29 = vsel %vm363_vm0, %v8553_v59, 0.0 }
0x1b01   :  { %4120 = vadd.xlane.f32.xlu0 %v4119_v29 }
0x1b6c   :  { %v4118_v22 = vpop.xlane.xlu2 %4117 }
0x1b6d   :  { %v4122_v52 = vmul.f32 %v4118_v22, %v7321_v12 }
0x1b6f   :  { %v4124_v46 = vsub.f32 %v8548_v13, %v4122_v52  ;;  %v8593_v52 = vld [vmem:[%s9077_s13] ss:$0 sm:$0xff] }
0x1b71   :  { %v4126_v10 = vmul.f32 %v4124_v46, %v4124_v46 }
0x1b73   :  { %v4128_v62 = vsel %vm363_vm0, %v4126_v10, 0.0 }
0x1b74   :  { %4129 = vadd.xlane.f32.xlu1 %v4128_v62  ;;  %v4121_v42 = vpop.xlane.xlu0 %4120  ;;  %v6324_v62 = vld [vmem:[%s9088_s4 + $0x4] ss:$0 sm:$0xff] }
0x1b75   :  { %v4123_v54 = vmul.f32 %v4121_v42, %v7321_v12  ;;  %v6322_v42 = vld [vmem:[%s9088_s4 + $0x3] ss:$0 sm:$0xff] }
0x1b77   :  { %v8562_v2 = vsub.f32 %v8553_v59, %v4123_v54 }
0x1b79   :  { %v4127_v7 = vmul.f32 %v8562_v2, %v8562_v2 }
0x1b7b   :  { %v4131_v26 = vsel %vm363_vm0, %v4127_v7, 0.0 }
0x1b7c   :  { %4132 = vadd.xlane.f32.xlu2 %v4131_v26 }
0x1be7   :  { %v4130_v50 = vpop.xlane.xlu1 %4129 }
0x1be8   :  { %v4134_v28 = vmul.f32 %v4130_v50, %v7321_v12 }
0x1bea   :  { %v4136_v6 = vadd.f32 1e-05, %v4134_v28 }
0x1bec   :  { %6545 = vrsqrt.f32 %v4136_v6  ;;  %vm4144_vm4 = vweird.f32 %v4136_v6 }
0x1bef   :  { %v4133_v0 = vpop.xlane.xlu2 %4132 }
0x1bf0   :  { %v4135_v58 = vmul.f32 %v4133_v0, %v7321_v12 }
0x1bf2   :  { %v6546_v19 = vpop.eup %6545  ;;  %v4137_v4 = vadd.f32 1e-05, %v4135_v58 }
0x1bf3   :  { %v4139_v63 = vmul.f32 %v6546_v19, %v4136_v6  ;;  %vm4145_vm15 = vweird.f32 %v6546_v19 }
0x1bf4   :  { %6547 = vrsqrt.f32 %v4137_v4  ;;  %vm4146_vm5 = vmor %vm4144_vm4, %vm4145_vm15  ;;  %vm4154_vm7 = vweird.f32 %v4137_v4 }
0x1bf5   :  { %v4140_v17 = vmul.f32 %v6546_v19, %v4139_v63 }
0x1bf7   :  { %v4141_v30 = vmul.f32 0.5, %v4140_v17 }
0x1bf9   :  { %v4142_v44 = vsub.f32 1.5, %v4141_v30 }
0x1bfa   :  { %v6548_v55 = vpop.eup %6547 }
0x1bfb   :  { %v4143_v60 = vmul.f32 %v6546_v19, %v4142_v44  ;;  %v4149_v47 = vmul.f32 %v6548_v55, %v4137_v4  ;;  %vm4155_vm6 = vweird.f32 %v6548_v55 }
0x1bfc   :  { %vm4156_vm1 = vmor %vm4154_vm7, %vm4155_vm6 }
0x1bfd   :  { %v4147_v37 = vsel %vm4146_vm5, %v6546_v19, %v4143_v60  ;;  %v4150_v48 = vmul.f32 %v6548_v55, %v4149_v47  ;;  %v8641_v19 = vld [vmem:[%s9089_s21] sm:$0xff] }
0x1bfe   :  { %v4158_v40 = vmul.f32 %v4147_v37, %v4124_v46 }
0x1bff   :  { %v4151_v53 = vmul.f32 0.5, %v4150_v48 }
0x1c00   :  { %v4163_v11 = vmul.f32 %v6320_v51, %v4158_v40 }
0x1c01   :  { %v4152_v39 = vsub.f32 1.5, %v4151_v53 }
0x1c02   :  { %v4168_v56 = vadd.f32 %v6321_v38, %v4163_v11 }
0x1c03   :  { %v4153_v45 = vmul.f32 %v6548_v55, %v4152_v39 }
0x1c04   :  { %6094 = vmatmul.msk.f32.vlgmr.msrb.gmra.mxu1 %vm363_vm0, %v4168_v56  ;;  %6101 = vmatmul.msk.f32.vlgmr.msrb.gmra.mxu2 %vm363_vm0, %v4168_v56 }
0x1c05   :  { %6108 = vmatmul.msk.f32.vlgmr.msrb.gmra.mxu0 %vm363_vm0, %v4168_v56  ;;  %v4157_v43 = vsel %vm4156_vm1, %v6548_v55, %v4153_v45  ;;  %v8646_v55 = vld [vmem:[%s9089_s21 + $0x8] sm:$0xff] }
0x1c06   :  { %v4159_v41 = vmul.f32 %v4157_v43, %v8562_v2  ;;  %v8599_v2 = vld [vmem:[%s9077_s13 + $0x1] ss:$0 sm:$0xff] }
0x1c08   :  { %v4164_v25 = vmul.f32 %v6320_v51, %v4159_v41 }
0x1c0a   :  { %v4169_v31 = vadd.f32 %v6321_v38, %v4164_v25 }
0x1c0c   :  { %6095 = vmatmul.msk.f32.gmra.mxu1 %vm363_vm0, %v4169_v31  ;;  %6102 = vmatmul.msk.f32.gmra.mxu2 %vm363_vm0, %v4169_v31 }
0x1c0d   :  { %6109 = vmatmul.msk.f32.gmra.mxu0 %vm363_vm0, %v4169_v31 }
0x1c81   :  { %v4203_v10 = vpop.f32.mrf.mxu1 }
0x1c82   :  { %v4269_v27 = vpop.f32.mrf.mxu0  ;;  %v8606_v8 = vadd.f32 %v6322_v42, %v4203_v10 }
0x1c83   :  { %v4270_v57 = vadd.f32 %v6323_v20, %v4269_v27 }
0x1c84   :  { %v4282_v49 = vmul.f32 %v8593_v52, %v8606_v8  ;;  %v4373_v33 = vmul.f32 %v8599_v2, %v8606_v8  ;;  %v4516_v28 = vmul.f32 %v8612_v21, %v8606_v8 }
0x1c85   :  { %v4456_v7 = vmul.f32 %v8599_v2, %v4270_v57  ;;  %v4371_v26 = vmul.f32 %v8593_v52, %v4270_v57  ;;  %v4715_v16 = vmul.f32 %v8448_v15, %v4270_v57  ;;  %v4599_v1 = vmul.f32 %v8612_v21, %v4270_v57 }
0x1c87   :  { %v4236_v32 = vpop.f32.mrf.mxu2 }
0x1c88   :  { %v4237_v5 = vadd.f32 %v6324_v62, %v4236_v32 }
0x1c89   :  { %v4206_v3 = vpop.f32.mrf.mxu1 }
0x1c8a   :  { %v4272_v24 = vpop.f32.mrf.mxu0  ;;  %v8625_v35 = vadd.f32 %v6322_v42, %v4206_v3 }
0x1c8b   :  { %v4273_v29 = vadd.f32 %v6323_v20, %v4272_v24 }
0x1c8c   :  { %v4283_v9 = vmul.f32 %v8593_v52, %v8625_v35  ;;  %v4374_v50 = vmul.f32 %v8599_v2, %v8625_v35  ;;  %v4517_v6 = vmul.f32 %v8612_v21, %v8625_v35 }
0x1c8d   :  { %v4457_v22 = vmul.f32 %v8366_v61, %v4273_v29  ;;  %v4372_v46 = vmul.f32 %v8593_v52, %v4273_v29  ;;  %v4716_v61 = vmul.f32 %v8448_v15, %v4273_v29  ;;  %v4600_v34 = vmul.f32 %v8612_v21, %v4273_v29 }
0x1c8f   :  { %4478 = vmatpush.msra.mxu2 %v4457_v22  ;;  %4507 = vmatpush.msra.mxu0 %v4372_v46  ;;  %v4239_v54 = vpop.f32.mrf.mxu2 }
0x1c90   :  { %v4240_v14 = vadd.f32 %v6324_v62, %v4239_v54 }
0x1c91   :  { %4479 = vmatpush.msra.mxu2 %v4456_v7  ;;  %4508 = vmatpush.msra.mxu0 %v4371_v26 }
0x1c92   :  { %6114 = vmatpush.xpose.msk.msra.mxu3 %vm363_vm0, %v4240_v14  ;;  %6118 = vmatpush.xpose.msk.msra.mxu1 %vm363_vm0, %v4240_v14 }
0x1c93   :  { %4737 = vmatpush.msrb.mxu0 %v4716_v61  ;;  %6132 = vmatpush.xpose.msk.msrb.mxu2 %vm363_vm0, %v4240_v14 }
0x1c95   :  { %4738 = vmatpush.msrb.mxu0 %v4715_v16 }
0x1c96   :  { %6115 = vmatpush.xpose.msk.msra.mxu3 %vm363_vm0, %v4237_v5  ;;  %6119 = vmatpush.xpose.msk.msra.mxu1 %vm363_vm0, %v4237_v5 }
0x1c97   :  { %6133 = vmatpush.xpose.msk.msrb.mxu2 %vm363_vm0, %v4237_v5 }
0x1c99   :  { %6116 = vmatmul.msk.f32.vlgmr.msra.gmra.mxu3 %vm363_vm0, %v4282_v49  ;;  %6120 = vmatmul.msk.f32.vlgmr.msra.gmra.mxu1 %vm363_vm0, %v4373_v33 }
0x1c9a   :  { %6126 = vmatpush.xpose.msk.msrb.mxu3 %vm363_vm0, %v4240_v14  ;;  %4621 = vmatpush.msrb.mxu1 %v4600_v34 }
0x1c9c   :  { %4622 = vmatpush.msrb.mxu1 %v4599_v1 }
0x1c9e   :  { %6127 = vmatpush.xpose.msk.msrb.mxu3 %vm363_vm0, %v4237_v5 }
0x1ca1   :  { %6117 = vmatmul.msk.f32.gmra.mxu3 %vm363_vm0, %v4283_v9  ;;  %6121 = vmatmul.msk.f32.gmra.mxu1 %vm363_vm0, %v4374_v50 }
0x1ca9   :  { %6128 = vmatmul.msk.f32.vlgmr.msrb.gmra.mxu3 %vm363_vm0, %v4516_v28 }
0x1cb1   :  { %6129 = vmatmul.msk.f32.gmra.mxu3 %vm363_vm0, %v4517_v6 }
0x1d16   :  { %v4398_v0 = vpop.f32.mrf.mxu1 }
0x1d17   :  { %v4404_v58 = vmul.f32 0.35355338, %v4398_v0 }
0x1d19   :  { %v4406_v63 = vadd.f32 %v8641_v19, %v4404_v58 }
0x1d1b   :  { %v4408_v4 = vsel %vm2814_vm2, %v4406_v63, -inf }
0x1d1c   :  { %4409 = vmax.xlane.f32.xlu0 %v4408_v4  ;;  %v4313_v44 = vpop.f32.mrf.mxu3 }
0x1d1d   :  { %v4319_v51 = vmul.f32 0.35355338, %v4313_v44 }
0x1d1e   :  { %v4401_v17 = vpop.f32.mrf.mxu1 }
0x1d1f   :  { %v4405_v30 = vmul.f32 0.35355338, %v4401_v17  ;;  %v8651_v37 = vadd.f32 %v8641_v19, %v4319_v51 }
0x1d21   :  { %v4407_v60 = vadd.f32 %v8646_v55, %v4405_v30  ;;  %v4323_v38 = vsel %vm2814_vm2, %v8651_v37, -inf  ;;  %v6151_v30 = vld [vmem:[%s9091_s2 + $0x58] sm:$0xff] }
0x1d23   :  { %v4411_v47 = vsel %vm2814_vm2, %v4407_v60, -inf }
0x1d24   :  { %4412 = vmax.xlane.f32.xlu1 %v4411_v47  ;;  %v4316_v40 = vpop.f32.mrf.mxu3 }
0x1d25   :  { %v4320_v25 = vmul.f32 0.35355338, %v4316_v40  ;;  %v6150_v40 = vld [vmem:[%s9091_s2 + $0x50] sm:$0xff] }
0x1d27   :  { %v4322_v27 = vadd.f32 %v8646_v55, %v4320_v25 }
0x1d29   :  { %v4326_v22 = vsel %vm2814_vm2, %v4322_v27, -inf }
0x1d2c   :  { %4324 = vmax.xlane.f32.xlu1 %v4323_v38  ;;  %v4541_v56 = vpop.f32.mrf.mxu3 }
0x1d2d   :  { %v4547_v24 = vmul.f32 0.35355338, %v4541_v56 }
0x1d2f   :  { %v8663_v46 = vadd.f32 %v8641_v19, %v4547_v24 }
0x1d31   :  { %v4551_v62 = vsel %vm2814_vm2, %v8663_v46, -inf }
0x1d34   :  { %v4544_v32 = vpop.f32.mrf.mxu3 }
0x1d35   :  { %v4548_v57 = vmul.f32 0.35355338, %v4544_v32  ;;  %v8688_v32 = vld [vmem:[%s9077_s13 + $0x3] ss:$0 sm:$0xff] }
0x1d37   :  { %v4550_v10 = vadd.f32 %v8646_v55, %v4548_v57  ;;  %v6113_v57 = vld [vmem:[%s9090_s22 + $0x38] sm:$0xff] }
0x1d38   :  { %4769 = vmatpush.msra.mxu3 %v6113_v57 }
0x1d39   :  { %v4554_v42 = vsel %vm2814_vm2, %v4550_v10, -inf }
0x1d8f   :  { %v4410_v48 = vpop.xlane.xlu0 %4409 }
0x1d90   :  { %v4414_v11 = vsub.f32 %v4406_v63, %v4410_v48 }
0x1d92   :  { %v4416_v53 = vmul.f32 1.442695, %v4414_v11 }
0x1d94   :  { %6549 = vpow2.f32 %v4416_v53  ;;  %v6149_v53 = vld [vmem:[%s9091_s2 + $0x48] sm:$0xff] }
0x1d97   :  { %v4413_v39 = vpop.xlane.xlu1 %4412 }
0x1d98   :  { %v4415_v45 = vsub.f32 %v4407_v60, %v4413_v39 }
0x1d9a   :  { %v6550_v43 = vpop.eup %6549  ;;  %v4418_v41 = vmul.f32 1.442695, %v4415_v45  ;;  %v6148_v45 = vld [vmem:[%s9091_s2 + $0x40] sm:$0xff] }
0x1d9b   :  { %v4420_v31 = vsel %vm2814_vm2, %v6550_v43, 0.0 }
0x1d9c   :  { %6551 = vpow2.f32 %v4418_v41  ;;  %4421 = vadd.xlane.f32.xlu2 %v4420_v31 }
0x1d9f   :  { %v4325_v24 = vpop.xlane.xlu1 %4324 }
0x1da2   :  { %v8657_v20 = vpop.eup %6551 }
0x1da3   :  { %v4423_v29 = vsel %vm2814_vm2, %v8657_v20, 0.0 }
0x1da4   :  { %4424 = vadd.xlane.f32.xlu0 %v4423_v29  ;;  %4327 = vmax.xlane.f32.xlu2 %v4326_v22  ;;  %v6112_v29 = vld [vmem:[%s9090_s22 + $0x30] sm:$0xff]  ;;  %v4329_v22 = vsub.f32 %v8651_v37, %v4325_v24 }
0x1da5   :  { %4770 = vmatpush.msra.mxu3 %v6112_v29 }
0x1dac   :  { %4552 = vmax.xlane.f32.xlu0 %v4551_v62  ;;  %4555 = vmax.xlane.f32.xlu2 %v4554_v42 }
0x1e0f   :  { %v4422_v54 = vpop.xlane.xlu2 %4421 }
0x1e10   :  { %6553 = vrcp.f32 %v4422_v54  ;;  %v4437_v34 = vand.u32 2147483648, %v4422_v54  ;;  %v4435_v33 = vand.u32 2147483647, %v4422_v54  ;;  %vm4431_vm14 = vweird.f32 %v4422_v54 }
0x1e12   :  { %v4438_v50 = vor.u32 1.1754944e-38, %v4437_v34  ;;  %vm4436_vm10 = vcmp.eq.f32.partialorder %v4435_v33, 8.507059e+37 }
0x1e16   :  { %v6554_v7 = vpop.eup %6553 }
0x1e17   :  { %v4427_v26 = vmul.f32 %v6554_v7, %v4422_v54  ;;  %v4425_v14 = vpop.xlane.xlu0 %4424  ;;  %v4328_v61 = vpop.xlane.xlu2 %4327  ;;  %vm4432_vm8 = vweird.f32 %v6554_v7 }
0x1e18   :  { %6555 = vrcp.f32 %v4425_v14  ;;  %v4330_v5 = vsub.f32 %v4322_v27, %v4328_v61  ;;  %vm4433_vm9 = vmor %vm4431_vm14, %vm4432_vm8  ;;  %v4452_v44 = vand.u32 2147483648, %v4425_v14  ;;  %v4450_v38 = vand.u32 2147483647, %v4425_v14 }
0x1e19   :  { %v4428_v16 = vsub.f32 1.0, %v4427_v26  ;;  %vm4446_vm15 = vweird.f32 %v4425_v14  ;;  %v4632_v27 = vmul.f32 %v8448_v15, %v8606_v8 }
0x1e1a   :  { %v4333_v3 = vmul.f32 1.442695, %v4330_v5  ;;  %v4453_v56 = vor.u32 1.1754944e-38, %v4452_v44  ;;  %vm4451_vm5 = vcmp.eq.f32.partialorder %v4450_v38, 8.507059e+37  ;;  %v6143_v44 = vld [vmem:[%s9092_s7 + $0x28] sm:$0xff] }
0x1e1b   :  { %v4429_v49 = vmul.f32 %v6554_v7, %v4428_v16 }
0x1e1c   :  { %6557 = vpow2.f32 %v4333_v3 }
0x1e1d   :  { %v4430_v1 = vadd.f32 %v6554_v7, %v4429_v49 }
0x1e1e   :  { %v6556_v9 = vpop.eup %6555 }
0x1e1f   :  { %v4434_v28 = vsel %vm4433_vm9, %v6554_v7, %v4430_v1  ;;  %v4442_v6 = vmul.f32 %v6556_v9, %v4425_v14  ;;  %v4556_v0 = vpop.xlane.xlu2 %4555  ;;  %vm4447_vm11 = vweird.f32 %v6556_v9  ;;  %v4553_v42 = vpop.xlane.xlu0 %4552  ;;  %v6110_v7 = vld [vmem:[%s9090_s22 + $0x20] sm:$0xff] }
0x1e20   :  { %v4439_v58 = vsel %vm4436_vm10, %v4438_v50, %v4434_v28  ;;  %v4558_v63 = vsub.f32 %v4550_v10, %v4556_v0  ;;  %vm4448_vm4 = vmor %vm4446_vm15, %vm4447_vm11  ;;  %v4331_v10 = vmul.f32 1.442695, %v4329_v22  ;;  %v4557_v14 = vsub.f32 %v8663_v46, %v4553_v42 }
0x1e21   :  { %v4440_v4 = vmul.f32 %v6550_v43, %v4439_v58  ;;  %v4443_v17 = vsub.f32 1.0, %v4442_v6 }
0x1e22   :  { %v4561_v60 = vmul.f32 1.442695, %v4558_v63  ;;  %v8670_v51 = vpop.eup %6557  ;;  %v4559_v16 = vmul.f32 1.442695, %v4557_v14  ;;  %v6145_v63 = vld [vmem:[%s9092_s7 + $0x38] sm:$0xff] }
0x1e23   :  { %v4444_v47 = vmul.f32 %v6556_v9, %v4443_v17  ;;  %6122 = vmatmul.msk.f32.vlgmr.msra.gmra.mxu2 %vm2814_vm2, %v4440_v4  ;;  %v4338_v48 = vsel %vm2814_vm2, %v8670_v51, 0.0  ;;  %4868 = vmatpush.msra.mxu1 %v6145_v63  ;;  %v6144_v4 = vld [vmem:[%s9092_s7 + $0x30] sm:$0xff] }
0x1e24   :  { %4901 = vmatpush.msra.mxu2 %v6151_v30  ;;  %6559 = vpow2.f32 %v4561_v60  ;;  %4339 = vadd.xlane.f32.xlu2 %v4338_v48  ;;  %v6142_v60 = vld [vmem:[%s9092_s7 + $0x20] sm:$0xff] }
0x1e25   :  { %v4445_v11 = vadd.f32 %v6556_v9, %v4444_v47  ;;  %6561 = vpow2.f32 %v4331_v10  ;;  %4869 = vmatpush.msra.mxu1 %v6144_v4 }
0x1e26   :  { %4902 = vmatpush.msra.mxu2 %v6150_v40  ;;  %6563 = vpow2.f32 %v4559_v16 }
0x1e27   :  { %v4449_v39 = vsel %vm4448_vm4, %v6556_v9, %v4445_v11  ;;  %4870 = vmatpush.msra.mxu1 %v6143_v44 }
0x1e28   :  { %v4454_v43 = vsel %vm4451_vm5, %v4453_v56, %v4449_v39  ;;  %4903 = vmatpush.msra.mxu2 %v6149_v53 }
0x1e29   :  { %v4455_v41 = vmul.f32 %v8657_v20, %v4454_v43  ;;  %v4633_v20 = vmul.f32 %v8688_v32, %v8625_v35  ;;  %v6111_v35 = vld [vmem:[%s9090_s22 + $0x28] sm:$0xff]  ;;  %4871 = vmatpush.msra.mxu1 %v6142_v60 }
0x1e2a   :  { %4904 = vmatpush.msra.mxu2 %v6148_v45  ;;  %v8679_v25 = vpop.eup %6559  ;;  %4771 = vmatpush.msra.mxu3 %v6111_v35 }
0x1e2b   :  { %6123 = vmatmul.msk.f32.gmra.mxu2 %vm2814_vm2, %v4455_v41  ;;  %v4566_v31 = vsel %vm2814_vm2, %v8679_v25, 0.0  ;;  %v8711_v34 = vpop.eup %6561 }
0x1e2c   :  { %4567 = vadd.xlane.f32.xlu2 %v4566_v31  ;;  %4772 = vmatpush.msra.mxu3 %v6110_v7  ;;  %v4335_v33 = vsel %vm2814_vm2, %v8711_v34, 0.0  ;;  %v8717_v3 = vpop.eup %6563 }
0x1e2d   :  { %v4563_v1 = vsel %vm2814_vm2, %v8717_v3, 0.0 }
0x1e33   :  { %6134 = vmatmul.msk.f32.vlgmr.msrb.gmra.mxu2 %vm363_vm0, %v4632_v27 }
0x1e3b   :  { %6135 = vmatmul.msk.f32.gmra.mxu2 %vm363_vm0, %v4633_v20 }
0x1e43   :  { %6153 = vmatmul.msk.f32.vlgmr.msra.gmra.mxu2 %vm363_vm0, %v8287_v23 }
0x1e4b   :  { %6154 = vmatmul.msk.f32.gmra.mxu2 %vm363_vm0, %v8330_v18 }
0x1e53   :  { %6155 = vmatmul.msk.f32.gmra.mxu2 %vm363_vm0, %v8338_v36 }
0x1e97   :  { %v8734_v58 = vpop.xlane.xlu2 %4339 }
0x1e98   :  { %6565 = vrcp.f32 %v8734_v58  ;;  %vm4361_vm9 = vweird.f32 %v8734_v58 }
0x1e9e   :  { %v6566_v40 = vpop.eup %6565 }
0x1e9f   :  { %v8741_v38 = vpop.xlane.xlu2 %4567  ;;  %v4357_v39 = vmul.f32 %v6566_v40, %v8734_v58  ;;  %vm4362_vm1 = vweird.f32 %v6566_v40 }
0x1ea0   :  { %vm8759_vm10 = vmor %vm4361_vm9, %vm4362_vm1  ;;  %vm4589_vm1 = vweird.f32 %v8741_v38 }
0x1ea1   :  { %v4358_v31 = vsub.f32 1.0, %v4357_v39 }
0x1ea3   :  { %v4359_v29 = vmul.f32 %v6566_v40, %v4358_v31  ;;  %v6157_v31 = vld [vmem:[%s9091_s2 + $0x68] sm:$0xff] }
0x1ea5   :  { %v4360_v14 = vadd.f32 %v6566_v40, %v4359_v29 }
0x1ea6   :  { %v8699_v15 = vpop.f32.mrf.mxu2 }
0x1eae   :  { %v8701_v8 = vpop.f32.mrf.mxu2 }
0x1eb6   :  { %v4657_v62 = vpop.f32.mrf.mxu2 }
0x1eb7   :  { %v4663_v54 = vmul.f32 0.35355338, %v4657_v62 }
0x1eb9   :  { %v4665_v26 = vadd.f32 %v8641_v19, %v4663_v54 }
0x1ebb   :  { %v4667_v61 = vsel %vm2814_vm2, %v4665_v26, -inf }
0x1ebc   :  { %4668 = vmax.xlane.f32.xlu1 %v4667_v61 }
0x1ebe   :  { %v4660_v5 = vpop.f32.mrf.mxu2 }
0x1ebf   :  { %v4664_v37 = vmul.f32 0.35355338, %v4660_v5 }
0x1ec1   :  { %v4666_v49 = vadd.f32 %v8646_v55, %v4664_v37  ;;  %v6325_v55 = vld [vmem:[%s9094_s12 + $0x2] ss:$0 sm:$0xff] }
0x1ec3   :  { %v4670_v19 = vsel %vm2814_vm2, %v4666_v49, -inf }
0x1ec4   :  { %4336 = vadd.xlane.f32.xlu1 %v4335_v33  ;;  %4671 = vmax.xlane.f32.xlu0 %v4670_v19 }
0x1ec6   :  { %v4906_v46 = vpop.f32.mrf.mxu2 }
0x1ec7   :  { %v8730_v0 = vadd.f32 %v6325_v55, %v4906_v46  ;;  %v4365_v46 = vand.u32 2147483647, %v8734_v58 }
0x1ec9   :  { %vm4366_vm15 = vcmp.eq.f32.partialorder %v4365_v46, 8.507059e+37 }
0x1ecc   :  { %4564 = vadd.xlane.f32.xlu0 %v4563_v1 }
0x1ece   :  { %v4909_v9 = vpop.f32.mrf.mxu2 }
0x1ecf   :  { %v8726_v6 = vadd.f32 %v6325_v55, %v4909_v9 }
0x1ed6   :  { %v4912_v50 = vpop.f32.mrf.mxu2 }
0x1ed7   :  { %v8722_v28 = vadd.f32 %v6325_v55, %v4912_v50  ;;  %v4364_v50 = vsel %vm8759_vm10, %v6566_v40, %v4360_v14  ;;  %v4595_v40 = vand.u32 2147483648, %v8741_v38 }
0x1ed9   :  { %6168 = vmatpush.xpose.msk.msrb.mxu3 %vm363_vm0, %v8722_v28 }
0x1edd   :  { %6169 = vmatpush.xpose.msk.msrb.mxu3 %vm363_vm0, %v8726_v6 }
0x1ee1   :  { %6170 = vmatpush.xpose.msk.msrb.mxu3 %vm363_vm0, %v8730_v0 }
0x1f2f   :  { %v4669_v17 = vpop.xlane.xlu1 %4668 }
0x1f30   :  { %v4673_v30 = vsub.f32 %v4665_v26, %v4669_v17 }
0x1f32   :  { %v4675_v47 = vmul.f32 1.442695, %v4673_v30 }
0x1f34   :  { %6567 = vpow2.f32 %v4675_v47 }
0x1f37   :  { %v4337_v48 = vpop.xlane.xlu1 %4336  ;;  %v4672_v11 = vpop.xlane.xlu0 %4671 }
0x1f38   :  { %6569 = vrcp.f32 %v4337_v48  ;;  %v4674_v53 = vsub.f32 %v4666_v49, %v4672_v11  ;;  %v4352_v35 = vand.u32 2147483648, %v4337_v48  ;;  %v4350_v42 = vand.u32 2147483647, %v4337_v48 }
0x1f39   :  { %6571 = vrcp.f32 %v8741_v38  ;;  %vm4346_vm7 = vweird.f32 %v4337_v48  ;;  %v4367_v49 = vand.u32 2147483648, %v8734_v58  ;;  %v4593_v11 = vand.u32 2147483647, %v8741_v38 }
0x1f3a   :  { %v8743_v56 = vpop.eup %6567  ;;  %v4677_v45 = vmul.f32 1.442695, %v4674_v53  ;;  %v4353_v61 = vor.u32 1.1754944e-38, %v4352_v35  ;;  %vm4351_vm14 = vcmp.eq.f32.partialorder %v4350_v42, 8.507059e+37 }
0x1f3b   :  { %v4679_v43 = vsel %vm2814_vm2, %v8743_v56, 0.0  ;;  %v4368_v30 = vor.u32 1.1754944e-38, %v4367_v49 }
0x1f3c   :  { %4680 = vadd.xlane.f32.xlu1 %v4679_v43  ;;  %6573 = vpow2.f32 %v4677_v45  ;;  %v4596_v43 = vor.u32 1.1754944e-38, %v4595_v40 }
0x1f3d   :  { %v4369_v60 = vsel %vm4366_vm15, %v4368_v30, %v4364_v50 }
0x1f3e   :  { %v6570_v41 = vpop.eup %6569  ;;  %v4370_v39 = vmul.f32 %v8670_v51, %v4369_v60 }
0x1f3f   :  { %v4342_v27 = vmul.f32 %v6570_v41, %v4337_v48  ;;  %v4565_v20 = vpop.xlane.xlu0 %4564  ;;  %v8749_v24 = vpop.eup %6571  ;;  %vm4347_vm6 = vweird.f32 %v6570_v41 }
0x1f40   :  { %6575 = vrcp.f32 %v4565_v20  ;;  %v4585_v10 = vmul.f32 %v8749_v24, %v8741_v38  ;;  %vm4348_vm8 = vmor %vm4346_vm7, %vm4347_vm6  ;;  %v4580_v55 = vand.u32 2147483648, %v4565_v20  ;;  %v4578_v17 = vand.u32 2147483647, %v4565_v20 }
0x1f41   :  { %v4343_v57 = vsub.f32 1.0, %v4342_v27  ;;  %vm4574_vm4 = vweird.f32 %v4565_v20  ;;  %vm4590_vm6 = vweird.f32 %v8749_v24  ;;  %v6156_v27 = vld [vmem:[%s9091_s2 + $0x60] sm:$0xff] }
0x1f42   :  { %v8751_v22 = vpop.eup %6573  ;;  %v4586_v16 = vsub.f32 1.0, %v4585_v10  ;;  %v4581_v58 = vor.u32 1.1754944e-38, %v4580_v55  ;;  %vm4579_vm7 = vcmp.eq.f32.partialorder %v4578_v17, 8.507059e+37 }
0x1f43   :  { %v4344_v62 = vmul.f32 %v6570_v41, %v4343_v57  ;;  %v4682_v54 = vsel %vm2814_vm2, %v8751_v22, 0.0 }
0x1f44   :  { %4683 = vadd.xlane.f32.xlu0 %v4682_v54  ;;  %v4587_v63 = vmul.f32 %v8749_v24, %v4586_v16 }
0x1f45   :  { %v4345_v7 = vadd.f32 %v6570_v41, %v4344_v62 }
0x1f46   :  { %v6576_v26 = vpop.eup %6575 }
0x1f47   :  { %v4349_v5 = vsel %vm4348_vm8, %v6570_v41, %v4345_v7  ;;  %v4570_v37 = vmul.f32 %v6576_v26, %v4565_v20  ;;  %vm4575_vm11 = vweird.f32 %v6576_v26  ;;  %vm4591_vm8 = vmor %vm4589_vm1, %vm4590_vm6  ;;  %v6158_v41 = vld [vmem:[%s9091_s2 + $0x70] sm:$0xff] }
0x1f48   :  { %v4354_v33 = vsel %vm4351_vm14, %v4353_v61, %v4349_v5  ;;  %vm4576_vm5 = vmor %vm4574_vm4, %vm4575_vm11  ;;  %vm4594_vm14 = vcmp.eq.f32.partialorder %v4593_v11, 8.507059e+37 }
0x1f49   :  { %v4355_v1 = vmul.f32 %v8711_v34, %v4354_v33  ;;  %v4571_v9 = vsub.f32 1.0, %v4570_v37  ;;  %v4588_v34 = vadd.f32 %v8749_v24, %v4587_v63 }
0x1f4b   :  { %v4572_v4 = vmul.f32 %v6576_v26, %v4571_v9  ;;  %6124 = vmatmul.msk.f32.vlgmr.msra.gmra.mxu0 %vm2814_vm2, %v4355_v1  ;;  %v4592_v45 = vsel %vm4591_vm8, %v8749_v24, %v4588_v34 }
0x1f4c   :  { %v4597_v38 = vsel %vm4594_vm14, %v4596_v43, %v4592_v45 }
0x1f4d   :  { %v4573_v44 = vadd.f32 %v6576_v26, %v4572_v4  ;;  %v4598_v51 = vmul.f32 %v8679_v25, %v4597_v38 }
0x1f4f   :  { %v4577_v47 = vsel %vm4576_vm5, %v6576_v26, %v4573_v44 }
0x1f50   :  { %v4582_v48 = vsel %vm4579_vm7, %v4581_v58, %v4577_v47  ;;  %v6326_v47 = vld [vmem:[%s9094_s12 + $0x3] ss:$0 sm:$0xff] }
0x1f51   :  { %v4583_v53 = vmul.f32 %v8717_v3, %v4582_v48  ;;  %v6159_v3 = vld [vmem:[%s9091_s2 + $0x78] sm:$0xff] }
0x1f52   :  { %4937 = vmatpush.msra.mxu0 %v6159_v3 }
0x1f53   :  { %6125 = vmatmul.msk.f32.gmra.mxu0 %vm2814_vm2, %v4370_v39  ;;  %6130 = vmatmul.msk.f32.vlgmr.msrb.gmra.mxu1 %vm2814_vm2, %v4583_v53 }
0x1f54   :  { %6173 = vmatpush.xpose.msk.msrb.mxu1 %vm363_vm0, %v8722_v28  ;;  %4938 = vmatpush.msra.mxu0 %v6158_v41 }
0x1f56   :  { %4939 = vmatpush.msra.mxu0 %v6157_v31 }
0x1f58   :  { %6174 = vmatpush.xpose.msk.msrb.mxu1 %vm363_vm0, %v8726_v6  ;;  %4940 = vmatpush.msra.mxu0 %v6156_v27 }
0x1f5b   :  { %6131 = vmatmul.msk.f32.gmra.mxu1 %vm2814_vm2, %v4598_v51  ;;  %v6327_v51 = vld [vmem:[#allocation9 + $0x1] ss:$0 sm:$0xff] }
0x1f5c   :  { %6175 = vmatpush.xpose.msk.msrb.mxu1 %vm363_vm0, %v8730_v0 }
0x1faf   :  { %v4681_v20 = vpop.xlane.xlu1 %4680 }
0x1fb0   :  { %6577 = vrcp.f32 %v4681_v20  ;;  %v4696_v25 = vand.u32 2147483648, %v4681_v20  ;;  %v4694_v62 = vand.u32 2147483647, %v4681_v20  ;;  %vm4690_vm10 = vweird.f32 %v4681_v20 }
0x1fb2   :  { %v4697_v54 = vor.u32 1.1754944e-38, %v4696_v25  ;;  %vm4695_vm15 = vcmp.eq.f32.partialorder %v4694_v62, 8.507059e+37 }
0x1fb6   :  { %v6578_v24 = vpop.eup %6577 }
0x1fb7   :  { %v4686_v57 = vmul.f32 %v6578_v24, %v4681_v20  ;;  %v4684_v29 = vpop.xlane.xlu0 %4683  ;;  %vm4691_vm9 = vweird.f32 %v6578_v24 }
0x1fb8   :  { %6579 = vrcp.f32 %v4684_v29  ;;  %vm4692_vm11 = vmor %vm4690_vm10, %vm4691_vm9  ;;  %v4711_v37 = vand.u32 2147483648, %v4684_v29  ;;  %v4709_v33 = vand.u32 2147483647, %v4684_v29  ;;  %vm4705_vm5 = vweird.f32 %v4684_v29 }
0x1fb9   :  { %v4687_v35 = vsub.f32 1.0, %v4686_v57 }
0x1fba   :  { %v4712_v46 = vor.u32 1.1754944e-38, %v4711_v37  ;;  %vm4710_vm7 = vcmp.eq.f32.partialorder %v4709_v33, 8.507059e+37 }
0x1fbb   :  { %v4688_v10 = vmul.f32 %v6578_v24, %v4687_v35 }
0x1fbd   :  { %v4689_v42 = vadd.f32 %v6578_v24, %v4688_v10 }
0x1fbe   :  { %v6580_v7 = vpop.eup %6579 }
0x1fbf   :  { %v4693_v26 = vsel %vm4692_vm11, %v6578_v24, %v4689_v42  ;;  %v4701_v61 = vmul.f32 %v6580_v7, %v4684_v29  ;;  %vm4706_vm4 = vweird.f32 %v6580_v7 }
0x1fc0   :  { %v4698_v14 = vsel %vm4695_vm15, %v4697_v54, %v4693_v26  ;;  %vm4707_vm6 = vmor %vm4705_vm5, %vm4706_vm4 }
0x1fc1   :  { %v4699_v16 = vmul.f32 %v8743_v56, %v4698_v14  ;;  %v4702_v5 = vsub.f32 1.0, %v4701_v61 }
0x1fc3   :  { %6136 = vmatmul.msk.f32.vlgmr.msrb.gmra.mxu0 %vm2814_vm2, %v4699_v16  ;;  %v4703_v49 = vmul.f32 %v6580_v7, %v4702_v5 }
0x1fc4   :  { %6184 = vmatpush.xpose.msk.msrb.mxu0 %vm363_vm0, %v8722_v28 }
0x1fc5   :  { %v4704_v19 = vadd.f32 %v6580_v7, %v4703_v49 }
0x1fc7   :  { %v4708_v1 = vsel %vm4707_vm6, %v6580_v7, %v4704_v19 }
0x1fc8   :  { %6185 = vmatpush.xpose.msk.msrb.mxu0 %vm363_vm0, %v8726_v6  ;;  %v4713_v56 = vsel %vm4710_vm7, %v4712_v46, %v4708_v1  ;;  %v4510_v55 = vpop.f32.mrf.mxu0 }
0x1fc9   :  { %v4714_v9 = vmul.f32 %v8751_v22, %v4713_v56  ;;  %v4511_v22 = vadd.f32 %v4510_v55, %v8699_v15  ;;  %v6328_v56 = vld [vmem:[%s9093_s9 + $0x2] ss:$0 sm:$0xff] }
0x1fcb   :  { %6137 = vmatmul.msk.f32.gmra.mxu0 %vm2814_vm2, %v4714_v9 }
0x1fcc   :  { %6186 = vmatpush.xpose.msk.msrb.mxu0 %vm363_vm0, %v8730_v0 }
0x1fd0   :  { %v4513_v50 = vpop.f32.mrf.mxu0  ;;  %v4624_v63 = vpop.f32.mrf.mxu1 }
0x1fd1   :  { %v4630_v4 = vadd.f32 %v4624_v63, %v4511_v22 }
0x1fd3   :  { %6161 = vmatmul.msk.f32.vlgmr.msra.gmra.mxu0 %vm363_vm0, %v8287_v23  ;;  %v4514_v23 = vadd.f32 %v4513_v50, %v8701_v8  ;;  %v6329_v50 = vld [vmem:[%s9093_s9 + $0x3] ss:$0 sm:$0xff] }
0x1fd8   :  { %v4627_v44 = vpop.f32.mrf.mxu1 }
0x1fd9   :  { %v4631_v58 = vadd.f32 %v4627_v44, %v4514_v23 }
0x1fdb   :  { %6162 = vmatmul.msk.f32.gmra.mxu0 %vm363_vm0, %v8330_v18 }
0x1fe3   :  { %6163 = vmatmul.msk.f32.gmra.mxu0 %vm363_vm0, %v8338_v36 }
0x2040   :  { %v4740_v17 = vpop.f32.mrf.mxu0 }
0x2041   :  { %v4746_v30 = vadd.f32 %v4740_v17, %v4630_v4 }
0x2043   :  { %6138 = vmatmul.msk.f32.vlgmr.msra.gmra.mxu3 %vm363_vm0, %v4746_v30 }
0x2048   :  { %v4743_v60 = vpop.f32.mrf.mxu0 }
0x2049   :  { %v4747_v18 = vadd.f32 %v4743_v60, %v4631_v58 }
0x204b   :  { %6139 = vmatmul.msk.f32.gmra.mxu3 %vm363_vm0, %v4747_v18 }
0x2050   :  { %v4942_v36 = vpop.f32.mrf.mxu0 }
0x2051   :  { %v8816_v11 = vadd.f32 %v6326_v47, %v4942_v36 }
0x2053   :  { %v5136_v43 = vmul.f32 %v8599_v2, %v8816_v11  ;;  %v5050_v38 = vmul.f32 %v8593_v52, %v8816_v11 }
0x2058   :  { %v4945_v34 = vpop.f32.mrf.mxu0 }
0x2059   :  { %v8812_v48 = vadd.f32 %v6326_v47, %v4945_v34  ;;  %v5286_v34 = vmul.f32 %v8612_v21, %v8816_v11 }
0x205b   :  { %v5137_v39 = vmul.f32 %v8599_v2, %v8812_v48  ;;  %v5051_v45 = vmul.f32 %v8593_v52, %v8812_v48  ;;  %v5287_v60 = vmul.f32 %v8612_v21, %v8812_v48 }
0x2060   :  { %v4948_v40 = vpop.f32.mrf.mxu0 }
0x2061   :  { %v8814_v15 = vadd.f32 %v6326_v47, %v4948_v40 }
0x2063   :  { %v5052_v53 = vmul.f32 %v8593_v52, %v8814_v15  ;;  %v5138_v8 = vmul.f32 %v8599_v2, %v8814_v15  ;;  %v5288_v23 = vmul.f32 %v8612_v21, %v8814_v15 }
0x2065   :  { %6178 = vmatpush.msk.msrb.mxu2 %vm834_vm12, %v5138_v8  ;;  %6181 = vmatpush.msk.msra.mxu3 %vm834_vm12, %v5052_v53  ;;  %v6330_v53 = vld [vmem:[#allocation10 + $0x1] ss:$0 sm:$0xff] }
0x2067   :  { %5162 = vmatpush.msrb.mxu2 %v5137_v39  ;;  %5194 = vmatpush.msra.mxu3 %v5051_v45 }
0x2069   :  { %5163 = vmatpush.msrb.mxu2 %v5136_v43  ;;  %5195 = vmatpush.msra.mxu3 %v5050_v38 }
0x206b   :  { %6192 = vmatpush.xpose.msk.msra.mxu2 %vm363_vm0, %v8722_v28 }
0x206f   :  { %6193 = vmatpush.xpose.msk.msra.mxu2 %vm363_vm0, %v8726_v6 }
0x2073   :  { %6194 = vmatpush.xpose.msk.msra.mxu2 %vm363_vm0, %v8730_v0 }
0x20c6   :  { %v4774_v3 = vpop.f32.mrf.mxu3 }
0x20c7   :  { %v4775_v41 = vadd.f32 %v6327_v51, %v4774_v3  ;;  %v5407_v3 = vmul.f32 %v8688_v32, %v8812_v48 }
0x20c9   :  { %v8839_v31 = vadd.f32 %v4775_v41, %v8548_v13  ;;  %v5406_v41 = vmul.f32 %v8688_v32, %v8816_v11 }
0x20cb   :  { %v4786_v27 = vsel %vm363_vm0, %v8839_v31, 0.0 }
0x20cc   :  { %4787 = vadd.xlane.f32.xlu1 %v4786_v27 }
0x20ce   :  { %v4777_v20 = vpop.f32.mrf.mxu3 }
0x20cf   :  { %v4778_v24 = vadd.f32 %v6327_v51, %v4777_v20  ;;  %v5408_v51 = vmul.f32 %v8688_v32, %v8814_v15 }
0x20d1   :  { %v8844_v28 = vadd.f32 %v4778_v24, %v8553_v59 }
0x20d3   :  { %v4789_v6 = vsel %vm363_vm0, %v8844_v28, 0.0 }
0x20d4   :  { %4790 = vadd.xlane.f32.xlu2 %v4789_v6 }
0x213f   :  { %v4788_v0 = vpop.xlane.xlu1 %4787 }
0x2140   :  { %v4792_v57 = vmul.f32 %v4788_v0, %v7321_v12  ;;  %v8897_v0 = vld [vmem:[%s9095_s6] sm:$0xff] }
0x2142   :  { %v4794_v29 = vsub.f32 %v8839_v31, %v4792_v57 }
0x2144   :  { %v4796_v13 = vmul.f32 %v4794_v29, %v4794_v29 }
0x2146   :  { %v4798_v35 = vsel %vm363_vm0, %v4796_v13, 0.0 }
0x2147   :  { %4799 = vadd.xlane.f32.xlu0 %v4798_v35  ;;  %v4791_v25 = vpop.xlane.xlu2 %4790  ;;  %v8902_v35 = vld [vmem:[%s9095_s6 + $0x8] sm:$0xff] }
0x2148   :  { %v4793_v10 = vmul.f32 %v4791_v25, %v7321_v12 }
0x214a   :  { %v4795_v62 = vsub.f32 %v8844_v28, %v4793_v10 }
0x214c   :  { %v4797_v59 = vmul.f32 %v4795_v62, %v4795_v62 }
0x214e   :  { %v4801_v42 = vsel %vm363_vm0, %v4797_v59, 0.0 }
0x214f   :  { %4802 = vadd.xlane.f32.xlu1 %v4801_v42 }
0x21ba   :  { %v4800_v54 = vpop.xlane.xlu0 %4799 }
0x21bb   :  { %v4804_v7 = vmul.f32 %v4800_v54, %v7321_v12 }
0x21bd   :  { %v4806_v26 = vadd.f32 1e-05, %v4804_v7 }
0x21bf   :  { %6581 = vrsqrt.f32 %v4806_v26  ;;  %vm4814_vm1 = vweird.f32 %v4806_v26 }
0x21c2   :  { %v4803_v14 = vpop.xlane.xlu1 %4802 }
0x21c3   :  { %v4805_v61 = vmul.f32 %v4803_v14, %v7321_v12 }
0x21c5   :  { %v6582_v16 = vpop.eup %6581  ;;  %v4807_v37 = vadd.f32 1e-05, %v4805_v61 }
0x21c6   :  { %v4809_v5 = vmul.f32 %v6582_v16, %v4806_v26  ;;  %vm4815_vm2 = vweird.f32 %v6582_v16 }
0x21c7   :  { %6583 = vrsqrt.f32 %v4807_v37  ;;  %vm4816_vm8 = vmor %vm4814_vm1, %vm4815_vm2  ;;  %vm4824_vm9 = vweird.f32 %v4807_v37 }
0x21c8   :  { %v4810_v49 = vmul.f32 %v6582_v16, %v4809_v5 }
0x21ca   :  { %v4811_v33 = vmul.f32 0.5, %v4810_v49 }
0x21cc   :  { %v4812_v19 = vsub.f32 1.5, %v4811_v33 }
0x21cd   :  { %v6584_v46 = vpop.eup %6583 }
0x21ce   :  { %v4813_v1 = vmul.f32 %v6582_v16, %v4812_v19  ;;  %v4819_v9 = vmul.f32 %v6584_v46, %v4807_v37  ;;  %vm4825_vm14 = vweird.f32 %v6584_v46 }
0x21cf   :  { %vm4826_vm10 = vmor %vm4824_vm9, %vm4825_vm14 }
0x21d0   :  { %v4817_v55 = vsel %vm4816_vm8, %v6582_v16, %v4813_v1  ;;  %v4820_v22 = vmul.f32 %v6584_v46, %v4819_v9 }
0x21d1   :  { %v4828_v63 = vmul.f32 %v4817_v55, %v4794_v29 }
0x21d2   :  { %v4821_v17 = vmul.f32 0.5, %v4820_v22 }
0x21d3   :  { %v4833_v4 = vmul.f32 %v6328_v56, %v4828_v63 }
0x21d4   :  { %v4822_v44 = vsub.f32 1.5, %v4821_v17 }
0x21d5   :  { %v4838_v30 = vadd.f32 %v6329_v50, %v4833_v4 }
0x21d6   :  { %v4823_v58 = vmul.f32 %v6584_v46, %v4822_v44 }
0x21d7   :  { %6146 = vmatmul.msk.f32.vlgmr.msra.gmra.mxu1 %vm363_vm0, %v4838_v30 }
0x21d8   :  { %6189 = vmatpush.msk.msra.mxu1 %vm834_vm12, %v5288_v23  ;;  %v4827_v18 = vsel %vm4826_vm10, %v6584_v46, %v4823_v58 }
0x21d9   :  { %v4829_v36 = vmul.f32 %v4827_v18, %v4795_v62 }
0x21da   :  { %5312 = vmatpush.msra.mxu1 %v5287_v60 }
0x21db   :  { %v4834_v47 = vmul.f32 %v6328_v56, %v4829_v36 }
0x21dc   :  { %5313 = vmatpush.msra.mxu1 %v5286_v34 }
0x21dd   :  { %v4839_v40 = vadd.f32 %v6329_v50, %v4834_v47 }
0x21df   :  { %6147 = vmatmul.msk.f32.gmra.mxu1 %vm363_vm0, %v4839_v40 }
0x2254   :  { %v4873_v8 = vpop.f32.mrf.mxu1 }
0x2255   :  { %v8867_v39 = vadd.f32 %v6330_v53, %v4873_v8 }
0x2257   :  { %v4958_v45 = vmul.f32 %v8593_v52, %v8867_v39  ;;  %v5053_v43 = vmul.f32 %v8599_v2, %v8867_v39  ;;  %v5203_v38 = vmul.f32 %v8612_v21, %v8867_v39 }
0x2259   :  { %6171 = vmatmul.msk.f32.vlgmr.msrb.gmra.mxu3 %vm363_vm0, %v4958_v45  ;;  %6176 = vmatmul.msk.f32.vlgmr.msrb.gmra.mxu1 %vm363_vm0, %v5053_v43 }
0x225a   :  { %6187 = vmatmul.msk.f32.vlgmr.msrb.gmra.mxu0 %vm363_vm0, %v5203_v38  ;;  %6197 = vmatpush.msk.msrb.mxu3 %vm834_vm12, %v5408_v51 }
0x225c   :  { %5432 = vmatpush.msrb.mxu3 %v5407_v3  ;;  %v4876_v27 = vpop.f32.mrf.mxu1 }
0x225d   :  { %v8885_v20 = vadd.f32 %v6330_v53, %v4876_v27 }
0x225e   :  { %5433 = vmatpush.msrb.mxu3 %v5406_v41 }
0x225f   :  { %v4959_v15 = vmul.f32 %v8593_v52, %v8885_v20  ;;  %v5054_v24 = vmul.f32 %v8599_v2, %v8885_v20  ;;  %v5204_v6 = vmul.f32 %v8612_v21, %v8885_v20 }
0x2261   :  { %6172 = vmatmul.msk.f32.gmra.mxu3 %vm363_vm0, %v4959_v15  ;;  %6177 = vmatmul.msk.f32.gmra.mxu1 %vm363_vm0, %v5054_v24 }
0x2262   :  { %6188 = vmatmul.msk.f32.gmra.mxu0 %vm363_vm0, %v5204_v6 }
0x22d6   :  { %v5078_v48 = vpop.f32.mrf.mxu1 }
0x22d7   :  { %v5084_v11 = vmul.f32 0.35355338, %v5078_v48  ;;  %v5228_v59 = vpop.f32.mrf.mxu0 }
0x22d8   :  { %v5234_v42 = vmul.f32 0.35355338, %v5228_v59 }
0x22d9   :  { %v5086_v57 = vadd.f32 %v8897_v0, %v5084_v11 }
0x22da   :  { %v5236_v7 = vadd.f32 %v8897_v0, %v5234_v42 }
0x22db   :  { %v5088_v52 = vsel %vm626_vm13, %v5086_v57, -inf }
0x22dc   :  { %5089 = vmax.xlane.f32.xlu2 %v5088_v52  ;;  %v4992_v13 = vpop.f32.mrf.mxu3  ;;  %v5238_v26 = vsel %vm626_vm13, %v5236_v7, -inf }
0x22dd   :  { %v4998_v25 = vmul.f32 0.35355338, %v4992_v13 }
0x22de   :  { %v5081_v29 = vpop.f32.mrf.mxu1 }
0x22df   :  { %v5085_v2 = vmul.f32 0.35355338, %v5081_v29  ;;  %v5000_v62 = vadd.f32 %v8897_v0, %v4998_v25 }
0x22e1   :  { %v5087_v21 = vadd.f32 %v8902_v35, %v5085_v2  ;;  %v5002_v54 = vsel %vm626_vm13, %v5000_v62, -inf }
0x22e3   :  { %v5091_v10 = vsel %vm626_vm13, %v5087_v21, -inf }
0x22e4   :  { %5092 = vmax.xlane.f32.xlu0 %v5091_v10  ;;  %v4995_v5 = vpop.f32.mrf.mxu3 }
0x22e5   :  { %v4999_v19 = vmul.f32 0.35355338, %v4995_v5 }
0x22e7   :  { %v8912_v56 = vadd.f32 %v8902_v35, %v4999_v19 }
0x22e9   :  { %v5005_v22 = vsel %vm626_vm13, %v8912_v56, -inf }
0x22ec   :  { %5003 = vmax.xlane.f32.xlu0 %v5002_v54 }
0x22f4   :  { %5239 = vmax.xlane.f32.xlu0 %v5238_v26 }
0x234f   :  { %v5090_v14 = vpop.xlane.xlu2 %5089 }
0x2350   :  { %v5094_v61 = vsub.f32 %v5086_v57, %v5090_v14 }
0x2352   :  { %v5096_v16 = vmul.f32 1.442695, %v5094_v61 }
0x2354   :  { %6585 = vpow2.f32 %v5096_v16 }
0x2357   :  { %v5093_v37 = vpop.xlane.xlu0 %5092 }
0x2358   :  { %v5095_v49 = vsub.f32 %v5087_v21, %v5093_v37 }
0x235a   :  { %v6586_v33 = vpop.eup %6585  ;;  %v5098_v46 = vmul.f32 1.442695, %v5095_v49 }
0x235b   :  { %v5100_v1 = vsel %vm626_vm13, %v6586_v33, 0.0 }
0x235c   :  { %5101 = vadd.xlane.f32.xlu1 %v5100_v1  ;;  %6587 = vpow2.f32 %v5098_v46  ;;  %v5323_v46 = vmul.f32 %v8688_v32, %v8867_v39  ;;  %v5324_v39 = vmul.f32 %v8688_v32, %v8885_v20 }
0x235f   :  { %v5004_v9 = vpop.xlane.xlu0 %5003 }
0x2360   :  { %v5008_v55 = vsub.f32 %v5000_v62, %v5004_v9 }
0x2362   :  { %v6588_v50 = vpop.eup %6587  ;;  %v5010_v63 = vmul.f32 1.442695, %v5008_v55 }
0x2363   :  { %v5103_v4 = vsel %vm626_vm13, %v6588_v50, 0.0 }
0x2364   :  { %5006 = vmax.xlane.f32.xlu1 %v5005_v22  ;;  %6589 = vpow2.f32 %v5010_v63  ;;  %5104 = vadd.xlane.f32.xlu2 %v5103_v4 }
0x2367   :  { %v5240_v17 = vpop.xlane.xlu0 %5239 }
0x2368   :  { %v5244_v30 = vsub.f32 %v5236_v7, %v5240_v17 }
0x236a   :  { %v8917_v44 = vpop.eup %6589  ;;  %v5246_v23 = vmul.f32 1.442695, %v5244_v30 }
0x236b   :  { %v5014_v58 = vsel %vm626_vm13, %v8917_v44, 0.0 }
0x236c   :  { %6591 = vpow2.f32 %v5246_v23  ;;  %5015 = vadd.xlane.f32.xlu0 %v5014_v58 }
0x2372   :  { %v8921_v60 = vpop.eup %6591 }
0x2373   :  { %v5250_v18 = vsel %vm626_vm13, %v8921_v60, 0.0 }
0x2374   :  { %5251 = vadd.xlane.f32.xlu0 %v5250_v18 }
0x23cf   :  { %v5102_v36 = vpop.xlane.xlu1 %5101 }
0x23d0   :  { %6593 = vrcp.f32 %v5102_v36  ;;  %v5117_v8 = vand.u32 2147483648, %v5102_v36  ;;  %v5115_v43 = vand.u32 2147483647, %v5102_v36  ;;  %vm5111_vm11 = vweird.f32 %v5102_v36 }
0x23d2   :  { %v5118_v51 = vor.u32 1.1754944e-38, %v5117_v8  ;;  %vm5116_vm4 = vcmp.eq.f32.partialorder %v5115_v43, 8.507059e+37 }
0x23d6   :  { %v6594_v34 = vpop.eup %6593 }
0x23d7   :  { %v5107_v47 = vmul.f32 %v6594_v34, %v5102_v36  ;;  %v5105_v40 = vpop.xlane.xlu2 %5104  ;;  %vm5112_vm12 = vweird.f32 %v6594_v34  ;;  %v5007_v58 = vpop.xlane.xlu1 %5006 }
0x23d8   :  { %6595 = vrcp.f32 %v5105_v40  ;;  %vm5113_vm15 = vmor %vm5111_vm11, %vm5112_vm12  ;;  %v5132_v57 = vand.u32 2147483648, %v5105_v40  ;;  %v5130_v52 = vand.u32 2147483647, %v5105_v40  ;;  %vm5126_vm6 = vweird.f32 %v5105_v40  ;;  %v5231_v36 = vpop.f32.mrf.mxu0 }
0x23d9   :  { %v5108_v53 = vsub.f32 1.0, %v5107_v47  ;;  %v5009_v47 = vsub.f32 %v8912_v56, %v5007_v58 }
0x23da   :  { %v5133_v13 = vor.u32 1.1754944e-38, %v5132_v57  ;;  %vm5131_vm2 = vcmp.eq.f32.partialorder %v5130_v52, 8.507059e+37 }
0x23db   :  { %v5109_v45 = vmul.f32 %v6594_v34, %v5108_v53  ;;  %v5012_v32 = vmul.f32 1.442695, %v5009_v47 }
0x23dd   :  { %v5110_v38 = vadd.f32 %v6594_v34, %v5109_v45 }
0x23de   :  { %v6596_v3 = vpop.eup %6595 }
0x23df   :  { %v5114_v41 = vsel %vm5113_vm15, %v6594_v34, %v5110_v38  ;;  %v5122_v15 = vmul.f32 %v6596_v3, %v5105_v40  ;;  %v5016_v24 = vpop.xlane.xlu0 %5015  ;;  %vm5127_vm5 = vweird.f32 %v6596_v3 }
0x23e0   :  { %v5119_v27 = vsel %vm5116_vm4, %v5118_v51, %v5114_v41  ;;  %6597 = vrcp.f32 %v5016_v24  ;;  %vm5128_vm7 = vmor %vm5126_vm6, %vm5127_vm5  ;;  %v5031_v42 = vand.u32 2147483648, %v5016_v24  ;;  %v5029_v26 = vand.u32 2147483647, %v5016_v24 }
0x23e1   :  { %v5120_v6 = vmul.f32 %v6586_v33, %v5119_v27  ;;  %v5123_v48 = vsub.f32 1.0, %v5122_v15  ;;  %vm5025_vm8 = vweird.f32 %v5016_v24 }
0x23e2   :  { %v5032_v16 = vor.u32 1.1754944e-38, %v5031_v42  ;;  %vm5030_vm9 = vcmp.eq.f32.partialorder %v5029_v26, 8.507059e+37 }
0x23e3   :  { %6179 = vmatmul.msk.f32.vlgmr.msrb.gmra.mxu2 %vm626_vm13, %v5120_v6  ;;  %v5124_v11 = vmul.f32 %v6596_v3, %v5123_v48 }
0x23e5   :  { %v5125_v29 = vadd.f32 %v6596_v3, %v5124_v11 }
0x23e6   :  { %v6598_v2 = vpop.eup %6597 }
0x23e7   :  { %v5021_v21 = vmul.f32 %v6598_v2, %v5016_v24  ;;  %v5252_v25 = vpop.xlane.xlu0 %5251  ;;  %v5129_v10 = vsel %vm5128_vm7, %v6596_v3, %v5125_v29  ;;  %vm5026_vm1 = vweird.f32 %v6598_v2 }
0x23e8   :  { %6599 = vrcp.f32 %v5252_v25  ;;  %v5134_v59 = vsel %vm5131_vm2, %v5133_v13, %v5129_v10  ;;  %vm5027_vm14 = vmor %vm5025_vm8, %vm5026_vm1  ;;  %v5267_v1 = vand.u32 2147483648, %v5252_v25  ;;  %v5265_v55 = vand.u32 2147483647, %v5252_v25 }
0x23e9   :  { %v5022_v62 = vsub.f32 1.0, %v5021_v21  ;;  %v5135_v54 = vmul.f32 %v6588_v50, %v5134_v59  ;;  %vm5261_vm12 = vweird.f32 %v5252_v25  ;;  %6601 = vpow2.f32 %v5012_v32 }
0x23ea   :  { %v5268_v63 = vor.u32 1.1754944e-38, %v5267_v1  ;;  %vm5266_vm15 = vcmp.eq.f32.partialorder %v5265_v55, 8.507059e+37 }
0x23eb   :  { %v5023_v7 = vmul.f32 %v6598_v2, %v5022_v62  ;;  %6180 = vmatmul.msk.f32.gmra.mxu2 %vm626_vm13, %v5135_v54 }
0x23ed   :  { %v5024_v14 = vadd.f32 %v6598_v2, %v5023_v7 }
0x23ee   :  { %v6600_v61 = vpop.eup %6599 }
0x23ef   :  { %v5028_v5 = vsel %vm5027_vm14, %v6598_v2, %v5024_v14  ;;  %v5257_v37 = vmul.f32 %v6600_v61, %v5252_v25  ;;  %vm5262_vm10 = vweird.f32 %v6600_v61 }
0x23f0   :  { %v5033_v49 = vsel %vm5030_vm9, %v5032_v16, %v5028_v5  ;;  %vm5263_vm11 = vmor %vm5261_vm12, %vm5262_vm10 }
0x23f1   :  { %v5034_v33 = vmul.f32 %v8917_v44, %v5033_v49  ;;  %v5258_v19 = vsub.f32 1.0, %v5257_v37 }
0x23f3   :  { %v5259_v9 = vmul.f32 %v6600_v61, %v5258_v19  ;;  %6182 = vmatmul.msk.f32.vlgmr.msra.gmra.mxu3 %vm626_vm13, %v5034_v33  ;;  %6195 = vmatmul.msk.f32.vlgmr.msra.gmra.mxu2 %vm363_vm0, %v5323_v46  ;;  %v6167_v19 = vld [vmem:[%s9098_s19 + $0x38] sm:$0xff]  ;;  %v6166_v46 = vld [vmem:[%s9098_s19 + $0x30] sm:$0xff] }
0x23f4   :  { %5464 = vmatpush.msra.mxu0 %v6167_v19 }
0x23f5   :  { %v5260_v50 = vadd.f32 %v6600_v61, %v5259_v9 }
0x23f6   :  { %5465 = vmatpush.msra.mxu0 %v6166_v46 }
0x23f7   :  { %v5264_v22 = vsel %vm5263_vm11, %v6600_v61, %v5260_v50 }
0x23f8   :  { %v5269_v4 = vsel %vm5266_vm15, %v5268_v63, %v5264_v22 }
0x23f9   :  { %v5270_v17 = vmul.f32 %v8921_v60, %v5269_v4  ;;  %v5235_v60 = vmul.f32 0.35355338, %v5231_v36 }
0x23fb   :  { %6190 = vmatmul.msk.f32.vlgmr.msra.gmra.mxu1 %vm626_vm13, %v5270_v17  ;;  %6196 = vmatmul.msk.f32.gmra.mxu2 %vm363_vm0, %v5324_v39  ;;  %v5237_v53 = vadd.f32 %v8902_v35, %v5235_v60 }
0x23fd   :  { %v5241_v43 = vsel %vm626_vm13, %v5237_v53, -inf }
0x2466   :  { %v8937_v30 = vpop.f32.mrf.mxu2 }
0x246e   :  { %v8939_v44 = vpop.f32.mrf.mxu2 }
0x2476   :  { %v5348_v23 = vpop.f32.mrf.mxu2 }
0x2477   :  { %v5354_v18 = vmul.f32 0.35355338, %v5348_v23 }
0x2479   :  { %v5356_v34 = vadd.f32 %v8897_v0, %v5354_v18  ;;  %v6602_v0 = vpop.eup %6601 }
0x247a   :  { %v5017_v56 = vsel %vm626_vm13, %v6602_v0, 0.0 }
0x247b   :  { %v5358_v40 = vsel %vm626_vm13, %v5356_v34, -inf }
0x247c   :  { %5359 = vmax.xlane.f32.xlu2 %v5358_v40 }
0x247e   :  { %v5351_v20 = vpop.f32.mrf.mxu2 }
0x247f   :  { %v5355_v8 = vmul.f32 0.35355338, %v5351_v20 }
0x2481   :  { %v5357_v45 = vadd.f32 %v8902_v35, %v5355_v8 }
0x2483   :  { %v5361_v38 = vsel %vm626_vm13, %v5357_v45, -inf }
0x2484   :  { %5242 = vmax.xlane.f32.xlu2 %v5241_v43  ;;  %5362 = vmax.xlane.f32.xlu1 %v5361_v38 }
0x248c   :  { %5018 = vadd.xlane.f32.xlu1 %v5017_v56 }
0x24ef   :  { %v5360_v51 = vpop.xlane.xlu2 %5359 }
0x24f0   :  { %v5364_v3 = vsub.f32 %v5356_v34, %v5360_v51 }
0x24f2   :  { %v5366_v41 = vmul.f32 1.442695, %v5364_v3 }
0x24f4   :  { %6603 = vpow2.f32 %v5366_v41 }
0x24f7   :  { %v5243_v27 = vpop.xlane.xlu2 %5242  ;;  %v5363_v15 = vpop.xlane.xlu1 %5362 }
0x24f8   :  { %v5245_v24 = vsub.f32 %v5237_v53, %v5243_v27  ;;  %v5365_v6 = vsub.f32 %v5357_v45, %v5363_v15 }
0x24fa   :  { %v6604_v35 = vpop.eup %6603  ;;  %v5248_v48 = vmul.f32 1.442695, %v5245_v24  ;;  %v5368_v11 = vmul.f32 1.442695, %v5365_v6  ;;  %v6165_v6 = vld [vmem:[%s9098_s19 + $0x28] sm:$0xff] }
0x24fb   :  { %v5370_v57 = vsel %vm626_vm13, %v6604_v35, 0.0  ;;  %5466 = vmatpush.msra.mxu0 %v6165_v6 }
0x24fc   :  { %6605 = vpow2.f32 %v5248_v48  ;;  %5371 = vadd.xlane.f32.xlu2 %v5370_v57  ;;  %v5197_v48 = vpop.f32.mrf.mxu3 }
0x24fd   :  { %6607 = vpow2.f32 %v5368_v11  ;;  %v5198_v57 = vadd.f32 %v5197_v48, %v8937_v30 }
0x24ff   :  { %v5019_v52 = vpop.xlane.xlu1 %5018 }
0x2500   :  { %6609 = vrcp.f32 %v5019_v52  ;;  %v5046_v59 = vand.u32 2147483648, %v5019_v52  ;;  %v5044_v54 = vand.u32 2147483647, %v5019_v52  ;;  %vm5040_vm5 = vweird.f32 %v5019_v52 }
0x2502   :  { %v8950_v29 = vpop.eup %6605  ;;  %v5047_v26 = vor.u32 1.1754944e-38, %v5046_v59  ;;  %vm5045_vm7 = vcmp.eq.f32.partialorder %v5044_v54, 8.507059e+37 }
0x2503   :  { %v8952_v2 = vpop.eup %6607  ;;  %v5253_v13 = vsel %vm626_vm13, %v8950_v29, 0.0 }
0x2504   :  { %5254 = vadd.xlane.f32.xlu2 %v5253_v13  ;;  %v5373_v21 = vsel %vm626_vm13, %v8952_v2, 0.0 }
0x2505   :  { %5374 = vadd.xlane.f32.xlu1 %v5373_v21 }
0x2506   :  { %v6610_v25 = vpop.eup %6609 }
0x2507   :  { %v5036_v10 = vmul.f32 %v6610_v25, %v5019_v52  ;;  %vm5041_vm4 = vweird.f32 %v6610_v25  ;;  %v5315_v52 = vpop.f32.mrf.mxu1 }
0x2508   :  { %vm5042_vm6 = vmor %vm5040_vm5, %vm5041_vm4  ;;  %v5321_v13 = vadd.f32 %v5315_v52, %v5198_v57 }
0x2509   :  { %v5037_v62 = vsub.f32 1.0, %v5036_v10 }
0x250b   :  { %v5038_v42 = vmul.f32 %v6610_v25, %v5037_v62 }
0x250d   :  { %v5039_v7 = vadd.f32 %v6610_v25, %v5038_v42  ;;  %v6331_v42 = vld [vmem:[#allocation12 + $0x1] ss:$0 sm:$0xff] }
0x250f   :  { %v5043_v14 = vsel %vm5042_vm6, %v6610_v25, %v5039_v7 }
0x2510   :  { %v5048_v61 = vsel %vm5045_vm7, %v5047_v26, %v5043_v14 }
0x2511   :  { %v5049_v16 = vmul.f32 %v6602_v0, %v5048_v61 }
0x2513   :  { %6183 = vmatmul.msk.f32.gmra.mxu3 %vm626_vm13, %v5049_v16 }
0x256f   :  { %v5372_v5 = vpop.xlane.xlu2 %5371 }
0x2570   :  { %6611 = vrcp.f32 %v5372_v5  ;;  %v5387_v55 = vand.u32 2147483648, %v5372_v5  ;;  %v5385_v63 = vand.u32 2147483647, %v5372_v5  ;;  %vm5381_vm1 = vweird.f32 %v5372_v5 }
0x2572   :  { %v5388_v17 = vor.u32 1.1754944e-38, %v5387_v55  ;;  %vm5386_vm14 = vcmp.eq.f32.partialorder %v5385_v63, 8.507059e+37  ;;  %v6207_v55 = vld [vmem:[%s9099_s11 + $0x38] sm:$0xff]  ;;  %v6205_v63 = vld [vmem:[%s9099_s11 + $0x28] sm:$0xff] }
0x2573   :  { %5563 = vmatpush.msrb.mxu1 %v6207_v55 }
0x2576   :  { %v6612_v37 = vpop.eup %6611 }
0x2577   :  { %v5377_v49 = vmul.f32 %v6612_v37, %v5372_v5  ;;  %v5255_v33 = vpop.xlane.xlu2 %5254  ;;  %vm5382_vm2 = vweird.f32 %v6612_v37 }
0x2578   :  { %6613 = vrcp.f32 %v5255_v33  ;;  %v5375_v1 = vpop.xlane.xlu1 %5374  ;;  %vm5383_vm8 = vmor %vm5381_vm1, %vm5382_vm2  ;;  %v5282_v60 = vand.u32 2147483648, %v5255_v33  ;;  %v5280_v20 = vand.u32 2147483647, %v5255_v33  ;;  %vm5276_vm12 = vweird.f32 %v5255_v33 }
0x2579   :  { %v5378_v9 = vsub.f32 1.0, %v5377_v49  ;;  %6615 = vrcp.f32 %v5375_v1  ;;  %v5402_v53 = vand.u32 2147483648, %v5375_v1  ;;  %v5400_v45 = vand.u32 2147483647, %v5375_v1 }
0x257a   :  { %v5283_v38 = vor.u32 1.1754944e-38, %v5282_v60  ;;  %vm5396_vm15 = vweird.f32 %v5375_v1  ;;  %vm5281_vm4 = vcmp.eq.f32.partialorder %v5280_v20, 8.507059e+37  ;;  %v6213_v20 = vld [vmem:[%s9100_s16 + $0x58] sm:$0xff] }
0x257b   :  { %v5379_v50 = vmul.f32 %v6612_v37, %v5378_v9  ;;  %v5403_v56 = vor.u32 1.1754944e-38, %v5402_v53  ;;  %vm5401_vm6 = vcmp.eq.f32.partialorder %v5400_v45, 8.507059e+37 }
0x257d   :  { %v5380_v22 = vadd.f32 %v6612_v37, %v5379_v50  ;;  %v6206_v50 = vld [vmem:[%s9099_s11 + $0x30] sm:$0xff] }
0x257e   :  { %v6614_v4 = vpop.eup %6613  ;;  %5564 = vmatpush.msrb.mxu1 %v6206_v50 }
0x257f   :  { %v6616_v39 = vpop.eup %6615  ;;  %v5384_v23 = vsel %vm5383_vm8, %v6612_v37, %v5380_v22  ;;  %v5272_v58 = vmul.f32 %v6614_v4, %v5255_v33  ;;  %vm5277_vm9 = vweird.f32 %v6614_v4  ;;  %v6204_v22 = vld [vmem:[%s9099_s11 + $0x20] sm:$0xff] }
0x2580   :  { %v5389_v18 = vsel %vm5386_vm14, %v5388_v17, %v5384_v23  ;;  %v5392_v36 = vmul.f32 %v6616_v39, %v5375_v1  ;;  %vm5397_vm10 = vweird.f32 %v6616_v39  ;;  %vm5278_vm11 = vmor %vm5276_vm12, %vm5277_vm9  ;;  %5565 = vmatpush.msrb.mxu1 %v6205_v63  ;;  %v6217_v23 = vld [vmem:[%s9100_s16 + $0x78] sm:$0xff] }
0x2581   :  { %v5390_v34 = vmul.f32 %v6604_v35, %v5389_v18  ;;  %v5273_v47 = vsub.f32 1.0, %v5272_v58  ;;  %vm5398_vm5 = vmor %vm5396_vm15, %vm5397_vm10  ;;  %v6164_v35 = vld [vmem:[%s9098_s19 + $0x20] sm:$0xff]  ;;  %v6216_v58 = vld [vmem:[%s9100_s16 + $0x70] sm:$0xff]  ;;  %5599 = vmatpush.msrb.mxu2 %v6217_v23 }
0x2582   :  { %v5393_v40 = vsub.f32 1.0, %v5392_v36  ;;  %5467 = vmatpush.msra.mxu0 %v6164_v35  ;;  %5566 = vmatpush.msrb.mxu1 %v6204_v22  ;;  %v6215_v18 = vld [vmem:[%s9100_s16 + $0x68] sm:$0xff] }
0x2583   :  { %v5274_v32 = vmul.f32 %v6614_v4, %v5273_v47  ;;  %6198 = vmatmul.msk.f32.vlgmr.msrb.gmra.mxu3 %vm626_vm13, %v5390_v34  ;;  %5600 = vmatpush.msrb.mxu2 %v6216_v58  ;;  %v6214_v47 = vld [vmem:[%s9100_s16 + $0x60] sm:$0xff] }
0x2584   :  { %v5394_v8 = vmul.f32 %v6616_v39, %v5393_v40 }
0x2585   :  { %v5275_v43 = vadd.f32 %v6614_v4, %v5274_v32  ;;  %5601 = vmatpush.msrb.mxu2 %v6215_v18 }
0x2586   :  { %v5395_v0 = vadd.f32 %v6616_v39, %v5394_v8 }
0x2587   :  { %v5279_v51 = vsel %vm5278_vm11, %v6614_v4, %v5275_v43  ;;  %5602 = vmatpush.msrb.mxu2 %v6214_v47 }
0x2588   :  { %v5284_v3 = vsel %vm5281_vm4, %v5283_v38, %v5279_v51  ;;  %v5399_v41 = vsel %vm5398_vm5, %v6616_v39, %v5395_v0  ;;  %v6332_v0 = vld [vmem:[%s9101_s10 + $0x2] ss:$0 sm:$0xff] }
0x2589   :  { %v5285_v27 = vmul.f32 %v8950_v29, %v5284_v3  ;;  %v5404_v15 = vsel %vm5401_vm6, %v5403_v56, %v5399_v41  ;;  %5603 = vmatpush.msrb.mxu2 %v6213_v20  ;;  %v6333_v3 = vld [vmem:[%s9101_s10 + $0x3] ss:$0 sm:$0xff] }
0x258a   :  { %v5405_v24 = vmul.f32 %v8952_v2, %v5404_v15 }
0x258b   :  { %6191 = vmatmul.msk.f32.gmra.mxu1 %vm626_vm13, %v5285_v27 }
0x258c   :  { %6199 = vmatmul.msk.f32.gmra.mxu3 %vm626_vm13, %v5405_v24 }
0x2596   :  { %v5200_v11 = vpop.f32.mrf.mxu3 }
0x2597   :  { %v5201_v2 = vadd.f32 %v5200_v11, %v8939_v44 }
0x2606   :  { %v5435_v21 = vpop.f32.mrf.mxu3 }
0x2607   :  { %v5441_v25 = vadd.f32 %v5435_v21, %v5321_v13  ;;  %v6212_v21 = vld [vmem:[%s9100_s16 + $0x50] sm:$0xff] }
0x2608   :  { %v5318_v29 = vpop.f32.mrf.mxu1  ;;  %5604 = vmatpush.msrb.mxu2 %v6212_v21 }
0x2609   :  { %6200 = vmatmul.msk.f32.vlgmr.msra.gmra.mxu0 %vm363_vm0, %v5441_v25  ;;  %v5322_v10 = vadd.f32 %v5318_v29, %v5201_v2  ;;  %v6211_v25 = vld [vmem:[%s9100_s16 + $0x48] sm:$0xff]  ;;  %v6210_v29 = vld [vmem:[%s9100_s16 + $0x40] sm:$0xff] }
0x260a   :  { %5605 = vmatpush.msrb.mxu2 %v6211_v25  ;;  %v6334_v2 = vld [vmem:[#allocation13 + $0x1] ss:$0 sm:$0xff] }
0x260c   :  { %5606 = vmatpush.msrb.mxu2 %v6210_v29 }
0x260f   :  { %v5438_v62 = vpop.f32.mrf.mxu3 }
0x2610   :  { %v5442_v59 = vadd.f32 %v5438_v62, %v5322_v10 }
0x2612   :  { %6201 = vmatmul.msk.f32.gmra.mxu0 %vm363_vm0, %v5442_v59 }
0x2686   :  { %v5469_v54 = vpop.f32.mrf.mxu0 }
0x2687   :  { %v5470_v7 = vadd.f32 %v6331_v42, %v5469_v54 }
0x2689   :  { %v8973_v26 = vadd.f32 %v5470_v7, %v8839_v31 }
0x268b   :  { %v5481_v30 = vsel %vm363_vm0, %v8973_v26, 0.0 }
0x268c   :  { %5482 = vadd.xlane.f32.xlu0 %v5481_v30  ;;  %v6335_v30 = vld [vmem:[#allocation15 + $0x1] ss:$0 sm:$0xff] }
0x268f   :  { %v5472_v14 = vpop.f32.mrf.mxu0 }
0x2690   :  { %v5473_v61 = vadd.f32 %v6331_v42, %v5472_v14 }
0x2692   :  { %v8978_v44 = vadd.f32 %v5473_v61, %v8844_v28 }
0x2694   :  { %v5484_v16 = vsel %vm363_vm0, %v8978_v44, 0.0 }
0x2695   :  { %5485 = vadd.xlane.f32.xlu1 %v5484_v16 }
0x26ff   :  { %v5483_v5 = vpop.xlane.xlu0 %5482 }
0x2700   :  { %v5487_v31 = vmul.f32 %v5483_v5, %v7321_v12 }
0x2702   :  { %v5489_v37 = vsub.f32 %v8973_v26, %v5487_v31 }
0x2704   :  { %v5491_v49 = vmul.f32 %v5489_v37, %v5489_v37 }
0x2706   :  { %v5493_v33 = vsel %vm363_vm0, %v5491_v49, 0.0 }
0x2707   :  { %5494 = vadd.xlane.f32.xlu2 %v5493_v33 }
0x2708   :  { %v5486_v19 = vpop.xlane.xlu1 %5485 }
0x2709   :  { %v5488_v28 = vmul.f32 %v5486_v19, %v7321_v12 }
0x270b   :  { %v5490_v46 = vsub.f32 %v8978_v44, %v5488_v28 }
0x270d   :  { %v5492_v1 = vmul.f32 %v5490_v46, %v5490_v46 }
0x270f   :  { %v5496_v9 = vsel %vm363_vm0, %v5492_v1, 0.0 }
0x2710   :  { %5497 = vadd.xlane.f32.xlu0 %v5496_v9 }
0x277a   :  { %v5495_v4 = vpop.xlane.xlu2 %5494 }
0x277b   :  { %v5499_v17 = vmul.f32 %v5495_v4, %v7321_v12 }
0x277d   :  { %v5501_v39 = vadd.f32 1e-05, %v5499_v17 }
0x277f   :  { %6617 = vrsqrt.f32 %v5501_v39  ;;  %vm5509_vm7 = vweird.f32 %v5501_v39 }
0x2783   :  { %v5498_v36 = vpop.xlane.xlu0 %5497 }
0x2784   :  { %v5500_v34 = vmul.f32 %v5498_v36, %v7321_v12 }
0x2785   :  { %v6618_v60 = vpop.eup %6617 }
0x2786   :  { %v5504_v40 = vmul.f32 %v6618_v60, %v5501_v39  ;;  %v5502_v32 = vadd.f32 1e-05, %v5500_v34  ;;  %vm5510_vm13 = vweird.f32 %v6618_v60 }
0x2787   :  { %vm5511_vm2 = vmor %vm5509_vm7, %vm5510_vm13 }
0x2788   :  { %v5505_v53 = vmul.f32 %v6618_v60, %v5504_v40  ;;  %6619 = vrsqrt.f32 %v5502_v32  ;;  %vm5519_vm8 = vweird.f32 %v5502_v32 }
0x278a   :  { %v5506_v8 = vmul.f32 0.5, %v5505_v53  ;;  %v6336_v53 = vld [vmem:[#allocation16] ss:$0 sm:$0xff] }
0x278c   :  { %v5507_v45 = vsub.f32 1.5, %v5506_v8 }
0x278e   :  { %v6620_v43 = vpop.eup %6619  ;;  %v5508_v38 = vmul.f32 %v6618_v60, %v5507_v45 }
0x278f   :  { %v5514_v56 = vmul.f32 %v6620_v43, %v5502_v32  ;;  %vm5520_vm1 = vweird.f32 %v6620_v43 }
0x2790   :  { %v5512_v51 = vsel %vm5511_vm2, %v6618_v60, %v5508_v38  ;;  %vm5521_vm14 = vmor %vm5519_vm8, %vm5520_vm1  ;;  %v6337_v38 = vld [vmem:[#allocation16 + $0x1] ss:$0 sm:$0xff] }
0x2791   :  { %v5523_v41 = vmul.f32 %v5512_v51, %v5489_v37  ;;  %v5515_v27 = vmul.f32 %v6620_v43, %v5514_v56 }
0x2793   :  { %v5528_v15 = vmul.f32 %v6332_v0, %v5523_v41  ;;  %v5516_v24 = vmul.f32 0.5, %v5515_v27 }
0x2795   :  { %v5533_v6 = vadd.f32 %v6333_v3, %v5528_v15  ;;  %v5517_v35 = vsub.f32 1.5, %v5516_v24 }
0x2797   :  { %v5518_v48 = vmul.f32 %v6620_v43, %v5517_v35  ;;  %6208 = vmatmul.msk.f32.vlgmr.msrb.gmra.mxu1 %vm363_vm0, %v5533_v6 }
0x2799   :  { %v5522_v11 = vsel %vm5521_vm14, %v6620_v43, %v5518_v48 }
0x279a   :  { %v5524_v57 = vmul.f32 %v5522_v11, %v5490_v46 }
0x279c   :  { %v5529_v52 = vmul.f32 %v6332_v0, %v5524_v57 }
0x279e   :  { %v5534_v13 = vadd.f32 %v6333_v3, %v5529_v52 }
0x27a0   :  { %6209 = vmatmul.msk.f32.gmra.mxu1 %vm363_vm0, %v5534_v13 }
0x2814   :  { %v5568_v10 = vpop.f32.mrf.mxu1 }
0x2815   :  { %v5569_v62 = vadd.f32 %v6334_v2, %v5568_v10 }
0x2817   :  { %v5574_v59 = vmax.f32 %v5569_v62, 0.0 }
0x2819   :  { %6218 = vmatmul.msk.f32.vlgmr.msrb.gmra.mxu2 %vm1404_vm3, %v5574_v59  ;;  %v5740_v59 = vld [vmem:[%s7198_s30 + $0x18] sm:$0xff] }
0x281a   :  { %5763 = vmatpush.msra.mxu3 %v5740_v59 }
0x281d   :  { %v5571_v42 = vpop.f32.mrf.mxu1 }
0x281e   :  { %v5572_v54 = vadd.f32 %v6334_v2, %v5571_v42  ;;  %v5739_v42 = vld [vmem:[%s7198_s30 + $0x10] sm:$0xff] }
0x281f   :  { %5764 = vmatpush.msra.mxu3 %v5739_v42 }
0x2820   :  { %v5575_v7 = vmax.f32 %v5572_v54, 0.0  ;;  %v5738_v54 = vld [vmem:[%s7198_s30 + $0x8] sm:$0xff] }
0x2821   :  { %5765 = vmatpush.msra.mxu3 %v5738_v54 }
0x2822   :  { %6219 = vmatmul.msk.f32.gmra.mxu2 %vm1404_vm3, %v5575_v7  ;;  %v5737_v7 = vld [vmem:[%s7198_s30] sm:$0xff] }
0x2823   :  { %5766 = vmatpush.msra.mxu3 %v5737_v7 }
0x289c   :  { %v5608_v14 = vpop.f32.mrf.mxu2 }
0x289d   :  { %v5614_v61 = vadd.f32 %v5608_v14, %v8973_v26 }
0x289f   :  { %v5621_v16 = vadd.f32 %v6335_v30, %v5614_v61 }
0x28a1   :  { %v5626_v5 = vsel %vm363_vm0, %v5621_v16, 0.0 }
0x28a2   :  { %5627 = vadd.xlane.f32.xlu1 %v5626_v5 }
0x28a5   :  { %v5611_v31 = vpop.f32.mrf.mxu2 }
0x28a6   :  { %v5615_v37 = vadd.f32 %v5611_v31, %v8978_v44 }
0x28a8   :  { %v5622_v49 = vadd.f32 %v6335_v30, %v5615_v37 }
0x28aa   :  { %v5629_v33 = vsel %vm363_vm0, %v5622_v49, 0.0 }
0x28ab   :  { %5630 = vadd.xlane.f32.xlu2 %v5629_v33 }
0x2915   :  { %v5628_v19 = vpop.xlane.xlu1 %5627 }
0x2916   :  { %v5632_v28 = vmul.f32 %v5628_v19, %v7321_v12 }
0x2918   :  { %v5634_v46 = vsub.f32 %v5621_v16, %v5632_v28 }
0x291a   :  { %v5636_v1 = vmul.f32 %v5634_v46, %v5634_v46 }
0x291c   :  { %v5638_v9 = vsel %vm363_vm0, %v5636_v1, 0.0 }
0x291d   :  { %5639 = vadd.xlane.f32.xlu0 %v5638_v9  ;;  %v6338_v9 = vld [vmem:[#allocation18] ss:$0 sm:$0xff] }
0x291e   :  { %v5631_v26 = vpop.xlane.xlu2 %5630 }
0x291f   :  { %v5633_v55 = vmul.f32 %v5631_v26, %v7321_v12 }
0x2921   :  { %v5635_v50 = vsub.f32 %v5622_v49, %v5633_v55 }
0x2923   :  { %v5637_v63 = vmul.f32 %v5635_v50, %v5635_v50 }
0x2925   :  { %v5641_v22 = vsel %vm363_vm0, %v5637_v63, 0.0 }
0x2926   :  { %5642 = vadd.xlane.f32.xlu1 %v5641_v22 }
0x2990   :  { %v5640_v44 = vpop.xlane.xlu0 %5639 }
0x2991   :  { %v5644_v4 = vmul.f32 %v5640_v44, %v7321_v12 }
0x2993   :  { %v5646_v17 = vadd.f32 1e-05, %v5644_v4 }
0x2995   :  { %6621 = vrsqrt.f32 %v5646_v17  ;;  %vm5654_vm9 = vweird.f32 %v5646_v17 }
0x2999   :  { %v5643_v39 = vpop.xlane.xlu1 %5642 }
0x299a   :  { %v5645_v23 = vmul.f32 %v5643_v39, %v7321_v12 }
0x299b   :  { %v6622_v58 = vpop.eup %6621 }
0x299c   :  { %v5649_v18 = vmul.f32 %v6622_v58, %v5646_v17  ;;  %v5647_v36 = vadd.f32 1e-05, %v5645_v23  ;;  %vm5655_vm3 = vweird.f32 %v6622_v58 }
0x299d   :  { %vm5656_vm10 = vmor %vm5654_vm9, %vm5655_vm3 }
0x299e   :  { %v5650_v34 = vmul.f32 %v6622_v58, %v5649_v18  ;;  %6623 = vrsqrt.f32 %v5647_v36  ;;  %vm5664_vm11 = vweird.f32 %v5647_v36 }
0x29a0   :  { %v5651_v47 = vmul.f32 0.5, %v5650_v34  ;;  %v6340_v34 = vld [vmem:[#allocation19] ss:$0 sm:$0xff] }
0x29a2   :  { %v5652_v60 = vsub.f32 1.5, %v5651_v47 }
0x29a4   :  { %v6624_v40 = vpop.eup %6623  ;;  %v5653_v32 = vmul.f32 %v6622_v58, %v5652_v60 }
0x29a5   :  { %v5659_v20 = vmul.f32 %v6624_v40, %v5647_v36  ;;  %vm5665_vm12 = vweird.f32 %v6624_v40 }
0x29a6   :  { %v5657_v8 = vsel %vm5656_vm10, %v6622_v58, %v5653_v32  ;;  %vm5666_vm15 = vmor %vm5664_vm11, %vm5665_vm12 }
0x29a7   :  { %v5660_v45 = vmul.f32 %v6624_v40, %v5659_v20  ;;  %v5668_v43 = vmul.f32 %v5657_v8, %v5634_v46 }
0x29a9   :  { %v5661_v0 = vmul.f32 0.5, %v5660_v45  ;;  %v5673_v56 = vmul.f32 %v6336_v53, %v5668_v43 }
0x29ab   :  { %v5662_v51 = vsub.f32 1.5, %v5661_v0  ;;  %v5678_v3 = vadd.f32 %v6337_v38, %v5673_v56 }
0x29ad   :  { %v5663_v41 = vmul.f32 %v6624_v40, %v5662_v51  ;;  %v5683_v27 = vsel %vm363_vm0, %v5678_v3, 0.0 }
0x29ae   :  { %5684 = vadd.xlane.f32.xlu2 %v5683_v27 }
0x29af   :  { %v5667_v15 = vsel %vm5666_vm15, %v6624_v40, %v5663_v41 }
0x29b0   :  { %v5669_v24 = vmul.f32 %v5667_v15, %v5635_v50  ;;  %v6339_v50 = vld [vmem:[#allocation18 + $0x1] ss:$0 sm:$0xff] }
0x29b2   :  { %v5674_v6 = vmul.f32 %v6336_v53, %v5669_v24 }
0x29b4   :  { %v5679_v35 = vadd.f32 %v6337_v38, %v5674_v6 }
0x29b6   :  { %v5686_v48 = vsel %vm363_vm0, %v5679_v35, 0.0 }
0x29b7   :  { %5687 = vadd.xlane.f32.xlu0 %v5686_v48 }
0x2a21   :  { %v5685_v11 = vpop.xlane.xlu2 %5684 }
0x2a22   :  { %v5689_v57 = vmul.f32 %v5685_v11, %v7321_v12 }
0x2a24   :  { %v5691_v52 = vsub.f32 %v5678_v3, %v5689_v57 }
0x2a26   :  { %v5693_v13 = vmul.f32 %v5691_v52, %v5691_v52 }
0x2a28   :  { %v5695_v21 = vsel %vm363_vm0, %v5693_v13, 0.0 }
0x2a29   :  { %5696 = vadd.xlane.f32.xlu1 %v5695_v21 }
0x2a2a   :  { %v5688_v25 = vpop.xlane.xlu0 %5687 }
0x2a2b   :  { %v5690_v29 = vmul.f32 %v5688_v25, %v7321_v12 }
0x2a2d   :  { %v5692_v2 = vsub.f32 %v5679_v35, %v5690_v29 }
0x2a2f   :  { %v5694_v10 = vmul.f32 %v5692_v2, %v5692_v2 }
0x2a31   :  { %v5698_v62 = vsel %vm363_vm0, %v5694_v10, 0.0 }
0x2a32   :  { %5699 = vadd.xlane.f32.xlu2 %v5698_v62 }
0x2a9c   :  { %v5697_v30 = vpop.xlane.xlu1 %5696 }
0x2a9d   :  { %v5701_v14 = vmul.f32 %v5697_v30, %v7321_v12 }
0x2a9f   :  { %v5703_v61 = vadd.f32 1e-05, %v5701_v14 }
0x2aa1   :  { %6625 = vrsqrt.f32 %v5703_v61  ;;  %vm5711_vm5 = vweird.f32 %v5703_v61 }
0x2aa5   :  { %v5700_v16 = vpop.xlane.xlu2 %5699 }
0x2aa6   :  { %v5702_v5 = vmul.f32 %v5700_v16, %v7321_v12 }
0x2aa7   :  { %v6626_v31 = vpop.eup %6625 }
0x2aa8   :  { %v5706_v37 = vmul.f32 %v6626_v31, %v5703_v61  ;;  %v5704_v49 = vadd.f32 1e-05, %v5702_v5  ;;  %vm5712_vm4 = vweird.f32 %v6626_v31 }
0x2aa9   :  { %vm5713_vm6 = vmor %vm5711_vm5, %vm5712_vm4 }
0x2aaa   :  { %v5707_v33 = vmul.f32 %v6626_v31, %v5706_v37  ;;  %6627 = vrsqrt.f32 %v5704_v49  ;;  %vm5721_vm7 = vweird.f32 %v5704_v49 }
0x2aac   :  { %v5708_v19 = vmul.f32 0.5, %v5707_v33 }
0x2aae   :  { %v5709_v28 = vsub.f32 1.5, %v5708_v19 }
0x2ab0   :  { %v6628_v46 = vpop.eup %6627  ;;  %v5710_v1 = vmul.f32 %v6626_v31, %v5709_v28 }
0x2ab1   :  { %v5716_v26 = vmul.f32 %v6628_v46, %v5704_v49  ;;  %vm5722_vm13 = vweird.f32 %v6628_v46 }
0x2ab2   :  { %v5714_v55 = vsel %vm5713_vm6, %v6626_v31, %v5710_v1  ;;  %vm5723_vm2 = vmor %vm5721_vm7, %vm5722_vm13 }
0x2ab3   :  { %v5725_v63 = vmul.f32 %v5714_v55, %v5691_v52  ;;  %v5717_v22 = vmul.f32 %v6628_v46, %v5716_v26 }
0x2ab5   :  { %v5730_v44 = vmul.f32 %v6338_v9, %v5725_v63  ;;  %v5718_v12 = vmul.f32 0.5, %v5717_v22 }
0x2ab7   :  { %v5735_v4 = vadd.f32 %v6339_v50, %v5730_v44  ;;  %v5719_v17 = vsub.f32 1.5, %v5718_v12 }
0x2ab9   :  { %v5720_v39 = vmul.f32 %v6628_v46, %v5719_v17  ;;  %6220 = vmatmul.msk.f32.vlgmr.msra.gmra.mxu3 %vm363_vm0, %v5735_v4 }
0x2abb   :  { %v5724_v23 = vsel %vm5723_vm2, %v6628_v46, %v5720_v39 }
0x2abc   :  { %v5726_v58 = vmul.f32 %v5724_v23, %v5692_v2 }
0x2abe   :  { %v5731_v18 = vmul.f32 %v6338_v9, %v5726_v58 }
0x2ac0   :  { %v5736_v36 = vadd.f32 %v6339_v50, %v5731_v18 }
0x2ac2   :  { %6221 = vmatmul.msk.f32.gmra.mxu3 %vm363_vm0, %v5736_v36 }
0x2b3c   :  { %v5768_v47 = vpop.f32.mrf.mxu3 }
0x2b3d   :  { %v5769_v60 = vadd.f32 %v6340_v34, %v5768_v47 }
0x2b3f   :  { %5774 = vst [vmem:[%s7208_s25] sm:$0xff] %v5769_v60 }
0x2b45   :  { %v5771_v40 = vpop.f32.mrf.mxu3 }
0x2b46   :  { %v5772_v32 = vadd.f32 %v6340_v34, %v5771_v40 }
0x2b48   :  { %5775 = vst [vmem:[%s7208_s25 + $0x8] sm:$0xff] %v5772_v32 }
0x2b49   :  { %5780 = vsyncpa [#allocation3], 1 }
0x2b4a   :  { %5781 = vsyncpa [#allocation5], 1 }
0x2b4b   :  { %5782 = vsyncpa [#allocation8], 1 }
0x2b4c   :  { %5783 = vsyncpa [#allocation11], 1 }
0x2b4d   :  { %5784 = vsyncpa [#allocation14], 1 }
0x2b4e   :  { %5785 = vsyncpa [#allocation17], 1 }
0x2b4f   :  { %5786 = vsyncpa [#allocation20], 1 }

</bundles_post_ra>
